<compile_context>
chip_gen: v5e
topology: v5e:2x2
jax: 0.10.0
libtpu: 0.0.40
codegen_flags: <defaults>
</compile_context>

<pallas_src>
import functools

import jax
import jax.numpy as jnp
from jax.experimental import pallas as pl
from jax.experimental.pallas import tpu as pltpu

# ---------------------------------------------------------------------------
# Config (defaults of the PyTorch module)
# ---------------------------------------------------------------------------
GROWTH = 32
BLOCK_CONFIG = (1, 1, 1, 1)
NUM_INIT = 64
BN_SIZE = 4
NUM_CLASSES = 6
SE_REDUCTION = 16
CONV2_KMAX = 5            # branch A (k=3) conv2 weights are zero-padded to k=5

VMEM = functools.partial(pl.BlockSpec, memory_space=pltpu.MemorySpace.VMEM)


# ---------------------------------------------------------------------------
# In-kernel helpers (operate on channels-last (L, C) float32 activations)
# ---------------------------------------------------------------------------
def _mxu(x, w):
    """MXU matmul: f32 activations cast to bf16, bf16 weights, f32 accumulation."""
    return jnp.dot(x.astype(jnp.bfloat16), w, preferred_element_type=jnp.float32)


def _bn(x, bn_ref, relu):
    """Inference BatchNorm (+ optional ReLU). bn_ref block is (1, 2, C): [scale; shift]."""
    y = x * bn_ref[0, 0:1, :] + bn_ref[0, 1:2, :]
    return jnp.maximum(y, 0.0) if relu else y


def _subsample2(x, offset, out_len):
    """rows out[i] = x[2*i + offset]; exact 0/1 selection matmul (f32 MXU)."""
    in_len = x.shape[0]
    r = jax.lax.broadcasted_iota(jnp.int32, (out_len, in_len), 0)
    c = jax.lax.broadcasted_iota(jnp.int32, (out_len, in_len), 1)
    sel = (c == 2 * r + offset).astype(jnp.float32)
    return jnp.dot(sel, x, preferred_element_type=jnp.float32)


def _stem(patches_n, p):
    # conv0 (k=7, s=2, p=3) was im2col'd on the raw 1-channel input in the wrapper.
    h0 = _mxu(patches_n, p["conv0_w"][0])                     # (L0, 64)
    l0 = h0.shape[0]
    l1 = (l0 - 3) // 2 + 1
    # conv1: k=3, stride=2, no padding  -> tap-accumulated matmuls.
    h1 = _mxu(_subsample2(h0, 0, l1), p["conv1_w"][0, 0])
    for k in (1, 2):
        h1 = h1 + _mxu(_subsample2(h0, k, l1), p["conv1_w"][0, k])
    h1 = _bn(h1, p["norm0"], relu=True)                       # (l1, 64)
    # maxpool k=3, s=2, p=1 (zero padding is exact: inputs are >= 0 post-ReLU).
    zp = jnp.zeros((1, h1.shape[1]), jnp.float32)
    hp = jnp.concatenate([zp, h1, zp], axis=0)                # (l1 + 2, 64)
    lp = (l1 + 2 - 3) // 2 + 1
    m = _subsample2(hp, 0, lp)
    m = jnp.maximum(m, _subsample2(hp, 1, lp))
    m = jnp.maximum(m, _subsample2(hp, 2, lp))
    return m                                                  # (lp, 64)


def _dense_layer(feat, lp):
    l = feat.shape[0]
    h = _bn(feat, lp["bn1"], relu=True)
    h = _mxu(h, lp["conv1w"][0])                              # 1x1 bottleneck -> (l, 128)
    h = _bn(h, lp["bn2"], relu=True)
    pad = CONV2_KMAX // 2
    zp = jnp.zeros((pad, h.shape[1]), jnp.float32)
    hp = jnp.concatenate([zp, h, zp], axis=0)                 # (l + 2*pad, 128)
    acc = _mxu(hp[0:l, :], lp["conv2w"][0, 0])
    for k in range(1, CONV2_KMAX):
        acc = acc + _mxu(hp[k:k + l, :], lp["conv2w"][0, k])  # (l, GROWTH)
    # SE block (assumed standard, bias-free)
    y = jnp.mean(acc, axis=0, keepdims=True)                  # (1, GROWTH)
    hh = jnp.maximum(_mxu(y, lp["se_w1"][0]), 0.0)            # (1, GROWTH // 16)
    z = _mxu(hh, lp["se_w2"][0])                              # (1, GROWTH)
    gate = 1.0 / (1.0 + jnp.exp(-z))
    return acc * gate                                         # dropout p=0 -> skipped


def _transition(feat, tp):
    l = feat.shape[0]
    h = _bn(feat, tp["bn"], relu=True)
    h = _mxu(h, tp["convw"][0])                               # 1x1 conv
    ev = _subsample2(h, 0, l // 2)
    od = _subsample2(h, 1, l // 2)
    return 0.5 * (ev + od)                                    # avgpool k=2, s=2


def _branch_kernel(treedef, n_weights, patches_ref, *rest):
    weight_refs = rest[:n_weights]
    out_ref = rest[n_weights]
    p = jax.tree_util.tree_unflatten(treedef, list(weight_refs))
    pooled = []
    for n in range(patches_ref.shape[0]):                     # static small batch
        feat = _stem(patches_ref[n], p)
        for blk in p["blocks"]:
            for lp in blk["layers"]:
                new = _dense_layer(feat, lp)
                feat = jnp.concatenate([feat, new], axis=1)   # channel (lane) concat
            if blk["trans"] is not None:
                feat = _transition(feat, blk["trans"])
        feat = _bn(feat, p["norm_final"], relu=False)
        # F.relu + adaptive_avg_pool1d(., 1)
        pooled.append(jnp.mean(jnp.maximum(feat, 0.0), axis=0, keepdims=True))
    out_ref[0] = jnp.concatenate(pooled, axis=0)              # (N, C_final)


def _head_kernel(pooled_ref, w_ref, b_ref, logits_ref, feats_ref):
    feats = jnp.concatenate([pooled_ref[0], pooled_ref[1]], axis=1)   # (N, 2*C)
    feats_ref[...] = feats
    logits_ref[...] = (
        jnp.dot(feats, w_ref[...], preferred_element_type=jnp.float32) + b_ref[...]
    )


# ---------------------------------------------------------------------------
# pallas_call wrappers
# ---------------------------------------------------------------------------
def _leaf_index_map(ndim_rest, b):
    return (b,) + (0,) * ndim_rest


def run_branches(patches, stacked):
    leaves, treedef = jax.tree_util.tree_flatten(stacked)
    n_batch = patches.shape[0]
    c_final = stacked["norm_final"].shape[-1]
    in_specs = [pl.BlockSpec(patches.shape, lambda b: (0, 0, 0))]
    for leaf in leaves:
        in_specs.append(
            pl.BlockSpec((1,) + leaf.shape[1:],
                         functools.partial(_leaf_index_map, leaf.ndim - 1)))
    return pl.pallas_call(
        functools.partial(_branch_kernel, treedef, len(leaves)),
        grid=(2,),
        out_shape=jax.ShapeDtypeStruct((2, n_batch, c_final), jnp.float32),
        in_specs=in_specs,
        out_specs=pl.BlockSpec((1, n_batch, c_final), lambda b: (b, 0, 0)),
        compiler_params=pltpu.CompilerParams(dimension_semantics=("parallel",)),
    )(patches, *leaves)


def head(pooled, w, b):
    n = pooled.shape[1]
    c2, nc = w.shape
    return pl.pallas_call(
        _head_kernel,
        out_shape=(jax.ShapeDtypeStruct((n, nc), jnp.float32),
                   jax.ShapeDtypeStruct((n, c2), jnp.float32)),
        in_specs=[VMEM(), VMEM(), VMEM()],
        out_specs=(VMEM(), VMEM()),
    )(pooled, w, b.reshape(1, nc))


def densenet_forward(x, params):
    # x: (N, 1, L) float32, matching the PyTorch module's input convention.
    n, _, l = x.shape
    l0 = (l + 2 * 3 - 7) // 2 + 1
    xp = jnp.pad(x[:, 0, :], ((0, 0), (3, 3)))                # (N, L + 6)
    # im2col only for the single-channel stem conv0 (tiny input); everything after
    # this point stays VMEM-resident inside the fused branch kernel.
    patches = jnp.stack(
        [xp[:, k:k + 2 * (l0 - 1) + 1:2] for k in range(7)], axis=-1)   # (N, L0, 7)
    pooled = run_branches(patches, params["stacked"])         # (2, N, C_final)
    logits, out_features = head(pooled, params["cls_w"], params["cls_b"])
    return logits, out_features


# ---------------------------------------------------------------------------
# Parameters (deterministic, shapes from the module's __init__)
# ---------------------------------------------------------------------------
def _bn_scale_shift(c, eps=1e-5):
    # BatchNorm1d inference with init params: weight=1, bias=0, mean=0, var=1.
    gamma = jnp.ones((c,), jnp.float32)
    beta = jnp.zeros((c,), jnp.float32)
    mean = jnp.zeros((c,), jnp.float32)
    var = jnp.ones((c,), jnp.float32)
    scale = gamma / jnp.sqrt(var + eps)
    shift = beta - mean * scale
    return jnp.stack([scale, shift], axis=0)                  # (2, C) float32


def _conv_w(key, cout, cin, k):
    fan_in = cin * k
    return jax.random.normal(key, (cout, cin, k), jnp.float32) * jnp.sqrt(2.0 / fan_in)


def make_branch_params(key, conv2_k):
    keys = iter(jax.random.split(key, 64))
    p = {}
    w0 = _conv_w(next(keys), NUM_INIT, 1, 7)
    p["conv0_w"] = jnp.transpose(w0[:, 0, :]).astype(jnp.bfloat16)        # (7, 64)
    w1 = _conv_w(next(keys), NUM_INIT, NUM_INIT, 3)
    p["conv1_w"] = jnp.transpose(w1, (2, 1, 0)).astype(jnp.bfloat16)      # (3, 64, 64)
    p["norm0"] = _bn_scale_shift(NUM_INIT)
    blocks = []
    nf = NUM_INIT
    for i, num_layers in enumerate(BLOCK_CONFIG):
        layers = []
        for j in range(num_layers):
            cin = nf + j * GROWTH
            mid = BN_SIZE * GROWTH
            hid = max(GROWTH // SE_REDUCTION, 1)
            c1 = _conv_w(next(keys), mid, cin, 1)
            c2 = jnp.transpose(_conv_w(next(keys), GROWTH, mid, conv2_k), (2, 1, 0))
            kpad = (CONV2_KMAX - conv2_k) // 2
            if kpad:
                # Zero-padding the taps and using pad=CONV2_KMAX//2 is mathematically
                # identical to the original k=conv2_k, padding=conv2_k//2 convolution.
                c2 = jnp.pad(c2, ((kpad, kpad), (0, 0), (0, 0)))
            layers.append(dict(
                bn1=_bn_scale_shift(cin),
                conv1w=jnp.transpose(c1[:, :, 0]).astype(jnp.bfloat16),   # (cin, 128)
                bn2=_bn_scale_shift(mid),
                conv2w=c2.astype(jnp.bfloat16),                           # (5, 128, 32)
                se_w1=(jax.random.normal(next(keys), (GROWTH, hid), jnp.float32)
                       * jnp.sqrt(2.0 / GROWTH)).astype(jnp.bfloat16),
                se_w2=(jax.random.normal(next(keys), (hid, GROWTH), jnp.float32)
                       * jnp.sqrt(2.0 / hid)).astype(jnp.bfloat16),
            ))
        nf += num_layers * GROWTH
        trans = None
        if i != len(BLOCK_CONFIG) - 1:
            tw = _conv_w(next(keys), nf // 2, nf, 1)
            trans = dict(bn=_bn_scale_shift(nf),
                         convw=jnp.transpose(tw[:, :, 0]).astype(jnp.bfloat16))
            nf //= 2
        blocks.append(dict(layers=layers, trans=trans))
    p["blocks"] = blocks
    p["norm_final"] = _bn_scale_shift(nf)
    return p, nf


# ---------------------------------------------------------------------------
# Main
# ---------------------------------------------------------------------------
if __name__ == "__main__":
    key = jax.random.PRNGKey(0)
    k_a, k_b, k_c, k_x = jax.random.split(key, 4)

    branch_a, nf_a = make_branch_params(k_a, conv2_k=3)   # 'features'  (_DenseBlock)
    branch_b, nf_b = make_branch_params(k_b, conv2_k=5)   # 'features1' (_DenseBlock1)
    assert nf_a == nf_b
    stacked = jax.tree_util.tree_map(lambda a, b: jnp.stack([a, b], axis=0),
                                     branch_a, branch_b)
    params = {
        "stacked": stacked,
        "cls_w": (jax.random.normal(k_c, (nf_a * 2, NUM_CLASSES), jnp.float32)
                  * jnp.sqrt(1.0 / (nf_a * 2))),
        "cls_b": jnp.zeros((NUM_CLASSES,), jnp.float32),   # module init: bias = 0
    }

    # Input matches the module's expectation: (N, 1, L) single-channel 1-D signal.
    x = jax.random.normal(k_x, (2, 1, 256), jnp.float32)

    out, out_features = jax.jit(densenet_forward)(x, params)
    jax.block_until_ready((out, out_features))

    assert out.shape == (2, NUM_CLASSES), out.shape
    assert out_features.shape == (2, nf_a * 2), out_features.shape
    assert jnp.all(jnp.isfinite(out)) and jnp.all(jnp.isfinite(out_features))
    print("KERNEL_OK")
</pallas_src>

<mosaic_0001>
module attributes {stable_mosaic.version = 11 : i64} {
  func.func @_head_kernel(%arg0: memref<2x2x68xf32, #tpu.memory_space<vmem>>, %arg1: memref<136x6xf32, #tpu.memory_space<vmem>>, %arg2: memref<1x6xf32, #tpu.memory_space<vmem>>, %arg3: memref<2x6xf32, #tpu.memory_space<vmem>>, %arg4: memref<2x136xf32, #tpu.memory_space<vmem>>) attributes {dimension_semantics = [], scalar_prefetch = 0 : i64, scratch_operands = 0 : i64, tpu.core_type = #tpu.core_type<tc>} {
    %c0 = arith.constant 0 : index
    %c0_0 = arith.constant 0 : index
    %c0_1 = arith.constant 0 : index
    %0 = vector.load %arg0[%c0, %c0_0, %c0_1] : memref<2x2x68xf32, #tpu.memory_space<vmem>>, vector<1x2x68xf32>
    %1 = vector.shape_cast %0 : vector<1x2x68xf32> to vector<2x68xf32>
    %c1 = arith.constant 1 : index
    %c0_2 = arith.constant 0 : index
    %c0_3 = arith.constant 0 : index
    %2 = vector.load %arg0[%c1, %c0_2, %c0_3] : memref<2x2x68xf32, #tpu.memory_space<vmem>>, vector<1x2x68xf32>
    %3 = vector.shape_cast %2 : vector<1x2x68xf32> to vector<2x68xf32>
    %4 = tpu.concatenate %1, %3 in 1 : vector<2x68xf32>, vector<2x68xf32> -> vector<2x136xf32>
    %c0_4 = arith.constant 0 : index
    %c0_5 = arith.constant 0 : index
    %5 = vector.load %arg4[%c0_4, %c0_5] : memref<2x136xf32, #tpu.memory_space<vmem>>, vector<2x136xf32>
    tpu.vector_store %arg4[%c0_4, %c0_5], %4 {strides = array<i32>} : memref<2x136xf32, #tpu.memory_space<vmem>>, vector<2x136xf32>,
    %c0_6 = arith.constant 0 : index
    %c0_7 = arith.constant 0 : index
    %6 = vector.load %arg1[%c0_6, %c0_7] : memref<136x6xf32, #tpu.memory_space<vmem>>, vector<136x6xf32>
    %cst = arith.constant dense<0.000000e+00> : vector<2x6xf32>
    %7 = tpu.matmul %4, %6, %cst {dimension_numbers = #tpu.dot_dimension_numbers<[1], [0], [0], [1], [0, 0, 1, 1], [], []>} : vector<2x136xf32>, vector<136x6xf32>, vector<2x6xf32> -> vector<2x6xf32>
    %c0_8 = arith.constant 0 : index
    %c0_9 = arith.constant 0 : index
    %8 = vector.load %arg2[%c0_8, %c0_9] : memref<1x6xf32, #tpu.memory_space<vmem>>, vector<1x6xf32>
    %9 = vector.broadcast %8 : vector<1x6xf32> to vector<2x6xf32>
    %10 = arith.addf %7, %9 : vector<2x6xf32>
    %c0_10 = arith.constant 0 : index
    %c0_11 = arith.constant 0 : index
    %11 = vector.load %arg3[%c0_10, %c0_11] : memref<2x6xf32, #tpu.memory_space<vmem>>, vector<2x6xf32>
    tpu.vector_store %arg3[%c0_10, %c0_11], %10 {strides = array<i32>} : memref<2x6xf32, #tpu.memory_space<vmem>>, vector<2x6xf32>,
    return
  }
}

module attributes {stable_mosaic.version = 11 : i64} {
  func.func @_branch_kernel(%arg0: i32, %arg1: memref<2x128x7xf32, #tpu.memory_space<vmem>>, %arg2: memref<1x2x64xf32, #tpu.memory_space<vmem>>, %arg3: memref<1x2x128xf32, #tpu.memory_space<vmem>>, %arg4: memref<1x64x128xbf16, #tpu.memory_space<vmem>>, %arg5: memref<1x5x128x32xbf16, #tpu.memory_space<vmem>>, %arg6: memref<1x32x2xbf16, #tpu.memory_space<vmem>>, %arg7: memref<1x2x32xbf16, #tpu.memory_space<vmem>>, %arg8: memref<1x2x96xf32, #tpu.memory_space<vmem>>, %arg9: memref<1x96x48xbf16, #tpu.memory_space<vmem>>, %arg10: memref<1x2x48xf32, #tpu.memory_space<vmem>>, %arg11: memref<1x2x128xf32, #tpu.memory_space<vmem>>, %arg12: memref<1x48x128xbf16, #tpu.memory_space<vmem>>, %arg13: memref<1x5x128x32xbf16, #tpu.memory_space<vmem>>, %arg14: memref<1x32x2xbf16, #tpu.memory_space<vmem>>, %arg15: memref<1x2x32xbf16, #tpu.memory_space<vmem>>, %arg16: memref<1x2x80xf32, #tpu.memory_space<vmem>>, %arg17: memref<1x80x40xbf16, #tpu.memory_space<vmem>>, %arg18: memref<1x2x40xf32, #tpu.memory_space<vmem>>, %arg19: memref<1x2x128xf32, #tpu.memory_space<vmem>>, %arg20: memref<1x40x128xbf16, #tpu.memory_space<vmem>>, %arg21: memref<1x5x128x32xbf16, #tpu.memory_space<vmem>>, %arg22: memref<1x32x2xbf16, #tpu.memory_space<vmem>>, %arg23: memref<1x2x32xbf16, #tpu.memory_space<vmem>>, %arg24: memref<1x2x72xf32, #tpu.memory_space<vmem>>, %arg25: memref<1x72x36xbf16, #tpu.memory_space<vmem>>, %arg26: memref<1x2x36xf32, #tpu.memory_space<vmem>>, %arg27: memref<1x2x128xf32, #tpu.memory_space<vmem>>, %arg28: memref<1x36x128xbf16, #tpu.memory_space<vmem>>, %arg29: memref<1x5x128x32xbf16, #tpu.memory_space<vmem>>, %arg30: memref<1x32x2xbf16, #tpu.memory_space<vmem>>, %arg31: memref<1x2x32xbf16, #tpu.memory_space<vmem>>, %arg32: memref<1x7x64xbf16, #tpu.memory_space<vmem>>, %arg33: memref<1x3x64x64xbf16, #tpu.memory_space<vmem>>, %arg34: memref<1x2x64xf32, #tpu.memory_space<vmem>>, %arg35: memref<1x2x68xf32, #tpu.memory_space<vmem>>, %arg36: memref<1x2x68xf32, #tpu.memory_space<vmem>>) attributes {dimension_semantics = [#tpu.dimension_semantics<parallel>], iteration_bounds = array<i64: 2>, scalar_prefetch = 0 : i64, scratch_operands = 0 : i64, tpu.core_type = #tpu.core_type<tc>, window_params = [{pipeline_mode = #tpu.pipeline_mode<synchronous>, transform_indices = @transform_0, window_bounds = array<i64: 2, 128, 7>}, {transform_indices = @transform_1, window_bounds = array<i64: 1, 2, 64>}, {transform_indices = @transform_2, window_bounds = array<i64: 1, 2, 128>}, {transform_indices = @transform_3, window_bounds = array<i64: 1, 64, 128>}, {transform_indices = @transform_4, window_bounds = array<i64: 1, 5, 128, 32>}, {transform_indices = @transform_5, window_bounds = array<i64: 1, 32, 2>}, {transform_indices = @transform_6, window_bounds = array<i64: 1, 2, 32>}, {transform_indices = @transform_7, window_bounds = array<i64: 1, 2, 96>}, {transform_indices = @transform_8, window_bounds = array<i64: 1, 96, 48>}, {transform_indices = @transform_9, window_bounds = array<i64: 1, 2, 48>}, {transform_indices = @transform_10, window_bounds = array<i64: 1, 2, 128>}, {transform_indices = @transform_11, window_bounds = array<i64: 1, 48, 128>}, {transform_indices = @transform_12, window_bounds = array<i64: 1, 5, 128, 32>}, {transform_indices = @transform_13, window_bounds = array<i64: 1, 32, 2>}, {transform_indices = @transform_14, window_bounds = array<i64: 1, 2, 32>}, {transform_indices = @transform_15, window_bounds = array<i64: 1, 2, 80>}, {transform_indices = @transform_16, window_bounds = array<i64: 1, 80, 40>}, {transform_indices = @transform_17, window_bounds = array<i64: 1, 2, 40>}, {transform_indices = @transform_18, window_bounds = array<i64: 1, 2, 128>}, {transform_indices = @transform_19, window_bounds = array<i64: 1, 40, 128>}, {transform_indices = @transform_20, window_bounds = array<i64: 1, 5, 128, 32>}, {transform_indices = @transform_21, window_bounds = array<i64: 1, 32, 2>}, {transform_indices = @transform_22, window_bounds = array<i64: 1, 2, 32>}, {transform_indices = @transform_23, window_bounds = array<i64: 1, 2, 72>}, {transform_indices = @transform_24, window_bounds = array<i64: 1, 72, 36>}, {transform_indices = @transform_25, window_bounds = array<i64: 1, 2, 36>}, {transform_indices = @transform_26, window_bounds = array<i64: 1, 2, 128>}, {transform_indices = @transform_27, window_bounds = array<i64: 1, 36, 128>}, {transform_indices = @transform_28, window_bounds = array<i64: 1, 5, 128, 32>}, {transform_indices = @transform_29, window_bounds = array<i64: 1, 32, 2>}, {transform_indices = @transform_30, window_bounds = array<i64: 1, 2, 32>}, {transform_indices = @transform_31, window_bounds = array<i64: 1, 7, 64>}, {transform_indices = @transform_32, window_bounds = array<i64: 1, 3, 64, 64>}, {transform_indices = @transform_33, window_bounds = array<i64: 1, 2, 64>}, {transform_indices = @transform_34, window_bounds = array<i64: 1, 2, 68>}, {transform_indices = @transform_35, window_bounds = array<i64: 1, 2, 68>}]} {
    %c0 = arith.constant 0 : index
    %c0_0 = arith.constant 0 : index
    %c0_1 = arith.constant 0 : index
    %0 = vector.load %arg1[%c0, %c0_0, %c0_1] : memref<2x128x7xf32, #tpu.memory_space<vmem>>, vector<1x128x7xf32>
    %1 = vector.shape_cast %0 : vector<1x128x7xf32> to vector<128x7xf32>
    %c0_2 = arith.constant 0 : index
    %c0_3 = arith.constant 0 : index
    %c0_4 = arith.constant 0 : index
    %2 = vector.load %arg32[%c0_2, %c0_3, %c0_4] : memref<1x7x64xbf16, #tpu.memory_space<vmem>>, vector<1x7x64xbf16>
    %3 = vector.shape_cast %2 : vector<1x7x64xbf16> to vector<7x64xbf16>
    %4 = arith.truncf %1 : vector<128x7xf32> to vector<128x7xbf16>
    %cst = arith.constant dense<0.000000e+00> : vector<128x64xf32>
    %5 = tpu.matmul %4, %3, %cst {dimension_numbers = #tpu.dot_dimension_numbers<[1], [0], [0], [1], [0, 0, 1, 1], [], []>} : vector<128x7xbf16>, vector<7x64xbf16>, vector<128x64xf32> -> vector<128x64xf32>
    %6 = tpu.iota {dimensions = array<i32: 0>} : vector<63x128xi32>
    %7 = tpu.iota {dimensions = array<i32: 1>} : vector<63x128xi32>
    %c2_i32 = arith.constant 2 : i32
    %8 = vector.broadcast %c2_i32 : i32 to vector<63x128xi32>
    %9 = arith.muli %8, %6 : vector<63x128xi32>
    %c0_i32 = arith.constant 0 : i32
    %10 = vector.broadcast %c0_i32 : i32 to vector<63x128xi32>
    %11 = arith.addi %9, %10 : vector<63x128xi32>
    %12 = arith.cmpi eq, %7, %11 : vector<63x128xi32>
    %13 = arith.extui %12 : vector<63x128xi1> to vector<63x128xi32>
    %14 = arith.sitofp %13 : vector<63x128xi32> to vector<63x128xf32>
    %cst_5 = arith.constant dense<0.000000e+00> : vector<63x64xf32>
    %15 = tpu.matmul %14, %5, %cst_5 {dimension_numbers = #tpu.dot_dimension_numbers<[1], [0], [0], [1], [0, 0, 1, 1], [], []>} : vector<63x128xf32>, vector<128x64xf32>, vector<63x64xf32> -> vector<63x64xf32>
    %c0_6 = arith.constant 0 : index
    %c0_7 = arith.constant 0 : index
    %c0_8 = arith.constant 0 : index
    %c0_9 = arith.constant 0 : index
    %16 = vector.load %arg33[%c0_6, %c0_7, %c0_8, %c0_9] : memref<1x3x64x64xbf16, #tpu.memory_space<vmem>>, vector<1x1x64x64xbf16>
    %17 = vector.shape_cast %16 : vector<1x1x64x64xbf16> to vector<64x64xbf16>
    %18 = arith.truncf %15 : vector<63x64xf32> to vector<63x64xbf16>
    %cst_10 = arith.constant dense<0.000000e+00> : vector<63x64xf32>
    %19 = tpu.matmul %18, %17, %cst_10 {dimension_numbers = #tpu.dot_dimension_numbers<[1], [0], [0], [1], [0, 0, 1, 1], [], []>} : vector<63x64xbf16>, vector<64x64xbf16>, vector<63x64xf32> -> vector<63x64xf32>
    %20 = tpu.iota {dimensions = array<i32: 0>} : vector<63x128xi32>
    %21 = tpu.iota {dimensions = array<i32: 1>} : vector<63x128xi32>
    %c2_i32_11 = arith.constant 2 : i32
    %22 = vector.broadcast %c2_i32_11 : i32 to vector<63x128xi32>
    %23 = arith.muli %22, %20 : vector<63x128xi32>
    %c1_i32 = arith.constant 1 : i32
    %24 = vector.broadcast %c1_i32 : i32 to vector<63x128xi32>
    %25 = arith.addi %23, %24 : vector<63x128xi32>
    %26 = arith.cmpi eq, %21, %25 : vector<63x128xi32>
    %27 = arith.extui %26 : vector<63x128xi1> to vector<63x128xi32>
    %28 = arith.sitofp %27 : vector<63x128xi32> to vector<63x128xf32>
    %cst_12 = arith.constant dense<0.000000e+00> : vector<63x64xf32>
    %29 = tpu.matmul %28, %5, %cst_12 {dimension_numbers = #tpu.dot_dimension_numbers<[1], [0], [0], [1], [0, 0, 1, 1], [], []>} : vector<63x128xf32>, vector<128x64xf32>, vector<63x64xf32> -> vector<63x64xf32>
    %c0_13 = arith.constant 0 : index
    %c1 = arith.constant 1 : index
    %c0_14 = arith.constant 0 : index
    %c0_15 = arith.constant 0 : index
    %30 = vector.load %arg33[%c0_13, %c1, %c0_14, %c0_15] : memref<1x3x64x64xbf16, #tpu.memory_space<vmem>>, vector<1x1x64x64xbf16>
    %31 = vector.shape_cast %30 : vector<1x1x64x64xbf16> to vector<64x64xbf16>
    %32 = arith.truncf %29 : vector<63x64xf32> to vector<63x64xbf16>
    %cst_16 = arith.constant dense<0.000000e+00> : vector<63x64xf32>
    %33 = tpu.matmul %32, %31, %cst_16 {dimension_numbers = #tpu.dot_dimension_numbers<[1], [0], [0], [1], [0, 0, 1, 1], [], []>} : vector<63x64xbf16>, vector<64x64xbf16>, vector<63x64xf32> -> vector<63x64xf32>
    %34 = arith.addf %19, %33 : vector<63x64xf32>
    %35 = tpu.iota {dimensions = array<i32: 0>} : vector<63x128xi32>
    %36 = tpu.iota {dimensions = array<i32: 1>} : vector<63x128xi32>
    %c2_i32_17 = arith.constant 2 : i32
    %37 = vector.broadcast %c2_i32_17 : i32 to vector<63x128xi32>
    %38 = arith.muli %37, %35 : vector<63x128xi32>
    %c2_i32_18 = arith.constant 2 : i32
    %39 = vector.broadcast %c2_i32_18 : i32 to vector<63x128xi32>
    %40 = arith.addi %38, %39 : vector<63x128xi32>
    %41 = arith.cmpi eq, %36, %40 : vector<63x128xi32>
    %42 = arith.extui %41 : vector<63x128xi1> to vector<63x128xi32>
    %43 = arith.sitofp %42 : vector<63x128xi32> to vector<63x128xf32>
    %cst_19 = arith.constant dense<0.000000e+00> : vector<63x64xf32>
    %44 = tpu.matmul %43, %5, %cst_19 {dimension_numbers = #tpu.dot_dimension_numbers<[1], [0], [0], [1], [0, 0, 1, 1], [], []>} : vector<63x128xf32>, vector<128x64xf32>, vector<63x64xf32> -> vector<63x64xf32>
    %c0_20 = arith.constant 0 : index
    %c2 = arith.constant 2 : index
    %c0_21 = arith.constant 0 : index
    %c0_22 = arith.constant 0 : index
    %45 = vector.load %arg33[%c0_20, %c2, %c0_21, %c0_22] : memref<1x3x64x64xbf16, #tpu.memory_space<vmem>>, vector<1x1x64x64xbf16>
    %46 = vector.shape_cast %45 : vector<1x1x64x64xbf16> to vector<64x64xbf16>
    %47 = arith.truncf %44 : vector<63x64xf32> to vector<63x64xbf16>
    %cst_23 = arith.constant dense<0.000000e+00> : vector<63x64xf32>
    %48 = tpu.matmul %47, %46, %cst_23 {dimension_numbers = #tpu.dot_dimension_numbers<[1], [0], [0], [1], [0, 0, 1, 1], [], []>} : vector<63x64xbf16>, vector<64x64xbf16>, vector<63x64xf32> -> vector<63x64xf32>
    %49 = arith.addf %34, %48 : vector<63x64xf32>
    %c0_24 = arith.constant 0 : index
    %c0_25 = arith.constant 0 : index
    %c0_26 = arith.constant 0 : index
    %50 = vector.load %arg34[%c0_24, %c0_25, %c0_26] : memref<1x2x64xf32, #tpu.memory_space<vmem>>, vector<1x1x64xf32>
    %51 = vector.shape_cast %50 : vector<1x1x64xf32> to vector<1x64xf32>
    %52 = vector.broadcast %51 : vector<1x64xf32> to vector<63x64xf32>
    %53 = arith.mulf %49, %52 : vector<63x64xf32>
    %c0_27 = arith.constant 0 : index
    %c1_28 = arith.constant 1 : index
    %c0_29 = arith.constant 0 : index
    %54 = vector.load %arg34[%c0_27, %c1_28, %c0_29] : memref<1x2x64xf32, #tpu.memory_space<vmem>>, vector<1x1x64xf32>
    %55 = vector.shape_cast %54 : vector<1x1x64xf32> to vector<1x64xf32>
    %56 = vector.broadcast %55 : vector<1x64xf32> to vector<63x64xf32>
    %57 = arith.addf %53, %56 : vector<63x64xf32>
    %cst_30 = arith.constant 0.000000e+00 : f32
    %58 = vector.broadcast %cst_30 : f32 to vector<63x64xf32>
    %59 = arith.maximumf %57, %58 : vector<63x64xf32>
    %cst_31 = arith.constant 0.000000e+00 : f32
    %60 = vector.broadcast %cst_31 : f32 to vector<1x64xf32>
    %61 = tpu.concatenate %60, %59, %60 in 0 : vector<1x64xf32>, vector<63x64xf32>, vector<1x64xf32> -> vector<65x64xf32>
    %62 = tpu.iota {dimensions = array<i32: 0>} : vector<32x65xi32>
    %63 = tpu.iota {dimensions = array<i32: 1>} : vector<32x65xi32>
    %c2_i32_32 = arith.constant 2 : i32
    %64 = vector.broadcast %c2_i32_32 : i32 to vector<32x65xi32>
    %65 = arith.muli %64, %62 : vector<32x65xi32>
    %c0_i32_33 = arith.constant 0 : i32
    %66 = vector.broadcast %c0_i32_33 : i32 to vector<32x65xi32>
    %67 = arith.addi %65, %66 : vector<32x65xi32>
    %68 = arith.cmpi eq, %63, %67 : vector<32x65xi32>
    %69 = arith.extui %68 : vector<32x65xi1> to vector<32x65xi32>
    %70 = arith.sitofp %69 : vector<32x65xi32> to vector<32x65xf32>
    %cst_34 = arith.constant dense<0.000000e+00> : vector<32x64xf32>
    %71 = tpu.matmul %70, %61, %cst_34 {dimension_numbers = #tpu.dot_dimension_numbers<[1], [0], [0], [1], [0, 0, 1, 1], [], []>} : vector<32x65xf32>, vector<65x64xf32>, vector<32x64xf32> -> vector<32x64xf32>
    %72 = tpu.iota {dimensions = array<i32: 0>} : vector<32x65xi32>
    %73 = tpu.iota {dimensions = array<i32: 1>} : vector<32x65xi32>
    %c2_i32_35 = arith.constant 2 : i32
    %74 = vector.broadcast %c2_i32_35 : i32 to vector<32x65xi32>
    %75 = arith.muli %74, %72 : vector<32x65xi32>
    %c1_i32_36 = arith.constant 1 : i32
    %76 = vector.broadcast %c1_i32_36 : i32 to vector<32x65xi32>
    %77 = arith.addi %75, %76 : vector<32x65xi32>
    %78 = arith.cmpi eq, %73, %77 : vector<32x65xi32>
    %79 = arith.extui %78 : vector<32x65xi1> to vector<32x65xi32>
    %80 = arith.sitofp %79 : vector<32x65xi32> to vector<32x65xf32>
    %cst_37 = arith.constant dense<0.000000e+00> : vector<32x64xf32>
    %81 = tpu.matmul %80, %61, %cst_37 {dimension_numbers = #tpu.dot_dimension_numbers<[1], [0], [0], [1], [0, 0, 1, 1], [], []>} : vector<32x65xf32>, vector<65x64xf32>, vector<32x64xf32> -> vector<32x64xf32>
    %82 = arith.maximumf %71, %81 : vector<32x64xf32>
    %83 = tpu.iota {dimensions = array<i32: 0>} : vector<32x65xi32>
    %84 = tpu.iota {dimensions = array<i32: 1>} : vector<32x65xi32>
    %c2_i32_38 = arith.constant 2 : i32
    %85 = vector.broadcast %c2_i32_38 : i32 to vector<32x65xi32>
    %86 = arith.muli %85, %83 : vector<32x65xi32>
    %c2_i32_39 = arith.constant 2 : i32
    %87 = vector.broadcast %c2_i32_39 : i32 to vector<32x65xi32>
    %88 = arith.addi %86, %87 : vector<32x65xi32>
    %89 = arith.cmpi eq, %84, %88 : vector<32x65xi32>
    %90 = arith.extui %89 : vector<32x65xi1> to vector<32x65xi32>
    %91 = arith.sitofp %90 : vector<32x65xi32> to vector<32x65xf32>
    %cst_40 = arith.constant dense<0.000000e+00> : vector<32x64xf32>
    %92 = tpu.matmul %91, %61, %cst_40 {dimension_numbers = #tpu.dot_dimension_numbers<[1], [0], [0], [1], [0, 0, 1, 1], [], []>} : vector<32x65xf32>, vector<65x64xf32>, vector<32x64xf32> -> vector<32x64xf32>
    %93 = arith.maximumf %82, %92 : vector<32x64xf32>
    %c0_41 = arith.constant 0 : index
    %c0_42 = arith.constant 0 : index
    %c0_43 = arith.constant 0 : index
    %94 = vector.load %arg2[%c0_41, %c0_42, %c0_43] : memref<1x2x64xf32, #tpu.memory_space<vmem>>, vector<1x1x64xf32>
    %95 = vector.shape_cast %94 : vector<1x1x64xf32> to vector<1x64xf32>
    %96 = vector.broadcast %95 : vector<1x64xf32> to vector<32x64xf32>
    %97 = arith.mulf %93, %96 : vector<32x64xf32>
    %c0_44 = arith.constant 0 : index
    %c1_45 = arith.constant 1 : index
    %c0_46 = arith.constant 0 : index
    %98 = vector.load %arg2[%c0_44, %c1_45, %c0_46] : memref<1x2x64xf32, #tpu.memory_space<vmem>>, vector<1x1x64xf32>
    %99 = vector.shape_cast %98 : vector<1x1x64xf32> to vector<1x64xf32>
    %100 = vector.broadcast %99 : vector<1x64xf32> to vector<32x64xf32>
    %101 = arith.addf %97, %100 : vector<32x64xf32>
    %cst_47 = arith.constant 0.000000e+00 : f32
    %102 = vector.broadcast %cst_47 : f32 to vector<32x64xf32>
    %103 = arith.maximumf %101, %102 : vector<32x64xf32>
    %c0_48 = arith.constant 0 : index
    %c0_49 = arith.constant 0 : index
    %c0_50 = arith.constant 0 : index
    %104 = vector.load %arg4[%c0_48, %c0_49, %c0_50] : memref<1x64x128xbf16, #tpu.memory_space<vmem>>, vector<1x64x128xbf16>
    %105 = vector.shape_cast %104 : vector<1x64x128xbf16> to vector<64x128xbf16>
    %106 = arith.truncf %103 : vector<32x64xf32> to vector<32x64xbf16>
    %cst_51 = arith.constant dense<0.000000e+00> : vector<32x128xf32>
    %107 = tpu.matmul %106, %105, %cst_51 {dimension_numbers = #tpu.dot_dimension_numbers<[1], [0], [0], [1], [0, 0, 1, 1], [], []>} : vector<32x64xbf16>, vector<64x128xbf16>, vector<32x128xf32> -> vector<32x128xf32>
    %c0_52 = arith.constant 0 : index
    %c0_53 = arith.constant 0 : index
    %c0_54 = arith.constant 0 : index
    %108 = vector.load %arg3[%c0_52, %c0_53, %c0_54] : memref<1x2x128xf32, #tpu.memory_space<vmem>>, vector<1x1x128xf32>
    %109 = vector.shape_cast %108 : vector<1x1x128xf32> to vector<1x128xf32>
    %110 = vector.broadcast %109 : vector<1x128xf32> to vector<32x128xf32>
    %111 = arith.mulf %107, %110 : vector<32x128xf32>
    %c0_55 = arith.constant 0 : index
    %c1_56 = arith.constant 1 : index
    %c0_57 = arith.constant 0 : index
    %112 = vector.load %arg3[%c0_55, %c1_56, %c0_57] : memref<1x2x128xf32, #tpu.memory_space<vmem>>, vector<1x1x128xf32>
    %113 = vector.shape_cast %112 : vector<1x1x128xf32> to vector<1x128xf32>
    %114 = vector.broadcast %113 : vector<1x128xf32> to vector<32x128xf32>
    %115 = arith.addf %111, %114 : vector<32x128xf32>
    %cst_58 = arith.constant 0.000000e+00 : f32
    %116 = vector.broadcast %cst_58 : f32 to vector<32x128xf32>
    %117 = arith.maximumf %115, %116 : vector<32x128xf32>
    %cst_59 = arith.constant 0.000000e+00 : f32
    %118 = vector.broadcast %cst_59 : f32 to vector<2x128xf32>
    %119 = tpu.concatenate %118, %117, %118 in 0 : vector<2x128xf32>, vector<32x128xf32>, vector<2x128xf32> -> vector<36x128xf32>
    %120 = vector.extract_strided_slice %119 {offsets = [0, 0], sizes = [32, 128], strides = [1, 1]} : vector<36x128xf32> to vector<32x128xf32>
    %c0_60 = arith.constant 0 : index
    %c0_61 = arith.constant 0 : index
    %c0_62 = arith.constant 0 : index
    %c0_63 = arith.constant 0 : index
    %121 = vector.load %arg5[%c0_60, %c0_61, %c0_62, %c0_63] : memref<1x5x128x32xbf16, #tpu.memory_space<vmem>>, vector<1x1x128x32xbf16>
    %122 = vector.shape_cast %121 : vector<1x1x128x32xbf16> to vector<128x32xbf16>
    %123 = arith.truncf %120 : vector<32x128xf32> to vector<32x128xbf16>
    %cst_64 = arith.constant dense<0.000000e+00> : vector<32x32xf32>
    %124 = tpu.matmul %123, %122, %cst_64 {dimension_numbers = #tpu.dot_dimension_numbers<[1], [0], [0], [1], [0, 0, 1, 1], [], []>} : vector<32x128xbf16>, vector<128x32xbf16>, vector<32x32xf32> -> vector<32x32xf32>
    %125 = vector.extract_strided_slice %119 {offsets = [1, 0], sizes = [32, 128], strides = [1, 1]} : vector<36x128xf32> to vector<32x128xf32>
    %c0_65 = arith.constant 0 : index
    %c1_66 = arith.constant 1 : index
    %c0_67 = arith.constant 0 : index
    %c0_68 = arith.constant 0 : index
    %126 = vector.load %arg5[%c0_65, %c1_66, %c0_67, %c0_68] : memref<1x5x128x32xbf16, #tpu.memory_space<vmem>>, vector<1x1x128x32xbf16>
    %127 = vector.shape_cast %126 : vector<1x1x128x32xbf16> to vector<128x32xbf16>
    %128 = arith.truncf %125 : vector<32x128xf32> to vector<32x128xbf16>
    %cst_69 = arith.constant dense<0.000000e+00> : vector<32x32xf32>
    %129 = tpu.matmul %128, %127, %cst_69 {dimension_numbers = #tpu.dot_dimension_numbers<[1], [0], [0], [1], [0, 0, 1, 1], [], []>} : vector<32x128xbf16>, vector<128x32xbf16>, vector<32x32xf32> -> vector<32x32xf32>
    %130 = arith.addf %124, %129 : vector<32x32xf32>
    %131 = vector.extract_strided_slice %119 {offsets = [2, 0], sizes = [32, 128], strides = [1, 1]} : vector<36x128xf32> to vector<32x128xf32>
    %c0_70 = arith.constant 0 : index
    %c2_71 = arith.constant 2 : index
    %c0_72 = arith.constant 0 : index
    %c0_73 = arith.constant 0 : index
    %132 = vector.load %arg5[%c0_70, %c2_71, %c0_72, %c0_73] : memref<1x5x128x32xbf16, #tpu.memory_space<vmem>>, vector<1x1x128x32xbf16>
    %133 = vector.shape_cast %132 : vector<1x1x128x32xbf16> to vector<128x32xbf16>
    %134 = arith.truncf %131 : vector<32x128xf32> to vector<32x128xbf16>
    %cst_74 = arith.constant dense<0.000000e+00> : vector<32x32xf32>
    %135 = tpu.matmul %134, %133, %cst_74 {dimension_numbers = #tpu.dot_dimension_numbers<[1], [0], [0], [1], [0, 0, 1, 1], [], []>} : vector<32x128xbf16>, vector<128x32xbf16>, vector<32x32xf32> -> vector<32x32xf32>
    %136 = arith.addf %130, %135 : vector<32x32xf32>
    %137 = vector.extract_strided_slice %119 {offsets = [3, 0], sizes = [32, 128], strides = [1, 1]} : vector<36x128xf32> to vector<32x128xf32>
    %c0_75 = arith.constant 0 : index
    %c3 = arith.constant 3 : index
    %c0_76 = arith.constant 0 : index
    %c0_77 = arith.constant 0 : index
    %138 = vector.load %arg5[%c0_75, %c3, %c0_76, %c0_77] : memref<1x5x128x32xbf16, #tpu.memory_space<vmem>>, vector<1x1x128x32xbf16>
    %139 = vector.shape_cast %138 : vector<1x1x128x32xbf16> to vector<128x32xbf16>
    %140 = arith.truncf %137 : vector<32x128xf32> to vector<32x128xbf16>
    %cst_78 = arith.constant dense<0.000000e+00> : vector<32x32xf32>
    %141 = tpu.matmul %140, %139, %cst_78 {dimension_numbers = #tpu.dot_dimension_numbers<[1], [0], [0], [1], [0, 0, 1, 1], [], []>} : vector<32x128xbf16>, vector<128x32xbf16>, vector<32x32xf32> -> vector<32x32xf32>
    %142 = arith.addf %136, %141 : vector<32x32xf32>
    %143 = vector.extract_strided_slice %119 {offsets = [4, 0], sizes = [32, 128], strides = [1, 1]} : vector<36x128xf32> to vector<32x128xf32>
    %c0_79 = arith.constant 0 : index
    %c4 = arith.constant 4 : index
    %c0_80 = arith.constant 0 : index
    %c0_81 = arith.constant 0 : index
    %144 = vector.load %arg5[%c0_79, %c4, %c0_80, %c0_81] : memref<1x5x128x32xbf16, #tpu.memory_space<vmem>>, vector<1x1x128x32xbf16>
    %145 = vector.shape_cast %144 : vector<1x1x128x32xbf16> to vector<128x32xbf16>
    %146 = arith.truncf %143 : vector<32x128xf32> to vector<32x128xbf16>
    %cst_82 = arith.constant dense<0.000000e+00> : vector<32x32xf32>
    %147 = tpu.matmul %146, %145, %cst_82 {dimension_numbers = #tpu.dot_dimension_numbers<[1], [0], [0], [1], [0, 0, 1, 1], [], []>} : vector<32x128xbf16>, vector<128x32xbf16>, vector<32x32xf32> -> vector<32x32xf32>
    %148 = arith.addf %142, %147 : vector<32x32xf32>
    %cst_83 = arith.constant dense<0.000000e+00> : vector<32xf32>
    %149 = vector.multi_reduction <add>, %148, %cst_83 [0] : vector<32x32xf32> to vector<32xf32>
    %150 = vector.shape_cast %149 : vector<32xf32> to vector<1x32xf32>
    %cst_84 = arith.constant 3.200000e+01 : f32
    %151 = vector.broadcast %cst_84 : f32 to vector<1x32xf32>
    %152 = arith.divf %150, %151 : vector<1x32xf32>
    %c0_85 = arith.constant 0 : index
    %c0_86 = arith.constant 0 : index
    %c0_87 = arith.constant 0 : index
    %153 = vector.load %arg6[%c0_85, %c0_86, %c0_87] : memref<1x32x2xbf16, #tpu.memory_space<vmem>>, vector<1x32x2xbf16>
    %154 = vector.shape_cast %153 : vector<1x32x2xbf16> to vector<32x2xbf16>
    %155 = arith.truncf %152 : vector<1x32xf32> to vector<1x32xbf16>
    %cst_88 = arith.constant dense<0.000000e+00> : vector<1x2xf32>
    %156 = tpu.matmul %155, %154, %cst_88 {dimension_numbers = #tpu.dot_dimension_numbers<[1], [0], [0], [1], [0, 0, 1, 1], [], []>} : vector<1x32xbf16>, vector<32x2xbf16>, vector<1x2xf32> -> vector<1x2xf32>
    %cst_89 = arith.constant 0.000000e+00 : f32
    %157 = vector.broadcast %cst_89 : f32 to vector<1x2xf32>
    %158 = arith.maximumf %156, %157 : vector<1x2xf32>
    %c0_90 = arith.constant 0 : index
    %c0_91 = arith.constant 0 : index
    %c0_92 = arith.constant 0 : index
    %159 = vector.load %arg7[%c0_90, %c0_91, %c0_92] : memref<1x2x32xbf16, #tpu.memory_space<vmem>>, vector<1x2x32xbf16>
    %160 = vector.shape_cast %159 : vector<1x2x32xbf16> to vector<2x32xbf16>
    %161 = arith.truncf %158 : vector<1x2xf32> to vector<1x2xbf16>
    %cst_93 = arith.constant dense<0.000000e+00> : vector<1x32xf32>
    %162 = tpu.matmul %161, %160, %cst_93 {dimension_numbers = #tpu.dot_dimension_numbers<[1], [0], [0], [1], [0, 0, 1, 1], [], []>} : vector<1x2xbf16>, vector<2x32xbf16>, vector<1x32xf32> -> vector<1x32xf32>
    %cst_94 = arith.constant 0.000000e+00 : f32
    %163 = vector.broadcast %cst_94 : f32 to vector<1x32xf32>
    %164 = arith.subf %163, %162 : vector<1x32xf32>
    %165 = math.exp %164 : vector<1x32xf32>
    %cst_95 = arith.constant 1.000000e+00 : f32
    %166 = vector.broadcast %cst_95 : f32 to vector<1x32xf32>
    %167 = arith.addf %166, %165 : vector<1x32xf32>
    %cst_96 = arith.constant 1.000000e+00 : f32
    %168 = vector.broadcast %cst_96 : f32 to vector<1x32xf32>
    %169 = arith.divf %168, %167 : vector<1x32xf32>
    %170 = vector.broadcast %169 : vector<1x32xf32> to vector<32x32xf32>
    %171 = arith.mulf %148, %170 : vector<32x32xf32>
    %172 = tpu.concatenate %93, %171 in 1 : vector<32x64xf32>, vector<32x32xf32> -> vector<32x96xf32>
    %c0_97 = arith.constant 0 : index
    %c0_98 = arith.constant 0 : index
    %c0_99 = arith.constant 0 : index
    %173 = vector.load %arg8[%c0_97, %c0_98, %c0_99] : memref<1x2x96xf32, #tpu.memory_space<vmem>>, vector<1x1x96xf32>
    %174 = vector.shape_cast %173 : vector<1x1x96xf32> to vector<1x96xf32>
    %175 = vector.broadcast %174 : vector<1x96xf32> to vector<32x96xf32>
    %176 = arith.mulf %172, %175 : vector<32x96xf32>
    %c0_100 = arith.constant 0 : index
    %c1_101 = arith.constant 1 : index
    %c0_102 = arith.constant 0 : index
    %177 = vector.load %arg8[%c0_100, %c1_101, %c0_102] : memref<1x2x96xf32, #tpu.memory_space<vmem>>, vector<1x1x96xf32>
    %178 = vector.shape_cast %177 : vector<1x1x96xf32> to vector<1x96xf32>
    %179 = vector.broadcast %178 : vector<1x96xf32> to vector<32x96xf32>
    %180 = arith.addf %176, %179 : vector<32x96xf32>
    %cst_103 = arith.constant 0.000000e+00 : f32
    %181 = vector.broadcast %cst_103 : f32 to vector<32x96xf32>
    %182 = arith.maximumf %180, %181 : vector<32x96xf32>
    %c0_104 = arith.constant 0 : index
    %c0_105 = arith.constant 0 : index
    %c0_106 = arith.constant 0 : index
    %183 = vector.load %arg9[%c0_104, %c0_105, %c0_106] : memref<1x96x48xbf16, #tpu.memory_space<vmem>>, vector<1x96x48xbf16>
    %184 = vector.shape_cast %183 : vector<1x96x48xbf16> to vector<96x48xbf16>
    %185 = arith.truncf %182 : vector<32x96xf32> to vector<32x96xbf16>
    %cst_107 = arith.constant dense<0.000000e+00> : vector<32x48xf32>
    %186 = tpu.matmul %185, %184, %cst_107 {dimension_numbers = #tpu.dot_dimension_numbers<[1], [0], [0], [1], [0, 0, 1, 1], [], []>} : vector<32x96xbf16>, vector<96x48xbf16>, vector<32x48xf32> -> vector<32x48xf32>
    %187 = tpu.iota {dimensions = array<i32: 0>} : vector<16x32xi32>
    %188 = tpu.iota {dimensions = array<i32: 1>} : vector<16x32xi32>
    %c2_i32_108 = arith.constant 2 : i32
    %189 = vector.broadcast %c2_i32_108 : i32 to vector<16x32xi32>
    %190 = arith.muli %189, %187 : vector<16x32xi32>
    %c0_i32_109 = arith.constant 0 : i32
    %191 = vector.broadcast %c0_i32_109 : i32 to vector<16x32xi32>
    %192 = arith.addi %190, %191 : vector<16x32xi32>
    %193 = arith.cmpi eq, %188, %192 : vector<16x32xi32>
    %194 = arith.extui %193 : vector<16x32xi1> to vector<16x32xi32>
    %195 = arith.sitofp %194 : vector<16x32xi32> to vector<16x32xf32>
    %cst_110 = arith.constant dense<0.000000e+00> : vector<16x48xf32>
    %196 = tpu.matmul %195, %186, %cst_110 {dimension_numbers = #tpu.dot_dimension_numbers<[1], [0], [0], [1], [0, 0, 1, 1], [], []>} : vector<16x32xf32>, vector<32x48xf32>, vector<16x48xf32> -> vector<16x48xf32>
    %197 = tpu.iota {dimensions = array<i32: 0>} : vector<16x32xi32>
    %198 = tpu.iota {dimensions = array<i32: 1>} : vector<16x32xi32>
    %c2_i32_111 = arith.constant 2 : i32
    %199 = vector.broadcast %c2_i32_111 : i32 to vector<16x32xi32>
    %200 = arith.muli %199, %197 : vector<16x32xi32>
    %c1_i32_112 = arith.constant 1 : i32
    %201 = vector.broadcast %c1_i32_112 : i32 to vector<16x32xi32>
    %202 = arith.addi %200, %201 : vector<16x32xi32>
    %203 = arith.cmpi eq, %198, %202 : vector<16x32xi32>
    %204 = arith.extui %203 : vector<16x32xi1> to vector<16x32xi32>
    %205 = arith.sitofp %204 : vector<16x32xi32> to vector<16x32xf32>
    %cst_113 = arith.constant dense<0.000000e+00> : vector<16x48xf32>
    %206 = tpu.matmul %205, %186, %cst_113 {dimension_numbers = #tpu.dot_dimension_numbers<[1], [0], [0], [1], [0, 0, 1, 1], [], []>} : vector<16x32xf32>, vector<32x48xf32>, vector<16x48xf32> -> vector<16x48xf32>
    %207 = arith.addf %196, %206 : vector<16x48xf32>
    %cst_114 = arith.constant 5.000000e-01 : f32
    %208 = vector.broadcast %cst_114 : f32 to vector<16x48xf32>
    %209 = arith.mulf %208, %207 : vector<16x48xf32>
    %c0_115 = arith.constant 0 : index
    %c0_116 = arith.constant 0 : index
    %c0_117 = arith.constant 0 : index
    %210 = vector.load %arg10[%c0_115, %c0_116, %c0_117] : memref<1x2x48xf32, #tpu.memory_space<vmem>>, vector<1x1x48xf32>
    %211 = vector.shape_cast %210 : vector<1x1x48xf32> to vector<1x48xf32>
    %212 = vector.broadcast %211 : vector<1x48xf32> to vector<16x48xf32>
    %213 = arith.mulf %209, %212 : vector<16x48xf32>
    %c0_118 = arith.constant 0 : index
    %c1_119 = arith.constant 1 : index
    %c0_120 = arith.constant 0 : index
    %214 = vector.load %arg10[%c0_118, %c1_119, %c0_120] : memref<1x2x48xf32, #tpu.memory_space<vmem>>, vector<1x1x48xf32>
    %215 = vector.shape_cast %214 : vector<1x1x48xf32> to vector<1x48xf32>
    %216 = vector.broadcast %215 : vector<1x48xf32> to vector<16x48xf32>
    %217 = arith.addf %213, %216 : vector<16x48xf32>
    %cst_121 = arith.constant 0.000000e+00 : f32
    %218 = vector.broadcast %cst_121 : f32 to vector<16x48xf32>
    %219 = arith.maximumf %217, %218 : vector<16x48xf32>
    %c0_122 = arith.constant 0 : index
    %c0_123 = arith.constant 0 : index
    %c0_124 = arith.constant 0 : index
    %220 = vector.load %arg12[%c0_122, %c0_123, %c0_124] : memref<1x48x128xbf16, #tpu.memory_space<vmem>>, vector<1x48x128xbf16>
    %221 = vector.shape_cast %220 : vector<1x48x128xbf16> to vector<48x128xbf16>
    %222 = arith.truncf %219 : vector<16x48xf32> to vector<16x48xbf16>
    %cst_125 = arith.constant dense<0.000000e+00> : vector<16x128xf32>
    %223 = tpu.matmul %222, %221, %cst_125 {dimension_numbers = #tpu.dot_dimension_numbers<[1], [0], [0], [1], [0, 0, 1, 1], [], []>} : vector<16x48xbf16>, vector<48x128xbf16>, vector<16x128xf32> -> vector<16x128xf32>
    %c0_126 = arith.constant 0 : index
    %c0_127 = arith.constant 0 : index
    %c0_128 = arith.constant 0 : index
    %224 = vector.load %arg11[%c0_126, %c0_127, %c0_128] : memref<1x2x128xf32, #tpu.memory_space<vmem>>, vector<1x1x128xf32>
    %225 = vector.shape_cast %224 : vector<1x1x128xf32> to vector<1x128xf32>
    %226 = vector.broadcast %225 : vector<1x128xf32> to vector<16x128xf32>
    %227 = arith.mulf %223, %226 : vector<16x128xf32>
    %c0_129 = arith.constant 0 : index
    %c1_130 = arith.constant 1 : index
    %c0_131 = arith.constant 0 : index
    %228 = vector.load %arg11[%c0_129, %c1_130, %c0_131] : memref<1x2x128xf32, #tpu.memory_space<vmem>>, vector<1x1x128xf32>
    %229 = vector.shape_cast %228 : vector<1x1x128xf32> to vector<1x128xf32>
    %230 = vector.broadcast %229 : vector<1x128xf32> to vector<16x128xf32>
    %231 = arith.addf %227, %230 : vector<16x128xf32>
    %cst_132 = arith.constant 0.000000e+00 : f32
    %232 = vector.broadcast %cst_132 : f32 to vector<16x128xf32>
    %233 = arith.maximumf %231, %232 : vector<16x128xf32>
    %cst_133 = arith.constant 0.000000e+00 : f32
    %234 = vector.broadcast %cst_133 : f32 to vector<2x128xf32>
    %235 = tpu.concatenate %234, %233, %234 in 0 : vector<2x128xf32>, vector<16x128xf32>, vector<2x128xf32> -> vector<20x128xf32>
    %236 = vector.extract_strided_slice %235 {offsets = [0, 0], sizes = [16, 128], strides = [1, 1]} : vector<20x128xf32> to vector<16x128xf32>
    %c0_134 = arith.constant 0 : index
    %c0_135 = arith.constant 0 : index
    %c0_136 = arith.constant 0 : index
    %c0_137 = arith.constant 0 : index
    %237 = vector.load %arg13[%c0_134, %c0_135, %c0_136, %c0_137] : memref<1x5x128x32xbf16, #tpu.memory_space<vmem>>, vector<1x1x128x32xbf16>
    %238 = vector.shape_cast %237 : vector<1x1x128x32xbf16> to vector<128x32xbf16>
    %239 = arith.truncf %236 : vector<16x128xf32> to vector<16x128xbf16>
    %cst_138 = arith.constant dense<0.000000e+00> : vector<16x32xf32>
    %240 = tpu.matmul %239, %238, %cst_138 {dimension_numbers = #tpu.dot_dimension_numbers<[1], [0], [0], [1], [0, 0, 1, 1], [], []>} : vector<16x128xbf16>, vector<128x32xbf16>, vector<16x32xf32> -> vector<16x32xf32>
    %241 = vector.extract_strided_slice %235 {offsets = [1, 0], sizes = [16, 128], strides = [1, 1]} : vector<20x128xf32> to vector<16x128xf32>
    %c0_139 = arith.constant 0 : index
    %c1_140 = arith.constant 1 : index
    %c0_141 = arith.constant 0 : index
    %c0_142 = arith.constant 0 : index
    %242 = vector.load %arg13[%c0_139, %c1_140, %c0_141, %c0_142] : memref<1x5x128x32xbf16, #tpu.memory_space<vmem>>, vector<1x1x128x32xbf16>
    %243 = vector.shape_cast %242 : vector<1x1x128x32xbf16> to vector<128x32xbf16>
    %244 = arith.truncf %241 : vector<16x128xf32> to vector<16x128xbf16>
    %cst_143 = arith.constant dense<0.000000e+00> : vector<16x32xf32>
    %245 = tpu.matmul %244, %243, %cst_143 {dimension_numbers = #tpu.dot_dimension_numbers<[1], [0], [0], [1], [0, 0, 1, 1], [], []>} : vector<16x128xbf16>, vector<128x32xbf16>, vector<16x32xf32> -> vector<16x32xf32>
    %246 = arith.addf %240, %245 : vector<16x32xf32>
    %247 = vector.extract_strided_slice %235 {offsets = [2, 0], sizes = [16, 128], strides = [1, 1]} : vector<20x128xf32> to vector<16x128xf32>
    %c0_144 = arith.constant 0 : index
    %c2_145 = arith.constant 2 : index
    %c0_146 = arith.constant 0 : index
    %c0_147 = arith.constant 0 : index
    %248 = vector.load %arg13[%c0_144, %c2_145, %c0_146, %c0_147] : memref<1x5x128x32xbf16, #tpu.memory_space<vmem>>, vector<1x1x128x32xbf16>
    %249 = vector.shape_cast %248 : vector<1x1x128x32xbf16> to vector<128x32xbf16>
    %250 = arith.truncf %247 : vector<16x128xf32> to vector<16x128xbf16>
    %cst_148 = arith.constant dense<0.000000e+00> : vector<16x32xf32>
    %251 = tpu.matmul %250, %249, %cst_148 {dimension_numbers = #tpu.dot_dimension_numbers<[1], [0], [0], [1], [0, 0, 1, 1], [], []>} : vector<16x128xbf16>, vector<128x32xbf16>, vector<16x32xf32> -> vector<16x32xf32>
    %252 = arith.addf %246, %251 : vector<16x32xf32>
    %253 = vector.extract_strided_slice %235 {offsets = [3, 0], sizes = [16, 128], strides = [1, 1]} : vector<20x128xf32> to vector<16x128xf32>
    %c0_149 = arith.constant 0 : index
    %c3_150 = arith.constant 3 : index
    %c0_151 = arith.constant 0 : index
    %c0_152 = arith.constant 0 : index
    %254 = vector.load %arg13[%c0_149, %c3_150, %c0_151, %c0_152] : memref<1x5x128x32xbf16, #tpu.memory_space<vmem>>, vector<1x1x128x32xbf16>
    %255 = vector.shape_cast %254 : vector<1x1x128x32xbf16> to vector<128x32xbf16>
    %256 = arith.truncf %253 : vector<16x128xf32> to vector<16x128xbf16>
    %cst_153 = arith.constant dense<0.000000e+00> : vector<16x32xf32>
    %257 = tpu.matmul %256, %255, %cst_153 {dimension_numbers = #tpu.dot_dimension_numbers<[1], [0], [0], [1], [0, 0, 1, 1], [], []>} : vector<16x128xbf16>, vector<128x32xbf16>, vector<16x32xf32> -> vector<16x32xf32>
    %258 = arith.addf %252, %257 : vector<16x32xf32>
    %259 = vector.extract_strided_slice %235 {offsets = [4, 0], sizes = [16, 128], strides = [1, 1]} : vector<20x128xf32> to vector<16x128xf32>
    %c0_154 = arith.constant 0 : index
    %c4_155 = arith.constant 4 : index
    %c0_156 = arith.constant 0 : index
    %c0_157 = arith.constant 0 : index
    %260 = vector.load %arg13[%c0_154, %c4_155, %c0_156, %c0_157] : memref<1x5x128x32xbf16, #tpu.memory_space<vmem>>, vector<1x1x128x32xbf16>
    %261 = vector.shape_cast %260 : vector<1x1x128x32xbf16> to vector<128x32xbf16>
    %262 = arith.truncf %259 : vector<16x128xf32> to vector<16x128xbf16>
    %cst_158 = arith.constant dense<0.000000e+00> : vector<16x32xf32>
    %263 = tpu.matmul %262, %261, %cst_158 {dimension_numbers = #tpu.dot_dimension_numbers<[1], [0], [0], [1], [0, 0, 1, 1], [], []>} : vector<16x128xbf16>, vector<128x32xbf16>, vector<16x32xf32> -> vector<16x32xf32>
    %264 = arith.addf %258, %263 : vector<16x32xf32>
    %cst_159 = arith.constant dense<0.000000e+00> : vector<32xf32>
    %265 = vector.multi_reduction <add>, %264, %cst_159 [0] : vector<16x32xf32> to vector<32xf32>
    %266 = vector.shape_cast %265 : vector<32xf32> to vector<1x32xf32>
    %cst_160 = arith.constant 1.600000e+01 : f32
    %267 = vector.broadcast %cst_160 : f32 to vector<1x32xf32>
    %268 = arith.divf %266, %267 : vector<1x32xf32>
    %c0_161 = arith.constant 0 : index
    %c0_162 = arith.constant 0 : index
    %c0_163 = arith.constant 0 : index
    %269 = vector.load %arg14[%c0_161, %c0_162, %c0_163] : memref<1x32x2xbf16, #tpu.memory_space<vmem>>, vector<1x32x2xbf16>
    %270 = vector.shape_cast %269 : vector<1x32x2xbf16> to vector<32x2xbf16>
    %271 = arith.truncf %268 : vector<1x32xf32> to vector<1x32xbf16>
    %cst_164 = arith.constant dense<0.000000e+00> : vector<1x2xf32>
    %272 = tpu.matmul %271, %270, %cst_164 {dimension_numbers = #tpu.dot_dimension_numbers<[1], [0], [0], [1], [0, 0, 1, 1], [], []>} : vector<1x32xbf16>, vector<32x2xbf16>, vector<1x2xf32> -> vector<1x2xf32>
    %cst_165 = arith.constant 0.000000e+00 : f32
    %273 = vector.broadcast %cst_165 : f32 to vector<1x2xf32>
    %274 = arith.maximumf %272, %273 : vector<1x2xf32>
    %c0_166 = arith.constant 0 : index
    %c0_167 = arith.constant 0 : index
    %c0_168 = arith.constant 0 : index
    %275 = vector.load %arg15[%c0_166, %c0_167, %c0_168] : memref<1x2x32xbf16, #tpu.memory_space<vmem>>, vector<1x2x32xbf16>
    %276 = vector.shape_cast %275 : vector<1x2x32xbf16> to vector<2x32xbf16>
    %277 = arith.truncf %274 : vector<1x2xf32> to vector<1x2xbf16>
    %cst_169 = arith.constant dense<0.000000e+00> : vector<1x32xf32>
    %278 = tpu.matmul %277, %276, %cst_169 {dimension_numbers = #tpu.dot_dimension_numbers<[1], [0], [0], [1], [0, 0, 1, 1], [], []>} : vector<1x2xbf16>, vector<2x32xbf16>, vector<1x32xf32> -> vector<1x32xf32>
    %cst_170 = arith.constant 0.000000e+00 : f32
    %279 = vector.broadcast %cst_170 : f32 to vector<1x32xf32>
    %280 = arith.subf %279, %278 : vector<1x32xf32>
    %281 = math.exp %280 : vector<1x32xf32>
    %cst_171 = arith.constant 1.000000e+00 : f32
    %282 = vector.broadcast %cst_171 : f32 to vector<1x32xf32>
    %283 = arith.addf %282, %281 : vector<1x32xf32>
    %cst_172 = arith.constant 1.000000e+00 : f32
    %284 = vector.broadcast %cst_172 : f32 to vector<1x32xf32>
    %285 = arith.divf %284, %283 : vector<1x32xf32>
    %286 = vector.broadcast %285 : vector<1x32xf32> to vector<16x32xf32>
    %287 = arith.mulf %264, %286 : vector<16x32xf32>
    %288 = tpu.concatenate %209, %287 in 1 : vector<16x48xf32>, vector<16x32xf32> -> vector<16x80xf32>
    %c0_173 = arith.constant 0 : index
    %c0_174 = arith.constant 0 : index
    %c0_175 = arith.constant 0 : index
    %289 = vector.load %arg16[%c0_173, %c0_174, %c0_175] : memref<1x2x80xf32, #tpu.memory_space<vmem>>, vector<1x1x80xf32>
    %290 = vector.shape_cast %289 : vector<1x1x80xf32> to vector<1x80xf32>
    %291 = vector.broadcast %290 : vector<1x80xf32> to vector<16x80xf32>
    %292 = arith.mulf %288, %291 : vector<16x80xf32>
    %c0_176 = arith.constant 0 : index
    %c1_177 = arith.constant 1 : index
    %c0_178 = arith.constant 0 : index
    %293 = vector.load %arg16[%c0_176, %c1_177, %c0_178] : memref<1x2x80xf32, #tpu.memory_space<vmem>>, vector<1x1x80xf32>
    %294 = vector.shape_cast %293 : vector<1x1x80xf32> to vector<1x80xf32>
    %295 = vector.broadcast %294 : vector<1x80xf32> to vector<16x80xf32>
    %296 = arith.addf %292, %295 : vector<16x80xf32>
    %cst_179 = arith.constant 0.000000e+00 : f32
    %297 = vector.broadcast %cst_179 : f32 to vector<16x80xf32>
    %298 = arith.maximumf %296, %297 : vector<16x80xf32>
    %c0_180 = arith.constant 0 : index
    %c0_181 = arith.constant 0 : index
    %c0_182 = arith.constant 0 : index
    %299 = vector.load %arg17[%c0_180, %c0_181, %c0_182] : memref<1x80x40xbf16, #tpu.memory_space<vmem>>, vector<1x80x40xbf16>
    %300 = vector.shape_cast %299 : vector<1x80x40xbf16> to vector<80x40xbf16>
    %301 = arith.truncf %298 : vector<16x80xf32> to vector<16x80xbf16>
    %cst_183 = arith.constant dense<0.000000e+00> : vector<16x40xf32>
    %302 = tpu.matmul %301, %300, %cst_183 {dimension_numbers = #tpu.dot_dimension_numbers<[1], [0], [0], [1], [0, 0, 1, 1], [], []>} : vector<16x80xbf16>, vector<80x40xbf16>, vector<16x40xf32> -> vector<16x40xf32>
    %303 = tpu.iota {dimensions = array<i32: 0>} : vector<8x16xi32>
    %304 = tpu.iota {dimensions = array<i32: 1>} : vector<8x16xi32>
    %c2_i32_184 = arith.constant 2 : i32
    %305 = vector.broadcast %c2_i32_184 : i32 to vector<8x16xi32>
    %306 = arith.muli %305, %303 : vector<8x16xi32>
    %c0_i32_185 = arith.constant 0 : i32
    %307 = vector.broadcast %c0_i32_185 : i32 to vector<8x16xi32>
    %308 = arith.addi %306, %307 : vector<8x16xi32>
    %309 = arith.cmpi eq, %304, %308 : vector<8x16xi32>
    %310 = arith.extui %309 : vector<8x16xi1> to vector<8x16xi32>
    %311 = arith.sitofp %310 : vector<8x16xi32> to vector<8x16xf32>
    %cst_186 = arith.constant dense<0.000000e+00> : vector<8x40xf32>
    %312 = tpu.matmul %311, %302, %cst_186 {dimension_numbers = #tpu.dot_dimension_numbers<[1], [0], [0], [1], [0, 0, 1, 1], [], []>} : vector<8x16xf32>, vector<16x40xf32>, vector<8x40xf32> -> vector<8x40xf32>
    %313 = tpu.iota {dimensions = array<i32: 0>} : vector<8x16xi32>
    %314 = tpu.iota {dimensions = array<i32: 1>} : vector<8x16xi32>
    %c2_i32_187 = arith.constant 2 : i32
    %315 = vector.broadcast %c2_i32_187 : i32 to vector<8x16xi32>
    %316 = arith.muli %315, %313 : vector<8x16xi32>
    %c1_i32_188 = arith.constant 1 : i32
    %317 = vector.broadcast %c1_i32_188 : i32 to vector<8x16xi32>
    %318 = arith.addi %316, %317 : vector<8x16xi32>
    %319 = arith.cmpi eq, %314, %318 : vector<8x16xi32>
    %320 = arith.extui %319 : vector<8x16xi1> to vector<8x16xi32>
    %321 = arith.sitofp %320 : vector<8x16xi32> to vector<8x16xf32>
    %cst_189 = arith.constant dense<0.000000e+00> : vector<8x40xf32>
    %322 = tpu.matmul %321, %302, %cst_189 {dimension_numbers = #tpu.dot_dimension_numbers<[1], [0], [0], [1], [0, 0, 1, 1], [], []>} : vector<8x16xf32>, vector<16x40xf32>, vector<8x40xf32> -> vector<8x40xf32>
    %323 = arith.addf %312, %322 : vector<8x40xf32>
    %cst_190 = arith.constant 5.000000e-01 : f32
    %324 = vector.broadcast %cst_190 : f32 to vector<8x40xf32>
    %325 = arith.mulf %324, %323 : vector<8x40xf32>
    %c0_191 = arith.constant 0 : index
    %c0_192 = arith.constant 0 : index
    %c0_193 = arith.constant 0 : index
    %326 = vector.load %arg18[%c0_191, %c0_192, %c0_193] : memref<1x2x40xf32, #tpu.memory_space<vmem>>, vector<1x1x40xf32>
    %327 = vector.shape_cast %326 : vector<1x1x40xf32> to vector<1x40xf32>
    %328 = vector.broadcast %327 : vector<1x40xf32> to vector<8x40xf32>
    %329 = arith.mulf %325, %328 : vector<8x40xf32>
    %c0_194 = arith.constant 0 : index
    %c1_195 = arith.constant 1 : index
    %c0_196 = arith.constant 0 : index
    %330 = vector.load %arg18[%c0_194, %c1_195, %c0_196] : memref<1x2x40xf32, #tpu.memory_space<vmem>>, vector<1x1x40xf32>
    %331 = vector.shape_cast %330 : vector<1x1x40xf32> to vector<1x40xf32>
    %332 = vector.broadcast %331 : vector<1x40xf32> to vector<8x40xf32>
    %333 = arith.addf %329, %332 : vector<8x40xf32>
    %cst_197 = arith.constant 0.000000e+00 : f32
    %334 = vector.broadcast %cst_197 : f32 to vector<8x40xf32>
    %335 = arith.maximumf %333, %334 : vector<8x40xf32>
    %c0_198 = arith.constant 0 : index
    %c0_199 = arith.constant 0 : index
    %c0_200 = arith.constant 0 : index
    %336 = vector.load %arg20[%c0_198, %c0_199, %c0_200] : memref<1x40x128xbf16, #tpu.memory_space<vmem>>, vector<1x40x128xbf16>
    %337 = vector.shape_cast %336 : vector<1x40x128xbf16> to vector<40x128xbf16>
    %338 = arith.truncf %335 : vector<8x40xf32> to vector<8x40xbf16>
    %cst_201 = arith.constant dense<0.000000e+00> : vector<8x128xf32>
    %339 = tpu.matmul %338, %337, %cst_201 {dimension_numbers = #tpu.dot_dimension_numbers<[1], [0], [0], [1], [0, 0, 1, 1], [], []>} : vector<8x40xbf16>, vector<40x128xbf16>, vector<8x128xf32> -> vector<8x128xf32>
    %c0_202 = arith.constant 0 : index
    %c0_203 = arith.constant 0 : index
    %c0_204 = arith.constant 0 : index
    %340 = vector.load %arg19[%c0_202, %c0_203, %c0_204] : memref<1x2x128xf32, #tpu.memory_space<vmem>>, vector<1x1x128xf32>
    %341 = vector.shape_cast %340 : vector<1x1x128xf32> to vector<1x128xf32>
    %342 = vector.broadcast %341 : vector<1x128xf32> to vector<8x128xf32>
    %343 = arith.mulf %339, %342 : vector<8x128xf32>
    %c0_205 = arith.constant 0 : index
    %c1_206 = arith.constant 1 : index
    %c0_207 = arith.constant 0 : index
    %344 = vector.load %arg19[%c0_205, %c1_206, %c0_207] : memref<1x2x128xf32, #tpu.memory_space<vmem>>, vector<1x1x128xf32>
    %345 = vector.shape_cast %344 : vector<1x1x128xf32> to vector<1x128xf32>
    %346 = vector.broadcast %345 : vector<1x128xf32> to vector<8x128xf32>
    %347 = arith.addf %343, %346 : vector<8x128xf32>
    %cst_208 = arith.constant 0.000000e+00 : f32
    %348 = vector.broadcast %cst_208 : f32 to vector<8x128xf32>
    %349 = arith.maximumf %347, %348 : vector<8x128xf32>
    %cst_209 = arith.constant 0.000000e+00 : f32
    %350 = vector.broadcast %cst_209 : f32 to vector<2x128xf32>
    %351 = tpu.concatenate %350, %349, %350 in 0 : vector<2x128xf32>, vector<8x128xf32>, vector<2x128xf32> -> vector<12x128xf32>
    %352 = vector.extract_strided_slice %351 {offsets = [0, 0], sizes = [8, 128], strides = [1, 1]} : vector<12x128xf32> to vector<8x128xf32>
    %c0_210 = arith.constant 0 : index
    %c0_211 = arith.constant 0 : index
    %c0_212 = arith.constant 0 : index
    %c0_213 = arith.constant 0 : index
    %353 = vector.load %arg21[%c0_210, %c0_211, %c0_212, %c0_213] : memref<1x5x128x32xbf16, #tpu.memory_space<vmem>>, vector<1x1x128x32xbf16>
    %354 = vector.shape_cast %353 : vector<1x1x128x32xbf16> to vector<128x32xbf16>
    %355 = arith.truncf %352 : vector<8x128xf32> to vector<8x128xbf16>
    %cst_214 = arith.constant dense<0.000000e+00> : vector<8x32xf32>
    %356 = tpu.matmul %355, %354, %cst_214 {dimension_numbers = #tpu.dot_dimension_numbers<[1], [0], [0], [1], [0, 0, 1, 1], [], []>} : vector<8x128xbf16>, vector<128x32xbf16>, vector<8x32xf32> -> vector<8x32xf32>
    %357 = vector.extract_strided_slice %351 {offsets = [1, 0], sizes = [8, 128], strides = [1, 1]} : vector<12x128xf32> to vector<8x128xf32>
    %c0_215 = arith.constant 0 : index
    %c1_216 = arith.constant 1 : index
    %c0_217 = arith.constant 0 : index
    %c0_218 = arith.constant 0 : index
    %358 = vector.load %arg21[%c0_215, %c1_216, %c0_217, %c0_218] : memref<1x5x128x32xbf16, #tpu.memory_space<vmem>>, vector<1x1x128x32xbf16>
    %359 = vector.shape_cast %358 : vector<1x1x128x32xbf16> to vector<128x32xbf16>
    %360 = arith.truncf %357 : vector<8x128xf32> to vector<8x128xbf16>
    %cst_219 = arith.constant dense<0.000000e+00> : vector<8x32xf32>
    %361 = tpu.matmul %360, %359, %cst_219 {dimension_numbers = #tpu.dot_dimension_numbers<[1], [0], [0], [1], [0, 0, 1, 1], [], []>} : vector<8x128xbf16>, vector<128x32xbf16>, vector<8x32xf32> -> vector<8x32xf32>
    %362 = arith.addf %356, %361 : vector<8x32xf32>
    %363 = vector.extract_strided_slice %351 {offsets = [2, 0], sizes = [8, 128], strides = [1, 1]} : vector<12x128xf32> to vector<8x128xf32>
    %c0_220 = arith.constant 0 : index
    %c2_221 = arith.constant 2 : index
    %c0_222 = arith.constant 0 : index
    %c0_223 = arith.constant 0 : index
    %364 = vector.load %arg21[%c0_220, %c2_221, %c0_222, %c0_223] : memref<1x5x128x32xbf16, #tpu.memory_space<vmem>>, vector<1x1x128x32xbf16>
    %365 = vector.shape_cast %364 : vector<1x1x128x32xbf16> to vector<128x32xbf16>
    %366 = arith.truncf %363 : vector<8x128xf32> to vector<8x128xbf16>
    %cst_224 = arith.constant dense<0.000000e+00> : vector<8x32xf32>
    %367 = tpu.matmul %366, %365, %cst_224 {dimension_numbers = #tpu.dot_dimension_numbers<[1], [0], [0], [1], [0, 0, 1, 1], [], []>} : vector<8x128xbf16>, vector<128x32xbf16>, vector<8x32xf32> -> vector<8x32xf32>
    %368 = arith.addf %362, %367 : vector<8x32xf32>
    %369 = vector.extract_strided_slice %351 {offsets = [3, 0], sizes = [8, 128], strides = [1, 1]} : vector<12x128xf32> to vector<8x128xf32>
    %c0_225 = arith.constant 0 : index
    %c3_226 = arith.constant 3 : index
    %c0_227 = arith.constant 0 : index
    %c0_228 = arith.constant 0 : index
    %370 = vector.load %arg21[%c0_225, %c3_226, %c0_227, %c0_228] : memref<1x5x128x32xbf16, #tpu.memory_space<vmem>>, vector<1x1x128x32xbf16>
    %371 = vector.shape_cast %370 : vector<1x1x128x32xbf16> to vector<128x32xbf16>
    %372 = arith.truncf %369 : vector<8x128xf32> to vector<8x128xbf16>
    %cst_229 = arith.constant dense<0.000000e+00> : vector<8x32xf32>
    %373 = tpu.matmul %372, %371, %cst_229 {dimension_numbers = #tpu.dot_dimension_numbers<[1], [0], [0], [1], [0, 0, 1, 1], [], []>} : vector<8x128xbf16>, vector<128x32xbf16>, vector<8x32xf32> -> vector<8x32xf32>
    %374 = arith.addf %368, %373 : vector<8x32xf32>
    %375 = vector.extract_strided_slice %351 {offsets = [4, 0], sizes = [8, 128], strides = [1, 1]} : vector<12x128xf32> to vector<8x128xf32>
    %c0_230 = arith.constant 0 : index
    %c4_231 = arith.constant 4 : index
    %c0_232 = arith.constant 0 : index
    %c0_233 = arith.constant 0 : index
    %376 = vector.load %arg21[%c0_230, %c4_231, %c0_232, %c0_233] : memref<1x5x128x32xbf16, #tpu.memory_space<vmem>>, vector<1x1x128x32xbf16>
    %377 = vector.shape_cast %376 : vector<1x1x128x32xbf16> to vector<128x32xbf16>
    %378 = arith.truncf %375 : vector<8x128xf32> to vector<8x128xbf16>
    %cst_234 = arith.constant dense<0.000000e+00> : vector<8x32xf32>
    %379 = tpu.matmul %378, %377, %cst_234 {dimension_numbers = #tpu.dot_dimension_numbers<[1], [0], [0], [1], [0, 0, 1, 1], [], []>} : vector<8x128xbf16>, vector<128x32xbf16>, vector<8x32xf32> -> vector<8x32xf32>
    %380 = arith.addf %374, %379 : vector<8x32xf32>
    %cst_235 = arith.constant dense<0.000000e+00> : vector<32xf32>
    %381 = vector.multi_reduction <add>, %380, %cst_235 [0] : vector<8x32xf32> to vector<32xf32>
    %382 = vector.shape_cast %381 : vector<32xf32> to vector<1x32xf32>
    %cst_236 = arith.constant 8.000000e+00 : f32
    %383 = vector.broadcast %cst_236 : f32 to vector<1x32xf32>
    %384 = arith.divf %382, %383 : vector<1x32xf32>
    %c0_237 = arith.constant 0 : index
    %c0_238 = arith.constant 0 : index
    %c0_239 = arith.constant 0 : index
    %385 = vector.load %arg22[%c0_237, %c0_238, %c0_239] : memref<1x32x2xbf16, #tpu.memory_space<vmem>>, vector<1x32x2xbf16>
    %386 = vector.shape_cast %385 : vector<1x32x2xbf16> to vector<32x2xbf16>
    %387 = arith.truncf %384 : vector<1x32xf32> to vector<1x32xbf16>
    %cst_240 = arith.constant dense<0.000000e+00> : vector<1x2xf32>
    %388 = tpu.matmul %387, %386, %cst_240 {dimension_numbers = #tpu.dot_dimension_numbers<[1], [0], [0], [1], [0, 0, 1, 1], [], []>} : vector<1x32xbf16>, vector<32x2xbf16>, vector<1x2xf32> -> vector<1x2xf32>
    %cst_241 = arith.constant 0.000000e+00 : f32
    %389 = vector.broadcast %cst_241 : f32 to vector<1x2xf32>
    %390 = arith.maximumf %388, %389 : vector<1x2xf32>
    %c0_242 = arith.constant 0 : index
    %c0_243 = arith.constant 0 : index
    %c0_244 = arith.constant 0 : index
    %391 = vector.load %arg23[%c0_242, %c0_243, %c0_244] : memref<1x2x32xbf16, #tpu.memory_space<vmem>>, vector<1x2x32xbf16>
    %392 = vector.shape_cast %391 : vector<1x2x32xbf16> to vector<2x32xbf16>
    %393 = arith.truncf %390 : vector<1x2xf32> to vector<1x2xbf16>
    %cst_245 = arith.constant dense<0.000000e+00> : vector<1x32xf32>
    %394 = tpu.matmul %393, %392, %cst_245 {dimension_numbers = #tpu.dot_dimension_numbers<[1], [0], [0], [1], [0, 0, 1, 1], [], []>} : vector<1x2xbf16>, vector<2x32xbf16>, vector<1x32xf32> -> vector<1x32xf32>
    %cst_246 = arith.constant 0.000000e+00 : f32
    %395 = vector.broadcast %cst_246 : f32 to vector<1x32xf32>
    %396 = arith.subf %395, %394 : vector<1x32xf32>
    %397 = math.exp %396 : vector<1x32xf32>
    %cst_247 = arith.constant 1.000000e+00 : f32
    %398 = vector.broadcast %cst_247 : f32 to vector<1x32xf32>
    %399 = arith.addf %398, %397 : vector<1x32xf32>
    %cst_248 = arith.constant 1.000000e+00 : f32
    %400 = vector.broadcast %cst_248 : f32 to vector<1x32xf32>
    %401 = arith.divf %400, %399 : vector<1x32xf32>
    %402 = vector.broadcast %401 : vector<1x32xf32> to vector<8x32xf32>
    %403 = arith.mulf %380, %402 : vector<8x32xf32>
    %404 = tpu.concatenate %325, %403 in 1 : vector<8x40xf32>, vector<8x32xf32> -> vector<8x72xf32>
    %c0_249 = arith.constant 0 : index
    %c0_250 = arith.constant 0 : index
    %c0_251 = arith.constant 0 : index
    %405 = vector.load %arg24[%c0_249, %c0_250, %c0_251] : memref<1x2x72xf32, #tpu.memory_space<vmem>>, vector<1x1x72xf32>
    %406 = vector.shape_cast %405 : vector<1x1x72xf32> to vector<1x72xf32>
    %407 = vector.broadcast %406 : vector<1x72xf32> to vector<8x72xf32>
    %408 = arith.mulf %404, %407 : vector<8x72xf32>
    %c0_252 = arith.constant 0 : index
    %c1_253 = arith.constant 1 : index
    %c0_254 = arith.constant 0 : index
    %409 = vector.load %arg24[%c0_252, %c1_253, %c0_254] : memref<1x2x72xf32, #tpu.memory_space<vmem>>, vector<1x1x72xf32>
    %410 = vector.shape_cast %409 : vector<1x1x72xf32> to vector<1x72xf32>
    %411 = vector.broadcast %410 : vector<1x72xf32> to vector<8x72xf32>
    %412 = arith.addf %408, %411 : vector<8x72xf32>
    %cst_255 = arith.constant 0.000000e+00 : f32
    %413 = vector.broadcast %cst_255 : f32 to vector<8x72xf32>
    %414 = arith.maximumf %412, %413 : vector<8x72xf32>
    %c0_256 = arith.constant 0 : index
    %c0_257 = arith.constant 0 : index
    %c0_258 = arith.constant 0 : index
    %415 = vector.load %arg25[%c0_256, %c0_257, %c0_258] : memref<1x72x36xbf16, #tpu.memory_space<vmem>>, vector<1x72x36xbf16>
    %416 = vector.shape_cast %415 : vector<1x72x36xbf16> to vector<72x36xbf16>
    %417 = arith.truncf %414 : vector<8x72xf32> to vector<8x72xbf16>
    %cst_259 = arith.constant dense<0.000000e+00> : vector<8x36xf32>
    %418 = tpu.matmul %417, %416, %cst_259 {dimension_numbers = #tpu.dot_dimension_numbers<[1], [0], [0], [1], [0, 0, 1, 1], [], []>} : vector<8x72xbf16>, vector<72x36xbf16>, vector<8x36xf32> -> vector<8x36xf32>
    %419 = tpu.iota {dimensions = array<i32: 0>} : vector<4x8xi32>
    %420 = tpu.iota {dimensions = array<i32: 1>} : vector<4x8xi32>
    %c2_i32_260 = arith.constant 2 : i32
    %421 = vector.broadcast %c2_i32_260 : i32 to vector<4x8xi32>
    %422 = arith.muli %421, %419 : vector<4x8xi32>
    %c0_i32_261 = arith.constant 0 : i32
    %423 = vector.broadcast %c0_i32_261 : i32 to vector<4x8xi32>
    %424 = arith.addi %422, %423 : vector<4x8xi32>
    %425 = arith.cmpi eq, %420, %424 : vector<4x8xi32>
    %426 = arith.extui %425 : vector<4x8xi1> to vector<4x8xi32>
    %427 = arith.sitofp %426 : vector<4x8xi32> to vector<4x8xf32>
    %cst_262 = arith.constant dense<0.000000e+00> : vector<4x36xf32>
    %428 = tpu.matmul %427, %418, %cst_262 {dimension_numbers = #tpu.dot_dimension_numbers<[1], [0], [0], [1], [0, 0, 1, 1], [], []>} : vector<4x8xf32>, vector<8x36xf32>, vector<4x36xf32> -> vector<4x36xf32>
    %429 = tpu.iota {dimensions = array<i32: 0>} : vector<4x8xi32>
    %430 = tpu.iota {dimensions = array<i32: 1>} : vector<4x8xi32>
    %c2_i32_263 = arith.constant 2 : i32
    %431 = vector.broadcast %c2_i32_263 : i32 to vector<4x8xi32>
    %432 = arith.muli %431, %429 : vector<4x8xi32>
    %c1_i32_264 = arith.constant 1 : i32
    %433 = vector.broadcast %c1_i32_264 : i32 to vector<4x8xi32>
    %434 = arith.addi %432, %433 : vector<4x8xi32>
    %435 = arith.cmpi eq, %430, %434 : vector<4x8xi32>
    %436 = arith.extui %435 : vector<4x8xi1> to vector<4x8xi32>
    %437 = arith.sitofp %436 : vector<4x8xi32> to vector<4x8xf32>
    %cst_265 = arith.constant dense<0.000000e+00> : vector<4x36xf32>
    %438 = tpu.matmul %437, %418, %cst_265 {dimension_numbers = #tpu.dot_dimension_numbers<[1], [0], [0], [1], [0, 0, 1, 1], [], []>} : vector<4x8xf32>, vector<8x36xf32>, vector<4x36xf32> -> vector<4x36xf32>
    %439 = arith.addf %428, %438 : vector<4x36xf32>
    %cst_266 = arith.constant 5.000000e-01 : f32
    %440 = vector.broadcast %cst_266 : f32 to vector<4x36xf32>
    %441 = arith.mulf %440, %439 : vector<4x36xf32>
    %c0_267 = arith.constant 0 : index
    %c0_268 = arith.constant 0 : index
    %c0_269 = arith.constant 0 : index
    %442 = vector.load %arg26[%c0_267, %c0_268, %c0_269] : memref<1x2x36xf32, #tpu.memory_space<vmem>>, vector<1x1x36xf32>
    %443 = vector.shape_cast %442 : vector<1x1x36xf32> to vector<1x36xf32>
    %444 = vector.broadcast %443 : vector<1x36xf32> to vector<4x36xf32>
    %445 = arith.mulf %441, %444 : vector<4x36xf32>
    %c0_270 = arith.constant 0 : index
    %c1_271 = arith.constant 1 : index
    %c0_272 = arith.constant 0 : index
    %446 = vector.load %arg26[%c0_270, %c1_271, %c0_272] : memref<1x2x36xf32, #tpu.memory_space<vmem>>, vector<1x1x36xf32>
    %447 = vector.shape_cast %446 : vector<1x1x36xf32> to vector<1x36xf32>
    %448 = vector.broadcast %447 : vector<1x36xf32> to vector<4x36xf32>
    %449 = arith.addf %445, %448 : vector<4x36xf32>
    %cst_273 = arith.constant 0.000000e+00 : f32
    %450 = vector.broadcast %cst_273 : f32 to vector<4x36xf32>
    %451 = arith.maximumf %449, %450 : vector<4x36xf32>
    %c0_274 = arith.constant 0 : index
    %c0_275 = arith.constant 0 : index
    %c0_276 = arith.constant 0 : index
    %452 = vector.load %arg28[%c0_274, %c0_275, %c0_276] : memref<1x36x128xbf16, #tpu.memory_space<vmem>>, vector<1x36x128xbf16>
    %453 = vector.shape_cast %452 : vector<1x36x128xbf16> to vector<36x128xbf16>
    %454 = arith.truncf %451 : vector<4x36xf32> to vector<4x36xbf16>
    %cst_277 = arith.constant dense<0.000000e+00> : vector<4x128xf32>
    %455 = tpu.matmul %454, %453, %cst_277 {dimension_numbers = #tpu.dot_dimension_numbers<[1], [0], [0], [1], [0, 0, 1, 1], [], []>} : vector<4x36xbf16>, vector<36x128xbf16>, vector<4x128xf32> -> vector<4x128xf32>
    %c0_278 = arith.constant 0 : index
    %c0_279 = arith.constant 0 : index
    %c0_280 = arith.constant 0 : index
    %456 = vector.load %arg27[%c0_278, %c0_279, %c0_280] : memref<1x2x128xf32, #tpu.memory_space<vmem>>, vector<1x1x128xf32>
    %457 = vector.shape_cast %456 : vector<1x1x128xf32> to vector<1x128xf32>
    %458 = vector.broadcast %457 : vector<1x128xf32> to vector<4x128xf32>
    %459 = arith.mulf %455, %458 : vector<4x128xf32>
    %c0_281 = arith.constant 0 : index
    %c1_282 = arith.constant 1 : index
    %c0_283 = arith.constant 0 : index
    %460 = vector.load %arg27[%c0_281, %c1_282, %c0_283] : memref<1x2x128xf32, #tpu.memory_space<vmem>>, vector<1x1x128xf32>
    %461 = vector.shape_cast %460 : vector<1x1x128xf32> to vector<1x128xf32>
    %462 = vector.broadcast %461 : vector<1x128xf32> to vector<4x128xf32>
    %463 = arith.addf %459, %462 : vector<4x128xf32>
    %cst_284 = arith.constant 0.000000e+00 : f32
    %464 = vector.broadcast %cst_284 : f32 to vector<4x128xf32>
    %465 = arith.maximumf %463, %464 : vector<4x128xf32>
    %cst_285 = arith.constant 0.000000e+00 : f32
    %466 = vector.broadcast %cst_285 : f32 to vector<2x128xf32>
    %467 = tpu.concatenate %466, %465, %466 in 0 : vector<2x128xf32>, vector<4x128xf32>, vector<2x128xf32> -> vector<8x128xf32>
    %468 = vector.extract_strided_slice %467 {offsets = [0, 0], sizes = [4, 128], strides = [1, 1]} : vector<8x128xf32> to vector<4x128xf32>
    %c0_286 = arith.constant 0 : index
    %c0_287 = arith.constant 0 : index
    %c0_288 = arith.constant 0 : index
    %c0_289 = arith.constant 0 : index
    %469 = vector.load %arg29[%c0_286, %c0_287, %c0_288, %c0_289] : memref<1x5x128x32xbf16, #tpu.memory_space<vmem>>, vector<1x1x128x32xbf16>
    %470 = vector.shape_cast %469 : vector<1x1x128x32xbf16> to vector<128x32xbf16>
    %471 = arith.truncf %468 : vector<4x128xf32> to vector<4x128xbf16>
    %cst_290 = arith.constant dense<0.000000e+00> : vector<4x32xf32>
    %472 = tpu.matmul %471, %470, %cst_290 {dimension_numbers = #tpu.dot_dimension_numbers<[1], [0], [0], [1], [0, 0, 1, 1], [], []>} : vector<4x128xbf16>, vector<128x32xbf16>, vector<4x32xf32> -> vector<4x32xf32>
    %473 = vector.extract_strided_slice %467 {offsets = [1, 0], sizes = [4, 128], strides = [1, 1]} : vector<8x128xf32> to vector<4x128xf32>
    %c0_291 = arith.constant 0 : index
    %c1_292 = arith.constant 1 : index
    %c0_293 = arith.constant 0 : index
    %c0_294 = arith.constant 0 : index
    %474 = vector.load %arg29[%c0_291, %c1_292, %c0_293, %c0_294] : memref<1x5x128x32xbf16, #tpu.memory_space<vmem>>, vector<1x1x128x32xbf16>
    %475 = vector.shape_cast %474 : vector<1x1x128x32xbf16> to vector<128x32xbf16>
    %476 = arith.truncf %473 : vector<4x128xf32> to vector<4x128xbf16>
    %cst_295 = arith.constant dense<0.000000e+00> : vector<4x32xf32>
    %477 = tpu.matmul %476, %475, %cst_295 {dimension_numbers = #tpu.dot_dimension_numbers<[1], [0], [0], [1], [0, 0, 1, 1], [], []>} : vector<4x128xbf16>, vector<128x32xbf16>, vector<4x32xf32> -> vector<4x32xf32>
    %478 = arith.addf %472, %477 : vector<4x32xf32>
    %479 = vector.extract_strided_slice %467 {offsets = [2, 0], sizes = [4, 128], strides = [1, 1]} : vector<8x128xf32> to vector<4x128xf32>
    %c0_296 = arith.constant 0 : index
    %c2_297 = arith.constant 2 : index
    %c0_298 = arith.constant 0 : index
    %c0_299 = arith.constant 0 : index
    %480 = vector.load %arg29[%c0_296, %c2_297, %c0_298, %c0_299] : memref<1x5x128x32xbf16, #tpu.memory_space<vmem>>, vector<1x1x128x32xbf16>
    %481 = vector.shape_cast %480 : vector<1x1x128x32xbf16> to vector<128x32xbf16>
    %482 = arith.truncf %479 : vector<4x128xf32> to vector<4x128xbf16>
    %cst_300 = arith.constant dense<0.000000e+00> : vector<4x32xf32>
    %483 = tpu.matmul %482, %481, %cst_300 {dimension_numbers = #tpu.dot_dimension_numbers<[1], [0], [0], [1], [0, 0, 1, 1], [], []>} : vector<4x128xbf16>, vector<128x32xbf16>, vector<4x32xf32> -> vector<4x32xf32>
    %484 = arith.addf %478, %483 : vector<4x32xf32>
    %485 = vector.extract_strided_slice %467 {offsets = [3, 0], sizes = [4, 128], strides = [1, 1]} : vector<8x128xf32> to vector<4x128xf32>
    %c0_301 = arith.constant 0 : index
    %c3_302 = arith.constant 3 : index
    %c0_303 = arith.constant 0 : index
    %c0_304 = arith.constant 0 : index
    %486 = vector.load %arg29[%c0_301, %c3_302, %c0_303, %c0_304] : memref<1x5x128x32xbf16, #tpu.memory_space<vmem>>, vector<1x1x128x32xbf16>
    %487 = vector.shape_cast %486 : vector<1x1x128x32xbf16> to vector<128x32xbf16>
    %488 = arith.truncf %485 : vector<4x128xf32> to vector<4x128xbf16>
    %cst_305 = arith.constant dense<0.000000e+00> : vector<4x32xf32>
    %489 = tpu.matmul %488, %487, %cst_305 {dimension_numbers = #tpu.dot_dimension_numbers<[1], [0], [0], [1], [0, 0, 1, 1], [], []>} : vector<4x128xbf16>, vector<128x32xbf16>, vector<4x32xf32> -> vector<4x32xf32>
    %490 = arith.addf %484, %489 : vector<4x32xf32>
    %491 = vector.extract_strided_slice %467 {offsets = [4, 0], sizes = [4, 128], strides = [1, 1]} : vector<8x128xf32> to vector<4x128xf32>
    %c0_306 = arith.constant 0 : index
    %c4_307 = arith.constant 4 : index
    %c0_308 = arith.constant 0 : index
    %c0_309 = arith.constant 0 : index
    %492 = vector.load %arg29[%c0_306, %c4_307, %c0_308, %c0_309] : memref<1x5x128x32xbf16, #tpu.memory_space<vmem>>, vector<1x1x128x32xbf16>
    %493 = vector.shape_cast %492 : vector<1x1x128x32xbf16> to vector<128x32xbf16>
    %494 = arith.truncf %491 : vector<4x128xf32> to vector<4x128xbf16>
    %cst_310 = arith.constant dense<0.000000e+00> : vector<4x32xf32>
    %495 = tpu.matmul %494, %493, %cst_310 {dimension_numbers = #tpu.dot_dimension_numbers<[1], [0], [0], [1], [0, 0, 1, 1], [], []>} : vector<4x128xbf16>, vector<128x32xbf16>, vector<4x32xf32> -> vector<4x32xf32>
    %496 = arith.addf %490, %495 : vector<4x32xf32>
    %cst_311 = arith.constant dense<0.000000e+00> : vector<32xf32>
    %497 = vector.multi_reduction <add>, %496, %cst_311 [0] : vector<4x32xf32> to vector<32xf32>
    %498 = vector.shape_cast %497 : vector<32xf32> to vector<1x32xf32>
    %cst_312 = arith.constant 4.000000e+00 : f32
    %499 = vector.broadcast %cst_312 : f32 to vector<1x32xf32>
    %500 = arith.divf %498, %499 : vector<1x32xf32>
    %c0_313 = arith.constant 0 : index
    %c0_314 = arith.constant 0 : index
    %c0_315 = arith.constant 0 : index
    %501 = vector.load %arg30[%c0_313, %c0_314, %c0_315] : memref<1x32x2xbf16, #tpu.memory_space<vmem>>, vector<1x32x2xbf16>
    %502 = vector.shape_cast %501 : vector<1x32x2xbf16> to vector<32x2xbf16>
    %503 = arith.truncf %500 : vector<1x32xf32> to vector<1x32xbf16>
    %cst_316 = arith.constant dense<0.000000e+00> : vector<1x2xf32>
    %504 = tpu.matmul %503, %502, %cst_316 {dimension_numbers = #tpu.dot_dimension_numbers<[1], [0], [0], [1], [0, 0, 1, 1], [], []>} : vector<1x32xbf16>, vector<32x2xbf16>, vector<1x2xf32> -> vector<1x2xf32>
    %cst_317 = arith.constant 0.000000e+00 : f32
    %505 = vector.broadcast %cst_317 : f32 to vector<1x2xf32>
    %506 = arith.maximumf %504, %505 : vector<1x2xf32>
    %c0_318 = arith.constant 0 : index
    %c0_319 = arith.constant 0 : index
    %c0_320 = arith.constant 0 : index
    %507 = vector.load %arg31[%c0_318, %c0_319, %c0_320] : memref<1x2x32xbf16, #tpu.memory_space<vmem>>, vector<1x2x32xbf16>
    %508 = vector.shape_cast %507 : vector<1x2x32xbf16> to vector<2x32xbf16>
    %509 = arith.truncf %506 : vector<1x2xf32> to vector<1x2xbf16>
    %cst_321 = arith.constant dense<0.000000e+00> : vector<1x32xf32>
    %510 = tpu.matmul %509, %508, %cst_321 {dimension_numbers = #tpu.dot_dimension_numbers<[1], [0], [0], [1], [0, 0, 1, 1], [], []>} : vector<1x2xbf16>, vector<2x32xbf16>, vector<1x32xf32> -> vector<1x32xf32>
    %cst_322 = arith.constant 0.000000e+00 : f32
    %511 = vector.broadcast %cst_322 : f32 to vector<1x32xf32>
    %512 = arith.subf %511, %510 : vector<1x32xf32>
    %513 = math.exp %512 : vector<1x32xf32>
    %cst_323 = arith.constant 1.000000e+00 : f32
    %514 = vector.broadcast %cst_323 : f32 to vector<1x32xf32>
    %515 = arith.addf %514, %513 : vector<1x32xf32>
    %cst_324 = arith.constant 1.000000e+00 : f32
    %516 = vector.broadcast %cst_324 : f32 to vector<1x32xf32>
    %517 = arith.divf %516, %515 : vector<1x32xf32>
    %518 = vector.broadcast %517 : vector<1x32xf32> to vector<4x32xf32>
    %519 = arith.mulf %496, %518 : vector<4x32xf32>
    %520 = tpu.concatenate %441, %519 in 1 : vector<4x36xf32>, vector<4x32xf32> -> vector<4x68xf32>
    %c0_325 = arith.constant 0 : index
    %c0_326 = arith.constant 0 : index
    %c0_327 = arith.constant 0 : index
    %521 = vector.load %arg35[%c0_325, %c0_326, %c0_327] : memref<1x2x68xf32, #tpu.memory_space<vmem>>, vector<1x1x68xf32>
    %522 = vector.shape_cast %521 : vector<1x1x68xf32> to vector<1x68xf32>
    %523 = vector.broadcast %522 : vector<1x68xf32> to vector<4x68xf32>
    %524 = arith.mulf %520, %523 : vector<4x68xf32>
    %c0_328 = arith.constant 0 : index
    %c1_329 = arith.constant 1 : index
    %c0_330 = arith.constant 0 : index
    %525 = vector.load %arg35[%c0_328, %c1_329, %c0_330] : memref<1x2x68xf32, #tpu.memory_space<vmem>>, vector<1x1x68xf32>
    %526 = vector.shape_cast %525 : vector<1x1x68xf32> to vector<1x68xf32>
    %527 = vector.broadcast %526 : vector<1x68xf32> to vector<4x68xf32>
    %528 = arith.addf %524, %527 : vector<4x68xf32>
    %cst_331 = arith.constant 0.000000e+00 : f32
    %529 = vector.broadcast %cst_331 : f32 to vector<4x68xf32>
    %530 = arith.maximumf %528, %529 : vector<4x68xf32>
    %cst_332 = arith.constant dense<0.000000e+00> : vector<68xf32>
    %531 = vector.multi_reduction <add>, %530, %cst_332 [0] : vector<4x68xf32> to vector<68xf32>
    %532 = vector.shape_cast %531 : vector<68xf32> to vector<1x68xf32>
    %cst_333 = arith.constant 4.000000e+00 : f32
    %533 = vector.broadcast %cst_333 : f32 to vector<1x68xf32>
    %534 = arith.divf %532, %533 : vector<1x68xf32>
    %c1_334 = arith.constant 1 : index
    %c0_335 = arith.constant 0 : index
    %c0_336 = arith.constant 0 : index
    %535 = vector.load %arg1[%c1_334, %c0_335, %c0_336] : memref<2x128x7xf32, #tpu.memory_space<vmem>>, vector<1x128x7xf32>
    %536 = vector.shape_cast %535 : vector<1x128x7xf32> to vector<128x7xf32>
    %c0_337 = arith.constant 0 : index
    %c0_338 = arith.constant 0 : index
    %c0_339 = arith.constant 0 : index
    %537 = vector.load %arg32[%c0_337, %c0_338, %c0_339] : memref<1x7x64xbf16, #tpu.memory_space<vmem>>, vector<1x7x64xbf16>
    %538 = vector.shape_cast %537 : vector<1x7x64xbf16> to vector<7x64xbf16>
    %539 = arith.truncf %536 : vector<128x7xf32> to vector<128x7xbf16>
    %cst_340 = arith.constant dense<0.000000e+00> : vector<128x64xf32>
    %540 = tpu.matmul %539, %538, %cst_340 {dimension_numbers = #tpu.dot_dimension_numbers<[1], [0], [0], [1], [0, 0, 1, 1], [], []>} : vector<128x7xbf16>, vector<7x64xbf16>, vector<128x64xf32> -> vector<128x64xf32>
    %541 = tpu.iota {dimensions = array<i32: 0>} : vector<63x128xi32>
    %542 = tpu.iota {dimensions = array<i32: 1>} : vector<63x128xi32>
    %c2_i32_341 = arith.constant 2 : i32
    %543 = vector.broadcast %c2_i32_341 : i32 to vector<63x128xi32>
    %544 = arith.muli %543, %541 : vector<63x128xi32>
    %c0_i32_342 = arith.constant 0 : i32
    %545 = vector.broadcast %c0_i32_342 : i32 to vector<63x128xi32>
    %546 = arith.addi %544, %545 : vector<63x128xi32>
    %547 = arith.cmpi eq, %542, %546 : vector<63x128xi32>
    %548 = arith.extui %547 : vector<63x128xi1> to vector<63x128xi32>
    %549 = arith.sitofp %548 : vector<63x128xi32> to vector<63x128xf32>
    %cst_343 = arith.constant dense<0.000000e+00> : vector<63x64xf32>
    %550 = tpu.matmul %549, %540, %cst_343 {dimension_numbers = #tpu.dot_dimension_numbers<[1], [0], [0], [1], [0, 0, 1, 1], [], []>} : vector<63x128xf32>, vector<128x64xf32>, vector<63x64xf32> -> vector<63x64xf32>
    %c0_344 = arith.constant 0 : index
    %c0_345 = arith.constant 0 : index
    %c0_346 = arith.constant 0 : index
    %c0_347 = arith.constant 0 : index
    %551 = vector.load %arg33[%c0_344, %c0_345, %c0_346, %c0_347] : memref<1x3x64x64xbf16, #tpu.memory_space<vmem>>, vector<1x1x64x64xbf16>
    %552 = vector.shape_cast %551 : vector<1x1x64x64xbf16> to vector<64x64xbf16>
    %553 = arith.truncf %550 : vector<63x64xf32> to vector<63x64xbf16>
    %cst_348 = arith.constant dense<0.000000e+00> : vector<63x64xf32>
    %554 = tpu.matmul %553, %552, %cst_348 {dimension_numbers = #tpu.dot_dimension_numbers<[1], [0], [0], [1], [0, 0, 1, 1], [], []>} : vector<63x64xbf16>, vector<64x64xbf16>, vector<63x64xf32> -> vector<63x64xf32>
    %555 = tpu.iota {dimensions = array<i32: 0>} : vector<63x128xi32>
    %556 = tpu.iota {dimensions = array<i32: 1>} : vector<63x128xi32>
    %c2_i32_349 = arith.constant 2 : i32
    %557 = vector.broadcast %c2_i32_349 : i32 to vector<63x128xi32>
    %558 = arith.muli %557, %555 : vector<63x128xi32>
    %c1_i32_350 = arith.constant 1 : i32
    %559 = vector.broadcast %c1_i32_350 : i32 to vector<63x128xi32>
    %560 = arith.addi %558, %559 : vector<63x128xi32>
    %561 = arith.cmpi eq, %556, %560 : vector<63x128xi32>
    %562 = arith.extui %561 : vector<63x128xi1> to vector<63x128xi32>
    %563 = arith.sitofp %562 : vector<63x128xi32> to vector<63x128xf32>
    %cst_351 = arith.constant dense<0.000000e+00> : vector<63x64xf32>
    %564 = tpu.matmul %563, %540, %cst_351 {dimension_numbers = #tpu.dot_dimension_numbers<[1], [0], [0], [1], [0, 0, 1, 1], [], []>} : vector<63x128xf32>, vector<128x64xf32>, vector<63x64xf32> -> vector<63x64xf32>
    %c0_352 = arith.constant 0 : index
    %c1_353 = arith.constant 1 : index
    %c0_354 = arith.constant 0 : index
    %c0_355 = arith.constant 0 : index
    %565 = vector.load %arg33[%c0_352, %c1_353, %c0_354, %c0_355] : memref<1x3x64x64xbf16, #tpu.memory_space<vmem>>, vector<1x1x64x64xbf16>
    %566 = vector.shape_cast %565 : vector<1x1x64x64xbf16> to vector<64x64xbf16>
    %567 = arith.truncf %564 : vector<63x64xf32> to vector<63x64xbf16>
    %cst_356 = arith.constant dense<0.000000e+00> : vector<63x64xf32>
    %568 = tpu.matmul %567, %566, %cst_356 {dimension_numbers = #tpu.dot_dimension_numbers<[1], [0], [0], [1], [0, 0, 1, 1], [], []>} : vector<63x64xbf16>, vector<64x64xbf16>, vector<63x64xf32> -> vector<63x64xf32>
    %569 = arith.addf %554, %568 : vector<63x64xf32>
    %570 = tpu.iota {dimensions = array<i32: 0>} : vector<63x128xi32>
    %571 = tpu.iota {dimensions = array<i32: 1>} : vector<63x128xi32>
    %c2_i32_357 = arith.constant 2 : i32
    %572 = vector.broadcast %c2_i32_357 : i32 to vector<63x128xi32>
    %573 = arith.muli %572, %570 : vector<63x128xi32>
    %c2_i32_358 = arith.constant 2 : i32
    %574 = vector.broadcast %c2_i32_358 : i32 to vector<63x128xi32>
    %575 = arith.addi %573, %574 : vector<63x128xi32>
    %576 = arith.cmpi eq, %571, %575 : vector<63x128xi32>
    %577 = arith.extui %576 : vector<63x128xi1> to vector<63x128xi32>
    %578 = arith.sitofp %577 : vector<63x128xi32> to vector<63x128xf32>
    %cst_359 = arith.constant dense<0.000000e+00> : vector<63x64xf32>
    %579 = tpu.matmul %578, %540, %cst_359 {dimension_numbers = #tpu.dot_dimension_numbers<[1], [0], [0], [1], [0, 0, 1, 1], [], []>} : vector<63x128xf32>, vector<128x64xf32>, vector<63x64xf32> -> vector<63x64xf32>
    %c0_360 = arith.constant 0 : index
    %c2_361 = arith.constant 2 : index
    %c0_362 = arith.constant 0 : index
    %c0_363 = arith.constant 0 : index
    %580 = vector.load %arg33[%c0_360, %c2_361, %c0_362, %c0_363] : memref<1x3x64x64xbf16, #tpu.memory_space<vmem>>, vector<1x1x64x64xbf16>
    %581 = vector.shape_cast %580 : vector<1x1x64x64xbf16> to vector<64x64xbf16>
    %582 = arith.truncf %579 : vector<63x64xf32> to vector<63x64xbf16>
    %cst_364 = arith.constant dense<0.000000e+00> : vector<63x64xf32>
    %583 = tpu.matmul %582, %581, %cst_364 {dimension_numbers = #tpu.dot_dimension_numbers<[1], [0], [0], [1], [0, 0, 1, 1], [], []>} : vector<63x64xbf16>, vector<64x64xbf16>, vector<63x64xf32> -> vector<63x64xf32>
    %584 = arith.addf %569, %583 : vector<63x64xf32>
    %c0_365 = arith.constant 0 : index
    %c0_366 = arith.constant 0 : index
    %c0_367 = arith.constant 0 : index
    %585 = vector.load %arg34[%c0_365, %c0_366, %c0_367] : memref<1x2x64xf32, #tpu.memory_space<vmem>>, vector<1x1x64xf32>
    %586 = vector.shape_cast %585 : vector<1x1x64xf32> to vector<1x64xf32>
    %587 = vector.broadcast %586 : vector<1x64xf32> to vector<63x64xf32>
    %588 = arith.mulf %584, %587 : vector<63x64xf32>
    %c0_368 = arith.constant 0 : index
    %c1_369 = arith.constant 1 : index
    %c0_370 = arith.constant 0 : index
    %589 = vector.load %arg34[%c0_368, %c1_369, %c0_370] : memref<1x2x64xf32, #tpu.memory_space<vmem>>, vector<1x1x64xf32>
    %590 = vector.shape_cast %589 : vector<1x1x64xf32> to vector<1x64xf32>
    %591 = vector.broadcast %590 : vector<1x64xf32> to vector<63x64xf32>
    %592 = arith.addf %588, %591 : vector<63x64xf32>
    %cst_371 = arith.constant 0.000000e+00 : f32
    %593 = vector.broadcast %cst_371 : f32 to vector<63x64xf32>
    %594 = arith.maximumf %592, %593 : vector<63x64xf32>
    %cst_372 = arith.constant 0.000000e+00 : f32
    %595 = vector.broadcast %cst_372 : f32 to vector<1x64xf32>
    %596 = tpu.concatenate %595, %594, %595 in 0 : vector<1x64xf32>, vector<63x64xf32>, vector<1x64xf32> -> vector<65x64xf32>
    %597 = tpu.iota {dimensions = array<i32: 0>} : vector<32x65xi32>
    %598 = tpu.iota {dimensions = array<i32: 1>} : vector<32x65xi32>
    %c2_i32_373 = arith.constant 2 : i32
    %599 = vector.broadcast %c2_i32_373 : i32 to vector<32x65xi32>
    %600 = arith.muli %599, %597 : vector<32x65xi32>
    %c0_i32_374 = arith.constant 0 : i32
    %601 = vector.broadcast %c0_i32_374 : i32 to vector<32x65xi32>
    %602 = arith.addi %600, %601 : vector<32x65xi32>
    %603 = arith.cmpi eq, %598, %602 : vector<32x65xi32>
    %604 = arith.extui %603 : vector<32x65xi1> to vector<32x65xi32>
    %605 = arith.sitofp %604 : vector<32x65xi32> to vector<32x65xf32>
    %cst_375 = arith.constant dense<0.000000e+00> : vector<32x64xf32>
    %606 = tpu.matmul %605, %596, %cst_375 {dimension_numbers = #tpu.dot_dimension_numbers<[1], [0], [0], [1], [0, 0, 1, 1], [], []>} : vector<32x65xf32>, vector<65x64xf32>, vector<32x64xf32> -> vector<32x64xf32>
    %607 = tpu.iota {dimensions = array<i32: 0>} : vector<32x65xi32>
    %608 = tpu.iota {dimensions = array<i32: 1>} : vector<32x65xi32>
    %c2_i32_376 = arith.constant 2 : i32
    %609 = vector.broadcast %c2_i32_376 : i32 to vector<32x65xi32>
    %610 = arith.muli %609, %607 : vector<32x65xi32>
    %c1_i32_377 = arith.constant 1 : i32
    %611 = vector.broadcast %c1_i32_377 : i32 to vector<32x65xi32>
    %612 = arith.addi %610, %611 : vector<32x65xi32>
    %613 = arith.cmpi eq, %608, %612 : vector<32x65xi32>
    %614 = arith.extui %613 : vector<32x65xi1> to vector<32x65xi32>
    %615 = arith.sitofp %614 : vector<32x65xi32> to vector<32x65xf32>
    %cst_378 = arith.constant dense<0.000000e+00> : vector<32x64xf32>
    %616 = tpu.matmul %615, %596, %cst_378 {dimension_numbers = #tpu.dot_dimension_numbers<[1], [0], [0], [1], [0, 0, 1, 1], [], []>} : vector<32x65xf32>, vector<65x64xf32>, vector<32x64xf32> -> vector<32x64xf32>
    %617 = arith.maximumf %606, %616 : vector<32x64xf32>
    %618 = tpu.iota {dimensions = array<i32: 0>} : vector<32x65xi32>
    %619 = tpu.iota {dimensions = array<i32: 1>} : vector<32x65xi32>
    %c2_i32_379 = arith.constant 2 : i32
    %620 = vector.broadcast %c2_i32_379 : i32 to vector<32x65xi32>
    %621 = arith.muli %620, %618 : vector<32x65xi32>
    %c2_i32_380 = arith.constant 2 : i32
    %622 = vector.broadcast %c2_i32_380 : i32 to vector<32x65xi32>
    %623 = arith.addi %621, %622 : vector<32x65xi32>
    %624 = arith.cmpi eq, %619, %623 : vector<32x65xi32>
    %625 = arith.extui %624 : vector<32x65xi1> to vector<32x65xi32>
    %626 = arith.sitofp %625 : vector<32x65xi32> to vector<32x65xf32>
    %cst_381 = arith.constant dense<0.000000e+00> : vector<32x64xf32>
    %627 = tpu.matmul %626, %596, %cst_381 {dimension_numbers = #tpu.dot_dimension_numbers<[1], [0], [0], [1], [0, 0, 1, 1], [], []>} : vector<32x65xf32>, vector<65x64xf32>, vector<32x64xf32> -> vector<32x64xf32>
    %628 = arith.maximumf %617, %627 : vector<32x64xf32>
    %c0_382 = arith.constant 0 : index
    %c0_383 = arith.constant 0 : index
    %c0_384 = arith.constant 0 : index
    %629 = vector.load %arg2[%c0_382, %c0_383, %c0_384] : memref<1x2x64xf32, #tpu.memory_space<vmem>>, vector<1x1x64xf32>
    %630 = vector.shape_cast %629 : vector<1x1x64xf32> to vector<1x64xf32>
    %631 = vector.broadcast %630 : vector<1x64xf32> to vector<32x64xf32>
    %632 = arith.mulf %628, %631 : vector<32x64xf32>
    %c0_385 = arith.constant 0 : index
    %c1_386 = arith.constant 1 : index
    %c0_387 = arith.constant 0 : index
    %633 = vector.load %arg2[%c0_385, %c1_386, %c0_387] : memref<1x2x64xf32, #tpu.memory_space<vmem>>, vector<1x1x64xf32>
    %634 = vector.shape_cast %633 : vector<1x1x64xf32> to vector<1x64xf32>
    %635 = vector.broadcast %634 : vector<1x64xf32> to vector<32x64xf32>
    %636 = arith.addf %632, %635 : vector<32x64xf32>
    %cst_388 = arith.constant 0.000000e+00 : f32
    %637 = vector.broadcast %cst_388 : f32 to vector<32x64xf32>
    %638 = arith.maximumf %636, %637 : vector<32x64xf32>
    %c0_389 = arith.constant 0 : index
    %c0_390 = arith.constant 0 : index
    %c0_391 = arith.constant 0 : index
    %639 = vector.load %arg4[%c0_389, %c0_390, %c0_391] : memref<1x64x128xbf16, #tpu.memory_space<vmem>>, vector<1x64x128xbf16>
    %640 = vector.shape_cast %639 : vector<1x64x128xbf16> to vector<64x128xbf16>
    %641 = arith.truncf %638 : vector<32x64xf32> to vector<32x64xbf16>
    %cst_392 = arith.constant dense<0.000000e+00> : vector<32x128xf32>
    %642 = tpu.matmul %641, %640, %cst_392 {dimension_numbers = #tpu.dot_dimension_numbers<[1], [0], [0], [1], [0, 0, 1, 1], [], []>} : vector<32x64xbf16>, vector<64x128xbf16>, vector<32x128xf32> -> vector<32x128xf32>
    %c0_393 = arith.constant 0 : index
    %c0_394 = arith.constant 0 : index
    %c0_395 = arith.constant 0 : index
    %643 = vector.load %arg3[%c0_393, %c0_394, %c0_395] : memref<1x2x128xf32, #tpu.memory_space<vmem>>, vector<1x1x128xf32>
    %644 = vector.shape_cast %643 : vector<1x1x128xf32> to vector<1x128xf32>
    %645 = vector.broadcast %644 : vector<1x128xf32> to vector<32x128xf32>
    %646 = arith.mulf %642, %645 : vector<32x128xf32>
    %c0_396 = arith.constant 0 : index
    %c1_397 = arith.constant 1 : index
    %c0_398 = arith.constant 0 : index
    %647 = vector.load %arg3[%c0_396, %c1_397, %c0_398] : memref<1x2x128xf32, #tpu.memory_space<vmem>>, vector<1x1x128xf32>
    %648 = vector.shape_cast %647 : vector<1x1x128xf32> to vector<1x128xf32>
    %649 = vector.broadcast %648 : vector<1x128xf32> to vector<32x128xf32>
    %650 = arith.addf %646, %649 : vector<32x128xf32>
    %cst_399 = arith.constant 0.000000e+00 : f32
    %651 = vector.broadcast %cst_399 : f32 to vector<32x128xf32>
    %652 = arith.maximumf %650, %651 : vector<32x128xf32>
    %cst_400 = arith.constant 0.000000e+00 : f32
    %653 = vector.broadcast %cst_400 : f32 to vector<2x128xf32>
    %654 = tpu.concatenate %653, %652, %653 in 0 : vector<2x128xf32>, vector<32x128xf32>, vector<2x128xf32> -> vector<36x128xf32>
    %655 = vector.extract_strided_slice %654 {offsets = [0, 0], sizes = [32, 128], strides = [1, 1]} : vector<36x128xf32> to vector<32x128xf32>
    %c0_401 = arith.constant 0 : index
    %c0_402 = arith.constant 0 : index
    %c0_403 = arith.constant 0 : index
    %c0_404 = arith.constant 0 : index
    %656 = vector.load %arg5[%c0_401, %c0_402, %c0_403, %c0_404] : memref<1x5x128x32xbf16, #tpu.memory_space<vmem>>, vector<1x1x128x32xbf16>
    %657 = vector.shape_cast %656 : vector<1x1x128x32xbf16> to vector<128x32xbf16>
    %658 = arith.truncf %655 : vector<32x128xf32> to vector<32x128xbf16>
    %cst_405 = arith.constant dense<0.000000e+00> : vector<32x32xf32>
    %659 = tpu.matmul %658, %657, %cst_405 {dimension_numbers = #tpu.dot_dimension_numbers<[1], [0], [0], [1], [0, 0, 1, 1], [], []>} : vector<32x128xbf16>, vector<128x32xbf16>, vector<32x32xf32> -> vector<32x32xf32>
    %660 = vector.extract_strided_slice %654 {offsets = [1, 0], sizes = [32, 128], strides = [1, 1]} : vector<36x128xf32> to vector<32x128xf32>
    %c0_406 = arith.constant 0 : index
    %c1_407 = arith.constant 1 : index
    %c0_408 = arith.constant 0 : index
    %c0_409 = arith.constant 0 : index
    %661 = vector.load %arg5[%c0_406, %c1_407, %c0_408, %c0_409] : memref<1x5x128x32xbf16, #tpu.memory_space<vmem>>, vector<1x1x128x32xbf16>
    %662 = vector.shape_cast %661 : vector<1x1x128x32xbf16> to vector<128x32xbf16>
    %663 = arith.truncf %660 : vector<32x128xf32> to vector<32x128xbf16>
    %cst_410 = arith.constant dense<0.000000e+00> : vector<32x32xf32>
    %664 = tpu.matmul %663, %662, %cst_410 {dimension_numbers = #tpu.dot_dimension_numbers<[1], [0], [0], [1], [0, 0, 1, 1], [], []>} : vector<32x128xbf16>, vector<128x32xbf16>, vector<32x32xf32> -> vector<32x32xf32>
    %665 = arith.addf %659, %664 : vector<32x32xf32>
    %666 = vector.extract_strided_slice %654 {offsets = [2, 0], sizes = [32, 128], strides = [1, 1]} : vector<36x128xf32> to vector<32x128xf32>
    %c0_411 = arith.constant 0 : index
    %c2_412 = arith.constant 2 : index
    %c0_413 = arith.constant 0 : index
    %c0_414 = arith.constant 0 : index
    %667 = vector.load %arg5[%c0_411, %c2_412, %c0_413, %c0_414] : memref<1x5x128x32xbf16, #tpu.memory_space<vmem>>, vector<1x1x128x32xbf16>
    %668 = vector.shape_cast %667 : vector<1x1x128x32xbf16> to vector<128x32xbf16>
    %669 = arith.truncf %666 : vector<32x128xf32> to vector<32x128xbf16>
    %cst_415 = arith.constant dense<0.000000e+00> : vector<32x32xf32>
    %670 = tpu.matmul %669, %668, %cst_415 {dimension_numbers = #tpu.dot_dimension_numbers<[1], [0], [0], [1], [0, 0, 1, 1], [], []>} : vector<32x128xbf16>, vector<128x32xbf16>, vector<32x32xf32> -> vector<32x32xf32>
    %671 = arith.addf %665, %670 : vector<32x32xf32>
    %672 = vector.extract_strided_slice %654 {offsets = [3, 0], sizes = [32, 128], strides = [1, 1]} : vector<36x128xf32> to vector<32x128xf32>
    %c0_416 = arith.constant 0 : index
    %c3_417 = arith.constant 3 : index
    %c0_418 = arith.constant 0 : index
    %c0_419 = arith.constant 0 : index
    %673 = vector.load %arg5[%c0_416, %c3_417, %c0_418, %c0_419] : memref<1x5x128x32xbf16, #tpu.memory_space<vmem>>, vector<1x1x128x32xbf16>
    %674 = vector.shape_cast %673 : vector<1x1x128x32xbf16> to vector<128x32xbf16>
    %675 = arith.truncf %672 : vector<32x128xf32> to vector<32x128xbf16>
    %cst_420 = arith.constant dense<0.000000e+00> : vector<32x32xf32>
    %676 = tpu.matmul %675, %674, %cst_420 {dimension_numbers = #tpu.dot_dimension_numbers<[1], [0], [0], [1], [0, 0, 1, 1], [], []>} : vector<32x128xbf16>, vector<128x32xbf16>, vector<32x32xf32> -> vector<32x32xf32>
    %677 = arith.addf %671, %676 : vector<32x32xf32>
    %678 = vector.extract_strided_slice %654 {offsets = [4, 0], sizes = [32, 128], strides = [1, 1]} : vector<36x128xf32> to vector<32x128xf32>
    %c0_421 = arith.constant 0 : index
    %c4_422 = arith.constant 4 : index
    %c0_423 = arith.constant 0 : index
    %c0_424 = arith.constant 0 : index
    %679 = vector.load %arg5[%c0_421, %c4_422, %c0_423, %c0_424] : memref<1x5x128x32xbf16, #tpu.memory_space<vmem>>, vector<1x1x128x32xbf16>
    %680 = vector.shape_cast %679 : vector<1x1x128x32xbf16> to vector<128x32xbf16>
    %681 = arith.truncf %678 : vector<32x128xf32> to vector<32x128xbf16>
    %cst_425 = arith.constant dense<0.000000e+00> : vector<32x32xf32>
    %682 = tpu.matmul %681, %680, %cst_425 {dimension_numbers = #tpu.dot_dimension_numbers<[1], [0], [0], [1], [0, 0, 1, 1], [], []>} : vector<32x128xbf16>, vector<128x32xbf16>, vector<32x32xf32> -> vector<32x32xf32>
    %683 = arith.addf %677, %682 : vector<32x32xf32>
    %cst_426 = arith.constant dense<0.000000e+00> : vector<32xf32>
    %684 = vector.multi_reduction <add>, %683, %cst_426 [0] : vector<32x32xf32> to vector<32xf32>
    %685 = vector.shape_cast %684 : vector<32xf32> to vector<1x32xf32>
    %cst_427 = arith.constant 3.200000e+01 : f32
    %686 = vector.broadcast %cst_427 : f32 to vector<1x32xf32>
    %687 = arith.divf %685, %686 : vector<1x32xf32>
    %c0_428 = arith.constant 0 : index
    %c0_429 = arith.constant 0 : index
    %c0_430 = arith.constant 0 : index
    %688 = vector.load %arg6[%c0_428, %c0_429, %c0_430] : memref<1x32x2xbf16, #tpu.memory_space<vmem>>, vector<1x32x2xbf16>
    %689 = vector.shape_cast %688 : vector<1x32x2xbf16> to vector<32x2xbf16>
    %690 = arith.truncf %687 : vector<1x32xf32> to vector<1x32xbf16>
    %cst_431 = arith.constant dense<0.000000e+00> : vector<1x2xf32>
    %691 = tpu.matmul %690, %689, %cst_431 {dimension_numbers = #tpu.dot_dimension_numbers<[1], [0], [0], [1], [0, 0, 1, 1], [], []>} : vector<1x32xbf16>, vector<32x2xbf16>, vector<1x2xf32> -> vector<1x2xf32>
    %cst_432 = arith.constant 0.000000e+00 : f32
    %692 = vector.broadcast %cst_432 : f32 to vector<1x2xf32>
    %693 = arith.maximumf %691, %692 : vector<1x2xf32>
    %c0_433 = arith.constant 0 : index
    %c0_434 = arith.constant 0 : index
    %c0_435 = arith.constant 0 : index
    %694 = vector.load %arg7[%c0_433, %c0_434, %c0_435] : memref<1x2x32xbf16, #tpu.memory_space<vmem>>, vector<1x2x32xbf16>
    %695 = vector.shape_cast %694 : vector<1x2x32xbf16> to vector<2x32xbf16>
    %696 = arith.truncf %693 : vector<1x2xf32> to vector<1x2xbf16>
    %cst_436 = arith.constant dense<0.000000e+00> : vector<1x32xf32>
    %697 = tpu.matmul %696, %695, %cst_436 {dimension_numbers = #tpu.dot_dimension_numbers<[1], [0], [0], [1], [0, 0, 1, 1], [], []>} : vector<1x2xbf16>, vector<2x32xbf16>, vector<1x32xf32> -> vector<1x32xf32>
    %cst_437 = arith.constant 0.000000e+00 : f32
    %698 = vector.broadcast %cst_437 : f32 to vector<1x32xf32>
    %699 = arith.subf %698, %697 : vector<1x32xf32>
    %700 = math.exp %699 : vector<1x32xf32>
    %cst_438 = arith.constant 1.000000e+00 : f32
    %701 = vector.broadcast %cst_438 : f32 to vector<1x32xf32>
    %702 = arith.addf %701, %700 : vector<1x32xf32>
    %cst_439 = arith.constant 1.000000e+00 : f32
    %703 = vector.broadcast %cst_439 : f32 to vector<1x32xf32>
    %704 = arith.divf %703, %702 : vector<1x32xf32>
    %705 = vector.broadcast %704 : vector<1x32xf32> to vector<32x32xf32>
    %706 = arith.mulf %683, %705 : vector<32x32xf32>
    %707 = tpu.concatenate %628, %706 in 1 : vector<32x64xf32>, vector<32x32xf32> -> vector<32x96xf32>
    %c0_440 = arith.constant 0 : index
    %c0_441 = arith.constant 0 : index
    %c0_442 = arith.constant 0 : index
    %708 = vector.load %arg8[%c0_440, %c0_441, %c0_442] : memref<1x2x96xf32, #tpu.memory_space<vmem>>, vector<1x1x96xf32>
    %709 = vector.shape_cast %708 : vector<1x1x96xf32> to vector<1x96xf32>
    %710 = vector.broadcast %709 : vector<1x96xf32> to vector<32x96xf32>
    %711 = arith.mulf %707, %710 : vector<32x96xf32>
    %c0_443 = arith.constant 0 : index
    %c1_444 = arith.constant 1 : index
    %c0_445 = arith.constant 0 : index
    %712 = vector.load %arg8[%c0_443, %c1_444, %c0_445] : memref<1x2x96xf32, #tpu.memory_space<vmem>>, vector<1x1x96xf32>
    %713 = vector.shape_cast %712 : vector<1x1x96xf32> to vector<1x96xf32>
    %714 = vector.broadcast %713 : vector<1x96xf32> to vector<32x96xf32>
    %715 = arith.addf %711, %714 : vector<32x96xf32>
    %cst_446 = arith.constant 0.000000e+00 : f32
    %716 = vector.broadcast %cst_446 : f32 to vector<32x96xf32>
    %717 = arith.maximumf %715, %716 : vector<32x96xf32>
    %c0_447 = arith.constant 0 : index
    %c0_448 = arith.constant 0 : index
    %c0_449 = arith.constant 0 : index
    %718 = vector.load %arg9[%c0_447, %c0_448, %c0_449] : memref<1x96x48xbf16, #tpu.memory_space<vmem>>, vector<1x96x48xbf16>
    %719 = vector.shape_cast %718 : vector<1x96x48xbf16> to vector<96x48xbf16>
    %720 = arith.truncf %717 : vector<32x96xf32> to vector<32x96xbf16>
    %cst_450 = arith.constant dense<0.000000e+00> : vector<32x48xf32>
    %721 = tpu.matmul %720, %719, %cst_450 {dimension_numbers = #tpu.dot_dimension_numbers<[1], [0], [0], [1], [0, 0, 1, 1], [], []>} : vector<32x96xbf16>, vector<96x48xbf16>, vector<32x48xf32> -> vector<32x48xf32>
    %722 = tpu.iota {dimensions = array<i32: 0>} : vector<16x32xi32>
    %723 = tpu.iota {dimensions = array<i32: 1>} : vector<16x32xi32>
    %c2_i32_451 = arith.constant 2 : i32
    %724 = vector.broadcast %c2_i32_451 : i32 to vector<16x32xi32>
    %725 = arith.muli %724, %722 : vector<16x32xi32>
    %c0_i32_452 = arith.constant 0 : i32
    %726 = vector.broadcast %c0_i32_452 : i32 to vector<16x32xi32>
    %727 = arith.addi %725, %726 : vector<16x32xi32>
    %728 = arith.cmpi eq, %723, %727 : vector<16x32xi32>
    %729 = arith.extui %728 : vector<16x32xi1> to vector<16x32xi32>
    %730 = arith.sitofp %729 : vector<16x32xi32> to vector<16x32xf32>
    %cst_453 = arith.constant dense<0.000000e+00> : vector<16x48xf32>
    %731 = tpu.matmul %730, %721, %cst_453 {dimension_numbers = #tpu.dot_dimension_numbers<[1], [0], [0], [1], [0, 0, 1, 1], [], []>} : vector<16x32xf32>, vector<32x48xf32>, vector<16x48xf32> -> vector<16x48xf32>
    %732 = tpu.iota {dimensions = array<i32: 0>} : vector<16x32xi32>
    %733 = tpu.iota {dimensions = array<i32: 1>} : vector<16x32xi32>
    %c2_i32_454 = arith.constant 2 : i32
    %734 = vector.broadcast %c2_i32_454 : i32 to vector<16x32xi32>
    %735 = arith.muli %734, %732 : vector<16x32xi32>
    %c1_i32_455 = arith.constant 1 : i32
    %736 = vector.broadcast %c1_i32_455 : i32 to vector<16x32xi32>
    %737 = arith.addi %735, %736 : vector<16x32xi32>
    %738 = arith.cmpi eq, %733, %737 : vector<16x32xi32>
    %739 = arith.extui %738 : vector<16x32xi1> to vector<16x32xi32>
    %740 = arith.sitofp %739 : vector<16x32xi32> to vector<16x32xf32>
    %cst_456 = arith.constant dense<0.000000e+00> : vector<16x48xf32>
    %741 = tpu.matmul %740, %721, %cst_456 {dimension_numbers = #tpu.dot_dimension_numbers<[1], [0], [0], [1], [0, 0, 1, 1], [], []>} : vector<16x32xf32>, vector<32x48xf32>, vector<16x48xf32> -> vector<16x48xf32>
    %742 = arith.addf %731, %741 : vector<16x48xf32>
    %cst_457 = arith.constant 5.000000e-01 : f32
    %743 = vector.broadcast %cst_457 : f32 to vector<16x48xf32>
    %744 = arith.mulf %743, %742 : vector<16x48xf32>
    %c0_458 = arith.constant 0 : index
    %c0_459 = arith.constant 0 : index
    %c0_460 = arith.constant 0 : index
    %745 = vector.load %arg10[%c0_458, %c0_459, %c0_460] : memref<1x2x48xf32, #tpu.memory_space<vmem>>, vector<1x1x48xf32>
    %746 = vector.shape_cast %745 : vector<1x1x48xf32> to vector<1x48xf32>
    %747 = vector.broadcast %746 : vector<1x48xf32> to vector<16x48xf32>
    %748 = arith.mulf %744, %747 : vector<16x48xf32>
    %c0_461 = arith.constant 0 : index
    %c1_462 = arith.constant 1 : index
    %c0_463 = arith.constant 0 : index
    %749 = vector.load %arg10[%c0_461, %c1_462, %c0_463] : memref<1x2x48xf32, #tpu.memory_space<vmem>>, vector<1x1x48xf32>
    %750 = vector.shape_cast %749 : vector<1x1x48xf32> to vector<1x48xf32>
    %751 = vector.broadcast %750 : vector<1x48xf32> to vector<16x48xf32>
    %752 = arith.addf %748, %751 : vector<16x48xf32>
    %cst_464 = arith.constant 0.000000e+00 : f32
    %753 = vector.broadcast %cst_464 : f32 to vector<16x48xf32>
    %754 = arith.maximumf %752, %753 : vector<16x48xf32>
    %c0_465 = arith.constant 0 : index
    %c0_466 = arith.constant 0 : index
    %c0_467 = arith.constant 0 : index
    %755 = vector.load %arg12[%c0_465, %c0_466, %c0_467] : memref<1x48x128xbf16, #tpu.memory_space<vmem>>, vector<1x48x128xbf16>
    %756 = vector.shape_cast %755 : vector<1x48x128xbf16> to vector<48x128xbf16>
    %757 = arith.truncf %754 : vector<16x48xf32> to vector<16x48xbf16>
    %cst_468 = arith.constant dense<0.000000e+00> : vector<16x128xf32>
    %758 = tpu.matmul %757, %756, %cst_468 {dimension_numbers = #tpu.dot_dimension_numbers<[1], [0], [0], [1], [0, 0, 1, 1], [], []>} : vector<16x48xbf16>, vector<48x128xbf16>, vector<16x128xf32> -> vector<16x128xf32>
    %c0_469 = arith.constant 0 : index
    %c0_470 = arith.constant 0 : index
    %c0_471 = arith.constant 0 : index
    %759 = vector.load %arg11[%c0_469, %c0_470, %c0_471] : memref<1x2x128xf32, #tpu.memory_space<vmem>>, vector<1x1x128xf32>
    %760 = vector.shape_cast %759 : vector<1x1x128xf32> to vector<1x128xf32>
    %761 = vector.broadcast %760 : vector<1x128xf32> to vector<16x128xf32>
    %762 = arith.mulf %758, %761 : vector<16x128xf32>
    %c0_472 = arith.constant 0 : index
    %c1_473 = arith.constant 1 : index
    %c0_474 = arith.constant 0 : index
    %763 = vector.load %arg11[%c0_472, %c1_473, %c0_474] : memref<1x2x128xf32, #tpu.memory_space<vmem>>, vector<1x1x128xf32>
    %764 = vector.shape_cast %763 : vector<1x1x128xf32> to vector<1x128xf32>
    %765 = vector.broadcast %764 : vector<1x128xf32> to vector<16x128xf32>
    %766 = arith.addf %762, %765 : vector<16x128xf32>
    %cst_475 = arith.constant 0.000000e+00 : f32
    %767 = vector.broadcast %cst_475 : f32 to vector<16x128xf32>
    %768 = arith.maximumf %766, %767 : vector<16x128xf32>
    %cst_476 = arith.constant 0.000000e+00 : f32
    %769 = vector.broadcast %cst_476 : f32 to vector<2x128xf32>
    %770 = tpu.concatenate %769, %768, %769 in 0 : vector<2x128xf32>, vector<16x128xf32>, vector<2x128xf32> -> vector<20x128xf32>
    %771 = vector.extract_strided_slice %770 {offsets = [0, 0], sizes = [16, 128], strides = [1, 1]} : vector<20x128xf32> to vector<16x128xf32>
    %c0_477 = arith.constant 0 : index
    %c0_478 = arith.constant 0 : index
    %c0_479 = arith.constant 0 : index
    %c0_480 = arith.constant 0 : index
    %772 = vector.load %arg13[%c0_477, %c0_478, %c0_479, %c0_480] : memref<1x5x128x32xbf16, #tpu.memory_space<vmem>>, vector<1x1x128x32xbf16>
    %773 = vector.shape_cast %772 : vector<1x1x128x32xbf16> to vector<128x32xbf16>
    %774 = arith.truncf %771 : vector<16x128xf32> to vector<16x128xbf16>
    %cst_481 = arith.constant dense<0.000000e+00> : vector<16x32xf32>
    %775 = tpu.matmul %774, %773, %cst_481 {dimension_numbers = #tpu.dot_dimension_numbers<[1], [0], [0], [1], [0, 0, 1, 1], [], []>} : vector<16x128xbf16>, vector<128x32xbf16>, vector<16x32xf32> -> vector<16x32xf32>
    %776 = vector.extract_strided_slice %770 {offsets = [1, 0], sizes = [16, 128], strides = [1, 1]} : vector<20x128xf32> to vector<16x128xf32>
    %c0_482 = arith.constant 0 : index
    %c1_483 = arith.constant 1 : index
    %c0_484 = arith.constant 0 : index
    %c0_485 = arith.constant 0 : index
    %777 = vector.load %arg13[%c0_482, %c1_483, %c0_484, %c0_485] : memref<1x5x128x32xbf16, #tpu.memory_space<vmem>>, vector<1x1x128x32xbf16>
    %778 = vector.shape_cast %777 : vector<1x1x128x32xbf16> to vector<128x32xbf16>
    %779 = arith.truncf %776 : vector<16x128xf32> to vector<16x128xbf16>
    %cst_486 = arith.constant dense<0.000000e+00> : vector<16x32xf32>
    %780 = tpu.matmul %779, %778, %cst_486 {dimension_numbers = #tpu.dot_dimension_numbers<[1], [0], [0], [1], [0, 0, 1, 1], [], []>} : vector<16x128xbf16>, vector<128x32xbf16>, vector<16x32xf32> -> vector<16x32xf32>
    %781 = arith.addf %775, %780 : vector<16x32xf32>
    %782 = vector.extract_strided_slice %770 {offsets = [2, 0], sizes = [16, 128], strides = [1, 1]} : vector<20x128xf32> to vector<16x128xf32>
    %c0_487 = arith.constant 0 : index
    %c2_488 = arith.constant 2 : index
    %c0_489 = arith.constant 0 : index
    %c0_490 = arith.constant 0 : index
    %783 = vector.load %arg13[%c0_487, %c2_488, %c0_489, %c0_490] : memref<1x5x128x32xbf16, #tpu.memory_space<vmem>>, vector<1x1x128x32xbf16>
    %784 = vector.shape_cast %783 : vector<1x1x128x32xbf16> to vector<128x32xbf16>
    %785 = arith.truncf %782 : vector<16x128xf32> to vector<16x128xbf16>
    %cst_491 = arith.constant dense<0.000000e+00> : vector<16x32xf32>
    %786 = tpu.matmul %785, %784, %cst_491 {dimension_numbers = #tpu.dot_dimension_numbers<[1], [0], [0], [1], [0, 0, 1, 1], [], []>} : vector<16x128xbf16>, vector<128x32xbf16>, vector<16x32xf32> -> vector<16x32xf32>
    %787 = arith.addf %781, %786 : vector<16x32xf32>
    %788 = vector.extract_strided_slice %770 {offsets = [3, 0], sizes = [16, 128], strides = [1, 1]} : vector<20x128xf32> to vector<16x128xf32>
    %c0_492 = arith.constant 0 : index
    %c3_493 = arith.constant 3 : index
    %c0_494 = arith.constant 0 : index
    %c0_495 = arith.constant 0 : index
    %789 = vector.load %arg13[%c0_492, %c3_493, %c0_494, %c0_495] : memref<1x5x128x32xbf16, #tpu.memory_space<vmem>>, vector<1x1x128x32xbf16>
    %790 = vector.shape_cast %789 : vector<1x1x128x32xbf16> to vector<128x32xbf16>
    %791 = arith.truncf %788 : vector<16x128xf32> to vector<16x128xbf16>
    %cst_496 = arith.constant dense<0.000000e+00> : vector<16x32xf32>
    %792 = tpu.matmul %791, %790, %cst_496 {dimension_numbers = #tpu.dot_dimension_numbers<[1], [0], [0], [1], [0, 0, 1, 1], [], []>} : vector<16x128xbf16>, vector<128x32xbf16>, vector<16x32xf32> -> vector<16x32xf32>
    %793 = arith.addf %787, %792 : vector<16x32xf32>
    %794 = vector.extract_strided_slice %770 {offsets = [4, 0], sizes = [16, 128], strides = [1, 1]} : vector<20x128xf32> to vector<16x128xf32>
    %c0_497 = arith.constant 0 : index
    %c4_498 = arith.constant 4 : index
    %c0_499 = arith.constant 0 : index
    %c0_500 = arith.constant 0 : index
    %795 = vector.load %arg13[%c0_497, %c4_498, %c0_499, %c0_500] : memref<1x5x128x32xbf16, #tpu.memory_space<vmem>>, vector<1x1x128x32xbf16>
    %796 = vector.shape_cast %795 : vector<1x1x128x32xbf16> to vector<128x32xbf16>
    %797 = arith.truncf %794 : vector<16x128xf32> to vector<16x128xbf16>
    %cst_501 = arith.constant dense<0.000000e+00> : vector<16x32xf32>
    %798 = tpu.matmul %797, %796, %cst_501 {dimension_numbers = #tpu.dot_dimension_numbers<[1], [0], [0], [1], [0, 0, 1, 1], [], []>} : vector<16x128xbf16>, vector<128x32xbf16>, vector<16x32xf32> -> vector<16x32xf32>
    %799 = arith.addf %793, %798 : vector<16x32xf32>
    %cst_502 = arith.constant dense<0.000000e+00> : vector<32xf32>
    %800 = vector.multi_reduction <add>, %799, %cst_502 [0] : vector<16x32xf32> to vector<32xf32>
    %801 = vector.shape_cast %800 : vector<32xf32> to vector<1x32xf32>
    %cst_503 = arith.constant 1.600000e+01 : f32
    %802 = vector.broadcast %cst_503 : f32 to vector<1x32xf32>
    %803 = arith.divf %801, %802 : vector<1x32xf32>
    %c0_504 = arith.constant 0 : index
    %c0_505 = arith.constant 0 : index
    %c0_506 = arith.constant 0 : index
    %804 = vector.load %arg14[%c0_504, %c0_505, %c0_506] : memref<1x32x2xbf16, #tpu.memory_space<vmem>>, vector<1x32x2xbf16>
    %805 = vector.shape_cast %804 : vector<1x32x2xbf16> to vector<32x2xbf16>
    %806 = arith.truncf %803 : vector<1x32xf32> to vector<1x32xbf16>
    %cst_507 = arith.constant dense<0.000000e+00> : vector<1x2xf32>
    %807 = tpu.matmul %806, %805, %cst_507 {dimension_numbers = #tpu.dot_dimension_numbers<[1], [0], [0], [1], [0, 0, 1, 1], [], []>} : vector<1x32xbf16>, vector<32x2xbf16>, vector<1x2xf32> -> vector<1x2xf32>
    %cst_508 = arith.constant 0.000000e+00 : f32
    %808 = vector.broadcast %cst_508 : f32 to vector<1x2xf32>
    %809 = arith.maximumf %807, %808 : vector<1x2xf32>
    %c0_509 = arith.constant 0 : index
    %c0_510 = arith.constant 0 : index
    %c0_511 = arith.constant 0 : index
    %810 = vector.load %arg15[%c0_509, %c0_510, %c0_511] : memref<1x2x32xbf16, #tpu.memory_space<vmem>>, vector<1x2x32xbf16>
    %811 = vector.shape_cast %810 : vector<1x2x32xbf16> to vector<2x32xbf16>
    %812 = arith.truncf %809 : vector<1x2xf32> to vector<1x2xbf16>
    %cst_512 = arith.constant dense<0.000000e+00> : vector<1x32xf32>
    %813 = tpu.matmul %812, %811, %cst_512 {dimension_numbers = #tpu.dot_dimension_numbers<[1], [0], [0], [1], [0, 0, 1, 1], [], []>} : vector<1x2xbf16>, vector<2x32xbf16>, vector<1x32xf32> -> vector<1x32xf32>
    %cst_513 = arith.constant 0.000000e+00 : f32
    %814 = vector.broadcast %cst_513 : f32 to vector<1x32xf32>
    %815 = arith.subf %814, %813 : vector<1x32xf32>
    %816 = math.exp %815 : vector<1x32xf32>
    %cst_514 = arith.constant 1.000000e+00 : f32
    %817 = vector.broadcast %cst_514 : f32 to vector<1x32xf32>
    %818 = arith.addf %817, %816 : vector<1x32xf32>
    %cst_515 = arith.constant 1.000000e+00 : f32
    %819 = vector.broadcast %cst_515 : f32 to vector<1x32xf32>
    %820 = arith.divf %819, %818 : vector<1x32xf32>
    %821 = vector.broadcast %820 : vector<1x32xf32> to vector<16x32xf32>
    %822 = arith.mulf %799, %821 : vector<16x32xf32>
    %823 = tpu.concatenate %744, %822 in 1 : vector<16x48xf32>, vector<16x32xf32> -> vector<16x80xf32>
    %c0_516 = arith.constant 0 : index
    %c0_517 = arith.constant 0 : index
    %c0_518 = arith.constant 0 : index
    %824 = vector.load %arg16[%c0_516, %c0_517, %c0_518] : memref<1x2x80xf32, #tpu.memory_space<vmem>>, vector<1x1x80xf32>
    %825 = vector.shape_cast %824 : vector<1x1x80xf32> to vector<1x80xf32>
    %826 = vector.broadcast %825 : vector<1x80xf32> to vector<16x80xf32>
    %827 = arith.mulf %823, %826 : vector<16x80xf32>
    %c0_519 = arith.constant 0 : index
    %c1_520 = arith.constant 1 : index
    %c0_521 = arith.constant 0 : index
    %828 = vector.load %arg16[%c0_519, %c1_520, %c0_521] : memref<1x2x80xf32, #tpu.memory_space<vmem>>, vector<1x1x80xf32>
    %829 = vector.shape_cast %828 : vector<1x1x80xf32> to vector<1x80xf32>
    %830 = vector.broadcast %829 : vector<1x80xf32> to vector<16x80xf32>
    %831 = arith.addf %827, %830 : vector<16x80xf32>
    %cst_522 = arith.constant 0.000000e+00 : f32
    %832 = vector.broadcast %cst_522 : f32 to vector<16x80xf32>
    %833 = arith.maximumf %831, %832 : vector<16x80xf32>
    %c0_523 = arith.constant 0 : index
    %c0_524 = arith.constant 0 : index
    %c0_525 = arith.constant 0 : index
    %834 = vector.load %arg17[%c0_523, %c0_524, %c0_525] : memref<1x80x40xbf16, #tpu.memory_space<vmem>>, vector<1x80x40xbf16>
    %835 = vector.shape_cast %834 : vector<1x80x40xbf16> to vector<80x40xbf16>
    %836 = arith.truncf %833 : vector<16x80xf32> to vector<16x80xbf16>
    %cst_526 = arith.constant dense<0.000000e+00> : vector<16x40xf32>
    %837 = tpu.matmul %836, %835, %cst_526 {dimension_numbers = #tpu.dot_dimension_numbers<[1], [0], [0], [1], [0, 0, 1, 1], [], []>} : vector<16x80xbf16>, vector<80x40xbf16>, vector<16x40xf32> -> vector<16x40xf32>
    %838 = tpu.iota {dimensions = array<i32: 0>} : vector<8x16xi32>
    %839 = tpu.iota {dimensions = array<i32: 1>} : vector<8x16xi32>
    %c2_i32_527 = arith.constant 2 : i32
    %840 = vector.broadcast %c2_i32_527 : i32 to vector<8x16xi32>
    %841 = arith.muli %840, %838 : vector<8x16xi32>
    %c0_i32_528 = arith.constant 0 : i32
    %842 = vector.broadcast %c0_i32_528 : i32 to vector<8x16xi32>
    %843 = arith.addi %841, %842 : vector<8x16xi32>
    %844 = arith.cmpi eq, %839, %843 : vector<8x16xi32>
    %845 = arith.extui %844 : vector<8x16xi1> to vector<8x16xi32>
    %846 = arith.sitofp %845 : vector<8x16xi32> to vector<8x16xf32>
    %cst_529 = arith.constant dense<0.000000e+00> : vector<8x40xf32>
    %847 = tpu.matmul %846, %837, %cst_529 {dimension_numbers = #tpu.dot_dimension_numbers<[1], [0], [0], [1], [0, 0, 1, 1], [], []>} : vector<8x16xf32>, vector<16x40xf32>, vector<8x40xf32> -> vector<8x40xf32>
    %848 = tpu.iota {dimensions = array<i32: 0>} : vector<8x16xi32>
    %849 = tpu.iota {dimensions = array<i32: 1>} : vector<8x16xi32>
    %c2_i32_530 = arith.constant 2 : i32
    %850 = vector.broadcast %c2_i32_530 : i32 to vector<8x16xi32>
    %851 = arith.muli %850, %848 : vector<8x16xi32>
    %c1_i32_531 = arith.constant 1 : i32
    %852 = vector.broadcast %c1_i32_531 : i32 to vector<8x16xi32>
    %853 = arith.addi %851, %852 : vector<8x16xi32>
    %854 = arith.cmpi eq, %849, %853 : vector<8x16xi32>
    %855 = arith.extui %854 : vector<8x16xi1> to vector<8x16xi32>
    %856 = arith.sitofp %855 : vector<8x16xi32> to vector<8x16xf32>
    %cst_532 = arith.constant dense<0.000000e+00> : vector<8x40xf32>
    %857 = tpu.matmul %856, %837, %cst_532 {dimension_numbers = #tpu.dot_dimension_numbers<[1], [0], [0], [1], [0, 0, 1, 1], [], []>} : vector<8x16xf32>, vector<16x40xf32>, vector<8x40xf32> -> vector<8x40xf32>
    %858 = arith.addf %847, %857 : vector<8x40xf32>
    %cst_533 = arith.constant 5.000000e-01 : f32
    %859 = vector.broadcast %cst_533 : f32 to vector<8x40xf32>
    %860 = arith.mulf %859, %858 : vector<8x40xf32>
    %c0_534 = arith.constant 0 : index
    %c0_535 = arith.constant 0 : index
    %c0_536 = arith.constant 0 : index
    %861 = vector.load %arg18[%c0_534, %c0_535, %c0_536] : memref<1x2x40xf32, #tpu.memory_space<vmem>>, vector<1x1x40xf32>
    %862 = vector.shape_cast %861 : vector<1x1x40xf32> to vector<1x40xf32>
    %863 = vector.broadcast %862 : vector<1x40xf32> to vector<8x40xf32>
    %864 = arith.mulf %860, %863 : vector<8x40xf32>
    %c0_537 = arith.constant 0 : index
    %c1_538 = arith.constant 1 : index
    %c0_539 = arith.constant 0 : index
    %865 = vector.load %arg18[%c0_537, %c1_538, %c0_539] : memref<1x2x40xf32, #tpu.memory_space<vmem>>, vector<1x1x40xf32>
    %866 = vector.shape_cast %865 : vector<1x1x40xf32> to vector<1x40xf32>
    %867 = vector.broadcast %866 : vector<1x40xf32> to vector<8x40xf32>
    %868 = arith.addf %864, %867 : vector<8x40xf32>
    %cst_540 = arith.constant 0.000000e+00 : f32
    %869 = vector.broadcast %cst_540 : f32 to vector<8x40xf32>
    %870 = arith.maximumf %868, %869 : vector<8x40xf32>
    %c0_541 = arith.constant 0 : index
    %c0_542 = arith.constant 0 : index
    %c0_543 = arith.constant 0 : index
    %871 = vector.load %arg20[%c0_541, %c0_542, %c0_543] : memref<1x40x128xbf16, #tpu.memory_space<vmem>>, vector<1x40x128xbf16>
    %872 = vector.shape_cast %871 : vector<1x40x128xbf16> to vector<40x128xbf16>
    %873 = arith.truncf %870 : vector<8x40xf32> to vector<8x40xbf16>
    %cst_544 = arith.constant dense<0.000000e+00> : vector<8x128xf32>
    %874 = tpu.matmul %873, %872, %cst_544 {dimension_numbers = #tpu.dot_dimension_numbers<[1], [0], [0], [1], [0, 0, 1, 1], [], []>} : vector<8x40xbf16>, vector<40x128xbf16>, vector<8x128xf32> -> vector<8x128xf32>
    %c0_545 = arith.constant 0 : index
    %c0_546 = arith.constant 0 : index
    %c0_547 = arith.constant 0 : index
    %875 = vector.load %arg19[%c0_545, %c0_546, %c0_547] : memref<1x2x128xf32, #tpu.memory_space<vmem>>, vector<1x1x128xf32>
    %876 = vector.shape_cast %875 : vector<1x1x128xf32> to vector<1x128xf32>
    %877 = vector.broadcast %876 : vector<1x128xf32> to vector<8x128xf32>
    %878 = arith.mulf %874, %877 : vector<8x128xf32>
    %c0_548 = arith.constant 0 : index
    %c1_549 = arith.constant 1 : index
    %c0_550 = arith.constant 0 : index
    %879 = vector.load %arg19[%c0_548, %c1_549, %c0_550] : memref<1x2x128xf32, #tpu.memory_space<vmem>>, vector<1x1x128xf32>
    %880 = vector.shape_cast %879 : vector<1x1x128xf32> to vector<1x128xf32>
    %881 = vector.broadcast %880 : vector<1x128xf32> to vector<8x128xf32>
    %882 = arith.addf %878, %881 : vector<8x128xf32>
    %cst_551 = arith.constant 0.000000e+00 : f32
    %883 = vector.broadcast %cst_551 : f32 to vector<8x128xf32>
    %884 = arith.maximumf %882, %883 : vector<8x128xf32>
    %cst_552 = arith.constant 0.000000e+00 : f32
    %885 = vector.broadcast %cst_552 : f32 to vector<2x128xf32>
    %886 = tpu.concatenate %885, %884, %885 in 0 : vector<2x128xf32>, vector<8x128xf32>, vector<2x128xf32> -> vector<12x128xf32>
    %887 = vector.extract_strided_slice %886 {offsets = [0, 0], sizes = [8, 128], strides = [1, 1]} : vector<12x128xf32> to vector<8x128xf32>
    %c0_553 = arith.constant 0 : index
    %c0_554 = arith.constant 0 : index
    %c0_555 = arith.constant 0 : index
    %c0_556 = arith.constant 0 : index
    %888 = vector.load %arg21[%c0_553, %c0_554, %c0_555, %c0_556] : memref<1x5x128x32xbf16, #tpu.memory_space<vmem>>, vector<1x1x128x32xbf16>
    %889 = vector.shape_cast %888 : vector<1x1x128x32xbf16> to vector<128x32xbf16>
    %890 = arith.truncf %887 : vector<8x128xf32> to vector<8x128xbf16>
    %cst_557 = arith.constant dense<0.000000e+00> : vector<8x32xf32>
    %891 = tpu.matmul %890, %889, %cst_557 {dimension_numbers = #tpu.dot_dimension_numbers<[1], [0], [0], [1], [0, 0, 1, 1], [], []>} : vector<8x128xbf16>, vector<128x32xbf16>, vector<8x32xf32> -> vector<8x32xf32>
    %892 = vector.extract_strided_slice %886 {offsets = [1, 0], sizes = [8, 128], strides = [1, 1]} : vector<12x128xf32> to vector<8x128xf32>
    %c0_558 = arith.constant 0 : index
    %c1_559 = arith.constant 1 : index
    %c0_560 = arith.constant 0 : index
    %c0_561 = arith.constant 0 : index
    %893 = vector.load %arg21[%c0_558, %c1_559, %c0_560, %c0_561] : memref<1x5x128x32xbf16, #tpu.memory_space<vmem>>, vector<1x1x128x32xbf16>
    %894 = vector.shape_cast %893 : vector<1x1x128x32xbf16> to vector<128x32xbf16>
    %895 = arith.truncf %892 : vector<8x128xf32> to vector<8x128xbf16>
    %cst_562 = arith.constant dense<0.000000e+00> : vector<8x32xf32>
    %896 = tpu.matmul %895, %894, %cst_562 {dimension_numbers = #tpu.dot_dimension_numbers<[1], [0], [0], [1], [0, 0, 1, 1], [], []>} : vector<8x128xbf16>, vector<128x32xbf16>, vector<8x32xf32> -> vector<8x32xf32>
    %897 = arith.addf %891, %896 : vector<8x32xf32>
    %898 = vector.extract_strided_slice %886 {offsets = [2, 0], sizes = [8, 128], strides = [1, 1]} : vector<12x128xf32> to vector<8x128xf32>
    %c0_563 = arith.constant 0 : index
    %c2_564 = arith.constant 2 : index
    %c0_565 = arith.constant 0 : index
    %c0_566 = arith.constant 0 : index
    %899 = vector.load %arg21[%c0_563, %c2_564, %c0_565, %c0_566] : memref<1x5x128x32xbf16, #tpu.memory_space<vmem>>, vector<1x1x128x32xbf16>
    %900 = vector.shape_cast %899 : vector<1x1x128x32xbf16> to vector<128x32xbf16>
    %901 = arith.truncf %898 : vector<8x128xf32> to vector<8x128xbf16>
    %cst_567 = arith.constant dense<0.000000e+00> : vector<8x32xf32>
    %902 = tpu.matmul %901, %900, %cst_567 {dimension_numbers = #tpu.dot_dimension_numbers<[1], [0], [0], [1], [0, 0, 1, 1], [], []>} : vector<8x128xbf16>, vector<128x32xbf16>, vector<8x32xf32> -> vector<8x32xf32>
    %903 = arith.addf %897, %902 : vector<8x32xf32>
    %904 = vector.extract_strided_slice %886 {offsets = [3, 0], sizes = [8, 128], strides = [1, 1]} : vector<12x128xf32> to vector<8x128xf32>
    %c0_568 = arith.constant 0 : index
    %c3_569 = arith.constant 3 : index
    %c0_570 = arith.constant 0 : index
    %c0_571 = arith.constant 0 : index
    %905 = vector.load %arg21[%c0_568, %c3_569, %c0_570, %c0_571] : memref<1x5x128x32xbf16, #tpu.memory_space<vmem>>, vector<1x1x128x32xbf16>
    %906 = vector.shape_cast %905 : vector<1x1x128x32xbf16> to vector<128x32xbf16>
    %907 = arith.truncf %904 : vector<8x128xf32> to vector<8x128xbf16>
    %cst_572 = arith.constant dense<0.000000e+00> : vector<8x32xf32>
    %908 = tpu.matmul %907, %906, %cst_572 {dimension_numbers = #tpu.dot_dimension_numbers<[1], [0], [0], [1], [0, 0, 1, 1], [], []>} : vector<8x128xbf16>, vector<128x32xbf16>, vector<8x32xf32> -> vector<8x32xf32>
    %909 = arith.addf %903, %908 : vector<8x32xf32>
    %910 = vector.extract_strided_slice %886 {offsets = [4, 0], sizes = [8, 128], strides = [1, 1]} : vector<12x128xf32> to vector<8x128xf32>
    %c0_573 = arith.constant 0 : index
    %c4_574 = arith.constant 4 : index
    %c0_575 = arith.constant 0 : index
    %c0_576 = arith.constant 0 : index
    %911 = vector.load %arg21[%c0_573, %c4_574, %c0_575, %c0_576] : memref<1x5x128x32xbf16, #tpu.memory_space<vmem>>, vector<1x1x128x32xbf16>
    %912 = vector.shape_cast %911 : vector<1x1x128x32xbf16> to vector<128x32xbf16>
    %913 = arith.truncf %910 : vector<8x128xf32> to vector<8x128xbf16>
    %cst_577 = arith.constant dense<0.000000e+00> : vector<8x32xf32>
    %914 = tpu.matmul %913, %912, %cst_577 {dimension_numbers = #tpu.dot_dimension_numbers<[1], [0], [0], [1], [0, 0, 1, 1], [], []>} : vector<8x128xbf16>, vector<128x32xbf16>, vector<8x32xf32> -> vector<8x32xf32>
    %915 = arith.addf %909, %914 : vector<8x32xf32>
    %cst_578 = arith.constant dense<0.000000e+00> : vector<32xf32>
    %916 = vector.multi_reduction <add>, %915, %cst_578 [0] : vector<8x32xf32> to vector<32xf32>
    %917 = vector.shape_cast %916 : vector<32xf32> to vector<1x32xf32>
    %cst_579 = arith.constant 8.000000e+00 : f32
    %918 = vector.broadcast %cst_579 : f32 to vector<1x32xf32>
    %919 = arith.divf %917, %918 : vector<1x32xf32>
    %c0_580 = arith.constant 0 : index
    %c0_581 = arith.constant 0 : index
    %c0_582 = arith.constant 0 : index
    %920 = vector.load %arg22[%c0_580, %c0_581, %c0_582] : memref<1x32x2xbf16, #tpu.memory_space<vmem>>, vector<1x32x2xbf16>
    %921 = vector.shape_cast %920 : vector<1x32x2xbf16> to vector<32x2xbf16>
    %922 = arith.truncf %919 : vector<1x32xf32> to vector<1x32xbf16>
    %cst_583 = arith.constant dense<0.000000e+00> : vector<1x2xf32>
    %923 = tpu.matmul %922, %921, %cst_583 {dimension_numbers = #tpu.dot_dimension_numbers<[1], [0], [0], [1], [0, 0, 1, 1], [], []>} : vector<1x32xbf16>, vector<32x2xbf16>, vector<1x2xf32> -> vector<1x2xf32>
    %cst_584 = arith.constant 0.000000e+00 : f32
    %924 = vector.broadcast %cst_584 : f32 to vector<1x2xf32>
    %925 = arith.maximumf %923, %924 : vector<1x2xf32>
    %c0_585 = arith.constant 0 : index
    %c0_586 = arith.constant 0 : index
    %c0_587 = arith.constant 0 : index
    %926 = vector.load %arg23[%c0_585, %c0_586, %c0_587] : memref<1x2x32xbf16, #tpu.memory_space<vmem>>, vector<1x2x32xbf16>
    %927 = vector.shape_cast %926 : vector<1x2x32xbf16> to vector<2x32xbf16>
    %928 = arith.truncf %925 : vector<1x2xf32> to vector<1x2xbf16>
    %cst_588 = arith.constant dense<0.000000e+00> : vector<1x32xf32>
    %929 = tpu.matmul %928, %927, %cst_588 {dimension_numbers = #tpu.dot_dimension_numbers<[1], [0], [0], [1], [0, 0, 1, 1], [], []>} : vector<1x2xbf16>, vector<2x32xbf16>, vector<1x32xf32> -> vector<1x32xf32>
    %cst_589 = arith.constant 0.000000e+00 : f32
    %930 = vector.broadcast %cst_589 : f32 to vector<1x32xf32>
    %931 = arith.subf %930, %929 : vector<1x32xf32>
    %932 = math.exp %931 : vector<1x32xf32>
    %cst_590 = arith.constant 1.000000e+00 : f32
    %933 = vector.broadcast %cst_590 : f32 to vector<1x32xf32>
    %934 = arith.addf %933, %932 : vector<1x32xf32>
    %cst_591 = arith.constant 1.000000e+00 : f32
    %935 = vector.broadcast %cst_591 : f32 to vector<1x32xf32>
    %936 = arith.divf %935, %934 : vector<1x32xf32>
    %937 = vector.broadcast %936 : vector<1x32xf32> to vector<8x32xf32>
    %938 = arith.mulf %915, %937 : vector<8x32xf32>
    %939 = tpu.concatenate %860, %938 in 1 : vector<8x40xf32>, vector<8x32xf32> -> vector<8x72xf32>
    %c0_592 = arith.constant 0 : index
    %c0_593 = arith.constant 0 : index
    %c0_594 = arith.constant 0 : index
    %940 = vector.load %arg24[%c0_592, %c0_593, %c0_594] : memref<1x2x72xf32, #tpu.memory_space<vmem>>, vector<1x1x72xf32>
    %941 = vector.shape_cast %940 : vector<1x1x72xf32> to vector<1x72xf32>
    %942 = vector.broadcast %941 : vector<1x72xf32> to vector<8x72xf32>
    %943 = arith.mulf %939, %942 : vector<8x72xf32>
    %c0_595 = arith.constant 0 : index
    %c1_596 = arith.constant 1 : index
    %c0_597 = arith.constant 0 : index
    %944 = vector.load %arg24[%c0_595, %c1_596, %c0_597] : memref<1x2x72xf32, #tpu.memory_space<vmem>>, vector<1x1x72xf32>
    %945 = vector.shape_cast %944 : vector<1x1x72xf32> to vector<1x72xf32>
    %946 = vector.broadcast %945 : vector<1x72xf32> to vector<8x72xf32>
    %947 = arith.addf %943, %946 : vector<8x72xf32>
    %cst_598 = arith.constant 0.000000e+00 : f32
    %948 = vector.broadcast %cst_598 : f32 to vector<8x72xf32>
    %949 = arith.maximumf %947, %948 : vector<8x72xf32>
    %c0_599 = arith.constant 0 : index
    %c0_600 = arith.constant 0 : index
    %c0_601 = arith.constant 0 : index
    %950 = vector.load %arg25[%c0_599, %c0_600, %c0_601] : memref<1x72x36xbf16, #tpu.memory_space<vmem>>, vector<1x72x36xbf16>
    %951 = vector.shape_cast %950 : vector<1x72x36xbf16> to vector<72x36xbf16>
    %952 = arith.truncf %949 : vector<8x72xf32> to vector<8x72xbf16>
    %cst_602 = arith.constant dense<0.000000e+00> : vector<8x36xf32>
    %953 = tpu.matmul %952, %951, %cst_602 {dimension_numbers = #tpu.dot_dimension_numbers<[1], [0], [0], [1], [0, 0, 1, 1], [], []>} : vector<8x72xbf16>, vector<72x36xbf16>, vector<8x36xf32> -> vector<8x36xf32>
    %954 = tpu.iota {dimensions = array<i32: 0>} : vector<4x8xi32>
    %955 = tpu.iota {dimensions = array<i32: 1>} : vector<4x8xi32>
    %c2_i32_603 = arith.constant 2 : i32
    %956 = vector.broadcast %c2_i32_603 : i32 to vector<4x8xi32>
    %957 = arith.muli %956, %954 : vector<4x8xi32>
    %c0_i32_604 = arith.constant 0 : i32
    %958 = vector.broadcast %c0_i32_604 : i32 to vector<4x8xi32>
    %959 = arith.addi %957, %958 : vector<4x8xi32>
    %960 = arith.cmpi eq, %955, %959 : vector<4x8xi32>
    %961 = arith.extui %960 : vector<4x8xi1> to vector<4x8xi32>
    %962 = arith.sitofp %961 : vector<4x8xi32> to vector<4x8xf32>
    %cst_605 = arith.constant dense<0.000000e+00> : vector<4x36xf32>
    %963 = tpu.matmul %962, %953, %cst_605 {dimension_numbers = #tpu.dot_dimension_numbers<[1], [0], [0], [1], [0, 0, 1, 1], [], []>} : vector<4x8xf32>, vector<8x36xf32>, vector<4x36xf32> -> vector<4x36xf32>
    %964 = tpu.iota {dimensions = array<i32: 0>} : vector<4x8xi32>
    %965 = tpu.iota {dimensions = array<i32: 1>} : vector<4x8xi32>
    %c2_i32_606 = arith.constant 2 : i32
    %966 = vector.broadcast %c2_i32_606 : i32 to vector<4x8xi32>
    %967 = arith.muli %966, %964 : vector<4x8xi32>
    %c1_i32_607 = arith.constant 1 : i32
    %968 = vector.broadcast %c1_i32_607 : i32 to vector<4x8xi32>
    %969 = arith.addi %967, %968 : vector<4x8xi32>
    %970 = arith.cmpi eq, %965, %969 : vector<4x8xi32>
    %971 = arith.extui %970 : vector<4x8xi1> to vector<4x8xi32>
    %972 = arith.sitofp %971 : vector<4x8xi32> to vector<4x8xf32>
    %cst_608 = arith.constant dense<0.000000e+00> : vector<4x36xf32>
    %973 = tpu.matmul %972, %953, %cst_608 {dimension_numbers = #tpu.dot_dimension_numbers<[1], [0], [0], [1], [0, 0, 1, 1], [], []>} : vector<4x8xf32>, vector<8x36xf32>, vector<4x36xf32> -> vector<4x36xf32>
    %974 = arith.addf %963, %973 : vector<4x36xf32>
    %cst_609 = arith.constant 5.000000e-01 : f32
    %975 = vector.broadcast %cst_609 : f32 to vector<4x36xf32>
    %976 = arith.mulf %975, %974 : vector<4x36xf32>
    %c0_610 = arith.constant 0 : index
    %c0_611 = arith.constant 0 : index
    %c0_612 = arith.constant 0 : index
    %977 = vector.load %arg26[%c0_610, %c0_611, %c0_612] : memref<1x2x36xf32, #tpu.memory_space<vmem>>, vector<1x1x36xf32>
    %978 = vector.shape_cast %977 : vector<1x1x36xf32> to vector<1x36xf32>
    %979 = vector.broadcast %978 : vector<1x36xf32> to vector<4x36xf32>
    %980 = arith.mulf %976, %979 : vector<4x36xf32>
    %c0_613 = arith.constant 0 : index
    %c1_614 = arith.constant 1 : index
    %c0_615 = arith.constant 0 : index
    %981 = vector.load %arg26[%c0_613, %c1_614, %c0_615] : memref<1x2x36xf32, #tpu.memory_space<vmem>>, vector<1x1x36xf32>
    %982 = vector.shape_cast %981 : vector<1x1x36xf32> to vector<1x36xf32>
    %983 = vector.broadcast %982 : vector<1x36xf32> to vector<4x36xf32>
    %984 = arith.addf %980, %983 : vector<4x36xf32>
    %cst_616 = arith.constant 0.000000e+00 : f32
    %985 = vector.broadcast %cst_616 : f32 to vector<4x36xf32>
    %986 = arith.maximumf %984, %985 : vector<4x36xf32>
    %c0_617 = arith.constant 0 : index
    %c0_618 = arith.constant 0 : index
    %c0_619 = arith.constant 0 : index
    %987 = vector.load %arg28[%c0_617, %c0_618, %c0_619] : memref<1x36x128xbf16, #tpu.memory_space<vmem>>, vector<1x36x128xbf16>
    %988 = vector.shape_cast %987 : vector<1x36x128xbf16> to vector<36x128xbf16>
    %989 = arith.truncf %986 : vector<4x36xf32> to vector<4x36xbf16>
    %cst_620 = arith.constant dense<0.000000e+00> : vector<4x128xf32>
    %990 = tpu.matmul %989, %988, %cst_620 {dimension_numbers = #tpu.dot_dimension_numbers<[1], [0], [0], [1], [0, 0, 1, 1], [], []>} : vector<4x36xbf16>, vector<36x128xbf16>, vector<4x128xf32> -> vector<4x128xf32>
    %c0_621 = arith.constant 0 : index
    %c0_622 = arith.constant 0 : index
    %c0_623 = arith.constant 0 : index
    %991 = vector.load %arg27[%c0_621, %c0_622, %c0_623] : memref<1x2x128xf32, #tpu.memory_space<vmem>>, vector<1x1x128xf32>
    %992 = vector.shape_cast %991 : vector<1x1x128xf32> to vector<1x128xf32>
    %993 = vector.broadcast %992 : vector<1x128xf32> to vector<4x128xf32>
    %994 = arith.mulf %990, %993 : vector<4x128xf32>
    %c0_624 = arith.constant 0 : index
    %c1_625 = arith.constant 1 : index
    %c0_626 = arith.constant 0 : index
    %995 = vector.load %arg27[%c0_624, %c1_625, %c0_626] : memref<1x2x128xf32, #tpu.memory_space<vmem>>, vector<1x1x128xf32>
    %996 = vector.shape_cast %995 : vector<1x1x128xf32> to vector<1x128xf32>
    %997 = vector.broadcast %996 : vector<1x128xf32> to vector<4x128xf32>
    %998 = arith.addf %994, %997 : vector<4x128xf32>
    %cst_627 = arith.constant 0.000000e+00 : f32
    %999 = vector.broadcast %cst_627 : f32 to vector<4x128xf32>
    %1000 = arith.maximumf %998, %999 : vector<4x128xf32>
    %cst_628 = arith.constant 0.000000e+00 : f32
    %1001 = vector.broadcast %cst_628 : f32 to vector<2x128xf32>
    %1002 = tpu.concatenate %1001, %1000, %1001 in 0 : vector<2x128xf32>, vector<4x128xf32>, vector<2x128xf32> -> vector<8x128xf32>
    %1003 = vector.extract_strided_slice %1002 {offsets = [0, 0], sizes = [4, 128], strides = [1, 1]} : vector<8x128xf32> to vector<4x128xf32>
    %c0_629 = arith.constant 0 : index
    %c0_630 = arith.constant 0 : index
    %c0_631 = arith.constant 0 : index
    %c0_632 = arith.constant 0 : index
    %1004 = vector.load %arg29[%c0_629, %c0_630, %c0_631, %c0_632] : memref<1x5x128x32xbf16, #tpu.memory_space<vmem>>, vector<1x1x128x32xbf16>
    %1005 = vector.shape_cast %1004 : vector<1x1x128x32xbf16> to vector<128x32xbf16>
    %1006 = arith.truncf %1003 : vector<4x128xf32> to vector<4x128xbf16>
    %cst_633 = arith.constant dense<0.000000e+00> : vector<4x32xf32>
    %1007 = tpu.matmul %1006, %1005, %cst_633 {dimension_numbers = #tpu.dot_dimension_numbers<[1], [0], [0], [1], [0, 0, 1, 1], [], []>} : vector<4x128xbf16>, vector<128x32xbf16>, vector<4x32xf32> -> vector<4x32xf32>
    %1008 = vector.extract_strided_slice %1002 {offsets = [1, 0], sizes = [4, 128], strides = [1, 1]} : vector<8x128xf32> to vector<4x128xf32>
    %c0_634 = arith.constant 0 : index
    %c1_635 = arith.constant 1 : index
    %c0_636 = arith.constant 0 : index
    %c0_637 = arith.constant 0 : index
    %1009 = vector.load %arg29[%c0_634, %c1_635, %c0_636, %c0_637] : memref<1x5x128x32xbf16, #tpu.memory_space<vmem>>, vector<1x1x128x32xbf16>
    %1010 = vector.shape_cast %1009 : vector<1x1x128x32xbf16> to vector<128x32xbf16>
    %1011 = arith.truncf %1008 : vector<4x128xf32> to vector<4x128xbf16>
    %cst_638 = arith.constant dense<0.000000e+00> : vector<4x32xf32>
    %1012 = tpu.matmul %1011, %1010, %cst_638 {dimension_numbers = #tpu.dot_dimension_numbers<[1], [0], [0], [1], [0, 0, 1, 1], [], []>} : vector<4x128xbf16>, vector<128x32xbf16>, vector<4x32xf32> -> vector<4x32xf32>
    %1013 = arith.addf %1007, %1012 : vector<4x32xf32>
    %1014 = vector.extract_strided_slice %1002 {offsets = [2, 0], sizes = [4, 128], strides = [1, 1]} : vector<8x128xf32> to vector<4x128xf32>
    %c0_639 = arith.constant 0 : index
    %c2_640 = arith.constant 2 : index
    %c0_641 = arith.constant 0 : index
    %c0_642 = arith.constant 0 : index
    %1015 = vector.load %arg29[%c0_639, %c2_640, %c0_641, %c0_642] : memref<1x5x128x32xbf16, #tpu.memory_space<vmem>>, vector<1x1x128x32xbf16>
    %1016 = vector.shape_cast %1015 : vector<1x1x128x32xbf16> to vector<128x32xbf16>
    %1017 = arith.truncf %1014 : vector<4x128xf32> to vector<4x128xbf16>
    %cst_643 = arith.constant dense<0.000000e+00> : vector<4x32xf32>
    %1018 = tpu.matmul %1017, %1016, %cst_643 {dimension_numbers = #tpu.dot_dimension_numbers<[1], [0], [0], [1], [0, 0, 1, 1], [], []>} : vector<4x128xbf16>, vector<128x32xbf16>, vector<4x32xf32> -> vector<4x32xf32>
    %1019 = arith.addf %1013, %1018 : vector<4x32xf32>
    %1020 = vector.extract_strided_slice %1002 {offsets = [3, 0], sizes = [4, 128], strides = [1, 1]} : vector<8x128xf32> to vector<4x128xf32>
    %c0_644 = arith.constant 0 : index
    %c3_645 = arith.constant 3 : index
    %c0_646 = arith.constant 0 : index
    %c0_647 = arith.constant 0 : index
    %1021 = vector.load %arg29[%c0_644, %c3_645, %c0_646, %c0_647] : memref<1x5x128x32xbf16, #tpu.memory_space<vmem>>, vector<1x1x128x32xbf16>
    %1022 = vector.shape_cast %1021 : vector<1x1x128x32xbf16> to vector<128x32xbf16>
    %1023 = arith.truncf %1020 : vector<4x128xf32> to vector<4x128xbf16>
    %cst_648 = arith.constant dense<0.000000e+00> : vector<4x32xf32>
    %1024 = tpu.matmul %1023, %1022, %cst_648 {dimension_numbers = #tpu.dot_dimension_numbers<[1], [0], [0], [1], [0, 0, 1, 1], [], []>} : vector<4x128xbf16>, vector<128x32xbf16>, vector<4x32xf32> -> vector<4x32xf32>
    %1025 = arith.addf %1019, %1024 : vector<4x32xf32>
    %1026 = vector.extract_strided_slice %1002 {offsets = [4, 0], sizes = [4, 128], strides = [1, 1]} : vector<8x128xf32> to vector<4x128xf32>
    %c0_649 = arith.constant 0 : index
    %c4_650 = arith.constant 4 : index
    %c0_651 = arith.constant 0 : index
    %c0_652 = arith.constant 0 : index
    %1027 = vector.load %arg29[%c0_649, %c4_650, %c0_651, %c0_652] : memref<1x5x128x32xbf16, #tpu.memory_space<vmem>>, vector<1x1x128x32xbf16>
    %1028 = vector.shape_cast %1027 : vector<1x1x128x32xbf16> to vector<128x32xbf16>
    %1029 = arith.truncf %1026 : vector<4x128xf32> to vector<4x128xbf16>
    %cst_653 = arith.constant dense<0.000000e+00> : vector<4x32xf32>
    %1030 = tpu.matmul %1029, %1028, %cst_653 {dimension_numbers = #tpu.dot_dimension_numbers<[1], [0], [0], [1], [0, 0, 1, 1], [], []>} : vector<4x128xbf16>, vector<128x32xbf16>, vector<4x32xf32> -> vector<4x32xf32>
    %1031 = arith.addf %1025, %1030 : vector<4x32xf32>
    %cst_654 = arith.constant dense<0.000000e+00> : vector<32xf32>
    %1032 = vector.multi_reduction <add>, %1031, %cst_654 [0] : vector<4x32xf32> to vector<32xf32>
    %1033 = vector.shape_cast %1032 : vector<32xf32> to vector<1x32xf32>
    %cst_655 = arith.constant 4.000000e+00 : f32
    %1034 = vector.broadcast %cst_655 : f32 to vector<1x32xf32>
    %1035 = arith.divf %1033, %1034 : vector<1x32xf32>
    %c0_656 = arith.constant 0 : index
    %c0_657 = arith.constant 0 : index
    %c0_658 = arith.constant 0 : index
    %1036 = vector.load %arg30[%c0_656, %c0_657, %c0_658] : memref<1x32x2xbf16, #tpu.memory_space<vmem>>, vector<1x32x2xbf16>
    %1037 = vector.shape_cast %1036 : vector<1x32x2xbf16> to vector<32x2xbf16>
    %1038 = arith.truncf %1035 : vector<1x32xf32> to vector<1x32xbf16>
    %cst_659 = arith.constant dense<0.000000e+00> : vector<1x2xf32>
    %1039 = tpu.matmul %1038, %1037, %cst_659 {dimension_numbers = #tpu.dot_dimension_numbers<[1], [0], [0], [1], [0, 0, 1, 1], [], []>} : vector<1x32xbf16>, vector<32x2xbf16>, vector<1x2xf32> -> vector<1x2xf32>
    %cst_660 = arith.constant 0.000000e+00 : f32
    %1040 = vector.broadcast %cst_660 : f32 to vector<1x2xf32>
    %1041 = arith.maximumf %1039, %1040 : vector<1x2xf32>
    %c0_661 = arith.constant 0 : index
    %c0_662 = arith.constant 0 : index
    %c0_663 = arith.constant 0 : index
    %1042 = vector.load %arg31[%c0_661, %c0_662, %c0_663] : memref<1x2x32xbf16, #tpu.memory_space<vmem>>, vector<1x2x32xbf16>
    %1043 = vector.shape_cast %1042 : vector<1x2x32xbf16> to vector<2x32xbf16>
    %1044 = arith.truncf %1041 : vector<1x2xf32> to vector<1x2xbf16>
    %cst_664 = arith.constant dense<0.000000e+00> : vector<1x32xf32>
    %1045 = tpu.matmul %1044, %1043, %cst_664 {dimension_numbers = #tpu.dot_dimension_numbers<[1], [0], [0], [1], [0, 0, 1, 1], [], []>} : vector<1x2xbf16>, vector<2x32xbf16>, vector<1x32xf32> -> vector<1x32xf32>
    %cst_665 = arith.constant 0.000000e+00 : f32
    %1046 = vector.broadcast %cst_665 : f32 to vector<1x32xf32>
    %1047 = arith.subf %1046, %1045 : vector<1x32xf32>
    %1048 = math.exp %1047 : vector<1x32xf32>
    %cst_666 = arith.constant 1.000000e+00 : f32
    %1049 = vector.broadcast %cst_666 : f32 to vector<1x32xf32>
    %1050 = arith.addf %1049, %1048 : vector<1x32xf32>
    %cst_667 = arith.constant 1.000000e+00 : f32
    %1051 = vector.broadcast %cst_667 : f32 to vector<1x32xf32>
    %1052 = arith.divf %1051, %1050 : vector<1x32xf32>
    %1053 = vector.broadcast %1052 : vector<1x32xf32> to vector<4x32xf32>
    %1054 = arith.mulf %1031, %1053 : vector<4x32xf32>
    %1055 = tpu.concatenate %976, %1054 in 1 : vector<4x36xf32>, vector<4x32xf32> -> vector<4x68xf32>
    %c0_668 = arith.constant 0 : index
    %c0_669 = arith.constant 0 : index
    %c0_670 = arith.constant 0 : index
    %1056 = vector.load %arg35[%c0_668, %c0_669, %c0_670] : memref<1x2x68xf32, #tpu.memory_space<vmem>>, vector<1x1x68xf32>
    %1057 = vector.shape_cast %1056 : vector<1x1x68xf32> to vector<1x68xf32>
    %1058 = vector.broadcast %1057 : vector<1x68xf32> to vector<4x68xf32>
    %1059 = arith.mulf %1055, %1058 : vector<4x68xf32>
    %c0_671 = arith.constant 0 : index
    %c1_672 = arith.constant 1 : index
    %c0_673 = arith.constant 0 : index
    %1060 = vector.load %arg35[%c0_671, %c1_672, %c0_673] : memref<1x2x68xf32, #tpu.memory_space<vmem>>, vector<1x1x68xf32>
    %1061 = vector.shape_cast %1060 : vector<1x1x68xf32> to vector<1x68xf32>
    %1062 = vector.broadcast %1061 : vector<1x68xf32> to vector<4x68xf32>
    %1063 = arith.addf %1059, %1062 : vector<4x68xf32>
    %cst_674 = arith.constant 0.000000e+00 : f32
    %1064 = vector.broadcast %cst_674 : f32 to vector<4x68xf32>
    %1065 = arith.maximumf %1063, %1064 : vector<4x68xf32>
    %cst_675 = arith.constant dense<0.000000e+00> : vector<68xf32>
    %1066 = vector.multi_reduction <add>, %1065, %cst_675 [0] : vector<4x68xf32> to vector<68xf32>
    %1067 = vector.shape_cast %1066 : vector<68xf32> to vector<1x68xf32>
    %cst_676 = arith.constant 4.000000e+00 : f32
    %1068 = vector.broadcast %cst_676 : f32 to vector<1x68xf32>
    %1069 = arith.divf %1067, %1068 : vector<1x68xf32>
    %1070 = tpu.concatenate %534, %1069 in 0 : vector<1x68xf32>, vector<1x68xf32> -> vector<2x68xf32>
    %c0_677 = arith.constant 0 : index
    %c0_678 = arith.constant 0 : index
    %c0_679 = arith.constant 0 : index
    %1071 = vector.load %arg36[%c0_677, %c0_678, %c0_679] : memref<1x2x68xf32, #tpu.memory_space<vmem>>, vector<1x2x68xf32>
    %1072 = vector.shape_cast %1071 : vector<1x2x68xf32> to vector<2x68xf32>
    %1073 = vector.shape_cast %1070 : vector<2x68xf32> to vector<1x2x68xf32>
    tpu.vector_store %arg36[%c0_677, %c0_678, %c0_679], %1073 {strides = array<i32>} : memref<1x2x68xf32, #tpu.memory_space<vmem>>, vector<1x2x68xf32>,
    return
  }
  func.func @transform_0(%arg0: i32) -> (i32, i32, i32) {
    %c0_i32 = arith.constant 0 : i32
    %c0_i32_0 = arith.constant 0 : i32
    %c0_i32_1 = arith.constant 0 : i32
    %c0_i32_2 = arith.constant 0 : i32
    return %c0_i32, %c0_i32_0, %c0_i32_1 : i32, i32, i32
  }
  func.func @transform_1(%arg0: i32) -> (i32, i32, i32) {
    %c0_i32 = arith.constant 0 : i32
    %c0_i32_0 = arith.constant 0 : i32
    %c0_i32_1 = arith.constant 0 : i32
    return %arg0, %c0_i32, %c0_i32_0 : i32, i32, i32
  }
  func.func @transform_2(%arg0: i32) -> (i32, i32, i32) {
    %c0_i32 = arith.constant 0 : i32
    %c0_i32_0 = arith.constant 0 : i32
    %c0_i32_1 = arith.constant 0 : i32
    return %arg0, %c0_i32, %c0_i32_0 : i32, i32, i32
  }
  func.func @transform_3(%arg0: i32) -> (i32, i32, i32) {
    %c0_i32 = arith.constant 0 : i32
    %c0_i32_0 = arith.constant 0 : i32
    %c0_i32_1 = arith.constant 0 : i32
    return %arg0, %c0_i32, %c0_i32_0 : i32, i32, i32
  }
  func.func @transform_4(%arg0: i32) -> (i32, i32, i32, i32) {
    %c0_i32 = arith.constant 0 : i32
    %c0_i32_0 = arith.constant 0 : i32
    %c0_i32_1 = arith.constant 0 : i32
    %c0_i32_2 = arith.constant 0 : i32
    return %arg0, %c0_i32, %c0_i32_0, %c0_i32_1 : i32, i32, i32, i32
  }
  func.func @transform_5(%arg0: i32) -> (i32, i32, i32) {
    %c0_i32 = arith.constant 0 : i32
    %c0_i32_0 = arith.constant 0 : i32
    %c0_i32_1 = arith.constant 0 : i32
    return %arg0, %c0_i32, %c0_i32_0 : i32, i32, i32
  }
  func.func @transform_6(%arg0: i32) -> (i32, i32, i32) {
    %c0_i32 = arith.constant 0 : i32
    %c0_i32_0 = arith.constant 0 : i32
    %c0_i32_1 = arith.constant 0 : i32
    return %arg0, %c0_i32, %c0_i32_0 : i32, i32, i32
  }
  func.func @transform_7(%arg0: i32) -> (i32, i32, i32) {
    %c0_i32 = arith.constant 0 : i32
    %c0_i32_0 = arith.constant 0 : i32
    %c0_i32_1 = arith.constant 0 : i32
    return %arg0, %c0_i32, %c0_i32_0 : i32, i32, i32
  }
  func.func @transform_8(%arg0: i32) -> (i32, i32, i32) {
    %c0_i32 = arith.constant 0 : i32
    %c0_i32_0 = arith.constant 0 : i32
    %c0_i32_1 = arith.constant 0 : i32
    return %arg0, %c0_i32, %c0_i32_0 : i32, i32, i32
  }
  func.func @transform_9(%arg0: i32) -> (i32, i32, i32) {
    %c0_i32 = arith.constant 0 : i32
    %c0_i32_0 = arith.constant 0 : i32
    %c0_i32_1 = arith.constant 0 : i32
    return %arg0, %c0_i32, %c0_i32_0 : i32, i32, i32
  }
  func.func @transform_10(%arg0: i32) -> (i32, i32, i32) {
    %c0_i32 = arith.constant 0 : i32
    %c0_i32_0 = arith.constant 0 : i32
    %c0_i32_1 = arith.constant 0 : i32
    return %arg0, %c0_i32, %c0_i32_0 : i32, i32, i32
  }
  func.func @transform_11(%arg0: i32) -> (i32, i32, i32) {
    %c0_i32 = arith.constant 0 : i32
    %c0_i32_0 = arith.constant 0 : i32
    %c0_i32_1 = arith.constant 0 : i32
    return %arg0, %c0_i32, %c0_i32_0 : i32, i32, i32
  }
  func.func @transform_12(%arg0: i32) -> (i32, i32, i32, i32) {
    %c0_i32 = arith.constant 0 : i32
    %c0_i32_0 = arith.constant 0 : i32
    %c0_i32_1 = arith.constant 0 : i32
    %c0_i32_2 = arith.constant 0 : i32
    return %arg0, %c0_i32, %c0_i32_0, %c0_i32_1 : i32, i32, i32, i32
  }
  func.func @transform_13(%arg0: i32) -> (i32, i32, i32) {
    %c0_i32 = arith.constant 0 : i32
    %c0_i32_0 = arith.constant 0 : i32
    %c0_i32_1 = arith.constant 0 : i32
    return %arg0, %c0_i32, %c0_i32_0 : i32, i32, i32
  }
  func.func @transform_14(%arg0: i32) -> (i32, i32, i32) {
    %c0_i32 = arith.constant 0 : i32
    %c0_i32_0 = arith.constant 0 : i32
    %c0_i32_1 = arith.constant 0 : i32
    return %arg0, %c0_i32, %c0_i32_0 : i32, i32, i32
  }
  func.func @transform_15(%arg0: i32) -> (i32, i32, i32) {
    %c0_i32 = arith.constant 0 : i32
    %c0_i32_0 = arith.constant 0 : i32
    %c0_i32_1 = arith.constant 0 : i32
    return %arg0, %c0_i32, %c0_i32_0 : i32, i32, i32
  }
  func.func @transform_16(%arg0: i32) -> (i32, i32, i32) {
    %c0_i32 = arith.constant 0 : i32
    %c0_i32_0 = arith.constant 0 : i32
    %c0_i32_1 = arith.constant 0 : i32
    return %arg0, %c0_i32, %c0_i32_0 : i32, i32, i32
  }
  func.func @transform_17(%arg0: i32) -> (i32, i32, i32) {
    %c0_i32 = arith.constant 0 : i32
    %c0_i32_0 = arith.constant 0 : i32
    %c0_i32_1 = arith.constant 0 : i32
    return %arg0, %c0_i32, %c0_i32_0 : i32, i32, i32
  }
  func.func @transform_18(%arg0: i32) -> (i32, i32, i32) {
    %c0_i32 = arith.constant 0 : i32
    %c0_i32_0 = arith.constant 0 : i32
    %c0_i32_1 = arith.constant 0 : i32
    return %arg0, %c0_i32, %c0_i32_0 : i32, i32, i32
  }
  func.func @transform_19(%arg0: i32) -> (i32, i32, i32) {
    %c0_i32 = arith.constant 0 : i32
    %c0_i32_0 = arith.constant 0 : i32
    %c0_i32_1 = arith.constant 0 : i32
    return %arg0, %c0_i32, %c0_i32_0 : i32, i32, i32
  }
  func.func @transform_20(%arg0: i32) -> (i32, i32, i32, i32) {
    %c0_i32 = arith.constant 0 : i32
    %c0_i32_0 = arith.constant 0 : i32
    %c0_i32_1 = arith.constant 0 : i32
    %c0_i32_2 = arith.constant 0 : i32
    return %arg0, %c0_i32, %c0_i32_0, %c0_i32_1 : i32, i32, i32, i32
  }
  func.func @transform_21(%arg0: i32) -> (i32, i32, i32) {
    %c0_i32 = arith.constant 0 : i32
    %c0_i32_0 = arith.constant 0 : i32
    %c0_i32_1 = arith.constant 0 : i32
    return %arg0, %c0_i32, %c0_i32_0 : i32, i32, i32
  }
  func.func @transform_22(%arg0: i32) -> (i32, i32, i32) {
    %c0_i32 = arith.constant 0 : i32
    %c0_i32_0 = arith.constant 0 : i32
    %c0_i32_1 = arith.constant 0 : i32
    return %arg0, %c0_i32, %c0_i32_0 : i32, i32, i32
  }
  func.func @transform_23(%arg0: i32) -> (i32, i32, i32) {
    %c0_i32 = arith.constant 0 : i32
    %c0_i32_0 = arith.constant 0 : i32
    %c0_i32_1 = arith.constant 0 : i32
    return %arg0, %c0_i32, %c0_i32_0 : i32, i32, i32
  }
  func.func @transform_24(%arg0: i32) -> (i32, i32, i32) {
    %c0_i32 = arith.constant 0 : i32
    %c0_i32_0 = arith.constant 0 : i32
    %c0_i32_1 = arith.constant 0 : i32
    return %arg0, %c0_i32, %c0_i32_0 : i32, i32, i32
  }
  func.func @transform_25(%arg0: i32) -> (i32, i32, i32) {
    %c0_i32 = arith.constant 0 : i32
    %c0_i32_0 = arith.constant 0 : i32
    %c0_i32_1 = arith.constant 0 : i32
    return %arg0, %c0_i32, %c0_i32_0 : i32, i32, i32
  }
  func.func @transform_26(%arg0: i32) -> (i32, i32, i32) {
    %c0_i32 = arith.constant 0 : i32
    %c0_i32_0 = arith.constant 0 : i32
    %c0_i32_1 = arith.constant 0 : i32
    return %arg0, %c0_i32, %c0_i32_0 : i32, i32, i32
  }
  func.func @transform_27(%arg0: i32) -> (i32, i32, i32) {
    %c0_i32 = arith.constant 0 : i32
    %c0_i32_0 = arith.constant 0 : i32
    %c0_i32_1 = arith.constant 0 : i32
    return %arg0, %c0_i32, %c0_i32_0 : i32, i32, i32
  }
  func.func @transform_28(%arg0: i32) -> (i32, i32, i32, i32) {
    %c0_i32 = arith.constant 0 : i32
    %c0_i32_0 = arith.constant 0 : i32
    %c0_i32_1 = arith.constant 0 : i32
    %c0_i32_2 = arith.constant 0 : i32
    return %arg0, %c0_i32, %c0_i32_0, %c0_i32_1 : i32, i32, i32, i32
  }
  func.func @transform_29(%arg0: i32) -> (i32, i32, i32) {
    %c0_i32 = arith.constant 0 : i32
    %c0_i32_0 = arith.constant 0 : i32
    %c0_i32_1 = arith.constant 0 : i32
    return %arg0, %c0_i32, %c0_i32_0 : i32, i32, i32
  }
  func.func @transform_30(%arg0: i32) -> (i32, i32, i32) {
    %c0_i32 = arith.constant 0 : i32
    %c0_i32_0 = arith.constant 0 : i32
    %c0_i32_1 = arith.constant 0 : i32
    return %arg0, %c0_i32, %c0_i32_0 : i32, i32, i32
  }
  func.func @transform_31(%arg0: i32) -> (i32, i32, i32) {
    %c0_i32 = arith.constant 0 : i32
    %c0_i32_0 = arith.constant 0 : i32
    %c0_i32_1 = arith.constant 0 : i32
    return %arg0, %c0_i32, %c0_i32_0 : i32, i32, i32
  }
  func.func @transform_32(%arg0: i32) -> (i32, i32, i32, i32) {
    %c0_i32 = arith.constant 0 : i32
    %c0_i32_0 = arith.constant 0 : i32
    %c0_i32_1 = arith.constant 0 : i32
    %c0_i32_2 = arith.constant 0 : i32
    return %arg0, %c0_i32, %c0_i32_0, %c0_i32_1 : i32, i32, i32, i32
  }
  func.func @transform_33(%arg0: i32) -> (i32, i32, i32) {
    %c0_i32 = arith.constant 0 : i32
    %c0_i32_0 = arith.constant 0 : i32
    %c0_i32_1 = arith.constant 0 : i32
    return %arg0, %c0_i32, %c0_i32_0 : i32, i32, i32
  }
  func.func @transform_34(%arg0: i32) -> (i32, i32, i32) {
    %c0_i32 = arith.constant 0 : i32
    %c0_i32_0 = arith.constant 0 : i32
    %c0_i32_1 = arith.constant 0 : i32
    return %arg0, %c0_i32, %c0_i32_0 : i32, i32, i32
  }
  func.func @transform_35(%arg0: i32) -> (i32, i32, i32) {
    %c0_i32 = arith.constant 0 : i32
    %c0_i32_0 = arith.constant 0 : i32
    %c0_i32_1 = arith.constant 0 : i32
    return %arg0, %c0_i32, %c0_i32_0 : i32, i32, i32
  }
}

</mosaic_0001>

<bundles_post_ra>
// kernel: densenet_forward.3
= control target key start
LH: loop header
LB: loop body
LE: loop exit
PB: predicated region body
PF: predicated region fallthrough
CT: control target
= control target key end

     0   :  { %10 = vsyncpa [#allocation3], 0  ;;  %s191_s21 = smov 68   ;;  %s285_s0 = inlined_call_operand.vmem [shape: f32[2,2,68], index: 0, kind: input, shape index: {}]   ;;  %s286_s1 = inlined_call_operand.vmem [shape: f32[136,6], index: 1, kind: input, shape index: {}]   ;;  %s287_s2 = inlined_call_operand.vmem [shape: f32[1,6], index: 2, kind: input, shape index: {}]   ;;  %s288_s3 = inlined_call_operand.hbm [shape: f32[2,6], index: 3, kind: output, shape index: {0}]   ;;  %s289_s4 = inlined_call_operand.hbm [shape: f32[2,136], index: 4, kind: output, shape index: {1}]  }
   0x1   :  { %v133_v0 = vld [vmem:[%s285_s0 + $0x2] sm:$0x3]  ;;  %v50_v1 = vld [vmem:[%s286_s1 + $0x78] sm:$0xff]  ;;  %v49_v2 = vld [vmem:[%s286_s1 + $0x70] sm:$0xff] }
   0x2   :  { %22 = vrot.lane.b32.xlu0 %v133_v0, %s191_s21  ;;  %59 = vmatpush.msra.mxu0 %v50_v1  ;;  %v48_v3 = vld [vmem:[%s286_s1 + $0x68] sm:$0xff]  ;;  %v47_v4 = vld [vmem:[%s286_s1 + $0x60] sm:$0xff] }
   0x4   :  { %60 = vmatpush.msra.mxu0 %v49_v2 }
   0x6   :  { %61 = vmatpush.msra.mxu0 %v48_v3 }
   0x7   :  { %11 = vsyncpa [#allocation5], 0  ;;  %v46_v5 = vld [vmem:[%s286_s1 + $0x58] sm:$0xff]  ;;  %v45_v6 = vld [vmem:[%s286_s1 + $0x50] sm:$0xff]  ;;  %vm56_vm0 = vcmask 64512   ;;  %vm25_vm1 = vcmask 556032  }
   0x8   :  { %62 = vmatpush.msra.mxu0 %v47_v4  ;;  %v44_v7 = vld [vmem:[%s286_s1 + $0x48] sm:$0xff]  ;;  %v43_v8 = vld [vmem:[%s286_s1 + $0x40] sm:$0xff]  ;;  %v42_v9 = vld [vmem:[%s286_s1 + $0x38] sm:$0xff]  ;;  %vm29_vm2 = vcmask 1041408   ;;  %vm32_vm3 = vcmask 60418   ;;  %s192_s28 = smov [#allocation4]  }
   0x9   :  { %v41_v10 = vld [vmem:[%s286_s1 + $0x30] sm:$0xff]  ;;  %v40_v11 = vld [vmem:[%s286_s1 + $0x28] sm:$0xff]  ;;  %v39_v12 = vld [vmem:[%s286_s1 + $0x20] sm:$0xff]  ;;  %s117_s29 = sshll.u32 %s192_s28, 4  ;;  %s119_s5 = sshll.u32 %s289_s4, 4  ;;  %vm99_vm5 = vcmask 41984   ;;  %s118_s29 = int_to_ptr.vmem [resolvable:$true] %s117_s29  ;;  %s120_s5 = int_to_ptr.hbm [resolvable:$true] %s119_s5 }
   0xa   :  { %63 = vmatpush.msra.mxu0 %v46_v5  ;;  %v38_v13 = vld [vmem:[%s286_s1 + $0x18] sm:$0xff]  ;;  %v37_v14 = vld [vmem:[%s286_s1 + $0x10] sm:$0xff]  ;;  %v36_v15 = vld [vmem:[%s286_s1 + $0x8] sm:$0xff]  ;;  %s193_s7 = smov [#allocation2]   ;;  %s108_s11 = sshll.u32 %s288_s3, 4  ;;  %s109_s11 = int_to_ptr.hbm [resolvable:$true] %s108_s11 }
   0xb   :  { %v51_v16 = vld [vmem:[%s286_s1 + $0x80] sm:$0xff]  ;;  %vm33_vm4 = vmor %vm32_vm3, %vm29_vm2  ;;  %s106_s8 = sshll.u32 %s193_s7, 4  ;;  %s107_s8 = int_to_ptr.vmem [resolvable:$true] %s106_s8 }
   0xc   :  { %64 = vmatpush.msra.mxu0 %v45_v6  ;;  %94 = vmatpush.msra.mxu1 %v51_v16  ;;  %v35_v17 = vld [vmem:[%s286_s1] sm:$0xff] }
   0xd   :  { %v18_v18 = vld [vmem:[%s285_s0] sm:$0x3] }
   0xe   :  { %65 = vmatpush.msra.mxu0 %v44_v7  ;;  %v138_v23 = vld [vmem:[%s287_s2] ss:$0 sm:$0xff] }
  0x10   :  { %66 = vmatpush.msra.mxu0 %v43_v8 }
  0x12   :  { %67 = vmatpush.msra.mxu0 %v42_v9 }
  0x14   :  { %68 = vmatpush.msra.mxu0 %v41_v10 }
  0x16   :  { %69 = vmatpush.msra.mxu0 %v40_v11 }
  0x18   :  { %70 = vmatpush.msra.mxu0 %v39_v12 }
  0x1a   :  { %71 = vmatpush.msra.mxu0 %v38_v13 }
  0x1c   :  { %72 = vmatpush.msra.mxu0 %v37_v14 }
  0x1e   :  { %73 = vmatpush.msra.mxu0 %v36_v15 }
  0x20   :  { %74 = vmatpush.msra.mxu0 %v35_v17 }
  0x74   :  { %v23_v19 = vpop.permute.xlu0 %22 }
  0x75   :  { %v28_v20 = vrot.slane %v23_v19, 6  ;;  %134 = vmatmul.msk.f32.vlgmr.msra.gmra.mxu1 %vm56_vm0, %v23_v19  ;;  %v26_v21 = vsel %vm25_vm1, %v18_v18, %v23_v19 }
  0x76   :  { %75 = vmatmul.f32.vlgmr.msra.gmra.mxu0 %v26_v21 }
  0x77   :  { %v30_v22 = vsel %vm29_vm2, %v26_v21, %v28_v20 }
  0x78   :  { %34 = vst.msk [vmem:[#allocation4] sm:$0xf] %vm33_vm4, %v30_v22 }
  0x79   :  { %122 = dma.vmem_to_hbm [thread:$0]  %s118_s29, 64, %s120_s5, [#allocation5]  }
  0xf2   :  { %v96_v26 = vpop.f32.mrf.mxu1 }
  0xf3   :  { %v76_v24 = vpop.f32.mrf.mxu0 }
  0xf4   :  { %v77_v25 = vadd.f32 %v138_v23, %v76_v24 }
  0xf6   :  { %v97_v27 = vadd.f32 %v96_v26, %v77_v25 }
  0xf8   :  { %100 = vst.msk [vmem:[#allocation2] sm:$0x3] %vm99_vm5, %v97_v27 }
  0xf9   :  { %111 = dma.vmem_to_hbm [thread:$0]  %s107_s8, 32, %s109_s11, [#allocation3]  }
  0xfa   :  { %187 = dma.done.wait [#allocation3], 32  }
  0xfb   :  { %188 = vsyncadd [#allocation3], 4294967264 }
  0xfc   :  { %189 = dma.done.wait [#allocation5], 64  }
  0xfd   :  { %190 = vsyncadd [#allocation5], 4294967232 }
  0xfe   :  { %131 = vsyncpa [#allocation3], 1 }
  0xff   :  { %132 = vsyncpa [#allocation5], 1 }

// kernel: densenet_forward.2
= control target key start
LH: loop header
LB: loop body
LE: loop exit
PB: predicated region body
PF: predicated region fallthrough
CT: control target
= control target key end

     0   :  { %s9403_s6 = smov 1   ;;  %s9404_s10 = smov 2   ;;  %s11264_s0 = inlined_call_operand.smem [shape: u32[36], index: -1, kind: input, shape index: {}] }
   0x1   :  { %s9458_s5 = sld [smem:[%s11264_s0]]   ;;  %s9405_s14 = smov 3  }
   0x2   :  { %s9463_s9 = sld [smem:[%s11264_s0 + %s9403_s6]]   ;;  %s9406_s18 = smov 4  }
   0x3   :  { %s9468_s13 = sld [smem:[%s11264_s0 + %s9404_s10]]   ;;  %s9407_s22 = smov 5  }
   0x4   :  { %s9473_s17 = sld [smem:[%s11264_s0 + %s9405_s14]]   ;;  %s9408_s26 = smov 6  }
   0x5   :  { %s9478_s21 = sld [smem:[%s11264_s0 + %s9406_s18]]   ;;  %s9409_s30 = smov 7  }
   0x6   :  { %s9483_s25 = sld [smem:[%s11264_s0 + %s9407_s22]]   ;;  %s9410_s4 = smov 8  }
   0x7   :  { %s9488_s29 = sld [smem:[%s11264_s0 + %s9408_s26]]   ;;  %s9411_s10 = smov 9  }
   0x8   :  { %11338 = sst [smem:[#allocation2_spill]] %s9463_s9  ;;  %s9412_s15 = smov 10  }
   0x9   :  { %11339 = sst [smem:[#allocation3_spill]] %s9468_s13  ;;  %s9413_s20 = smov 11  }
   0xa   :  { %11340 = sst [smem:[#allocation4_spill]] %s9473_s17  ;;  %s9414_s26 = smov 12  }
   0xb   :  { %11341 = sst [smem:[#allocation5_spill]] %s9478_s21  ;;  %s9415_s1 = smov 13  }
   0xc   :  { %11342 = sst [smem:[#allocation6_spill]] %s9483_s25  ;;  %s9416_s7 = smov 14  }
   0xd   :  { %11343 = sst [smem:[#allocation7_spill]] %s9488_s29  ;;  %s9418_s22 = smov 16  }
   0xe   :  { %s9493_s3 = sld [smem:[%s11264_s0 + %s9409_s30]]   ;;  %s9419_s28 = smov 17  }
   0xf   :  { %s9498_s8 = sld [smem:[%s11264_s0 + %s9410_s4]]  }
  0x10   :  { %s9503_s14 = sld [smem:[%s11264_s0 + %s9411_s10]]  }
  0x11   :  { %s9508_s19 = sld [smem:[%s11264_s0 + %s9412_s15]]   ;;  %s9417_s15 = smov 15  }
  0x12   :  { %s9513_s24 = sld [smem:[%s11264_s0 + %s9413_s20]]  }
  0x13   :  { %s9518_s30 = sld [smem:[%s11264_s0 + %s9414_s26]]  }
  0x14   :  { %11344 = sst [smem:[#allocation8_spill]] %s9493_s3 }
  0x15   :  { %11345 = sst [smem:[#allocation9_spill]] %s9498_s8 }
  0x16   :  { %11346 = sst [smem:[#allocation10_spill]] %s9503_s14 }
  0x17   :  { %11347 = sst [smem:[#allocation11_spill]] %s9508_s19 }
  0x18   :  { %11348 = sst [smem:[#allocation12_spill]] %s9513_s24 }
  0x19   :  { %11349 = sst [smem:[#allocation13_spill]] %s9518_s30 }
  0x1a   :  { %s9523_s6 = sld [smem:[%s11264_s0 + %s9415_s1]]  }
  0x1b   :  { %s9528_s12 = sld [smem:[%s11264_s0 + %s9416_s7]]   ;;  %s9420_s7 = smov 18  }
  0x1c   :  { %s9533_s20 = sld [smem:[%s11264_s0 + %s9417_s15]]   ;;  %s9421_s15 = smov 19  }
  0x1d   :  { %s9538_s27 = sld [smem:[%s11264_s0 + %s9418_s22]]   ;;  %s9422_s22 = smov 20  }
  0x1e   :  { %s9543_s4 = sld [smem:[%s11264_s0 + %s9419_s28]]   ;;  %s9423_s28 = smov 21  }
  0x20   :  { %11350 = sst [smem:[#allocation14_spill]] %s9523_s6 }
  0x21   :  { %11351 = sst [smem:[#allocation15_spill]] %s9528_s12 }
  0x22   :  { %11352 = sst [smem:[#allocation16_spill]] %s9533_s20 }
  0x23   :  { %11353 = sst [smem:[#allocation17_spill]] %s9538_s27 }
  0x24   :  { %11354 = sst [smem:[#allocation18_spill]] %s9543_s4 }
  0x25   :  { %s9548_s12 = sld [smem:[%s11264_s0 + %s9420_s7]]   ;;  %s9424_s7 = smov 22  }
  0x26   :  { %s9553_s20 = sld [smem:[%s11264_s0 + %s9421_s15]]   ;;  %s9425_s15 = smov 23  }
  0x27   :  { %s9558_s27 = sld [smem:[%s11264_s0 + %s9422_s22]]   ;;  %s9426_s22 = smov 24  }
  0x28   :  { %s9563_s4 = sld [smem:[%s11264_s0 + %s9423_s28]]   ;;  %s9427_s28 = smov 25  }
  0x2b   :  { %11355 = sst [smem:[#allocation19_spill]] %s9548_s12 }
  0x2c   :  { %11356 = sst [smem:[#allocation20_spill]] %s9553_s20 }
  0x2d   :  { %11357 = sst [smem:[#allocation21_spill]] %s9558_s27 }
  0x2e   :  { %11358 = sst [smem:[#allocation22_spill]] %s9563_s4 }
  0x2f   :  { %s9568_s12 = sld [smem:[%s11264_s0 + %s9424_s7]]   ;;  %s9428_s7 = smov 26  }
  0x30   :  { %s9573_s20 = sld [smem:[%s11264_s0 + %s9425_s15]]   ;;  %s9429_s15 = smov 27  }
  0x31   :  { %s9578_s27 = sld [smem:[%s11264_s0 + %s9426_s22]]   ;;  %s9430_s22 = smov 28  }
  0x32   :  { %s9583_s4 = sld [smem:[%s11264_s0 + %s9427_s28]]   ;;  %s9431_s28 = smov 29  }
  0x35   :  { %11359 = sst [smem:[#allocation23_spill]] %s9568_s12 }
  0x36   :  { %11360 = sst [smem:[#allocation24_spill]] %s9573_s20 }
  0x37   :  { %11361 = sst [smem:[#allocation25_spill]] %s9578_s27 }
  0x38   :  { %11362 = sst [smem:[#allocation26_spill]] %s9583_s4 }
  0x39   :  { %s9588_s12 = sld [smem:[%s11264_s0 + %s9428_s7]]   ;;  %s9432_s7 = smov 30  }
  0x3a   :  { %s9593_s20 = sld [smem:[%s11264_s0 + %s9429_s15]]   ;;  %s9433_s15 = smov 31  }
  0x3b   :  { %s9598_s27 = sld [smem:[%s11264_s0 + %s9430_s22]]   ;;  %s9434_s22 = smov 32  }
  0x3c   :  { %s9603_s4 = sld [smem:[%s11264_s0 + %s9431_s28]]   ;;  %s9435_s28 = smov 33  }
  0x3f   :  { %11363 = sst [smem:[#allocation27_spill]] %s9588_s12 }
  0x40   :  { %11364 = sst [smem:[#allocation28_spill]] %s9593_s20 }
  0x41   :  { %11365 = sst [smem:[#allocation29_spill]] %s9598_s27 }
  0x42   :  { %11366 = sst [smem:[#allocation30_spill]] %s9603_s4 }
  0x43   :  { %s9608_s12 = sld [smem:[%s11264_s0 + %s9432_s7]]   ;;  %s9436_s7 = smov 34  }
  0x44   :  { %s9613_s20 = sld [smem:[%s11264_s0 + %s9433_s15]]   ;;  %s9437_s15 = smov 35  }
  0x45   :  { %s9618_s27 = sld [smem:[%s11264_s0 + %s9434_s22]]   ;;  %s9635_s22 = smov 0  }
  0x46   :  { %s9623_s4 = sld [smem:[%s11264_s0 + %s9435_s28]]  }
  0x47   :  { %s9633_s6 = sld [smem:[%s11264_s0 + %s9437_s15]]  }
  0x49   :  { %11367 = sst [smem:[#allocation31_spill]] %s9608_s12 }
  0x4a   :  { %11368 = sst [smem:[#allocation32_spill]] %s9613_s20 }
  0x4b   :  { %11369 = sst [smem:[#allocation33_spill]] %s9618_s27 }
  0x4c   :  { %11370 = sst [smem:[#allocation34_spill]] %s9623_s4 }
  0x4d   :  { %s9628_s12 = sld [smem:[%s11264_s0 + %s9436_s7]]  }
  0x4e   :  { %11371 = sst [smem:[#allocation35_spill]] %s9633_s6 }
  0x4f LB: > { %11372 = sst [smem:[#allocation36_spill]] %s9401_s22  ;;  %s7433_s23 = sadd.s32 4294967295, %s9401_s22   ;;  %s9401_s22 = sphi %s9635_s22, %s81_s22  }
  0x50   : > { %p7437_p0 = scmp.ge.s32.totalorder %s9401_s22, 1  ;;  %p1281_p1 = scmp.lt.s32.totalorder %s9401_s22, 3 }
  0x52   : > { %p1282_p2 = pnand %p7437_p0, %p1281_p1 }
  0x54   : > { %1285 = sbr.rel (%p1282_p2) target bundleno = 9005 (0x232d), region = 160 }
  0x59   : > { %p1511_p3 = scmp.lt.s32.totalorder %s7433_s23, 1  ;;  %s11373_s20 = sld [smem:[#allocation32_spill]]  ;;  %vm1714_vm0 = vcmask 1042432   ;;  %vm11282_vm1 = vcmask 1043456   ;;  %v9438_v0 = vmov 65535   ;;  %v1664_v3 = vld [vmem:[%s9458_s5] sm:$0xff]  ;;  %v1770_v45 = vlaneseq }
  0x5a   : > { %v1716_v1 = vsel %vm1714_vm0, 4294967295, %v9438_v0  ;;  %v1665_v4 = vld [vmem:[%s9458_s5 + $0x8] sm:$0xff]  ;;  %vm11275_vm2 = vcmask 56320   ;;  %v1666_v8 = vld [vmem:[%s9458_s5 + $0x10] sm:$0xff]  ;;  %v1667_v9 = vld [vmem:[%s9458_s5 + $0x18] sm:$0xff]  ;;  %v11276_v52 = vmov 1.0  }
  0x5b   : > { %s11526_s23 = smov (!%p1511_p3, %s7433_s23), 1  ;;  %v1717_v2 = vsel %vm11282_vm1, %v1716_v1, 0  ;;  %v1681_v7 = vpack.c.bf16 %v1665_v4, %v1664_v3  ;;  %v1682_v10 = vpack.c.bf16 %v1667_v9, %v1666_v8  ;;  %v1668_v11 = vld [vmem:[%s9458_s5 + $0x20] sm:$0xff]  ;;  %v1669_v12 = vld [vmem:[%s9458_s5 + $0x28] sm:$0xff]  ;;  %v1670_v14 = vld [vmem:[%s9458_s5 + $0x30] sm:$0xff]  ;;  %v9705_v46 = vshrl.u32 %v1770_v45, 7 }
  0x5c   : > { %s7469_s0 = sshll.u32 %s11526_s23, 2  ;;  %v1683_v13 = vpack.c.bf16 %v1669_v12, %v1668_v11  ;;  %v1671_v15 = vld [vmem:[%s9458_s5 + $0x38] sm:$0xff]  ;;  %v1672_v17 = vld [vmem:[%s9458_s5 + $0x40] sm:$0xff]  ;;  %v1673_v18 = vld [vmem:[%s9458_s5 + $0x48] sm:$0xff]  ;;  %v9718_v48 = vand.u32 127, %v1770_v45  ;;  %s11374_s27 = sld [smem:[#allocation33_spill]] }
  0x5d   : > { %v1684_v16 = vpack.c.bf16 %v1671_v15, %v1670_v14  ;;  %v1685_v19 = vpack.c.bf16 %v1673_v18, %v1672_v17  ;;  %v1674_v20 = vld [vmem:[%s9458_s5 + $0x50] sm:$0xff]  ;;  %v1675_v21 = vld [vmem:[%s9458_s5 + $0x58] sm:$0xff]  ;;  %v1676_v23 = vld [vmem:[%s9458_s5 + $0x60] sm:$0xff]  ;;  %v9712_v47 = vmul.u32 2, %v9705_v46  ;;  %v1772_v50 = vadd.s32 8, %v9705_v46  ;;  %s9043_s28 = smul.u32 96, %s11526_s23 }
  0x5e   : > { %v1686_v22 = vpack.c.bf16 %v1675_v21, %v1674_v20  ;;  %v1677_v24 = vld [vmem:[%s9458_s5 + $0x68] sm:$0xff]  ;;  %v1678_v26 = vld [vmem:[%s9458_s5 + $0x70] sm:$0xff]  ;;  %v1679_v27 = vld [vmem:[%s9458_s5 + $0x78] sm:$0xff]  ;;  %v1773_v54 = vadd.s32 16, %v9705_v46  ;;  %v1774_v57 = vadd.s32 24, %v9705_v46  ;;  %v1775_v60 = vadd.s32 32, %v9705_v46 }
  0x5f   : > { %s1645_s26 = scalar_lea.vmem %s11373_s20, %s7469_s0  ;;  %v1687_v25 = vpack.c.bf16 %v1677_v24, %v1676_v23  ;;  %v1688_v28 = vpack.c.bf16 %v1679_v27, %v1678_v26  ;;  %v9721_v49 = vadd.s32 1, %v9712_v47  ;;  %vm11306_vm3 = vcmp.eq.s32.totalorder %v9718_v48, %v9712_v47  ;;  %s11378_s4 = sld [smem:[#allocation34_spill]] }
  0x60   : > { %v1680_v5 = vld [vmem:[%s1645_s26] sm:$0xf]  ;;  %v9732_v51 = vmul.u32 2, %v1772_v50  ;;  %v9752_v55 = vmul.u32 2, %v1773_v54  ;;  %v9772_v58 = vmul.u32 2, %v1774_v57  ;;  %v9794_v61 = vmul.u32 2, %v1775_v60 }
  0x61   : > { %v9650_v6 = vand.u32 %v1717_v2, %v1680_v5  ;;  %vm11302_vm4 = vcmp.eq.s32.totalorder %v9718_v48, %v9721_v49  ;;  %v1776_v63 = vadd.s32 40, %v9705_v46  ;;  %v1777_v2 = vadd.s32 48, %v9705_v46  ;;  %s9972_s2 = sshll.u32 %s11526_s23, 1  ;;  %s11379_s9 = sld [smem:[#allocation2_spill]] }
  0x62   : > { %v9745_v53 = vadd.s32 1, %v9732_v51  ;;  %vm11305_vm5 = vcmp.eq.s32.totalorder %v9718_v48, %v9732_v51  ;;  %v9763_v56 = vadd.s32 1, %v9752_v55  ;;  %vm11304_vm7 = vcmp.eq.s32.totalorder %v9718_v48, %v9752_v55  ;;  %s9919_s1 = scalar_lea.vmem %s11374_s27, %s9043_s28  ;;  %s11385_s13 = sld [smem:[#allocation3_spill]] }
  0x63   : > { %1728 = vmatpush.bf16.msra.mxu0 %v9650_v6  ;;  %v9785_v59 = vadd.s32 1, %v9772_v58  ;;  %vm11303_vm9 = vcmp.eq.s32.totalorder %v9718_v48, %v9772_v58  ;;  %v9807_v62 = vadd.s32 1, %v9794_v61  ;;  %vm11272_vm11 = vcmp.eq.s32.totalorder %v9718_v48, %v9794_v61  ;;  %v8830_v14 = vld [vmem:[%s9919_s1 + $0x38] sm:$0xff]  ;;  %v8828_v17 = vld [vmem:[%s9919_s1 + $0x28] sm:$0xff]  ;;  %s11386_s17 = sld [smem:[#allocation4_spill]]  ;;  %s8818_s15 = sshll.u32 %s11526_s23, 5 }
  0x64   : > { %vm11301_vm6 = vcmp.eq.s32.totalorder %v9718_v48, %v9745_v53  ;;  %vm11293_vm8 = vcmp.eq.s32.totalorder %v9718_v48, %v9763_v56  ;;  %v9816_v0 = vmul.u32 2, %v1776_v63  ;;  %v9835_v3 = vmul.u32 2, %v1777_v2  ;;  %1993 = vmatpush.bf16.msra.mxu3 %v8830_v14  ;;  %s11393_s21 = sld [smem:[#allocation5_spill]]  ;;  %s10106_s18 = smul.u32 320, %s11526_s23 }
  0x65   : > { %vm11288_vm10 = vcmp.eq.s32.totalorder %v9718_v48, %v9785_v59  ;;  %vm11266_vm12 = vcmp.eq.s32.totalorder %v9718_v48, %v9807_v62  ;;  %v1778_v5 = vadd.s32 56, %v9705_v46  ;;  %v9879_v9 = vadd.s32 2, %v9712_v47  ;;  %s9976_s7 = scalar_lea.vmem %s11378_s4, %s9972_s2  ;;  %s11398_s25 = sld [smem:[#allocation6_spill]] }
  0x66   : > { %7474 = vmatmul.msk.bf16.vlgmr.msra.gmra.mxu0 %vm11275_vm2, %v1681_v7  ;;  %v9828_v1 = vadd.s32 1, %v9816_v0  ;;  %vm11271_vm13 = vcmp.eq.s32.totalorder %v9718_v48, %v9816_v0  ;;  %v9846_v4 = vadd.s32 1, %v9835_v3  ;;  %vm11270_vm15 = vcmp.eq.s32.totalorder %v9718_v48, %v9835_v3  ;;  %s10203_s26 = sshll.u32 %s11526_s23, 4  ;;  %s11399_s29 = sld [smem:[#allocation7_spill]] }
  0x67   : > { %v9853_v7 = vmul.u32 2, %v1778_v5  ;;  %v9897_v11 = vadd.s32 2, %v9752_v55  ;;  %v9906_v12 = vadd.s32 2, %v9772_v58  ;;  %v9929_v15 = vadd.s32 2, %v9816_v0  ;;  %s10028_s10 = scalar_lea.vmem %s11379_s9, %s9972_s2  ;;  %s11400_s3 = sld [smem:[#allocation8_spill]] }
  0x68   : > { %vm11265_vm14 = vcmp.eq.s32.totalorder %v9718_v48, %v9828_v1  ;;  %vm11267_vm0 = vcmp.eq.s32.totalorder %v9718_v48, %v9846_v4  ;;  %v9940_v18 = vadd.s32 2, %v9835_v3  ;;  %vm11283_vm1 = vcmask 531456   ;;  %s10095_s11 = scalar_lea.vmem %s11385_s13, %s9972_s2  ;;  %s11401_s8 = sld [smem:[#allocation9_spill]] }
  0x69   : > { %v9864_v8 = vadd.s32 1, %v9853_v7  ;;  %11375 = vst [vmem:[#allocation37_spill] sm:$0xff] %v9929_v15  ;;  %v9950_v20 = vadd.s32 2, %v9853_v7  ;;  %s10099_s16 = scalar_lea.vmem %s11386_s17, %s8818_s15  ;;  %s9038_s9 = smul.u32 48, %s11526_s23 }
  0x6a   : > { %11376 = vst [vmem:[#allocation38_spill] sm:$0xff] %v9940_v18  ;;  %s10110_s0 = scalar_lea.vmem %s11393_s21, %s10106_s18  ;;  %s11402_s14 = sld [smem:[#allocation10_spill]] }
  0x6b   : > { %11377 = vst [vmem:[#allocation39_spill] sm:$0xff] %v9950_v20  ;;  %s10207_s28 = scalar_lea.vmem %s11398_s25, %s10203_s26  ;;  %s11403_s19 = sld [smem:[#allocation11_spill]] }
  0x6c   : > { %s1536_s15 = scalar_lea.vmem %s11399_s29, %s11526_s23  ;;  %s11404_s24 = sld [smem:[#allocation12_spill]] }
  0x6d   : > { %s10240_s4 = scalar_lea.vmem %s11400_s3, %s9972_s2  ;;  %s11405_s30 = sld [smem:[#allocation13_spill]] }
  0x6e   : > { %s11409_s21 = sld [smem:[#allocation17_spill]]  ;;  %s9040_s25 = smul.u32 40, %s11526_s23 }
  0x71   : > { %s10286_s3 = scalar_lea.vmem %s11403_s19, %s9972_s2  ;;  %s11408_s19 = sld [smem:[#allocation16_spill]] }
  0x76   : > { %7475 = vmatmul.msk.bf16.gmra.mxu0 %vm11275_vm2, %v1682_v10  ;;  %v9888_v10 = vadd.s32 2, %v9732_v51 }
  0x86   : > { %7476 = vmatmul.msk.bf16.gmra.mxu0 %vm11275_vm2, %v1683_v13  ;;  %v9916_v13 = vadd.s32 2, %v9794_v61 }
  0x96   : > { %7477 = vmatmul.msk.bf16.gmra.mxu0 %vm11275_vm2, %v1684_v16  ;;  %v8829_v16 = vld [vmem:[%s9919_s1 + $0x30] sm:$0xff] }
  0x97   : > { %1994 = vmatpush.bf16.msra.mxu3 %v8829_v16 }
  0x9b   : > { %1995 = vmatpush.bf16.msra.mxu3 %v8828_v17 }
  0xa6   : > { %7478 = vmatmul.msk.bf16.gmra.mxu0 %vm11275_vm2, %v1685_v19  ;;  %v8827_v19 = vld [vmem:[%s9919_s1 + $0x20] sm:$0xff] }
  0xa7   : > { %1996 = vmatpush.bf16.msra.mxu3 %v8827_v19 }
  0xb6   : > { %7479 = vmatmul.msk.bf16.gmra.mxu0 %vm11275_vm2, %v1686_v22 }
  0xc6   : > { %7480 = vmatmul.msk.bf16.gmra.mxu0 %vm11275_vm2, %v1687_v25 }
  0xd6   : > { %7481 = vmatmul.msk.bf16.gmra.mxu0 %vm11275_vm2, %v1688_v28  ;;  %vm1976_vm2 = vcmask 523264  }
  0xe3   : > { %v9675_v29 = vpop.f32.mrf.mxu0 }
  0xeb   : > { %v9677_v30 = vpop.f32.mrf.mxu0 }
  0xf3   : > { %v9679_v31 = vpop.f32.mrf.mxu0 }
  0xfb   : > { %v9681_v32 = vpop.f32.mrf.mxu0 }
 0x103   : > { %v9683_v33 = vpop.f32.mrf.mxu0 }
 0x10b   : > { %v9685_v34 = vpop.f32.mrf.mxu0 }
 0x113   : > { %v9687_v35 = vpop.f32.mrf.mxu0 }
 0x11b   : > { %v9689_v36 = vpop.f32.mrf.mxu0 }
 0x123   : > { %v9691_v37 = vpop.f32.mrf.mxu0 }
 0x12b   : > { %v9693_v38 = vpop.f32.mrf.mxu0 }
 0x133   : > { %v9695_v39 = vpop.f32.mrf.mxu0 }
 0x13b   : > { %v1757_v40 = vpop.f32.mrf.mxu0 }
 0x143   : > { %v1760_v41 = vpop.f32.mrf.mxu0 }
 0x14b   : > { %v1762_v42 = vpop.f32.mrf.mxu0 }
 0x153   : > { %v1765_v43 = vpop.f32.mrf.mxu0 }
 0x15b   : > { %v1767_v44 = vpop.f32.mrf.mxu0 }
 0x15c   : > { %1813 = vmatpush.msra.mxu1 %v1767_v44  ;;  %1898 = vmatpush.msra.mxu2 %v1767_v44 }
 0x15e   : > { %1814 = vmatpush.msra.mxu1 %v1765_v43  ;;  %1899 = vmatpush.msra.mxu2 %v1765_v43 }
 0x160   : > { %1815 = vmatpush.msra.mxu1 %v1762_v42  ;;  %1900 = vmatpush.msra.mxu2 %v1762_v42 }
 0x162   : > { %1816 = vmatpush.msra.mxu1 %v1760_v41  ;;  %1901 = vmatpush.msra.mxu2 %v1760_v41 }
 0x164   : > { %1817 = vmatpush.msra.mxu1 %v1757_v40  ;;  %1902 = vmatpush.msra.mxu2 %v1757_v40 }
 0x166   : > { %1818 = vmatpush.msra.mxu1 %v9695_v39  ;;  %1903 = vmatpush.msra.mxu2 %v9695_v39 }
 0x168   : > { %1819 = vmatpush.msra.mxu1 %v9693_v38  ;;  %1904 = vmatpush.msra.mxu2 %v9693_v38 }
 0x16a   : > { %1820 = vmatpush.msra.mxu1 %v9691_v37  ;;  %1905 = vmatpush.msra.mxu2 %v9691_v37 }
 0x16c   : > { %1821 = vmatpush.msra.mxu1 %v9689_v36  ;;  %1906 = vmatpush.msra.mxu2 %v9689_v36 }
 0x16e   : > { %1822 = vmatpush.msra.mxu1 %v9687_v35  ;;  %1907 = vmatpush.msra.mxu2 %v9687_v35 }
 0x170   : > { %1823 = vmatpush.msra.mxu1 %v9685_v34  ;;  %1908 = vmatpush.msra.mxu2 %v9685_v34 }
 0x172   : > { %1824 = vmatpush.msra.mxu1 %v9683_v33  ;;  %1909 = vmatpush.msra.mxu2 %v9683_v33 }
 0x174   : > { %1825 = vmatpush.msra.mxu1 %v9681_v32  ;;  %1910 = vmatpush.msra.mxu2 %v9681_v32 }
 0x176   : > { %1826 = vmatpush.msra.mxu1 %v9679_v31  ;;  %1911 = vmatpush.msra.mxu2 %v9679_v31 }
 0x178   : > { %1827 = vmatpush.msra.mxu1 %v9677_v30  ;;  %1912 = vmatpush.msra.mxu2 %v9677_v30 }
 0x17a   : > { %1828 = vmatpush.msra.mxu1 %v9675_v29  ;;  %1913 = vmatpush.msra.mxu2 %v9675_v29 }
 0x17b   : > { %7490 = vmatmul.msk.f32.vlgmr.msra.gmra.mxu1 %vm11306_vm3, %v11276_v52  ;;  %7506 = vmatmul.msk.f32.vlgmr.msra.gmra.mxu2 %vm11302_vm4, %v11276_v52 }
 0x17c   : > { %2115 = vmatpush.msrb.mxu1 %v1767_v44 }
 0x17e   : > { %2116 = vmatpush.msrb.mxu1 %v1765_v43 }
 0x180   : > { %2117 = vmatpush.msrb.mxu1 %v1762_v42 }
 0x182   : > { %2118 = vmatpush.msrb.mxu1 %v1760_v41  ;;  %v8823_v41 = vld [vmem:[%s9919_s1] sm:$0xff] }
 0x183   : > { %7491 = vmatmul.msk.f32.gmra.mxu1 %vm11305_vm5, %v11276_v52  ;;  %7507 = vmatmul.msk.f32.gmra.mxu2 %vm11301_vm6, %v11276_v52 }
 0x184   : > { %2119 = vmatpush.msrb.mxu1 %v1757_v40  ;;  %v8824_v40 = vld [vmem:[%s9919_s1 + $0x8] sm:$0xff] }
 0x186   : > { %2120 = vmatpush.msrb.mxu1 %v9695_v39 }
 0x188   : > { %2121 = vmatpush.msrb.mxu1 %v9693_v38  ;;  %v8831_v38 = vld [vmem:[%s9919_s1 + $0x40] sm:$0xff] }
 0x18a   : > { %2122 = vmatpush.msrb.mxu1 %v9691_v37 }
 0x18b   : > { %7492 = vmatmul.msk.f32.gmra.mxu1 %vm11304_vm7, %v11276_v52  ;;  %7508 = vmatmul.msk.f32.gmra.mxu2 %vm11293_vm8, %v11276_v52 }
 0x18c   : > { %2123 = vmatpush.msrb.mxu1 %v9689_v36  ;;  %v8825_v36 = vld [vmem:[%s9919_s1 + $0x10] sm:$0xff] }
 0x18e   : > { %2124 = vmatpush.msrb.mxu1 %v9687_v35  ;;  %v8832_v35 = vld [vmem:[%s9919_s1 + $0x48] sm:$0xff] }
 0x190   : > { %2125 = vmatpush.msrb.mxu1 %v9685_v34  ;;  %v8826_v34 = vld [vmem:[%s9919_s1 + $0x18] sm:$0xff] }
 0x191   : > { %2058 = vmatpush.bf16.msrb.mxu3 %v8826_v34 }
 0x192   : > { %2126 = vmatpush.msrb.mxu1 %v9683_v33 }
 0x193   : > { %7493 = vmatmul.msk.f32.gmra.mxu1 %vm11303_vm9, %v11276_v52  ;;  %7509 = vmatmul.msk.f32.gmra.mxu2 %vm11288_vm10, %v11276_v52 }
 0x194   : > { %2127 = vmatpush.msrb.mxu1 %v9681_v32  ;;  %v8833_v32 = vld [vmem:[%s9919_s1 + $0x50] sm:$0xff] }
 0x195   : > { %2059 = vmatpush.bf16.msrb.mxu3 %v8825_v36 }
 0x196   : > { %2128 = vmatpush.msrb.mxu1 %v9679_v31 }
 0x198   : > { %2129 = vmatpush.msrb.mxu1 %v9677_v30 }
 0x199   : > { %2060 = vmatpush.bf16.msrb.mxu3 %v8824_v40 }
 0x19a   : > { %2130 = vmatpush.msrb.mxu1 %v9675_v29  ;;  %v8834_v29 = vld [vmem:[%s9919_s1 + $0x58] sm:$0xff] }
 0x19b   : > { %7494 = vmatmul.msk.f32.gmra.mxu1 %vm11272_vm11, %v11276_v52  ;;  %7510 = vmatmul.msk.f32.gmra.mxu2 %vm11266_vm12, %v11276_v52  ;;  %vm11269_vm12 = vcmp.eq.s32.totalorder %v9718_v48, %v9864_v8  ;;  %vm11274_vm11 = vcmp.eq.s32.totalorder %v9718_v48, %v9929_v15 }
 0x19c   : > { %2209 = vmatpush.bf16.msrb.mxu2 %v8834_v29 }
 0x19d   : > { %2061 = vmatpush.bf16.msrb.mxu3 %v8823_v41 }
 0x1a0   : > { %2210 = vmatpush.bf16.msrb.mxu2 %v8833_v32 }
 0x1a3   : > { %7495 = vmatmul.msk.f32.gmra.mxu1 %vm11271_vm13, %v11276_v52  ;;  %7511 = vmatmul.msk.f32.gmra.mxu2 %vm11265_vm14, %v11276_v52  ;;  %vm11268_vm14 = vcmp.eq.s32.totalorder %v9718_v48, %v9853_v7  ;;  %vm11273_vm13 = vcmp.eq.s32.totalorder %v9718_v48, %v9916_v13 }
 0x1a4   : > { %2211 = vmatpush.bf16.msrb.mxu2 %v8832_v35 }
 0x1a8   : > { %2212 = vmatpush.bf16.msrb.mxu2 %v8831_v38 }
 0x1ab   : > { %7496 = vmatmul.msk.f32.gmra.mxu1 %vm11270_vm15, %v11276_v52  ;;  %7512 = vmatmul.msk.f32.gmra.mxu2 %vm11267_vm0, %v11276_v52  ;;  %vm11287_vm0 = vcmp.eq.s32.totalorder %v9718_v48, %v9879_v9  ;;  %vm11284_vm15 = vcmp.eq.s32.totalorder %v9718_v48, %v9906_v12 }
 0x1b3   : > { %7497 = vmatmul.msk.f32.gmra.mxu1 %vm11268_vm14, %v11276_v52  ;;  %7513 = vmatmul.msk.f32.gmra.mxu2 %vm11269_vm12, %v11276_v52  ;;  %vm11286_vm14 = vcmp.eq.s32.totalorder %v9718_v48, %v9888_v10  ;;  %vm11285_vm12 = vcmp.eq.s32.totalorder %v9718_v48, %v9897_v11 }
 0x1bb   : > { %7570 = vmatmul.msk.f32.vlgmr.msrb.gmra.mxu1 %vm11287_vm0, %v11276_v52 }
 0x1c3   : > { %7571 = vmatmul.msk.f32.gmra.mxu1 %vm11286_vm14, %v11276_v52 }
 0x1cb   : > { %7572 = vmatmul.msk.f32.gmra.mxu1 %vm11285_vm12, %v11276_v52 }
 0x1d3   : > { %7573 = vmatmul.msk.f32.gmra.mxu1 %vm11284_vm15, %v11276_v52 }
 0x1db   : > { %7574 = vmatmul.msk.f32.gmra.mxu1 %vm11273_vm13, %v11276_v52  ;;  %vm11281_vm13 = vcmp.eq.s32.totalorder %v9718_v48, %v9940_v18 }
 0x1e3   : > { %7575 = vmatmul.msk.f32.gmra.mxu1 %vm11274_vm11, %v11276_v52  ;;  %vm11280_vm11 = vcmp.eq.s32.totalorder %v9718_v48, %v9950_v20 }
 0x1eb   : > { %7576 = vmatmul.msk.f32.gmra.mxu1 %vm11281_vm13, %v11276_v52 }
 0x1f3   : > { %7577 = vmatmul.msk.f32.gmra.mxu1 %vm11280_vm11, %v11276_v52  ;;  %vm2278_vm11 = vcmask 1040384  }
 0x1f4   : > { %vm9995_vm13 = vmneg %vm2278_vm11 }
 0x1f8   : > { %v1830_v21 = vpop.f32.mrf.mxu1 }
 0x1fe   : > { %v1915_v22 = vpop.f32.mrf.mxu2 }
 0x200   : > { %v1833_v23 = vpop.f32.mrf.mxu1 }
 0x201   : > { %v1862_v2 = vpack.c.bf16 %v1833_v23, %v1830_v21 }
 0x206   : > { %v1918_v24 = vpop.f32.mrf.mxu2 }
 0x207   : > { %v1948_v25 = vpack.c.bf16 %v1918_v24, %v1915_v22 }
 0x208   : > { %v1836_v26 = vpop.f32.mrf.mxu1 }
 0x209   : > { %7538 = vmatmul.msk.bf16.vlgmr.msra.gmra.mxu3 %vm1976_vm2, %v1948_v25 }
 0x20e   : > { %v1921_v27 = vpop.f32.mrf.mxu2 }
 0x210   : > { %v1839_v28 = vpop.f32.mrf.mxu1 }
 0x211   : > { %v1863_v17 = vpack.c.bf16 %v1839_v28, %v1836_v26 }
 0x216   : > { %v1924_v30 = vpop.f32.mrf.mxu2 }
 0x217   : > { %v1949_v31 = vpack.c.bf16 %v1924_v30, %v1921_v27 }
 0x218   : > { %v1842_v33 = vpop.f32.mrf.mxu1 }
 0x219   : > { %7539 = vmatmul.msk.bf16.gmra.mxu3 %vm1976_vm2, %v1949_v31 }
 0x21e   : > { %v1927_v37 = vpop.f32.mrf.mxu2 }
 0x220   : > { %v1845_v39 = vpop.f32.mrf.mxu1 }
 0x221   : > { %v1864_v25 = vpack.c.bf16 %v1845_v39, %v1842_v33 }
 0x226   : > { %v1930_v42 = vpop.f32.mrf.mxu2 }
 0x227   : > { %v1950_v43 = vpack.c.bf16 %v1930_v42, %v1927_v37 }
 0x228   : > { %v1848_v44 = vpop.f32.mrf.mxu1 }
 0x229   : > { %7540 = vmatmul.msk.bf16.gmra.mxu3 %vm1976_vm2, %v1950_v43 }
 0x22e   : > { %v1933_v45 = vpop.f32.mrf.mxu2 }
 0x230   : > { %v1851_v46 = vpop.f32.mrf.mxu1 }
 0x231   : > { %v1865_v29 = vpack.c.bf16 %v1851_v46, %v1848_v44 }
 0x236   : > { %v1936_v50 = vpop.f32.mrf.mxu2 }
 0x237   : > { %v1951_v54 = vpack.c.bf16 %v1936_v50, %v1933_v45 }
 0x238   : > { %v2132_v57 = vpop.f32.mrf.mxu1 }
 0x239   : > { %7541 = vmatmul.msk.bf16.gmra.mxu3 %vm1976_vm2, %v1951_v54 }
 0x240   : > { %v2135_v60 = vpop.f32.mrf.mxu1 }
 0x241   : > { %v2165_v63 = vpack.c.bf16 %v2135_v60, %v2132_v57 }
 0x243   : > { %7602 = vmatmul.msk.bf16.vlgmr.msrb.gmra.mxu2 %vm1976_vm2, %v2165_v63 }
 0x248   : > { %v2138_v5 = vpop.f32.mrf.mxu1 }
 0x249   : > { %7558 = vmatmul.msk.bf16.vlgmr.msrb.gmra.mxu3 %vm1976_vm2, %v1862_v2 }
 0x250   : > { %v2141_v14 = vpop.f32.mrf.mxu1 }
 0x251   : > { %v2166_v16 = vpack.c.bf16 %v2141_v14, %v2138_v5 }
 0x253   : > { %7603 = vmatmul.msk.bf16.gmra.mxu2 %vm1976_vm2, %v2166_v16 }
 0x258   : > { %v2144_v19 = vpop.f32.mrf.mxu1 }
 0x259   : > { %7559 = vmatmul.msk.bf16.gmra.mxu3 %vm1976_vm2, %v1863_v17  ;;  %v9099_v17 = vld [vmem:[%s9976_s7] ss:$0 sm:$0xff] }
 0x260   : > { %v2147_v22 = vpop.f32.mrf.mxu1 }
 0x261   : > { %v2167_v24 = vpack.c.bf16 %v2147_v22, %v2144_v19 }
 0x263   : > { %7604 = vmatmul.msk.bf16.gmra.mxu2 %vm1976_vm2, %v2167_v24 }
 0x268   : > { %v2150_v27 = vpop.f32.mrf.mxu1 }
 0x269   : > { %7560 = vmatmul.msk.bf16.gmra.mxu3 %vm1976_vm2, %v1864_v25 }
 0x270   : > { %v2153_v21 = vpop.f32.mrf.mxu1 }
 0x271   : > { %v2168_v23 = vpack.c.bf16 %v2153_v21, %v2150_v27 }
 0x273   : > { %7605 = vmatmul.msk.bf16.gmra.mxu2 %vm1976_vm2, %v2168_v23  ;;  %v9100_v23 = vld [vmem:[%s9976_s7 + $0x1] ss:$0 sm:$0xff] }
 0x279   : > { %7561 = vmatmul.msk.bf16.gmra.mxu3 %vm1976_vm2, %v1865_v29 }
 0x28c   : > { %v1998_v30 = vpop.f32.mrf.mxu3 }
 0x294   : > { %v2000_v26 = vpop.f32.mrf.mxu3 }
 0x29c   : > { %v2003_v28 = vpop.f32.mrf.mxu3 }
 0x2a4   : > { %v2005_v31 = vpop.f32.mrf.mxu3 }
 0x2ac   : > { %v2008_v32 = vpop.f32.mrf.mxu3 }
 0x2b4   : > { %v2010_v34 = vpop.f32.mrf.mxu3 }
 0x2bc   : > { %v2013_v35 = vpop.f32.mrf.mxu3 }
 0x2c4   : > { %v2015_v36 = vpop.f32.mrf.mxu3 }
 0x2c6   : > { %v2214_v37 = vpop.f32.mrf.mxu2 }
 0x2cc   : > { %v2063_v33 = vpop.f32.mrf.mxu3 }
 0x2cd   : > { %v2064_v38 = vadd.f32 %v2063_v33, %v1998_v30 }
 0x2ce   : > { %v2216_v39 = vpop.f32.mrf.mxu2 }
 0x2cf   : > { %v2234_v40 = vadd.f32 %v2214_v37, %v2064_v38 }
 0x2d4   : > { %v2065_v41 = vpop.f32.mrf.mxu3 }
 0x2d5   : > { %v2066_v29 = vadd.f32 %v2065_v41, %v2000_v26  ;;  %v2244_v41 = vmul.f32 %v9099_v17, %v2234_v40 }
 0x2d6   : > { %v2219_v42 = vpop.f32.mrf.mxu2 }
 0x2dc   : > { %v2068_v43 = vpop.f32.mrf.mxu3 }
 0x2dd   : > { %v2069_v24 = vadd.f32 %v2068_v43, %v2003_v28 }
 0x2de   : > { %v2221_v44 = vpop.f32.mrf.mxu2 }
 0x2df   : > { %v2236_v52 = vadd.f32 %v2219_v42, %v2069_v24 }
 0x2e4   : > { %v2070_v45 = vpop.f32.mrf.mxu3 }
 0x2e5   : > { %v2071_v19 = vadd.f32 %v2070_v45, %v2005_v31  ;;  %v2246_v31 = vmul.f32 %v9099_v17, %v2236_v52  ;;  %v2254_v52 = vadd.f32 %v9100_v23, %v2244_v41  ;;  %v8836_v41 = vld [vmem:[%s10099_s16 + $0x8] sm:$0xff] }
 0x2e6   : > { %v2224_v46 = vpop.f32.mrf.mxu2 }
 0x2e7   : > { %v2237_v30 = vadd.f32 %v2221_v44, %v2071_v19  ;;  %v2256_v42 = vadd.f32 %v9100_v23, %v2246_v31 }
 0x2ec   : > { %v2073_v50 = vpop.f32.mrf.mxu3 }
 0x2ed   : > { %v2074_v14 = vadd.f32 %v2073_v50, %v2008_v32  ;;  %v2247_v32 = vmul.f32 %v9099_v17, %v2237_v30 }
 0x2ee   : > { %v2226_v54 = vpop.f32.mrf.mxu2 }
 0x2ef   : > { %v2238_v25 = vadd.f32 %v2224_v46, %v2074_v14 }
 0x2f1   : > { %v2248_v20 = vmul.f32 %v9099_v17, %v2238_v25 }
 0x2f3   : > { %v2258_v43 = vadd.f32 %v9100_v23, %v2248_v20 }
 0x2f4   : > { %v2075_v57 = vpop.f32.mrf.mxu3 }
 0x2f5   : > { %v2076_v2 = vadd.f32 %v2075_v57, %v2010_v34 }
 0x2f6   : > { %v2229_v60 = vpop.f32.mrf.mxu2 }
 0x2f7   : > { %v2239_v22 = vadd.f32 %v2226_v54, %v2076_v2  ;;  %v2257_v54 = vadd.f32 %v9100_v23, %v2247_v32 }
 0x2f9   : > { %v2249_v37 = vmul.f32 %v9099_v17, %v2239_v22  ;;  %v2262_v22 = vmax.f32 %v2254_v52, 0.0  ;;  %v9101_v52 = vld [vmem:[%s10028_s10] ss:$0 sm:$0xff] }
 0x2fb   : > { %v2259_v50 = vadd.f32 %v9100_v23, %v2249_v37  ;;  %v11380_v37 = vmov 0 }
 0x2fc   : > { %v2078_v63 = vpop.f32.mrf.mxu3  ;;  %v11381_v37 = vsel %vm9995_vm13, 4294967295, %v11380_v37 }
 0x2fd   : > { %v2079_v5 = vadd.f32 %v2078_v63, %v2013_v35  ;;  %v2235_v35 = vadd.f32 %v2216_v39, %v2066_v29  ;;  %v2267_v26 = vmax.f32 %v2259_v50, 0.0  ;;  %v2266_v63 = vmax.f32 %v2258_v43, 0.0  ;;  %11382 = vst [vmem:[#allocation40_spill] sm:$0xff] %v11381_v37 }
 0x2fe   : > { %v2231_v38 = vpop.f32.mrf.mxu2 }
 0x2ff   : > { %v2240_v16 = vadd.f32 %v2229_v60, %v2079_v5  ;;  %v2245_v46 = vmul.f32 %v9099_v17, %v2235_v35  ;;  %v2288_v39 = vrot.slane %v2267_v26, 7  ;;  %v2265_v5 = vmax.f32 %v2257_v54, 0.0  ;;  %v8837_v26 = vld [vmem:[%s10099_s16 + $0x10] sm:$0xff] }
 0x300   : > { %v2286_v20 = vrot.slane %v2266_v63, 7 }
 0x301   : > { %v2250_v27 = vmul.f32 %v9099_v17, %v2240_v16  ;;  %v2255_v14 = vadd.f32 %v9100_v23, %v2245_v46  ;;  %v2264_v16 = vmax.f32 %v2256_v42, 0.0 }
 0x302   : > { %v2289_v40 = vsel %vm2278_vm11, %v2286_v20, %v2288_v39 }
 0x303   : > { %v2260_v34 = vadd.f32 %v9100_v23, %v2250_v27  ;;  %v2263_v19 = vmax.f32 %v2255_v14, 0.0  ;;  %v2282_v25 = vrot.slane %v2264_v16, 7 }
 0x304   : > { %v2080_v21 = vpop.f32.mrf.mxu3 }
 0x305   : > { %v2081_v33 = vadd.f32 %v2080_v21, %v2015_v36  ;;  %v2268_v28 = vmax.f32 %v2260_v34, 0.0  ;;  %v2280_v21 = vrot.slane %v2263_v19, 7 }
 0x307   : > { %v2241_v18 = vadd.f32 %v2231_v38, %v2081_v33  ;;  %v2290_v44 = vrot.slane %v2268_v28, 7  ;;  %v2283_v29 = vsel %vm2278_vm11, %v2280_v21, %v2282_v25  ;;  %v9440_v33 = vmov 0.0  }
 0x308   : > { %v10002_v38 = vsel %vm11302_vm4, 1.0, %v9440_v33  ;;  %v10007_v34 = vsel %vm11306_vm3, 1.0, %v9440_v33  ;;  %v10012_v35 = vsel %vm11287_vm0, 1.0, %v9440_v33  ;;  %v10033_v32 = vsel %vm11301_vm6, 1.0, %v9440_v33 }
 0x309   : > { %v2251_v57 = vmul.f32 %v9099_v17, %v2241_v18  ;;  %v2291_v18 = vsel %vm2278_vm11, %v2288_v39, %v2290_v44  ;;  %v2284_v17 = vrot.slane %v2265_v5, 7  ;;  %11383 = vst [vmem:[#allocation41_spill] sm:$0xff] %v10012_v35  ;;  %v10038_v50 = vsel %vm11305_vm5, 1.0, %v9440_v33 }
 0x30a   : > { %v10054_v31 = vsel %vm11293_vm8, 1.0, %v9440_v33  ;;  %v10064_v28 = vsel %vm11285_vm12, 1.0, %v9440_v33  ;;  %v10075_v43 = vsel %vm11288_vm10, 1.0, %v9440_v33  ;;  %v10080_v46 = vsel %vm11303_vm9, 1.0, %v9440_v33 }
 0x30b   : > { %v2261_v45 = vadd.f32 %v9100_v23, %v2251_v57  ;;  %v2287_v24 = vsel %vm2278_vm11, %v2284_v17, %v2286_v20  ;;  %v2285_v27 = vsel %vm2278_vm11, %v2282_v25, %v2284_v17  ;;  %v2279_v23 = vrot.slane %v2262_v22, 7  ;;  %11387 = vst [vmem:[#allocation43_spill] sm:$0xff] %v10054_v31  ;;  %v8845_v20 = vld [vmem:[%s10110_s0 + $0x30] sm:$0xff]  ;;  %v9102_v17 = vld [vmem:[%s10028_s10 + $0x1] ss:$0 sm:$0xff] }
 0x30c   : > { %v10043_v57 = vsel %vm11286_vm14, 1.0, %v9440_v33  ;;  %11389 = vst [vmem:[#allocation45_spill] sm:$0xff] %v10064_v28  ;;  %v10085_v54 = vsel %vm11284_vm15, 1.0, %v9440_v33  ;;  %vm9441_vm12 = vmmov 1   ;;  %vm2584_vm0 = vsmask.f32 7424 }
 0x30d   : > { %v2269_v60 = vmax.f32 %v2261_v45, 0.0  ;;  %v2281_v30 = vsel %vm2278_vm11, %v2279_v23, %v2280_v21  ;;  %11384 = vst [vmem:[#allocation42_spill] sm:$0xff] %v10043_v57  ;;  %v10059_v45 = vsel %vm11304_vm7, 1.0, %v9440_v33  ;;  %vm11310_vm10 = vsmask.f32 6400 }
 0x30e   : > { %11388 = vst [vmem:[#allocation44_spill] sm:$0xff] %v10059_v45  ;;  %vm2961_vm8 = vcmask 1045504   ;;  %vm3040_vm6 = vcmask 261120   ;;  %vm11337_vm9 = vcmask 15360  }
 0x30f   : > { %v2292_v36 = vrot.slane %v2269_v60, 7  ;;  %11390 = vst [vmem:[#allocation46_spill] sm:$0xff] %v10075_v43  ;;  %v8838_v60 = vld [vmem:[%s10099_s16 + $0x18] sm:$0xff] }
 0x310   : > { %11391 = vst [vmem:[#allocation47_spill] sm:$0xff] %v10080_v46  ;;  %2498 = vmatpush.bf16.msra.mxu2 %v8838_v60 }
 0x311   : > { %v2293_v2 = vsel %vm2278_vm11, %v2290_v44, %v2292_v36  ;;  %11392 = vst [vmem:[#allocation48_spill] sm:$0xff] %v10085_v54  ;;  %v8835_v44 = vld [vmem:[%s10099_s16] sm:$0xff] }
 0x312   : > { %2327 = vmatpush.msrb.mxu0 %v2293_v2  ;;  %2368 = vmatpush.msra.mxu3 %v2293_v2 }
 0x313   : > { %2413 = vmatpush.msra.mxu1 %v2293_v2 }
 0x314   : > { %2328 = vmatpush.msrb.mxu0 %v2291_v18  ;;  %2369 = vmatpush.msra.mxu3 %v2291_v18 }
 0x315   : > { %2414 = vmatpush.msra.mxu1 %v2291_v18  ;;  %2499 = vmatpush.bf16.msra.mxu2 %v8837_v26  ;;  %v8846_v18 = vld [vmem:[%s10110_s0 + $0x38] sm:$0xff] }
 0x316   : > { %2329 = vmatpush.msrb.mxu0 %v2289_v40  ;;  %2370 = vmatpush.msra.mxu3 %v2289_v40 }
 0x317   : > { %2415 = vmatpush.msra.mxu1 %v2289_v40 }
 0x318   : > { %2330 = vmatpush.msrb.mxu0 %v2287_v24  ;;  %2371 = vmatpush.msra.mxu3 %v2287_v24 }
 0x319   : > { %2416 = vmatpush.msra.mxu1 %v2287_v24  ;;  %2500 = vmatpush.bf16.msra.mxu2 %v8836_v41  ;;  %v8844_v24 = vld [vmem:[%s10110_s0 + $0x28] sm:$0xff] }
 0x31a   : > { %2331 = vmatpush.msrb.mxu0 %v2285_v27  ;;  %2372 = vmatpush.msra.mxu3 %v2285_v27 }
 0x31b   : > { %2417 = vmatpush.msra.mxu1 %v2285_v27 }
 0x31c   : > { %2332 = vmatpush.msrb.mxu0 %v2283_v29  ;;  %2373 = vmatpush.msra.mxu3 %v2283_v29 }
 0x31d   : > { %2418 = vmatpush.msra.mxu1 %v2283_v29  ;;  %2501 = vmatpush.bf16.msra.mxu2 %v8835_v44 }
 0x31e   : > { %2333 = vmatpush.msrb.mxu0 %v2281_v30  ;;  %2374 = vmatpush.msra.mxu3 %v2281_v30 }
 0x31f   : > { %2419 = vmatpush.msra.mxu1 %v2281_v30 }
 0x320   : > { %7607 = vmatpush.msk.msrb.mxu0 %vm9995_vm13, %v2279_v23  ;;  %7613 = vmatpush.msk.msra.mxu3 %vm9995_vm13, %v2279_v23 }
 0x321   : > { %7619 = vmatpush.msk.msra.mxu1 %vm9995_vm13, %v2279_v23  ;;  %7614 = vmatmul.msk.f32.vlgmr.msra.gmra.mxu3 %vm11283_vm1, %v10002_v38 }
 0x322   : > { %7608 = vmatmul.msk.f32.vlgmr.msrb.gmra.mxu0 %vm11283_vm1, %v10007_v34  ;;  %7620 = vmatmul.msk.f32.vlgmr.msra.gmra.mxu1 %vm11283_vm1, %v10012_v35 }
 0x323   : > { %2722 = vmatpush.bf16.msrb.mxu3 %v8846_v18 }
 0x327   : > { %2723 = vmatpush.bf16.msrb.mxu3 %v8845_v20 }
 0x329   : > { %7615 = vmatmul.msk.f32.gmra.mxu3 %vm11283_vm1, %v10033_v32 }
 0x32a   : > { %7609 = vmatmul.msk.f32.gmra.mxu0 %vm11283_vm1, %v10038_v50  ;;  %7621 = vmatmul.msk.f32.gmra.mxu1 %vm11283_vm1, %v10043_v57 }
 0x32b   : > { %2724 = vmatpush.bf16.msrb.mxu3 %v8844_v24 }
 0x331   : > { %7616 = vmatmul.msk.f32.gmra.mxu3 %vm11283_vm1, %v10054_v31 }
 0x332   : > { %7610 = vmatmul.msk.f32.gmra.mxu0 %vm11283_vm1, %v10059_v45  ;;  %7622 = vmatmul.msk.f32.gmra.mxu1 %vm11283_vm1, %v10064_v28 }
 0x339   : > { %7617 = vmatmul.msk.f32.gmra.mxu3 %vm11283_vm1, %v10075_v43 }
 0x33a   : > { %7611 = vmatmul.msk.f32.gmra.mxu0 %vm11283_vm1, %v10080_v46  ;;  %7623 = vmatmul.msk.f32.gmra.mxu1 %vm11283_vm1, %v10085_v54  ;;  %vm2533_vm1 = vcmask 1041408  }
 0x33b   : > { %vm10165_vm15 = vmneg %vm2533_vm1 }
 0x33c   : > { %vm10173_vm14 = vmpackc.low %vm9441_vm12, %vm10165_vm15  ;;  %vm2761_vm12 = vcmask 1046528  }
 0x39f   : > { %v2336_v36 = vpop.f32.mrf.mxu0  ;;  %v2422_v63 = vpop.f32.mrf.mxu1 }
 0x3a4   : > { %v2377_v42 = vpop.f32.mrf.mxu3 }
 0x3a5   : > { %v2389_v2 = vmax.f32 %v2336_v36, %v2377_v42 }
 0x3a7   : > { %v2339_v39 = vpop.f32.mrf.mxu0  ;;  %v2425_v5 = vpop.f32.mrf.mxu1  ;;  %v10112_v14 = vmax.f32 %v2389_v2, %v2422_v63 }
 0x3a9   : > { %v2440_v40 = vmul.f32 %v9101_v52, %v10112_v14 }
 0x3ab   : > { %v2446_v27 = vadd.f32 %v9102_v17, %v2440_v40 }
 0x3ac   : > { %v2380_v16 = vpop.f32.mrf.mxu3 }
 0x3ad   : > { %v2390_v19 = vmax.f32 %v2339_v39, %v2380_v16  ;;  %v2450_v33 = vmax.f32 %v2446_v27, 0.0  ;;  %v8842_v27 = vld [vmem:[%s10110_s0 + $0x18] sm:$0xff] }
 0x3af   : > { %v10119_v22 = vmax.f32 %v2390_v19, %v2425_v5  ;;  %v2342_v25 = vpop.f32.mrf.mxu0  ;;  %v2428_v23 = vpop.f32.mrf.mxu1 }
 0x3b1   : > { %v2441_v21 = vmul.f32 %v9101_v52, %v10119_v22 }
 0x3b3   : > { %v2447_v29 = vadd.f32 %v9102_v17, %v2441_v21  ;;  %v8862_v21 = vld [vmem:[%s10110_s0 + $0xb8] sm:$0xff] }
 0x3b4   : > { %v2383_v30 = vpop.f32.mrf.mxu3  ;;  %2817 = vmatpush.bf16.msrb.mxu1 %v8862_v21 }
 0x3b5   : > { %v2451_v60 = vmax.f32 %v2447_v29, 0.0  ;;  %v2391_v26 = vmax.f32 %v2342_v25, %v2383_v30  ;;  %v8843_v25 = vld [vmem:[%s10110_s0 + $0x20] sm:$0xff]  ;;  %v8870_v29 = vld [vmem:[%s10110_s0 + $0xf8] sm:$0xff]  ;;  %v8840_v30 = vld [vmem:[%s10110_s0 + $0x8] sm:$0xff] }
 0x3b6   : > { %2725 = vmatpush.bf16.msrb.mxu3 %v8843_v25  ;;  %2921 = vmatpush.bf16.msrb.mxu2 %v8870_v29  ;;  %v8856_v25 = vld [vmem:[%s10110_s0 + $0x88] sm:$0xff]  ;;  %v8855_v29 = vld [vmem:[%s10110_s0 + $0x80] sm:$0xff] }
 0x3b7   : > { %v2462_v41 = vpack.c.bf16 %v2451_v60, %v2450_v33  ;;  %v10123_v44 = vmax.f32 %v2391_v26, %v2428_v23  ;;  %v2345_v36 = vpop.f32.mrf.mxu0  ;;  %v2431_v42 = vpop.f32.mrf.mxu1  ;;  %v8841_v23 = vld [vmem:[%s10110_s0 + $0x10] sm:$0xff]  ;;  %v8860_v60 = vld [vmem:[%s10110_s0 + $0xa8] sm:$0xff] }
 0x3b8   : > { %v8853_v33 = vld [vmem:[%s10110_s0 + $0x70] sm:$0xff] }
 0x3b9   : > { %7640 = vmatmul.msk.bf16.vlgmr.msra.gmra.mxu2 %vm1976_vm2, %v2462_v41  ;;  %v2442_v2 = vmul.f32 %v9101_v52, %v10123_v44  ;;  %v8869_v26 = vld [vmem:[%s10110_s0 + $0xf0] sm:$0xff]  ;;  %v8839_v41 = vld [vmem:[%s10110_s0] sm:$0xff] }
 0x3ba   : > { %2726 = vmatpush.bf16.msrb.mxu3 %v8842_v27  ;;  %2922 = vmatpush.bf16.msrb.mxu2 %v8869_v26  ;;  %v8865_v27 = vld [vmem:[%s10110_s0 + $0xd0] sm:$0xff]  ;;  %v8863_v26 = vld [vmem:[%s10110_s0 + $0xc0] sm:$0xff] }
 0x3bb   : > { %v2448_v18 = vadd.f32 %v9102_v17, %v2442_v2  ;;  %v8851_v2 = vld [vmem:[%s10110_s0 + $0x60] sm:$0xff] }
 0x3bc   : > { %v2386_v63 = vpop.f32.mrf.mxu3 }
 0x3bd   : > { %v2392_v39 = vmax.f32 %v2345_v36, %v2386_v63  ;;  %v2452_v40 = vmax.f32 %v2448_v18, 0.0  ;;  %v8852_v36 = vld [vmem:[%s10110_s0 + $0x68] sm:$0xff]  ;;  %v8859_v63 = vld [vmem:[%s10110_s0 + $0xa0] sm:$0xff] }
 0x3be   : > { %2727 = vmatpush.bf16.msrb.mxu3 %v8841_v23  ;;  %v8867_v18 = vld [vmem:[%s10110_s0 + $0xe0] sm:$0xff]  ;;  %v8848_v23 = vld [vmem:[%s10110_s0 + $0x48] sm:$0xff] }
 0x3bf   : > { %v10127_v5 = vmax.f32 %v2392_v39, %v2431_v42  ;;  %v8868_v42 = vld [vmem:[%s10110_s0 + $0xe8] sm:$0xff]  ;;  %v8858_v39 = vld [vmem:[%s10110_s0 + $0x98] sm:$0xff] }
 0x3c0   : > { %2923 = vmatpush.bf16.msrb.mxu2 %v8868_v42 }
 0x3c1   : > { %v2443_v20 = vmul.f32 %v9101_v52, %v10127_v5  ;;  %v8854_v52 = vld [vmem:[%s10110_s0 + $0x78] sm:$0xff] }
 0x3c2   : > { %2655 = vmatpush.bf16.msra.mxu0 %v8854_v52  ;;  %2728 = vmatpush.bf16.msrb.mxu3 %v8840_v30  ;;  %v8864_v30 = vld [vmem:[%s10110_s0 + $0xc8] sm:$0xff] }
 0x3c3   : > { %v2449_v16 = vadd.f32 %v9102_v17, %v2443_v20  ;;  %v8861_v17 = vld [vmem:[%s10110_s0 + $0xb0] sm:$0xff]  ;;  %v8850_v20 = vld [vmem:[%s10110_s0 + $0x58] sm:$0xff] }
 0x3c4   : > { %2818 = vmatpush.bf16.msrb.mxu1 %v8861_v17  ;;  %2924 = vmatpush.bf16.msrb.mxu2 %v8867_v18  ;;  %v8877_v18 = vld [vmem:[%s10110_s0 + $0x130] sm:$0xff] }
 0x3c5   : > { %v2453_v19 = vmax.f32 %v2449_v16, 0.0  ;;  %v8857_v16 = vld [vmem:[%s10110_s0 + $0x90] sm:$0xff] }
 0x3c6   : > { %2656 = vmatpush.bf16.msra.mxu0 %v8853_v33  ;;  %2729 = vmatpush.bf16.msrb.mxu3 %v8839_v41  ;;  %v8847_v33 = vld [vmem:[%s10110_s0 + $0x40] sm:$0xff] }
 0x3c7   : > { %v2463_v24 = vpack.c.bf16 %v2453_v19, %v2452_v40  ;;  %v8866_v40 = vld [vmem:[%s10110_s0 + $0xd8] sm:$0xff]  ;;  %v8849_v19 = vld [vmem:[%s10110_s0 + $0x50] sm:$0xff] }
 0x3c8   : > { %2819 = vmatpush.bf16.msrb.mxu1 %v8860_v60  ;;  %2925 = vmatpush.bf16.msrb.mxu2 %v8866_v40 }
 0x3c9   : > { %7641 = vmatmul.msk.bf16.gmra.mxu2 %vm1976_vm2, %v2463_v24  ;;  %v9103_v24 = vld [vmem:[%s10095_s11] ss:$0 sm:$0xff] }
 0x3ca   : > { %2657 = vmatpush.bf16.msra.mxu0 %v8852_v36  ;;  %9029 = vmatpush.bf16.msra.mxu3 %v8862_v21 }
 0x3cc   : > { %2820 = vmatpush.bf16.msrb.mxu1 %v8859_v63  ;;  %2926 = vmatpush.bf16.msrb.mxu2 %v8865_v27 }
 0x3ce   : > { %2658 = vmatpush.bf16.msra.mxu0 %v8851_v2  ;;  %9030 = vmatpush.bf16.msra.mxu3 %v8861_v17  ;;  %v9104_v17 = vld [vmem:[%s10095_s11 + $0x1] ss:$0 sm:$0xff] }
 0x3d0   : > { %2821 = vmatpush.bf16.msrb.mxu1 %v8858_v39  ;;  %2927 = vmatpush.bf16.msrb.mxu2 %v8864_v30 }
 0x3d2   : > { %2659 = vmatpush.bf16.msra.mxu0 %v8850_v20  ;;  %9031 = vmatpush.bf16.msra.mxu3 %v8860_v60 }
 0x3d4   : > { %2822 = vmatpush.bf16.msrb.mxu1 %v8857_v16  ;;  %2928 = vmatpush.bf16.msrb.mxu2 %v8863_v26 }
 0x3d6   : > { %2660 = vmatpush.bf16.msra.mxu0 %v8849_v19  ;;  %9032 = vmatpush.bf16.msra.mxu3 %v8859_v63  ;;  %v8878_v63 = vld [vmem:[%s10110_s0 + $0x138] sm:$0xff]  ;;  %v8876_v19 = vld [vmem:[%s10110_s0 + $0x128] sm:$0xff] }
 0x3d8   : > { %2823 = vmatpush.bf16.msrb.mxu1 %v8856_v25 }
 0x3da   : > { %2661 = vmatpush.bf16.msra.mxu0 %v8848_v23  ;;  %9033 = vmatpush.bf16.msra.mxu3 %v8858_v39 }
 0x3dc   : > { %2824 = vmatpush.bf16.msrb.mxu1 %v8855_v29 }
 0x3de   : > { %2662 = vmatpush.bf16.msra.mxu0 %v8847_v33  ;;  %9034 = vmatpush.bf16.msra.mxu3 %v8857_v16 }
 0x3e2   : > { %3017 = vmatpush.bf16.msrb.mxu0 %v8878_v63  ;;  %9035 = vmatpush.bf16.msra.mxu3 %v8856_v25  ;;  %v8874_v63 = vld [vmem:[%s10110_s0 + $0x118] sm:$0xff] }
 0x3e6   : > { %3018 = vmatpush.bf16.msrb.mxu0 %v8877_v18  ;;  %9036 = vmatpush.bf16.msra.mxu3 %v8855_v29  ;;  %v8875_v29 = vld [vmem:[%s10110_s0 + $0x120] sm:$0xff] }
 0x3ea   : > { %3019 = vmatpush.bf16.msrb.mxu0 %v8876_v19 }
 0x3ee   : > { %3020 = vmatpush.bf16.msrb.mxu0 %v8875_v29 }
 0x3f2   : > { %3021 = vmatpush.bf16.msrb.mxu0 %v8874_v63 }
 0x43c   : > { %v2503_v21 = vpop.f32.mrf.mxu2 }
 0x43d   : > { %v2515_v52 = vmul.f32 %v9103_v24, %v2503_v21 }
 0x43f   : > { %v2521_v60 = vadd.f32 %v9104_v17, %v2515_v52 }
 0x441   : > { %v2525_v42 = vmax.f32 %v2521_v60, 0.0 }
 0x443   : > { %v2534_v40 = vrot.slane %v2525_v42, 6 }
 0x444   : > { %v2505_v41 = vpop.f32.mrf.mxu2 }
 0x445   : > { %v2516_v36 = vmul.f32 %v9103_v24, %v2505_v41  ;;  %v2546_v33 = vsel %vm2533_vm1, 0.0, %v2534_v40 }
 0x447   : > { %v2522_v2 = vadd.f32 %v9104_v17, %v2516_v36 }
 0x449   : > { %v2526_v39 = vmax.f32 %v2522_v2, 0.0  ;;  %v8873_v2 = vld [vmem:[%s10110_s0 + $0x110] sm:$0xff] }
 0x44a   : > { %3022 = vmatpush.bf16.msrb.mxu0 %v8873_v2 }
 0x44b   : > { %v2535_v16 = vrot.slane %v2526_v39, 6 }
 0x44c   : > { %v2508_v27 = vpop.f32.mrf.mxu2 }
 0x44d   : > { %v2536_v21 = vsel %vm2533_vm1, %v2534_v40, %v2535_v16  ;;  %v2517_v23 = vmul.f32 %v9103_v24, %v2508_v27 }
 0x44e   : > { %v7724_v52 = vpack.c.bf16 %v2536_v21, %v2534_v40  ;;  %v10181_v26 = vpack.c.bf16 %v2536_v21, %v2546_v33  ;;  %v8871_v33 = vld [vmem:[%s10110_s0 + $0x100] sm:$0xff] }
 0x44f   : > { %v2523_v30 = vadd.f32 %v9104_v17, %v2517_v23 }
 0x450   : > { %7725 = vmatmul.msk.bf16.vlgmr.msrb.gmra.mxu3 %vm10173_vm14, %v7724_v52  ;;  %v2588_v19 = vshll.u32 %v10181_v26, 16  ;;  %v2586_v23 = vshrl.u32 %v10181_v26, 16  ;;  %v8872_v52 = vld [vmem:[%s10110_s0 + $0x108] sm:$0xff] }
 0x451   : > { %v2527_v41 = vmax.f32 %v2523_v30, 0.0  ;;  %3023 = vmatpush.bf16.msrb.mxu0 %v8872_v52 }
 0x452   : > { %v2590_v29 = vrot.slane %v2588_v19, 1  ;;  %v2858_v30 = vrot.slane %v2586_v23, 1  ;;  %v2859_v63 = vrot.slane %v2588_v19, 2 }
 0x453   : > { %v2537_v18 = vrot.slane %v2527_v41, 6 }
 0x454   : > { %v2510_v60 = vpop.f32.mrf.mxu2 }
 0x455   : > { %v2518_v36 = vmul.f32 %v9103_v24, %v2510_v60  ;;  %v2538_v40 = vsel %vm2533_vm1, %v2535_v16, %v2537_v18  ;;  %3024 = vmatpush.bf16.msrb.mxu0 %v8871_v33 }
 0x457   : > { %v2524_v42 = vadd.f32 %v9104_v17, %v2518_v36  ;;  %v2762_v17 = vrot.slane %v10181_v26, 1 }
 0x459   : > { %v2528_v39 = vmax.f32 %v2524_v42, 0.0  ;;  %v2591_v42 = vor.u32 %v2590_v29, %v2586_v23 }
 0x45b   : > { %v2539_v27 = vrot.slane %v2528_v39, 6 }
 0x45d   : > { %v2540_v21 = vsel %vm2533_vm1, %v2537_v18, %v2539_v27 }
 0x45e   : > { %v2565_v24 = vpack.c.bf16 %v2540_v21, %v2538_v40  ;;  %v2547_v40 = vsel %vm2533_vm1, %v2539_v27, 0.0  ;;  %v2860_v21 = vor.u32 %v2859_v63, %v2858_v30 }
 0x45f   : > { %v2583_v54 = vpack.c.bf16 %v2547_v40, %v2547_v40 }
 0x460   : > { %2735 = vmatmul.bf16.gmra.mxu3 %v2565_v24  ;;  %v2763_v60 = vrot.slane %v2565_v24, 1  ;;  %v2593_v41 = vshll.u32 %v2565_v24, 16  ;;  %v2597_v36 = vshrl.u32 %v2565_v24, 16  ;;  %v2963_v63 = vrot.slane %v2565_v24, 2 }
 0x461   : > { %v2601_v23 = vshll.u32 %v2583_v54, 16  ;;  %v2865_v29 = vshrl.u32 %v2583_v54, 16  ;;  %v2965_v40 = vrot.slane %v2583_v54, 2 }
 0x462   : > { %v2764_v2 = vsel %vm2761_vm12, %v2762_v17, %v2763_v60  ;;  %v2595_v16 = vrot.slane %v2593_v41, 1  ;;  %v2861_v39 = vrot.slane %v2597_v36, 1  ;;  %v2862_v18 = vrot.slane %v2593_v41, 2 }
 0x463   : > { %2825 = vmatmul.bf16.vlgmr.msrb.gmra.mxu1 %v2764_v2  ;;  %v2765_v17 = vrot.slane %v2583_v54, 1  ;;  %v2867_v43 = vrot.slane %v2865_v29, 1  ;;  %v2868_v45 = vrot.slane %v2601_v23, 2  ;;  %v2603_v2 = vrot.slane %v2601_v23, 1 }
 0x464   : > { %v2596_v52 = vsel %vm2584_vm0, %v2591_v42, %v2595_v16  ;;  %v2863_v46 = vor.u32 %v2862_v18, %v2861_v39  ;;  %v2599_v27 = vor.u32 %v2597_v36, %v2595_v16  ;;  %v2962_v39 = vrot.slane %v10181_v26, 2 }
 0x465   : > { %2663 = vmatmul.bf16.vlgmr.msra.gmra.mxu0 %v2596_v52  ;;  %v2766_v41 = vsel %vm2761_vm12, %v2763_v60, %v2765_v17  ;;  %v2869_v33 = vor.u32 %v2868_v45, %v2867_v43  ;;  %v2966_v60 = vsel %vm2961_vm8, %v2963_v63, %v2965_v40 }
 0x466   : > { %v2864_v19 = vsel %vm11310_vm10, %v2860_v21, %v2863_v46  ;;  %v2604_v42 = vsel %vm2584_vm0, %v2599_v27, %v2603_v2  ;;  %v2964_v18 = vsel %vm2961_vm8, %v2962_v39, %v2963_v63  ;;  %v8879_v63 = vld [vmem:[%s10207_s28] sm:$0xff] }
 0x467   : > { %2929 = vmatmul.bf16.vlgmr.msrb.gmra.mxu2 %v2864_v19  ;;  %v2870_v30 = vsel %vm11310_vm10, %v2863_v46, %v2869_v33 }
 0x470   : > { %2830 = vmatmul.bf16.vlgmr.msra.gmra.mxu3 %v2766_v41  ;;  %v8880_v41 = vld [vmem:[%s10207_s28 + $0x8] sm:$0xff] }
 0x471   : > { %3088 = vmatpush.bf16.msrb.mxu3 %v8880_v41 }
 0x475   : > { %2668 = vmatmul.bf16.gmra.mxu0 %v2604_v42  ;;  %3089 = vmatpush.bf16.msrb.mxu3 %v8879_v63 }
 0x477   : > { %2934 = vmatmul.bf16.gmra.mxu2 %v2870_v30 }
 0x485   : > { %3025 = vmatmul.bf16.vlgmr.msrb.gmra.mxu0 %v2964_v18  ;;  %v9442_v18 = vmov 32.0  }
 0x486   : > { %9125 = vrcp.f32 %v9442_v18 }
 0x495   : > { %3030 = vmatmul.bf16.gmra.mxu0 %v2966_v60 }
 0x4d3   : > { %v2731_v45 = vpop.f32.mrf.mxu3 }
 0x4db   : > { %v2733_v16 = vpop.f32.mrf.mxu3 }
 0x4e0   : > { %v2826_v29 = vpop.f32.mrf.mxu1 }
 0x4e2   : > { %v2664_v43 = vpop.f32.mrf.mxu0 }
 0x4e3   : > { %v2736_v46 = vpop.f32.mrf.mxu3  ;;  %v2732_v33 = vadd.f32 %v2731_v45, %v2664_v43  ;;  %v9126_v43 = vpop.eup %9125 }
 0x4e4   : > { %vm3059_vm4 = vweird.f32 %v9126_v43 }
 0x4e5   : > { %v2836_v40 = vadd.f32 %v2826_v29, %v2732_v33 }
 0x4e8   : > { %v2828_v30 = vpop.f32.mrf.mxu1 }
 0x4ea   : > { %v2666_v36 = vpop.f32.mrf.mxu0  ;;  %v2930_v21 = vpop.f32.mrf.mxu2 }
 0x4eb   : > { %v2738_v19 = vpop.f32.mrf.mxu3  ;;  %v2734_v27 = vadd.f32 %v2733_v16, %v2666_v36  ;;  %v2940_v57 = vadd.f32 %v2930_v21, %v2836_v40 }
 0x4ed   : > { %v2837_v39 = vadd.f32 %v2828_v30, %v2734_v27 }
 0x4f2   : > { %v2669_v52 = vpop.f32.mrf.mxu0  ;;  %v2932_v23 = vpop.f32.mrf.mxu2 }
 0x4f3   : > { %v2831_v54 = vpop.f32.mrf.mxu3  ;;  %v2737_v42 = vadd.f32 %v2736_v46, %v2669_v52  ;;  %v2941_v60 = vadd.f32 %v2932_v23, %v2837_v39 }
 0x4f5   : > { %v2838_v28 = vadd.f32 %v2831_v54, %v2737_v42 }
 0x4fa   : > { %v2671_v24 = vpop.f32.mrf.mxu0  ;;  %v2935_v2 = vpop.f32.mrf.mxu2 }
 0x4fb   : > { %v2739_v35 = vadd.f32 %v2738_v19, %v2671_v24  ;;  %v2942_v37 = vadd.f32 %v2935_v2, %v2838_v28  ;;  %v2833_v36 = vpop.f32.mrf.mxu3  ;;  %v3055_v24 = vmul.f32 32.0, %v9126_v43 }
 0x4fd   : > { %v2839_v46 = vadd.f32 %v2833_v36, %v2739_v35  ;;  %v3056_v35 = vsub.f32 1.0, %v3055_v24 }
 0x4ff   : > { %v3057_v41 = vmul.f32 %v9126_v43, %v3056_v35 }
 0x501   : > { %v3058_v33 = vadd.f32 %v9126_v43, %v3057_v41 }
 0x502   : > { %v3026_v26 = vpop.f32.mrf.mxu0  ;;  %v2937_v52 = vpop.f32.mrf.mxu2 }
 0x503   : > { %v10213_v16 = vadd.f32 %v3026_v26, %v2940_v57  ;;  %v2943_v23 = vadd.f32 %v2937_v52, %v2839_v46  ;;  %v10227_v63 = vsel %vm3059_vm4, %v9126_v43, %v3058_v33 }
 0x505   : > { %v3041_v21 = vsel %vm3040_vm6, %v10213_v16, 0.0 }
 0x50a   : > { %v3028_v17 = vpop.f32.mrf.mxu0 }
 0x50b   : > { %v10211_v15 = vadd.f32 %v3028_v17, %v2941_v60  ;;  %v3096_v60 = vld [vmem:[%s1536_s15] sm:$0x1]  ;;  %s10244_s15 = scalar_lea.vmem %s11401_s8, %s9038_s9  ;;  %s11307_s9 = smov 64  }
 0x50c   : > { %v10234_v36 = vsel %vm2278_vm11, %v3096_v60, 0  ;;  %s9039_s8 = smul.u32 24, %s11526_s23 }
 0x50d   : > { %v3042_v29 = vsel %vm3040_vm6, %v10211_v15, 0.0  ;;  %3112 = vmatpush.bf16.msra.mxu1 %v10234_v36 }
 0x50e   : > { %v3043_v19 = vadd.f32 %v3042_v29, %v3041_v21  ;;  %s10290_s13 = scalar_lea.vmem %s11404_s24, %s9039_s8  ;;  %s11406_s8 = sld [smem:[#allocation14_spill]] }
 0x50f   : > { %s10380_s24 = scalar_lea.vmem %s11408_s19, %s9972_s2  ;;  %s11412_s19 = sld [smem:[#allocation19_spill]] }
 0x510   : > { %11410 = sst [smem:[#allocation49_spill]] %s10380_s24 }
 0x512   : > { %v3031_v31 = vpop.f32.mrf.mxu0 }
 0x513   : > { %v10215_v45 = vadd.f32 %v3031_v31, %v2942_v37 }
 0x514   : > { %s10361_s17 = scalar_lea.vmem %s11406_s8, %s10203_s26  ;;  %s11407_s8 = sld [smem:[#allocation15_spill]] }
 0x515   : > { %v3044_v28 = vsel %vm3040_vm6, %v10215_v45, 0.0  ;;  %s10410_s29 = scalar_lea.vmem %s11412_s19, %s9972_s2 }
 0x516   : > { %v3045_v37 = vadd.f32 %v3044_v28, %v3043_v19  ;;  %11416 = sst [smem:[#allocation51_spill]] %s10410_s29 }
 0x51a   : > { %v3033_v57 = vpop.f32.mrf.mxu0  ;;  %s1571_s20 = scalar_lea.vmem %s11407_s8, %s11526_s23  ;;  %s11413_s8 = sld [smem:[#allocation20_spill]] }
 0x51b   : > { %v10223_v26 = vadd.f32 %v3033_v57, %v2943_v23  ;;  %v8886_v57 = vld [vmem:[%s10244_s15 + $0x28] sm:$0xff] }
 0x51c   : > { %3237 = vmatpush.bf16.msra.mxu2 %v8886_v57 }
 0x51d   : > { %v3046_v31 = vsel %vm3040_vm6, %v10223_v26, 0.0 }
 0x51e   : > { %v3047_v54 = vadd.f32 %v3046_v31, %v3045_v37  ;;  %v8885_v31 = vld [vmem:[%s10244_s15 + $0x20] sm:$0xff] }
 0x520   : > { %v3048_v17 = vrot.slane %v3047_v54, 4  ;;  %3238 = vmatpush.bf16.msra.mxu2 %v8885_v31 }
 0x522   : > { %v3049_v27 = vadd.f32 %v3048_v17, %v3047_v54 }
 0x524   : > { %v3050_v2 = vrot.slane %v3049_v27, 2 }
 0x526   : > { %v3051_v42 = vadd.f32 %v3050_v2, %v3049_v27 }
 0x528   : > { %v3052_v30 = vrot.slane %v3051_v42, 1 }
 0x52a   : > { %v3053_v39 = vadd.f32 %v3052_v30, %v3051_v42 }
 0x52c   : > { %v3061_v18 = vmul.f32 %v10227_v63, %v3053_v39 }
 0x52e   : > { %v3066_v40 = vpack.c.bf16 %v3061_v18, %v3061_v18 }
 0x530   : > { %7878 = vmatmul.msk.bf16.vlgmr.msrb.gmra.mxu3 %vm3040_vm6, %v3066_v40 }
 0x5b3   : > { %v3091_v52 = vpop.f32.mrf.mxu3 }
 0x5b4   : > { %v3095_v46 = vmax.f32 %v3091_v52, 0.0 }
 0x5b6   : > { %v3097_v43 = vpack.c.bf16 %v3095_v46, %v3095_v46 }
 0x5b8   : > { %7879 = vmatmul.msk.bf16.vlgmr.msra.gmra.mxu1 %vm11337_vm9, %v3097_v43  ;;  %v8884_v43 = vld [vmem:[%s10244_s15 + $0x18] sm:$0xff] }
 0x5b9   : > { %3239 = vmatpush.bf16.msra.mxu2 %v8884_v43  ;;  %v8888_v43 = vld [vmem:[%s10290_s13 + $0x8] sm:$0xff] }
 0x5bb   : > { %v3093_v29 = vpop.f32.mrf.mxu3 }
 0x5bc   : > { %v8881_v29 = vld [vmem:[%s10244_s15] sm:$0xff] }
 0x635   : > { %v3114_v23 = vpop.f32.mrf.mxu1 }
 0x636   : > { %v3118_v21 = vsub.f32 0.0, %v3114_v23 }
 0x638   : > { %v3119_v28 = vmul.f32 1.442695, %v3118_v21  ;;  %v9105_v21 = vld [vmem:[%s10240_s4] ss:$0 sm:$0xff] }
 0x63a   : > { %9127 = vpow2.f32 %v3119_v28 }
 0x63d   : > { %v3116_v24 = vpop.f32.mrf.mxu1 }
 0x63e   : > { %v9106_v24 = vld [vmem:[%s10240_s4 + $0x1] ss:$0 sm:$0xff] }
 0x640   : > { %v9128_v19 = vpop.eup %9127 }
 0x641   : > { %v3121_v37 = vadd.f32 1.0, %v9128_v19 }
 0x643   : > { %9129 = vrcp.f32 %v3121_v37  ;;  %v3133_v41 = vand.u32 2147483648, %v3121_v37  ;;  %v3131_v2 = vand.u32 2147483647, %v3121_v37  ;;  %vm3127_vm7 = vweird.f32 %v3121_v37 }
 0x645   : > { %v3134_v42 = vor.u32 1.1754944e-38, %v3133_v41  ;;  %vm3132_vm3 = vcmp.eq.f32.partialorder %v3131_v2, 8.507059e+37 }
 0x649   : > { %v9130_v35 = vpop.eup %9129 }
 0x64a   : > { %v3123_v54 = vmul.f32 %v9130_v35, %v3121_v37  ;;  %vm3128_vm4 = vweird.f32 %v9130_v35 }
 0x64b   : > { %vm3129_vm5 = vmor %vm3127_vm7, %vm3128_vm4 }
 0x64c   : > { %v3124_v17 = vsub.f32 1.0, %v3123_v54 }
 0x64e   : > { %v3125_v27 = vmul.f32 %v9130_v35, %v3124_v17 }
 0x650   : > { %v3126_v33 = vadd.f32 %v9130_v35, %v3125_v27 }
 0x652   : > { %v3130_v30 = vsel %vm3129_vm5, %v9130_v35, %v3126_v33  ;;  %vm11324_vm5 = vcmask 392192  }
 0x653   : > { %v3135_v39 = vsel %vm3132_vm3, %v3134_v42, %v3130_v30  ;;  %vm11309_vm3 = vcmask 785408  }
 0x654   : > { %v3137_v18 = vperm.slane %v3135_v39, 0 }
 0x656   : > { %v3140_v40 = vmul.f32 %v3137_v18, %v10215_v45  ;;  %v3138_v60 = vmul.f32 %v3137_v18, %v10213_v16  ;;  %v3141_v52 = vmul.f32 %v3137_v18, %v10223_v26  ;;  %v3139_v46 = vmul.f32 %v3137_v18, %v10211_v15  ;;  %v8883_v45 = vld [vmem:[%s10244_s15 + $0x10] sm:$0xff]  ;;  %v8882_v16 = vld [vmem:[%s10244_s15 + $0x8] sm:$0xff] }
 0x657   : > { %3240 = vmatpush.bf16.msra.mxu2 %v8883_v45  ;;  %v8887_v45 = vld [vmem:[%s10290_s13] sm:$0xff] }
 0x658   : > { %3150 = vrot.lane.b32.xlu1 %v3140_v40, %s11307_s9  ;;  %3146 = vrot.lane.b32.xlu0 %v3138_v60, %s11307_s9 }
 0x65b   : > { %3241 = vmatpush.bf16.msra.mxu2 %v8882_v16 }
 0x65f   : > { %3242 = vmatpush.bf16.msra.mxu2 %v8881_v29 }
 0x660   : > { %3152 = vrot.lane.b32.xlu1 %v3141_v52, %s11307_s9  ;;  %3148 = vrot.lane.b32.xlu0 %v3139_v46, %s11307_s9  ;;  %s10278_s9 = scalar_lea.vmem %s11402_s14, %s9972_s2  ;;  %s10296_s14 = scalar_lea.vmem %s11405_s30, %s10106_s18 }
 0x661   : > { %v8905_v16 = vld [vmem:[%s10296_s14 + $0x78] sm:$0xff]  ;;  %s11315_s30 = smul.u32 20, %s11526_s23 }
 0x662   : > { %v8897_v29 = vld [vmem:[%s10296_s14 + $0x38] sm:$0xff] }
 0x663   : > { %3479 = vmatpush.bf16.msrb.mxu2 %v8905_v16  ;;  %v8919_v16 = vld [vmem:[%s10296_s14 + $0xe8] sm:$0xff]  ;;  %s10416_s22 = scalar_lea.vmem %s11413_s8, %s11315_s30  ;;  %s11420_s8 = sld [smem:[#allocation23_spill]] }
 0x664   : > { %s11422_s30 = sld [smem:[#allocation25_spill]] }
 0x669   : > { %s1606_s6 = scalar_lea.vmem %s11420_s8, %s11526_s23  ;;  %s11428_s8 = sld [smem:[#allocation28_spill]] }
 0x6ca   : > { %v3147_v23 = vpop.permute.xlu0 %3146  ;;  %v3151_v28 = vpop.permute.xlu1 %3150 }
 0x6cb   : > { %v3158_v26 = vsel %vm1976_vm2, %v10112_v14, %v3147_v23  ;;  %v3160_v14 = vsel %vm1976_vm2, %v10123_v44, %v3151_v28  ;;  %v8889_v44 = vld [vmem:[%s10290_s13 + $0x10] sm:$0xff]  ;;  %v8913_v23 = vld [vmem:[%s10296_s14 + $0xb8] sm:$0xff] }
 0x6cc   : > { %v3164_v15 = vmul.f32 %v9105_v21, %v3158_v26  ;;  %v3166_v42 = vmul.f32 %v9105_v21, %v3160_v14  ;;  %3354 = vmatpush.bf16.msrb.mxu1 %v8889_v44  ;;  %v8896_v26 = vld [vmem:[%s10296_s14 + $0x30] sm:$0xff]  ;;  %v8921_v28 = vld [vmem:[%s10296_s14 + $0xf8] sm:$0xff]  ;;  %v8894_v44 = vld [vmem:[%s10296_s14 + $0x20] sm:$0xff] }
 0x6ce   : > { %v3170_v37 = vadd.f32 %v9106_v24, %v3164_v15  ;;  %v8903_v15 = vld [vmem:[%s10296_s14 + $0x68] sm:$0xff] }
 0x6d0   : > { %v3174_v54 = vmax.f32 %v3170_v37, 0.0  ;;  %3355 = vmatpush.bf16.msrb.mxu1 %v8888_v43  ;;  %v8902_v37 = vld [vmem:[%s10296_s14 + $0x60] sm:$0xff]  ;;  %v8900_v43 = vld [vmem:[%s10296_s14 + $0x50] sm:$0xff] }
 0x6d2   : > { %v3149_v19 = vpop.permute.xlu0 %3148  ;;  %v3153_v17 = vpop.permute.xlu1 %3152 }
 0x6d3   : > { %v3159_v57 = vsel %vm1976_vm2, %v10119_v22, %v3149_v19  ;;  %v3161_v2 = vsel %vm1976_vm2, %v10127_v5, %v3153_v17  ;;  %v3172_v22 = vadd.f32 %v9106_v24, %v3166_v42  ;;  %v8895_v19 = vld [vmem:[%s10296_s14 + $0x28] sm:$0xff] }
 0x6d4   : > { %v3165_v31 = vmul.f32 %v9105_v21, %v3159_v57  ;;  %v3167_v33 = vmul.f32 %v9105_v21, %v3161_v2  ;;  %3356 = vmatpush.bf16.msrb.mxu1 %v8887_v45  ;;  %v8904_v21 = vld [vmem:[%s10296_s14 + $0x70] sm:$0xff]  ;;  %v8910_v45 = vld [vmem:[%s10296_s14 + $0xa0] sm:$0xff] }
 0x6d5   : > { %v3176_v18 = vmax.f32 %v3172_v22, 0.0  ;;  %3480 = vmatpush.bf16.msrb.mxu2 %v8904_v21  ;;  %v8909_v21 = vld [vmem:[%s10296_s14 + $0x98] sm:$0xff] }
 0x6d6   : > { %v3171_v35 = vadd.f32 %v9106_v24, %v3165_v31  ;;  %v3173_v30 = vadd.f32 %v9106_v24, %v3167_v33  ;;  %v8912_v24 = vld [vmem:[%s10296_s14 + $0xb0] sm:$0xff]  ;;  %v9108_v33 = vld [vmem:[%s10278_s9 + $0x1] ss:$0 sm:$0xff] }
 0x6d8   : > { %v3175_v41 = vmax.f32 %v3171_v35, 0.0  ;;  %v3177_v39 = vmax.f32 %v3173_v30, 0.0  ;;  %3717 = vmatpush.bf16.msra.mxu1 %v8921_v28  ;;  %v8892_v28 = vld [vmem:[%s10296_s14 + $0x10] sm:$0xff] }
 0x6d9   : > { %3481 = vmatpush.bf16.msrb.mxu2 %v8903_v15  ;;  %v8908_v15 = vld [vmem:[%s10296_s14 + $0x90] sm:$0xff] }
 0x6da   : > { %v3190_v27 = vpack.c.bf16 %v3175_v41, %v3174_v54  ;;  %v3191_v40 = vpack.c.bf16 %v3177_v39, %v3176_v18  ;;  %v8901_v54 = vld [vmem:[%s10296_s14 + $0x58] sm:$0xff]  ;;  %v9107_v41 = vld [vmem:[%s10278_s9] ss:$0 sm:$0xff] }
 0x6dc   : > { %7904 = vmatmul.msk.bf16.vlgmr.msra.gmra.mxu2 %vm11309_vm3, %v3190_v27 }
 0x6dd   : > { %3482 = vmatpush.bf16.msrb.mxu2 %v8902_v37  ;;  %v8891_v37 = vld [vmem:[%s10296_s14 + $0x8] sm:$0xff] }
 0x6e1   : > { %3483 = vmatpush.bf16.msrb.mxu2 %v8901_v54  ;;  %v8928_v54 = vld [vmem:[%s10296_s14 + $0x130] sm:$0xff] }
 0x6e5   : > { %3484 = vmatpush.bf16.msrb.mxu2 %v8900_v43  ;;  %v8922_v43 = vld [vmem:[%s10296_s14 + $0x100] sm:$0xff] }
 0x6ec   : > { %7905 = vmatmul.msk.bf16.gmra.mxu2 %vm11309_vm3, %v3191_v40 }
 0x75f   : > { %v3244_v60 = vpop.f32.mrf.mxu2 }
 0x767   : > { %v3246_v52 = vpop.f32.mrf.mxu2 }
 0x76f   : > { %v3249_v5 = vpop.f32.mrf.mxu2 }
 0x777   : > { %v3251_v46 = vpop.f32.mrf.mxu2 }
 0x778   : > { %3270 = vmatpush.msra.mxu3 %v3251_v46  ;;  %3297 = vmatpush.msra.mxu0 %v3251_v46  ;;  %v8920_v46 = vld [vmem:[%s10296_s14 + $0xf0] sm:$0xff] }
 0x779   : > { %3718 = vmatpush.bf16.msra.mxu1 %v8920_v46 }
 0x77a   : > { %3271 = vmatpush.msra.mxu3 %v3249_v5  ;;  %3298 = vmatpush.msra.mxu0 %v3249_v5  ;;  %v8911_v5 = vld [vmem:[%s10296_s14 + $0xa8] sm:$0xff] }
 0x77c   : > { %3272 = vmatpush.msra.mxu3 %v3246_v52  ;;  %3299 = vmatpush.msra.mxu0 %v3246_v52 }
 0x77d   : > { %3719 = vmatpush.bf16.msra.mxu1 %v8919_v16 }
 0x77e   : > { %3273 = vmatpush.msra.mxu3 %v3244_v60  ;;  %3300 = vmatpush.msra.mxu0 %v3244_v60 }
 0x77f   : > { %7906 = vmatmul.msk.f32.vlgmr.msra.gmra.mxu3 %vm3040_vm6, %v10002_v38  ;;  %7908 = vmatmul.msk.f32.vlgmr.msra.gmra.mxu0 %vm3040_vm6, %v10007_v34 }
 0x780   : > { %3541 = vmatpush.bf16.msrb.mxu3 %v8897_v29  ;;  %3626 = vmatpush.bf16.msrb.mxu0 %v8913_v23  ;;  %v8893_v29 = vld [vmem:[%s10296_s14 + $0x18] sm:$0xff]  ;;  %v8899_v23 = vld [vmem:[%s10296_s14 + $0x48] sm:$0xff] }
 0x781   : > { %3485 = vmatpush.bf16.msrb.mxu2 %v8899_v23 }
 0x784   : > { %3542 = vmatpush.bf16.msrb.mxu3 %v8896_v26  ;;  %3627 = vmatpush.bf16.msrb.mxu0 %v8912_v24  ;;  %v8918_v26 = vld [vmem:[%s10296_s14 + $0xe0] sm:$0xff] }
 0x785   : > { %3720 = vmatpush.bf16.msra.mxu1 %v8918_v26  ;;  %v8898_v24 = vld [vmem:[%s10296_s14 + $0x40] sm:$0xff] }
 0x786   : > { %3486 = vmatpush.bf16.msrb.mxu2 %v8898_v24 }
 0x787   : > { %7907 = vmatmul.msk.f32.gmra.mxu3 %vm3040_vm6, %v10033_v32  ;;  %7909 = vmatmul.msk.f32.gmra.mxu0 %vm3040_vm6, %v10038_v50 }
 0x788   : > { %3543 = vmatpush.bf16.msrb.mxu3 %v8895_v19  ;;  %3628 = vmatpush.bf16.msrb.mxu0 %v8911_v5  ;;  %v8917_v19 = vld [vmem:[%s10296_s14 + $0xd8] sm:$0xff]  ;;  %v8923_v5 = vld [vmem:[%s10296_s14 + $0x108] sm:$0xff] }
 0x789   : > { %3721 = vmatpush.bf16.msra.mxu1 %v8917_v19 }
 0x78c   : > { %3544 = vmatpush.bf16.msrb.mxu3 %v8894_v44  ;;  %3629 = vmatpush.bf16.msrb.mxu0 %v8910_v45 }
 0x790   : > { %3545 = vmatpush.bf16.msrb.mxu3 %v8893_v29  ;;  %3630 = vmatpush.bf16.msrb.mxu0 %v8909_v21 }
 0x794   : > { %3546 = vmatpush.bf16.msrb.mxu3 %v8892_v28  ;;  %3631 = vmatpush.bf16.msrb.mxu0 %v8908_v15 }
 0x798   : > { %3547 = vmatpush.bf16.msrb.mxu3 %v8891_v37 }
 0x7fc   : > { %v3302_v57 = vpop.f32.mrf.mxu0 }
 0x802   : > { %v3275_v31 = vpop.f32.mrf.mxu3 }
 0x803   : > { %v3303_v35 = vadd.f32 %v3302_v57, %v3275_v31  ;;  %v8929_v57 = vld [vmem:[%s10296_s14 + $0x138] sm:$0xff]  ;;  %v8907_v31 = vld [vmem:[%s10296_s14 + $0x88] sm:$0xff] }
 0x804   : > { %v3305_v27 = vpop.f32.mrf.mxu0  ;;  %3802 = vmatpush.bf16.msra.mxu2 %v8929_v57  ;;  %3632 = vmatpush.bf16.msrb.mxu0 %v8907_v31 }
 0x805   : > { %v10310_v17 = vmul.f32 0.5, %v3303_v35  ;;  %v8916_v35 = vld [vmem:[%s10296_s14 + $0xd0] sm:$0xff] }
 0x806   : > { %3722 = vmatpush.bf16.msra.mxu1 %v8916_v35 }
 0x807   : > { %v3312_v14 = vmul.f32 %v9107_v41, %v10310_v17 }
 0x808   : > { %3803 = vmatpush.bf16.msra.mxu2 %v8928_v54 }
 0x809   : > { %v3316_v22 = vadd.f32 %v9108_v33, %v3312_v14  ;;  %v8927_v14 = vld [vmem:[%s10296_s14 + $0x128] sm:$0xff] }
 0x80a   : > { %v3278_v2 = vpop.f32.mrf.mxu3 }
 0x80b   : > { %v3306_v42 = vadd.f32 %v3305_v27, %v3278_v2  ;;  %v3318_v40 = vmax.f32 %v3316_v22, 0.0  ;;  %v8906_v27 = vld [vmem:[%s10296_s14 + $0x80] sm:$0xff]  ;;  %v8915_v2 = vld [vmem:[%s10296_s14 + $0xc8] sm:$0xff]  ;;  %v8925_v22 = vld [vmem:[%s10296_s14 + $0x118] sm:$0xff] }
 0x80c   : > { %3633 = vmatpush.bf16.msrb.mxu0 %v8906_v27  ;;  %3723 = vmatpush.bf16.msra.mxu1 %v8915_v2 }
 0x80d   : > { %v10315_v30 = vmul.f32 0.5, %v3306_v42  ;;  %3804 = vmatpush.bf16.msra.mxu2 %v8927_v14  ;;  %v8926_v42 = vld [vmem:[%s10296_s14 + $0x120] sm:$0xff] }
 0x80f   : > { %v3313_v39 = vmul.f32 %v9107_v41, %v10315_v30  ;;  %v8890_v41 = vld [vmem:[%s10296_s14] sm:$0xff] }
 0x810   : > { %3548 = vmatpush.bf16.msrb.mxu3 %v8890_v41 }
 0x811   : > { %v3317_v18 = vadd.f32 %v9108_v33, %v3313_v39  ;;  %v8914_v33 = vld [vmem:[%s10296_s14 + $0xc0] sm:$0xff]  ;;  %3805 = vmatpush.bf16.msra.mxu2 %v8926_v42 }
 0x812   : > { %3724 = vmatpush.bf16.msra.mxu1 %v8914_v33  ;;  %v9109_v39 = vld [vmem:[%s10286_s3] ss:$0 sm:$0xff] }
 0x813   : > { %v3319_v60 = vmax.f32 %v3317_v18, 0.0 }
 0x815   : > { %v3326_v52 = vpack.c.bf16 %v3319_v60, %v3318_v40  ;;  %3806 = vmatpush.bf16.msra.mxu2 %v8925_v22  ;;  %v8924_v40 = vld [vmem:[%s10296_s14 + $0x110] sm:$0xff] }
 0x817   : > { %7922 = vmatmul.msk.bf16.vlgmr.msrb.gmra.mxu1 %vm11324_vm5, %v3326_v52  ;;  %v9110_v52 = vld [vmem:[%s10286_s3 + $0x1] ss:$0 sm:$0xff] }
 0x819   : > { %3807 = vmatpush.bf16.msra.mxu2 %v8924_v40 }
 0x81d   : > { %3808 = vmatpush.bf16.msra.mxu2 %v8923_v5 }
 0x821   : > { %3809 = vmatpush.bf16.msra.mxu2 %v8922_v43 }
 0x894   : > { %v3358_v18 = vpop.f32.mrf.mxu1 }
 0x895   : > { %v3365_v60 = vmul.f32 %v9109_v39, %v3358_v18 }
 0x897   : > { %v3369_v46 = vadd.f32 %v9110_v52, %v3365_v60 }
 0x899   : > { %v3371_v45 = vmax.f32 %v3369_v46, 0.0 }
 0x89b   : > { %v3375_v23 = vrot.slane %v3371_v45, 6 }
 0x89c   : > { %v3360_v44 = vpop.f32.mrf.mxu1 }
 0x89d   : > { %v3366_v16 = vmul.f32 %v9109_v39, %v3360_v44  ;;  %v3381_v28 = vsel %vm2533_vm1, 0.0, %v3375_v23 }
 0x89f   : > { %v3370_v29 = vadd.f32 %v9110_v52, %v3366_v16 }
 0x8a1   : > { %v3372_v21 = vmax.f32 %v3370_v29, 0.0 }
 0x8a3   : > { %v3376_v26 = vrot.slane %v3372_v21, 6 }
 0x8a5   : > { %v3377_v24 = vsel %vm2533_vm1, %v3375_v23, %v3376_v26  ;;  %v3382_v15 = vsel %vm2533_vm1, %v3376_v26, 0.0 }
 0x8a6   : > { %v3399_v19 = vpack.c.bf16 %v3377_v24, %v3381_v28  ;;  %v3417_v57 = vpack.c.bf16 %v3382_v15, %v3382_v15  ;;  %v8005_v37 = vpack.c.bf16 %v3377_v24, %v3375_v23  ;;  %v8931_v28 = vld [vmem:[%s10361_s17 + $0x8] sm:$0xff]  ;;  %v8930_v15 = vld [vmem:[%s10361_s17] sm:$0xff] }
 0x8a7   : > { %3861 = vmatpush.bf16.msra.mxu3 %v8931_v28 }
 0x8a8   : > { %8006 = vmatmul.msk.bf16.vlgmr.msrb.gmra.mxu3 %vm10173_vm14, %v8005_v37  ;;  %v3574_v31 = vrot.slane %v3399_v19, 1  ;;  %v3575_v35 = vrot.slane %v3417_v57, 1  ;;  %v3419_v54 = vshrl.u32 %v3399_v19, 16  ;;  %v3421_v41 = vshll.u32 %v3399_v19, 16 }
 0x8a9   : > { %v3426_v27 = vshll.u32 %v3417_v57, 16  ;;  %v3662_v2 = vshrl.u32 %v3417_v57, 16  ;;  %v3750_v43 = vrot.slane %v3399_v19, 2  ;;  %v3751_v45 = vrot.slane %v3417_v57, 2 }
 0x8aa   : > { %v3576_v14 = vsel %vm2761_vm12, %v3574_v31, %v3575_v35  ;;  %v3423_v33 = vrot.slane %v3421_v41, 1  ;;  %v3659_v42 = vrot.slane %v3419_v54, 1  ;;  %v3660_v22 = vrot.slane %v3421_v41, 2 }
 0x8ab   : > { %3634 = vmatmul.bf16.vlgmr.msrb.gmra.mxu0 %v3576_v14  ;;  %v3664_v39 = vrot.slane %v3662_v2, 1  ;;  %v3665_v18 = vrot.slane %v3426_v27, 2  ;;  %v3428_v60 = vrot.slane %v3426_v27, 1  ;;  %v3752_v16 = vsel %vm2961_vm8, %v3750_v43, %v3751_v45  ;;  %3862 = vmatpush.bf16.msra.mxu3 %v8930_v15 }
 0x8ac   : > { %v3424_v40 = vor.u32 %v3423_v33, %v3419_v54  ;;  %v3661_v52 = vor.u32 %v3660_v22, %v3659_v42  ;;  %v9444_v35 = vmov 16.0  }
 0x8ad   : > { %v3666_v5 = vor.u32 %v3665_v18, %v3664_v39  ;;  %9131 = vrcp.f32 %v9444_v35 }
 0x8ae   : > { %v3429_v46 = vsel %vm2584_vm0, %v3424_v40, %v3428_v60 }
 0x8af   : > { %3487 = vmatmul.bf16.vlgmr.msrb.gmra.mxu2 %v3429_v46  ;;  %v3667_v44 = vsel %vm11310_vm10, %v3661_v52, %v3666_v5 }
 0x8b0   : > { %3725 = vmatmul.bf16.vlgmr.msra.gmra.mxu1 %v3667_v44 }
 0x8b3   : > { %v9132_v2 = vpop.eup %9131 }
 0x8b4   : > { %v3828_v39 = vmul.f32 16.0, %v9132_v2  ;;  %vm3832_vm7 = vweird.f32 %v9132_v2 }
 0x8b6   : > { %v3829_v5 = vsub.f32 1.0, %v3828_v39 }
 0x8b8   : > { %v3830_v43 = vmul.f32 %v9132_v2, %v3829_v5 }
 0x8bf   : > { %3810 = vmatmul.bf16.vlgmr.msra.gmra.mxu2 %v3752_v16 }
 0x928   : > { %v3635_v21 = vpop.f32.mrf.mxu0 }
 0x92b   : > { %v3550_v23 = vpop.f32.mrf.mxu3 }
 0x92d   : > { %v3726_v24 = vpop.f32.mrf.mxu1 }
 0x930   : > { %v3637_v41 = vpop.f32.mrf.mxu0 }
 0x932   : > { %v3488_v29 = vpop.f32.mrf.mxu2 }
 0x933   : > { %v3551_v37 = vadd.f32 %v3550_v23, %v3488_v29  ;;  %v3552_v31 = vpop.f32.mrf.mxu3  ;;  %v3831_v29 = vadd.f32 %v9132_v2, %v3830_v43 }
 0x935   : > { %v3640_v54 = vadd.f32 %v3635_v21, %v3551_v37  ;;  %v3728_v33 = vpop.f32.mrf.mxu1  ;;  %v3869_v37 = vld [vmem:[%s1571_s20] sm:$0x1]  ;;  %s10384_s20 = scalar_lea.vmem %s11409_s21, %s9040_s25  ;;  %s11311_s21 = smov 48  }
 0x936   : > { %s11411_s25 = sld [smem:[#allocation18_spill]] }
 0x937   : > { %v3731_v14 = vadd.f32 %v3726_v24, %v3640_v54 }
 0x93a   : > { %v3490_v26 = vpop.f32.mrf.mxu2 }
 0x93b   : > { %v3553_v19 = vadd.f32 %v3552_v31, %v3490_v26  ;;  %v10367_v26 = vsel %vm3832_vm7, %v9132_v2, %v3831_v29  ;;  %v10374_v31 = vsel %vm2278_vm11, %v3869_v37, 0  ;;  %v8933_v37 = vld [vmem:[%s10384_s20 + $0x8] sm:$0xff] }
 0x93c   : > { %3884 = vmatpush.bf16.msra.mxu0 %v10374_v31  ;;  %s10406_s27 = scalar_lea.vmem %s11411_s25, %s9972_s2 }
 0x93d   : > { %v3641_v27 = vadd.f32 %v3637_v41, %v3553_v19  ;;  %11415 = sst [smem:[#allocation50_spill]] %s10406_s27 }
 0x93f   : > { %v3732_v22 = vadd.f32 %v3728_v33, %v3641_v27 }
 0x942   : > { %v3811_v57 = vpop.f32.mrf.mxu2 }
 0x943   : > { %v3816_v42 = vadd.f32 %v3811_v57, %v3731_v14 }
 0x945   : > { %v3818_v60 = vsel %vm3040_vm6, %v3816_v42, 0.0 }
 0x94a   : > { %v3813_v18 = vpop.f32.mrf.mxu2 }
 0x94b   : > { %v3817_v40 = vadd.f32 %v3813_v18, %v3732_v22  ;;  %v8936_v22 = vld [vmem:[%s10384_s20 + $0x20] sm:$0xff] }
 0x94c   : > { %3980 = vmatpush.bf16.msrb.mxu1 %v8936_v22 }
 0x94d   : > { %v3819_v52 = vsel %vm3040_vm6, %v3817_v40, 0.0 }
 0x94e   : > { %v3820_v46 = vadd.f32 %v3819_v52, %v3818_v60 }
 0x950   : > { %v3821_v44 = vrot.slane %v3820_v46, 4 }
 0x952   : > { %v3822_v45 = vadd.f32 %v3821_v44, %v3820_v46 }
 0x954   : > { %v3823_v16 = vrot.slane %v3822_v45, 2 }
 0x956   : > { %v3824_v23 = vadd.f32 %v3823_v16, %v3822_v45 }
 0x958   : > { %v3825_v21 = vrot.slane %v3824_v23, 1 }
 0x95a   : > { %v3826_v28 = vadd.f32 %v3825_v21, %v3824_v23 }
 0x95c   : > { %v3834_v24 = vmul.f32 %v10367_v26, %v3826_v28 }
 0x95e   : > { %v3839_v15 = vpack.c.bf16 %v3834_v24, %v3834_v24  ;;  %v8935_v24 = vld [vmem:[%s10384_s20 + $0x18] sm:$0xff] }
 0x95f   : > { %3981 = vmatpush.bf16.msrb.mxu1 %v8935_v24 }
 0x960   : > { %8159 = vmatmul.msk.bf16.vlgmr.msra.gmra.mxu3 %vm3040_vm6, %v3839_v15  ;;  %v8934_v15 = vld [vmem:[%s10384_s20 + $0x10] sm:$0xff] }
 0x963   : > { %3982 = vmatpush.bf16.msrb.mxu1 %v8934_v15 }
 0x967   : > { %3983 = vmatpush.bf16.msrb.mxu1 %v8933_v37 }
 0x9e3   : > { %v3864_v35 = vpop.f32.mrf.mxu3 }
 0x9e4   : > { %v3868_v19 = vmax.f32 %v3864_v35, 0.0  ;;  %v8932_v35 = vld [vmem:[%s10384_s20] sm:$0xff] }
 0x9e5   : > { %3984 = vmatpush.bf16.msrb.mxu1 %v8932_v35 }
 0x9e6   : > { %v3870_v57 = vpack.c.bf16 %v3868_v19, %v3868_v19 }
 0x9e8   : > { %8160 = vmatmul.msk.bf16.vlgmr.msra.gmra.mxu0 %vm11337_vm9, %v3870_v57  ;;  %v9111_v57 = vld [vmem:[%s10380_s24] ss:$0 sm:$0xff] }
 0x9eb   : > { %v3866_v54 = vpop.f32.mrf.mxu3 }
 0x9ec   : > { %v9112_v54 = vld [vmem:[%s10380_s24 + $0x1] ss:$0 sm:$0xff] }
 0xa65   : > { %v3886_v41 = vpop.f32.mrf.mxu0 }
 0xa66   : > { %v3890_v27 = vsub.f32 0.0, %v3886_v41 }
 0xa68   : > { %v3891_v2 = vmul.f32 1.442695, %v3890_v27 }
 0xa6a   : > { %9133 = vpow2.f32 %v3891_v2 }
 0xa6d   : > { %v3888_v14 = vpop.f32.mrf.mxu0 }
 0xa70   : > { %v9134_v33 = vpop.eup %9133 }
 0xa71   : > { %v3893_v39 = vadd.f32 1.0, %v9134_v33 }
 0xa73   : > { %9135 = vrcp.f32 %v3893_v39  ;;  %v3905_v5 = vand.u32 2147483648, %v3893_v39  ;;  %v3903_v44 = vand.u32 2147483647, %v3893_v39  ;;  %vm3899_vm7 = vweird.f32 %v3893_v39 }
 0xa75   : > { %v3906_v45 = vor.u32 1.1754944e-38, %v3905_v5  ;;  %vm3904_vm10 = vcmp.eq.f32.partialorder %v3903_v44, 8.507059e+37  ;;  %v8938_v44 = vld [vmem:[%s10416_s22 + $0x8] sm:$0xff] }
 0xa79   : > { %v9136_v18 = vpop.eup %9135 }
 0xa7a   : > { %v3895_v60 = vmul.f32 %v9136_v18, %v3893_v39  ;;  %vm3900_vm4 = vweird.f32 %v9136_v18 }
 0xa7b   : > { %vm3901_vm3 = vmor %vm3899_vm7, %vm3900_vm4  ;;  %vm11417_vm4 = vcmask 1043456   ;;  %vm11335_vm7 = vcmask 326656  }
 0xa7c   : > { %v3896_v52 = vsub.f32 1.0, %v3895_v60 }
 0xa7e   : > { %v3897_v46 = vmul.f32 %v9136_v18, %v3896_v52 }
 0xa80   : > { %v3898_v43 = vadd.f32 %v9136_v18, %v3897_v46 }
 0xa82   : > { %v3902_v16 = vsel %vm3901_vm3, %v9136_v18, %v3898_v43  ;;  %vm11322_vm3 = vcmask 130048   ;;  %v8937_v43 = vld [vmem:[%s10416_s22] sm:$0xff] }
 0xa83   : > { %v3907_v29 = vsel %vm3904_vm10, %v3906_v45, %v3902_v16  ;;  %vm11323_vm10 = vcmask 654336  }
 0xa84   : > { %v3909_v23 = vperm.slane %v3907_v29, 0 }
 0xa86   : > { %v3910_v21 = vmul.f32 %v3909_v23, %v3816_v42  ;;  %v3911_v28 = vmul.f32 %v3909_v23, %v3817_v40 }
 0xa88   : > { %3914 = vrot.lane.b32.xlu2 %v3910_v21, %s11311_s21 }
 0xa90   : > { %3916 = vrot.lane.b32.xlu2 %v3911_v28, %s11311_s21  ;;  %s11414_s21 = sld [smem:[#allocation21_spill]] }
 0xa96   : > { %s10426_s25 = scalar_lea.vmem %s11414_s21, %s10106_s18  ;;  %s11418_s21 = sld [smem:[#allocation22_spill]] }
 0xa97   : > { %v8954_v45 = vld [vmem:[%s10426_s25 + $0x78] sm:$0xff]  ;;  %v8953_v23 = vld [vmem:[%s10426_s25 + $0x70] sm:$0xff]  ;;  %v8952_v37 = vld [vmem:[%s10426_s25 + $0x68] sm:$0xff] }
 0xa98   : > { %v8946_v16 = vld [vmem:[%s10426_s25 + $0x38] sm:$0xff]  ;;  %4188 = vmatpush.bf16.msrb.mxu2 %v8954_v45  ;;  %v8945_v21 = vld [vmem:[%s10426_s25 + $0x30] sm:$0xff]  ;;  %v8944_v35 = vld [vmem:[%s10426_s25 + $0x28] sm:$0xff] }
 0xa99   : > { %v8962_v29 = vld [vmem:[%s10426_s25 + $0xb8] sm:$0xff]  ;;  %v8961_v24 = vld [vmem:[%s10426_s25 + $0xb0] sm:$0xff] }
 0xa9a   : > { %v8970_v28 = vld [vmem:[%s10426_s25 + $0xf8] sm:$0xff]  ;;  %4330 = vmatpush.bf16.msra.mxu1 %v8962_v29  ;;  %v8969_v15 = vld [vmem:[%s10426_s25 + $0xf0] sm:$0xff]  ;;  %v8947_v29 = vld [vmem:[%s10426_s25 + $0x40] sm:$0xff] }
 0xa9c   : > { %4189 = vmatpush.bf16.msrb.mxu2 %v8953_v23  ;;  %v8957_v23 = vld [vmem:[%s10426_s25 + $0x90] sm:$0xff]  ;;  %s10489_s19 = scalar_lea.vmem %s11418_s21, %s10203_s26  ;;  %s11421_s21 = sld [smem:[#allocation24_spill]] }
 0xa9d   : > { %11419 = sst [smem:[#allocation52_spill]] %s10489_s19 }
 0xa9e   : > { %4331 = vmatpush.bf16.msra.mxu1 %v8961_v24  ;;  %v8940_v24 = vld [vmem:[%s10426_s25 + $0x8] sm:$0xff] }
 0xaa0   : > { %4190 = vmatpush.bf16.msrb.mxu2 %v8952_v37  ;;  %v8965_v37 = vld [vmem:[%s10426_s25 + $0xd0] sm:$0xff] }
 0xae2   : > { %v3915_v19 = vpop.permute.xlu2 %3914 }
 0xae3   : > { %v3920_v42 = vsel %vm11324_vm5, %v10310_v17, %v3915_v19  ;;  %v8960_v19 = vld [vmem:[%s10426_s25 + $0xa8] sm:$0xff] }
 0xae4   : > { %v3924_v41 = vmul.f32 %v9111_v57, %v3920_v42  ;;  %v8951_v42 = vld [vmem:[%s10426_s25 + $0x60] sm:$0xff]  ;;  %4332 = vmatpush.bf16.msra.mxu1 %v8960_v19 }
 0xae5   : > { %4191 = vmatpush.bf16.msrb.mxu2 %v8951_v42  ;;  %v8939_v19 = vld [vmem:[%s10426_s25] sm:$0xff]  ;;  %v8964_v42 = vld [vmem:[%s10426_s25 + $0xc8] sm:$0xff] }
 0xae6   : > { %v3928_v2 = vadd.f32 %v9112_v54, %v3924_v41  ;;  %v8959_v41 = vld [vmem:[%s10426_s25 + $0xa0] sm:$0xff] }
 0xae8   : > { %v3930_v22 = vmax.f32 %v3928_v2, 0.0  ;;  %v8942_v2 = vld [vmem:[%s10426_s25 + $0x18] sm:$0xff]  ;;  %4333 = vmatpush.bf16.msra.mxu1 %v8959_v41  ;;  %v8963_v41 = vld [vmem:[%s10426_s25 + $0xc0] sm:$0xff] }
 0xaea   : > { %v3917_v27 = vpop.permute.xlu2 %3916 }
 0xaeb   : > { %v3921_v40 = vsel %vm11324_vm5, %v10315_v30, %v3917_v27  ;;  %v4048_v30 = vld [vmem:[%s10416_s22 + $0x10] sm:$0xf]  ;;  %v8967_v27 = vld [vmem:[%s10426_s25 + $0xe0] sm:$0xff] }
 0xaec   : > { %v3925_v14 = vmul.f32 %v9111_v57, %v3921_v40  ;;  %v4059_v52 = vunpack.c.l.b16 %v4048_v30  ;;  %v8968_v57 = vld [vmem:[%s10426_s25 + $0xe8] sm:$0xff]  ;;  %v8950_v40 = vld [vmem:[%s10426_s25 + $0x58] sm:$0xff]  ;;  %v9114_v30 = vld [vmem:[%s10406_s27 + $0x1] ss:$0 sm:$0xff] }
 0xaed   : > { %4192 = vmatpush.bf16.msrb.mxu2 %v8950_v40  ;;  %v8974_v40 = vld [vmem:[%s10426_s25 + $0x118] sm:$0xff] }
 0xaee   : > { %v3929_v33 = vadd.f32 %v9112_v54, %v3925_v14  ;;  %v4062_v5 = vpack.c.b16 %v4059_v52, %v4059_v52  ;;  %v8943_v54 = vld [vmem:[%s10426_s25 + $0x20] sm:$0xff]  ;;  %v8958_v14 = vld [vmem:[%s10426_s25 + $0x98] sm:$0xff]  ;;  %v8948_v52 = vld [vmem:[%s10426_s25 + $0x48] sm:$0xff] }
 0xaef   : > { %4334 = vmatpush.bf16.msra.mxu1 %v8958_v14  ;;  %v8972_v14 = vld [vmem:[%s10426_s25 + $0x108] sm:$0xff] }
 0xaf0   : > { %v3931_v39 = vmax.f32 %v3929_v33, 0.0  ;;  %v10420_v46 = vsel %vm11417_vm4, %v4062_v5, 0  ;;  %vm11314_vm4 = vmpackc.low %vm10165_vm15, %vm10165_vm15 }
 0xaf2   : > { %v3942_v17 = vpack.c.bf16 %v3931_v39, %v3930_v22  ;;  %v8949_v22 = vld [vmem:[%s10426_s25 + $0x50] sm:$0xff] }
 0xaf3   : > { %4193 = vmatpush.bf16.msrb.mxu2 %v8949_v22  ;;  %4335 = vmatpush.bf16.msra.mxu1 %v8957_v23  ;;  %v9116_v22 = vld [vmem:[%s10410_s29 + $0x1] ss:$0 sm:$0xff] }
 0xaf4   : > { %8181 = vmatmul.msk.bf16.vlgmr.msrb.gmra.mxu1 %vm11323_vm10, %v3942_v17 }
 0xaf7   : > { %4194 = vmatpush.bf16.msrb.mxu2 %v8948_v52 }
 0xafb   : > { %4195 = vmatpush.bf16.msrb.mxu2 %v8947_v29 }
 0xb71   : > { %v3986_v18 = vpop.f32.mrf.mxu1 }
 0xb79   : > { %v3988_v60 = vpop.f32.mrf.mxu1 }
 0xb7a   : > { %4008 = vmatpush.msrb.mxu3 %v3988_v60  ;;  %4030 = vmatpush.msrb.mxu0 %v3988_v60 }
 0xb7c   : > { %4009 = vmatpush.msrb.mxu3 %v3986_v18  ;;  %4031 = vmatpush.msrb.mxu0 %v3986_v18  ;;  %v9113_v18 = vld [vmem:[%s10406_s27] ss:$0 sm:$0xff]  ;;  %s9042_s27 = smul.u32 36, %s11526_s23 }
 0xb7d   : > { %8182 = vmatmul.msk.f32.vlgmr.msrb.gmra.mxu3 %vm11322_vm3, %v10002_v38  ;;  %8183 = vmatmul.msk.f32.vlgmr.msrb.gmra.mxu0 %vm11322_vm3, %v10007_v34 }
 0xb7e   : > { %4077 = vmatpush.bf16.msra.mxu3 %v10420_v46  ;;  %4249 = vmatpush.bf16.msra.mxu0 %v8946_v16  ;;  %v8941_v16 = vld [vmem:[%s10426_s25 + $0x10] sm:$0xff] }
 0xb82   : > { %4078 = vmatpush.bf16.msra.mxu3 %v8938_v44  ;;  %4250 = vmatpush.bf16.msra.mxu0 %v8945_v21  ;;  %v8966_v21 = vld [vmem:[%s10426_s25 + $0xd8] sm:$0xff] }
 0xb86   : > { %4079 = vmatpush.bf16.msra.mxu3 %v8937_v43  ;;  %4251 = vmatpush.bf16.msra.mxu0 %v8944_v35  ;;  %v8977_v35 = vld [vmem:[%s10426_s25 + $0x130] sm:$0xff] }
 0xb8a   : > { %4413 = vmatpush.bf16.msrb.mxu3 %v8970_v28  ;;  %4252 = vmatpush.bf16.msra.mxu0 %v8943_v54  ;;  %v8978_v28 = vld [vmem:[%s10426_s25 + $0x138] sm:$0xff]  ;;  %v8976_v54 = vld [vmem:[%s10426_s25 + $0x128] sm:$0xff] }
 0xb8b   : > { %4494 = vmatpush.bf16.msra.mxu2 %v8978_v28 }
 0xb8e   : > { %4414 = vmatpush.bf16.msrb.mxu3 %v8969_v15  ;;  %4253 = vmatpush.bf16.msra.mxu0 %v8942_v2  ;;  %v8956_v15 = vld [vmem:[%s10426_s25 + $0x88] sm:$0xff]  ;;  %v8973_v2 = vld [vmem:[%s10426_s25 + $0x110] sm:$0xff] }
 0xb8f   : > { %4336 = vmatpush.bf16.msra.mxu1 %v8956_v15  ;;  %4495 = vmatpush.bf16.msra.mxu2 %v8977_v35 }
 0xb92   : > { %4415 = vmatpush.bf16.msrb.mxu3 %v8968_v57  ;;  %4254 = vmatpush.bf16.msra.mxu0 %v8941_v16  ;;  %v8955_v57 = vld [vmem:[%s10426_s25 + $0x80] sm:$0xff] }
 0xb93   : > { %4337 = vmatpush.bf16.msra.mxu1 %v8955_v57  ;;  %4496 = vmatpush.bf16.msra.mxu2 %v8976_v54 }
 0xb96   : > { %4416 = vmatpush.bf16.msrb.mxu3 %v8967_v27  ;;  %4255 = vmatpush.bf16.msra.mxu0 %v8940_v24  ;;  %v8975_v27 = vld [vmem:[%s10426_s25 + $0x120] sm:$0xff] }
 0xb97   : > { %4497 = vmatpush.bf16.msra.mxu2 %v8975_v27 }
 0xb9a   : > { %4417 = vmatpush.bf16.msrb.mxu3 %v8966_v21  ;;  %4256 = vmatpush.bf16.msra.mxu0 %v8939_v19 }
 0xb9b   : > { %4498 = vmatpush.bf16.msra.mxu2 %v8974_v40  ;;  %v8980_v40 = vld [vmem:[%s10489_s19 + $0x8] sm:$0xff] }
 0xb9e   : > { %4418 = vmatpush.bf16.msrb.mxu3 %v8965_v37  ;;  %4549 = vmatpush.bf16.msrb.mxu0 %v8980_v40 }
 0xb9f   : > { %4499 = vmatpush.bf16.msra.mxu2 %v8973_v2 }
 0xba2   : > { %4419 = vmatpush.bf16.msrb.mxu3 %v8964_v42 }
 0xba3   : > { %4500 = vmatpush.bf16.msra.mxu2 %v8972_v14 }
 0xba6   : > { %4420 = vmatpush.bf16.msrb.mxu3 %v8963_v41 }
 0xbfa   : > { %v4033_v33 = vpop.f32.mrf.mxu0 }
 0xc00   : > { %v4011_v39 = vpop.f32.mrf.mxu3 }
 0xc01   : > { %v4034_v17 = vadd.f32 %v4033_v33, %v4011_v39  ;;  %v9115_v33 = vld [vmem:[%s10410_s29] ss:$0 sm:$0xff]  ;;  %s10507_s29 = scalar_lea.vmem %s11421_s21, %s9972_s2 }
 0xc02   : > { %v8971_v39 = vld [vmem:[%s10426_s25 + $0x100] sm:$0xff]  ;;  %11423 = sst [smem:[#allocation53_spill]] %s10507_s29 }
 0xc03   : > { %v10450_v60 = vmul.f32 0.5, %v4034_v17  ;;  %4501 = vmatpush.bf16.msra.mxu2 %v8971_v39 }
 0xc05   : > { %v4039_v5 = vmul.f32 %v9113_v18, %v10450_v60 }
 0xc07   : > { %v4042_v44 = vadd.f32 %v9114_v30, %v4039_v5 }
 0xc09   : > { %v4043_v43 = vmax.f32 %v4042_v44, 0.0 }
 0xc0b   : > { %v4049_v45 = vpack.c.bf16 %v4043_v43, %v4043_v43 }
 0xc0d   : > { %8192 = vmatmul.msk.bf16.vlgmr.msra.gmra.mxu3 %vm11335_vm7, %v4049_v45 }
 0xc90   : > { %v4081_v17 = vpop.f32.mrf.mxu3 }
 0xc91   : > { %v4087_v18 = vmul.f32 %v9115_v33, %v4081_v17  ;;  %v8979_v33 = vld [vmem:[%s10489_s19] sm:$0xff]  ;;  %s10511_s19 = scalar_lea.vmem %s11422_s30, %s9042_s27  ;;  %s11325_s30 = smov 40  }
 0xc92   : > { %4550 = vmatpush.bf16.msrb.mxu0 %v8979_v33  ;;  %11424 = sst [smem:[#allocation54_spill]] %s10511_s19 }
 0xc93   : > { %v4090_v30 = vadd.f32 %v9116_v22, %v4087_v18  ;;  %v9446_v22 = vmov 8.0   ;;  %s11427_s27 = sld [smem:[#allocation27_spill]] }
 0xc94   : > { %9137 = vrcp.f32 %v9446_v22 }
 0xc95   : > { %v4091_v52 = vmax.f32 %v4090_v30, 0.0 }
 0xc97   : > { %v4093_v5 = vrot.slane %v4091_v52, 6 }
 0xc98   : > { %v4083_v44 = vpop.f32.mrf.mxu3 }
 0xc99   : > { %v4095_v43 = vsel %vm2533_vm1, 0.0, %v4093_v5  ;;  %v4096_v45 = vsel %vm2533_vm1, %v4093_v5, 0.0  ;;  %v8276_v16 = vpack.c.bf16 %v4093_v5, %v4093_v5 }
 0xc9a   : > { %v4131_v29 = vpack.c.bf16 %v4096_v45, %v4095_v43  ;;  %v9138_v30 = vpop.eup %9137 }
 0xc9b   : > { %8277 = vmatmul.msk.bf16.vlgmr.msra.gmra.mxu0 %vm11314_vm4, %v8276_v16  ;;  %v4516_v5 = vmul.f32 8.0, %v9138_v30  ;;  %vm4520_vm4 = vweird.f32 %v9138_v30 }
 0xc9c   : > { %v4280_v23 = vrot.slane %v4131_v29, 1  ;;  %v4133_v21 = vshrl.u32 %v4131_v29, 16  ;;  %v4135_v28 = vshll.u32 %v4131_v29, 16  ;;  %v4444_v57 = vrot.slane %v4131_v29, 2 }
 0xc9d   : > { %v4517_v16 = vsub.f32 1.0, %v4516_v5 }
 0xc9e   : > { %4338 = vmatmul.bf16.vlgmr.msra.gmra.mxu1 %v4280_v23  ;;  %v4137_v24 = vrot.slane %v4135_v28, 1  ;;  %v4361_v15 = vrot.slane %v4133_v21, 1  ;;  %v4362_v37 = vrot.slane %v4135_v28, 2 }
 0xca0   : > { %v4138_v35 = vor.u32 %v4137_v24, %v4133_v21  ;;  %v4363_v19 = vor.u32 %v4362_v37, %v4361_v15  ;;  %v4518_v21 = vmul.f32 %v9138_v30, %v4517_v16  ;;  %v8984_v16 = vld [vmem:[%s10511_s19 + $0x18] sm:$0xff] }
 0xca2   : > { %4196 = vmatmul.bf16.vlgmr.msrb.gmra.mxu2 %v4138_v35  ;;  %4421 = vmatmul.bf16.vlgmr.msrb.gmra.mxu3 %v4363_v19  ;;  %v4519_v37 = vadd.f32 %v9138_v30, %v4518_v21  ;;  %v8983_v21 = vld [vmem:[%s10511_s19 + $0x10] sm:$0xff] }
 0xcb2   : > { %4502 = vmatmul.bf16.vlgmr.msra.gmra.mxu2 %v4444_v57  ;;  %v10494_v57 = vsel %vm4520_vm4, %v9138_v30, %v4519_v37  ;;  %v4619_v30 = vld [vmem:[%s10511_s19 + $0x20] sm:$0xf]  ;;  %vm11425_vm4 = vcmask 1043456  }
 0xd18   : > { %v4258_v42 = vpop.f32.mrf.mxu0 }
 0xd1b   : > { %v4339_v54 = vpop.f32.mrf.mxu1 }
 0xd20   : > { %v4260_v41 = vpop.f32.mrf.mxu0 }
 0xd23   : > { %v4341_v27 = vpop.f32.mrf.mxu1 }
 0xd24   : > { %v4557_v27 = vld [vmem:[%s1606_s6] sm:$0x1]  ;;  %s11426_s6 = sld [smem:[#allocation26_spill]] }
 0xd25   : > { %v4197_v2 = vpop.f32.mrf.mxu2  ;;  %v4422_v14 = vpop.f32.mrf.mxu3  ;;  %v10501_v40 = vsel %vm2278_vm11, %v4557_v27, 0 }
 0xd26   : > { %v4259_v39 = vadd.f32 %v4258_v42, %v4197_v2  ;;  %4572 = vmatpush.bf16.msrb.mxu1 %v10501_v40 }
 0xd28   : > { %v4343_v52 = vadd.f32 %v4339_v54, %v4259_v39 }
 0xd2a   : > { %v4426_v44 = vadd.f32 %v4422_v14, %v4343_v52  ;;  %v4638_v52 = vunpack.c.l.b16 %v4619_v30  ;;  %s10530_s21 = scalar_lea.vmem %s11426_s6, %s9972_s2 }
 0xd2c   : > { %v4643_v5 = vpack.c.b16 %v4638_v52, %v4638_v52 }
 0xd2d   : > { %v4199_v17 = vpop.f32.mrf.mxu2  ;;  %v4424_v18 = vpop.f32.mrf.mxu3 }
 0xd35   : > { %v4503_v43 = vpop.f32.mrf.mxu2 }
 0xd36   : > { %v4507_v45 = vadd.f32 %v4503_v43, %v4426_v44  ;;  %v10515_v43 = vsel %vm11425_vm4, %v4643_v5, 0 }
 0xd37   : > { %4658 = vmatpush.bf16.msra.mxu3 %v10515_v43 }
 0xd38   : > { %v4508_v29 = vsel %vm3040_vm6, %v4507_v45, 0.0 }
 0xd39   : > { %v4509_v23 = vrot.slane %v4508_v29, 4 }
 0xd3b   : > { %v4510_v28 = vadd.f32 %v4509_v23, %v4508_v29  ;;  %4659 = vmatpush.bf16.msra.mxu3 %v8984_v16 }
 0xd3d   : > { %v4511_v24 = vrot.slane %v4510_v28, 2  ;;  %v4505_v15 = vpop.f32.mrf.mxu2 }
 0xd3f   : > { %v4512_v35 = vadd.f32 %v4511_v24, %v4510_v28  ;;  %4660 = vmatpush.bf16.msra.mxu3 %v8983_v21 }
 0xd41   : > { %v4513_v19 = vrot.slane %v4512_v35, 1 }
 0xd43   : > { %v4514_v42 = vadd.f32 %v4513_v19, %v4512_v35 }
 0xd45   : > { %v4522_v54 = vmul.f32 %v10494_v57, %v4514_v42 }
 0xd47   : > { %v4527_v41 = vpack.c.bf16 %v4522_v54, %v4522_v54 }
 0xd49   : > { %8430 = vmatmul.msk.bf16.vlgmr.msrb.gmra.mxu0 %vm3040_vm6, %v4527_v41 }
 0xdc6   : > { %v4552_v2 = vpop.f32.mrf.mxu0 }
 0xdc7   : > { %v4556_v14 = vmax.f32 %v4552_v2, 0.0 }
 0xdc9   : > { %v4558_v33 = vpack.c.bf16 %v4556_v14, %v4556_v14 }
 0xdcb   : > { %8431 = vmatmul.msk.bf16.vlgmr.msrb.gmra.mxu1 %vm11337_vm9, %v4558_v33  ;;  %v8982_v33 = vld [vmem:[%s10511_s19 + $0x8] sm:$0xff] }
 0xdcc   : > { %4661 = vmatpush.bf16.msra.mxu3 %v8982_v33 }
 0xdce   : > { %v4554_v22 = vpop.f32.mrf.mxu0 }
 0xdcf   : > { %v8981_v22 = vld [vmem:[%s10511_s19] sm:$0xff]  ;;  %s11430_s19 = smul.u32 20, %s11526_s23 }
 0xdd0   : > { %4662 = vmatpush.bf16.msra.mxu3 %v8981_v22 }
 0xdd1   : > { %s10543_s24 = scalar_lea.vmem %s11428_s8, %s11430_s19 }
 0xe48   : > { %v4574_v39 = vpop.f32.mrf.mxu1 }
 0xe49   : > { %v4578_v17 = vsub.f32 0.0, %v4574_v39  ;;  %v9117_v39 = vld [vmem:[%s10507_s29] ss:$0 sm:$0xff] }
 0xe4b   : > { %v4579_v18 = vmul.f32 1.442695, %v4578_v17  ;;  %v9118_v17 = vld [vmem:[%s10507_s29 + $0x1] ss:$0 sm:$0xff]  ;;  %s10538_s29 = scalar_lea.vmem %s11427_s27, %s9972_s2 }
 0xe4d   : > { %9139 = vpow2.f32 %v4579_v18 }
 0xe50   : > { %v4576_v44 = vpop.f32.mrf.mxu1 }
 0xe53   : > { %v9140_v29 = vpop.eup %9139 }
 0xe54   : > { %v4581_v23 = vadd.f32 1.0, %v9140_v29  ;;  %v4725_v29 = vld [vmem:[%s10543_s24 + $0x10] sm:$0x3] }
 0xe56   : > { %9141 = vrcp.f32 %v4581_v23  ;;  %v4593_v37 = vand.u32 2147483648, %v4581_v23  ;;  %v4591_v19 = vand.u32 2147483647, %v4581_v23  ;;  %vm4587_vm4 = vweird.f32 %v4581_v23 }
 0xe58   : > { %v4594_v54 = vor.u32 1.1754944e-38, %v4593_v37  ;;  %vm4592_vm5 = vcmp.eq.f32.partialorder %v4591_v19, 8.507059e+37 }
 0xe5c   : > { %v9142_v28 = vpop.eup %9141 }
 0xe5d   : > { %v4583_v24 = vmul.f32 %v9142_v28, %v4581_v23  ;;  %vm4588_vm3 = vweird.f32 %v9142_v28  ;;  %v4736_v23 = vunpack.c.l.b16 %v4725_v29  ;;  %v9119_v29 = vld [vmem:[%s10530_s21] ss:$0 sm:$0xff] }
 0xe5e   : > { %vm4589_vm10 = vmor %vm4587_vm4, %vm4588_vm3  ;;  %vm11332_vm3 = vcmask 293888  }
 0xe5f   : > { %v4584_v15 = vsub.f32 1.0, %v4583_v24  ;;  %v4739_v21 = vpack.c.b16 %v4736_v23, %v4736_v23  ;;  %v8986_v24 = vld [vmem:[%s10543_s24 + $0x8] sm:$0xff]  ;;  %vm10608_vm4 = vmpackc.low %vm2961_vm8, %vm2961_vm8 }
 0xe61   : > { %v4585_v35 = vmul.f32 %v9142_v28, %v4584_v15  ;;  %v8985_v15 = vld [vmem:[%s10543_s24] sm:$0xff] }
 0xe63   : > { %v4586_v42 = vadd.f32 %v9142_v28, %v4585_v35 }
 0xe65   : > { %v4590_v41 = vsel %vm4589_vm10, %v9142_v28, %v4586_v42  ;;  %vm11333_vm10 = vcmask 64512   ;;  %v10547_v28 = vsel %vm2533_vm1, %v4739_v21, 0  ;;  %v9120_v21 = vld [vmem:[%s10530_s21 + $0x1] ss:$0 sm:$0xff] }
 0xe66   : > { %v4595_v27 = vsel %vm4592_vm5, %v4594_v54, %v4590_v41  ;;  %vm11334_vm5 = vcmask 588800  }
 0xe67   : > { %v4597_v2 = vperm.slane %v4595_v27, 0 }
 0xe69   : > { %v4598_v14 = vmul.f32 %v4597_v2, %v4507_v45 }
 0xe6b   : > { %4600 = vrot.lane.b32.xlu0 %v4598_v14, %s11325_s30  ;;  %s11429_s30 = sld [smem:[#allocation29_spill]] }
 0xe71   : > { %s10553_s6 = scalar_lea.vmem %s11429_s30, %s10106_s18  ;;  %s11437_s18 = sld [smem:[#allocation30_spill]] }
 0xe72   : > { %v9002_v37 = vld [vmem:[%s10553_s6 + $0x78] sm:$0xff]  ;;  %v9001_v42 = vld [vmem:[%s10553_s6 + $0x70] sm:$0xff]  ;;  %v9000_v14 = vld [vmem:[%s10553_s6 + $0x68] sm:$0xff] }
 0xe73   : > { %v8994_v35 = vld [vmem:[%s10553_s6 + $0x38] sm:$0xff]  ;;  %4865 = vmatpush.bf16.msrb.mxu2 %v9002_v37  ;;  %v8993_v54 = vld [vmem:[%s10553_s6 + $0x30] sm:$0xff]  ;;  %v8992_v33 = vld [vmem:[%s10553_s6 + $0x28] sm:$0xff] }
 0xe74   : > { %v9010_v19 = vld [vmem:[%s10553_s6 + $0xb8] sm:$0xff]  ;;  %4926 = vmatpush.bf16.msrb.mxu3 %v8994_v35  ;;  %v9009_v27 = vld [vmem:[%s10553_s6 + $0xb0] sm:$0xff]  ;;  %v9008_v22 = vld [vmem:[%s10553_s6 + $0xa8] sm:$0xff] }
 0xe75   : > { %v9018_v41 = vld [vmem:[%s10553_s6 + $0xf8] sm:$0xff]  ;;  %v9017_v2 = vld [vmem:[%s10553_s6 + $0xf0] sm:$0xff] }
 0xe76   : > { %v9345_v20 = vld [vmem:[%s10553_s6 + $0x78] sm:$0xff] }
 0xe77   : > { %4866 = vmatpush.bf16.msrb.mxu2 %v9001_v42  ;;  %v9006_v42 = vld [vmem:[%s10553_s6 + $0x98] sm:$0xff]  ;;  %s10648_s19 = scalar_lea.vmem %s11437_s18, %s10203_s26  ;;  %s11440_s26 = sld [smem:[#allocation31_spill]] }
 0xe78   : > { %4927 = vmatpush.bf16.msrb.mxu3 %v8993_v54  ;;  %v9015_v54 = vld [vmem:[%s10553_s6 + $0xe0] sm:$0xff] }
 0xe7b   : > { %4867 = vmatpush.bf16.msrb.mxu2 %v9000_v14  ;;  %v9014_v14 = vld [vmem:[%s10553_s6 + $0xd8] sm:$0xff] }
 0xe7c   : > { %4928 = vmatpush.bf16.msrb.mxu3 %v8992_v33  ;;  %v9026_v33 = vld [vmem:[%s10553_s6 + $0x138] sm:$0xff] }
 0xe7d   : > { %s1641_s30 = scalar_lea.vmem %s11440_s26, %s11526_s23  ;;  %s11506_s23 = sld [smem:[#allocation50_spill]] }
 0xedd   : > { %v4601_v18 = vpop.permute.xlu0 %4600 }
 0xede   : > { %v4603_v30 = vsel %vm11335_vm7, %v10450_v60, %v4601_v18  ;;  %v8991_v18 = vld [vmem:[%s10553_s6 + $0x20] sm:$0xff] }
 0xedf   : > { %v4606_v45 = vmul.f32 %v9117_v39, %v4603_v30  ;;  %v9016_v39 = vld [vmem:[%s10553_s6 + $0xe8] sm:$0xff]  ;;  %v9007_v30 = vld [vmem:[%s10553_s6 + $0xa0] sm:$0xff]  ;;  %4929 = vmatpush.bf16.msrb.mxu3 %v8991_v18  ;;  %v9025_v18 = vld [vmem:[%s10553_s6 + $0x130] sm:$0xff] }
 0xee1   : > { %v4609_v52 = vadd.f32 %v9118_v17, %v4606_v45  ;;  %v8999_v17 = vld [vmem:[%s10553_s6 + $0x60] sm:$0xff]  ;;  %v8998_v45 = vld [vmem:[%s10553_s6 + $0x58] sm:$0xff] }
 0xee2   : > { %4868 = vmatpush.bf16.msrb.mxu2 %v8999_v17  ;;  %v9013_v17 = vld [vmem:[%s10553_s6 + $0xd0] sm:$0xff] }
 0xee3   : > { %v4610_v5 = vmax.f32 %v4609_v52, 0.0  ;;  %v8990_v52 = vld [vmem:[%s10553_s6 + $0x18] sm:$0xff] }
 0xee4   : > { %4930 = vmatpush.bf16.msrb.mxu3 %v8990_v52  ;;  %v9012_v52 = vld [vmem:[%s10553_s6 + $0xc8] sm:$0xff] }
 0xee5   : > { %v4620_v44 = vpack.c.bf16 %v4610_v5, %v4610_v5  ;;  %v8997_v5 = vld [vmem:[%s10553_s6 + $0x50] sm:$0xff] }
 0xee6   : > { %4869 = vmatpush.bf16.msrb.mxu2 %v8998_v45  ;;  %v9003_v45 = vld [vmem:[%s10553_s6 + $0x80] sm:$0xff] }
 0xee7   : > { %8448 = vmatmul.msk.bf16.vlgmr.msra.gmra.mxu3 %vm11334_vm5, %v4620_v44 }
 0xeea   : > { %4870 = vmatpush.bf16.msrb.mxu2 %v8997_v5  ;;  %v9024_v5 = vld [vmem:[%s10553_s6 + $0x128] sm:$0xff] }
 0xf6a   : > { %v4664_v16 = vpop.f32.mrf.mxu3 }
 0xf6b   : > { %4686 = vmatpush.msra.mxu0 %v4664_v16  ;;  %4708 = vmatpush.msra.mxu1 %v4664_v16 }
 0xf6c   : > { %8449 = vmatmul.msk.f32.vlgmr.msra.gmra.mxu0 %vm11333_vm10, %v10002_v38  ;;  %8450 = vmatmul.msk.f32.vlgmr.msra.gmra.mxu1 %vm11333_vm10, %v10007_v34 }
 0xf6d   : > { %4754 = vmatpush.bf16.msrb.mxu0 %v10547_v28  ;;  %5007 = vmatpush.bf16.msrb.mxu1 %v9010_v19 }
 0xf71   : > { %4755 = vmatpush.bf16.msrb.mxu0 %v8986_v24  ;;  %5008 = vmatpush.bf16.msrb.mxu1 %v9009_v27  ;;  %v8996_v24 = vld [vmem:[%s10553_s6 + $0x48] sm:$0xff]  ;;  %v8995_v27 = vld [vmem:[%s10553_s6 + $0x40] sm:$0xff] }
 0xf72   : > { %v4666_v60 = vpop.f32.mrf.mxu3  ;;  %4871 = vmatpush.bf16.msrb.mxu2 %v8996_v24  ;;  %v9121_v24 = vld [vmem:[%s10538_s29] ss:$0 sm:$0xff] }
 0xf75   : > { %4756 = vmatpush.bf16.msrb.mxu0 %v8985_v15  ;;  %5009 = vmatpush.bf16.msrb.mxu1 %v9008_v22  ;;  %v8988_v22 = vld [vmem:[%s10553_s6 + $0x8] sm:$0xff] }
 0xf76   : > { %4872 = vmatpush.bf16.msrb.mxu2 %v8995_v27 }
 0xf79   : > { %5090 = vmatpush.bf16.msra.mxu0 %v9018_v41  ;;  %5010 = vmatpush.bf16.msrb.mxu1 %v9007_v30  ;;  %v8989_v41 = vld [vmem:[%s10553_s6 + $0x10] sm:$0xff]  ;;  %v8987_v30 = vld [vmem:[%s10553_s6] sm:$0xff] }
 0xf7a   : > { %4931 = vmatpush.bf16.msrb.mxu3 %v8989_v41  ;;  %5171 = vmatpush.bf16.msra.mxu2 %v9026_v33 }
 0xf7d   : > { %5091 = vmatpush.bf16.msra.mxu0 %v9017_v2  ;;  %5011 = vmatpush.bf16.msrb.mxu1 %v9006_v42  ;;  %v9005_v2 = vld [vmem:[%s10553_s6 + $0x90] sm:$0xff] }
 0xf7e   : > { %4932 = vmatpush.bf16.msrb.mxu3 %v8988_v22  ;;  %5172 = vmatpush.bf16.msra.mxu2 %v9025_v18 }
 0xf81   : > { %5092 = vmatpush.bf16.msra.mxu0 %v9016_v39  ;;  %5012 = vmatpush.bf16.msrb.mxu1 %v9005_v2  ;;  %v9004_v39 = vld [vmem:[%s10553_s6 + $0x88] sm:$0xff] }
 0xf82   : > { %4933 = vmatpush.bf16.msrb.mxu3 %v8987_v30  ;;  %5173 = vmatpush.bf16.msra.mxu2 %v9024_v5 }
 0xf85   : > { %5093 = vmatpush.bf16.msra.mxu0 %v9015_v54  ;;  %5013 = vmatpush.bf16.msrb.mxu1 %v9004_v39 }
 0xf89   : > { %5094 = vmatpush.bf16.msra.mxu0 %v9014_v14  ;;  %5014 = vmatpush.bf16.msrb.mxu1 %v9003_v45 }
 0xf8d   : > { %5095 = vmatpush.bf16.msra.mxu0 %v9013_v17 }
 0xf91   : > { %5096 = vmatpush.bf16.msra.mxu0 %v9012_v52 }
 0xfe9   : > { %v4688_v44 = vpop.f32.mrf.mxu0  ;;  %v4710_v16 = vpop.f32.mrf.mxu1 }
 0xfea   : > { %v4711_v60 = vadd.f32 %v4710_v16, %v4688_v44  ;;  %v9011_v44 = vld [vmem:[%s10553_s6 + $0xc0] sm:$0xff] }
 0xfeb   : > { %v9023_v16 = vld [vmem:[%s10553_s6 + $0x120] sm:$0xff]  ;;  %5097 = vmatpush.bf16.msra.mxu0 %v9011_v44 }
 0xfec   : > { %v10575_v23 = vmul.f32 0.5, %v4711_v60  ;;  %5174 = vmatpush.bf16.msra.mxu2 %v9023_v16  ;;  %v9022_v60 = vld [vmem:[%s10553_s6 + $0x118] sm:$0xff] }
 0xfed   : > { %v9165_v16 = vld [vmem:[%s9919_s1 + $0x38] sm:$0xff] }
 0xfee   : > { %v4716_v15 = vmul.f32 %v9119_v29, %v10575_v23  ;;  %v9021_v29 = vld [vmem:[%s10553_s6 + $0x110] sm:$0xff] }
 0xff0   : > { %v4719_v37 = vadd.f32 %v9120_v21, %v4716_v15  ;;  %5175 = vmatpush.bf16.msra.mxu2 %v9022_v60  ;;  %v9020_v21 = vld [vmem:[%s10553_s6 + $0x108] sm:$0xff]  ;;  %v9122_v15 = vld [vmem:[%s10538_s29 + $0x1] ss:$0 sm:$0xff]  ;;  %v9166_v60 = vld [vmem:[%s9919_s1 + $0x30] sm:$0xff] }
 0xff2   : > { %v4720_v35 = vmax.f32 %v4719_v37, 0.0 }
 0xff4   : > { %v4726_v19 = vpack.c.bf16 %v4720_v35, %v4720_v35  ;;  %5176 = vmatpush.bf16.msra.mxu2 %v9021_v29  ;;  %v9019_v35 = vld [vmem:[%s10553_s6 + $0x100] sm:$0xff] }
 0xff5   : > { %v8697_v29 = vld [vmem:[%s9458_s5 + $0x80] sm:$0xff] }
 0xff6   : > { %8459 = vmatmul.msk.bf16.vlgmr.msrb.gmra.mxu0 %vm11332_vm3, %v4726_v19  ;;  %vm11433_vm3 = vcmask 56320  }
 0xff7   : > { %5354 = vmatpush.bf16.msrb.mxu0 %v9650_v6  ;;  %vm11434_vm10 = vmmov %vm11433_vm3 }
 0xff8   : > { %5177 = vmatpush.bf16.msra.mxu2 %v9020_v21  ;;  %v8698_v21 = vld [vmem:[%s9458_s5 + $0x88] sm:$0xff]  ;;  %vm11435_vm5 = vmmov %vm11433_vm3 }
 0xff9   : > { %vm11436_vm7 = vmmov %vm11433_vm3 }
 0xffc   : > { %5178 = vmatpush.bf16.msra.mxu2 %v9019_v35 }
0x1073   : > { %v4758_v37 = vpop.f32.mrf.mxu0 }
0x1074   : > { %v4764_v19 = vmul.f32 %v9121_v24, %v4758_v37  ;;  %v9167_v24 = vld [vmem:[%s9919_s1 + $0x28] sm:$0xff]  ;;  %v9168_v37 = vld [vmem:[%s9919_s1 + $0x20] sm:$0xff] }
0x1076   : > { %v4767_v42 = vadd.f32 %v9122_v15, %v4764_v19  ;;  %v5315_v15 = vpack.c.bf16 %v8698_v21, %v8697_v29  ;;  %v9169_v19 = vld [vmem:[%s9919_s1 + $0x18] sm:$0xff]  ;;  %v8709_v29 = vld [vmem:[%s9458_s5 + $0xe0] sm:$0xff]  ;;  %v8710_v21 = vld [vmem:[%s9458_s5 + $0xe8] sm:$0xff] }
0x1078   : > { %v4768_v54 = vmax.f32 %v4767_v42, 0.0  ;;  %v9170_v42 = vld [vmem:[%s9919_s1 + $0x10] sm:$0xff] }
0x107a   : > { %v4770_v41 = vrot.slane %v4768_v54, 6  ;;  %v8699_v54 = vld [vmem:[%s9458_s5 + $0x90] sm:$0xff] }
0x107b   : > { %v4760_v27 = vpop.f32.mrf.mxu0 }
0x107c   : > { %v4772_v2 = vsel %vm2533_vm1, 0.0, %v4770_v41  ;;  %v8700_v41 = vld [vmem:[%s9458_s5 + $0x98] sm:$0xff]  ;;  %v9171_v27 = vld [vmem:[%s9919_s1 + $0x8] sm:$0xff] }
0x107d   : > { %v4774_v14 = vsel %vm2961_vm8, %v4772_v2, 0.0  ;;  %v8541_v33 = vpack.c.bf16 %v4772_v2, %v4772_v2  ;;  %v5316_v2 = vpack.c.bf16 %v8700_v41, %v8699_v54 }
0x107e   : > { %v4791_v22 = vpack.c.bf16 %v4774_v14, %v4774_v14  ;;  %v9172_v14 = vld [vmem:[%s9919_s1] sm:$0xff] }
0x107f   : > { %8542 = vmatmul.msk.bf16.vlgmr.msrb.gmra.mxu3 %vm10608_vm4, %v8541_v33  ;;  %v8701_v33 = vld [vmem:[%s9458_s5 + $0xa0] sm:$0xff] }
0x1080   : > { %v4812_v39 = vshll.u32 %v4791_v22, 16  ;;  %v4957_v17 = vrot.slane %v4791_v22, 1  ;;  %v4810_v18 = vshrl.u32 %v4791_v22, 16  ;;  %v5121_v35 = vrot.slane %v4791_v22, 2  ;;  %v8702_v22 = vld [vmem:[%s9458_s5 + $0xa8] sm:$0xff] }
0x1082   : > { %5015 = vmatmul.bf16.vlgmr.msrb.gmra.mxu1 %v4957_v17  ;;  %v4814_v30 = vrot.slane %v4812_v39, 1  ;;  %v5038_v45 = vrot.slane %v4810_v18, 1  ;;  %v5039_v52 = vrot.slane %v4812_v39, 2  ;;  %v5317_v39 = vpack.c.bf16 %v8702_v22, %v8701_v33  ;;  %v8703_v17 = vld [vmem:[%s9458_s5 + $0xb0] sm:$0xff]  ;;  %v9027_v22 = vld [vmem:[%s10648_s19] sm:$0xff] }
0x1084   : > { %v4815_v5 = vor.u32 %v4814_v30, %v4810_v18  ;;  %v5040_v44 = vor.u32 %v5039_v52, %v5038_v45  ;;  %v8704_v18 = vld [vmem:[%s9458_s5 + $0xb8] sm:$0xff]  ;;  %v8705_v45 = vld [vmem:[%s9458_s5 + $0xc0] sm:$0xff]  ;;  %v8706_v52 = vld [vmem:[%s9458_s5 + $0xc8] sm:$0xff] }
0x1085   : > { %v5318_v30 = vpack.c.bf16 %v8704_v18, %v8703_v17 }
0x1086   : > { %4873 = vmatmul.bf16.vlgmr.msrb.gmra.mxu2 %v4815_v5  ;;  %5098 = vmatmul.bf16.vlgmr.msra.gmra.mxu0 %v5040_v44  ;;  %v5319_v5 = vpack.c.bf16 %v8706_v52, %v8705_v45  ;;  %v8707_v44 = vld [vmem:[%s9458_s5 + $0xd0] sm:$0xff] }
0x1087   : > { %5502 = vmatpush.bf16.msrb.mxu2 %v9165_v16  ;;  %v8708_v16 = vld [vmem:[%s9458_s5 + $0xd8] sm:$0xff] }
0x108b   : > { %5503 = vmatpush.bf16.msrb.mxu2 %v9166_v60  ;;  %v5320_v60 = vpack.c.bf16 %v8708_v16, %v8707_v44 }
0x108f   : > { %5504 = vmatpush.bf16.msrb.mxu2 %v9167_v24  ;;  %v5321_v24 = vpack.c.bf16 %v8710_v21, %v8709_v29 }
0x1093   : > { %5505 = vmatpush.bf16.msrb.mxu2 %v9168_v37  ;;  %v8711_v37 = vld [vmem:[%s9458_s5 + $0xf0] sm:$0xff] }
0x1096   : > { %5179 = vmatmul.bf16.vlgmr.msra.gmra.mxu2 %v5121_v35  ;;  %8713 = vmatmul.msk.bf16.vlgmr.msrb.gmra.mxu0 %vm11433_vm3, %v5315_v15  ;;  %v8712_v35 = vld [vmem:[%s9458_s5 + $0xf8] sm:$0xff] }
0x1097   : > { %5543 = vmatpush.bf16.msra.mxu2 %v9169_v19 }
0x109b   : > { %5544 = vmatpush.bf16.msra.mxu2 %v9170_v42  ;;  %v5322_v42 = vpack.c.bf16 %v8712_v35, %v8711_v37 }
0x109f   : > { %5545 = vmatpush.bf16.msra.mxu2 %v9171_v27  ;;  %v9028_v27 = vld [vmem:[%s10648_s19 + $0x8] sm:$0xff] }
0x10a0   : > { %5227 = vmatpush.bf16.msra.mxu3 %v9028_v27 }
0x10a3   : > { %5546 = vmatpush.bf16.msra.mxu2 %v9172_v14 }
0x10a4   : > { %5228 = vmatpush.bf16.msra.mxu3 %v9027_v22 }
0x10a6   : > { %8714 = vmatmul.msk.bf16.gmra.mxu0 %vm11434_vm10, %v5316_v2  ;;  %vm11438_vm10 = vmmov %vm11433_vm3 }
0x10b6   : > { %8715 = vmatmul.msk.bf16.gmra.mxu0 %vm11433_vm3, %v5317_v39  ;;  %v9448_v39 = vmov 4.0  }
0x10b7   : > { %9143 = vrcp.f32 %v9448_v39 }
0x10c6   : > { %8716 = vmatmul.msk.bf16.gmra.mxu0 %vm11435_vm5, %v5318_v30  ;;  %vm11439_vm5 = vmmov %vm11433_vm3  ;;  %v9144_v30 = vpop.eup %9143 }
0x10d6   : > { %8717 = vmatmul.msk.bf16.gmra.mxu0 %vm11436_vm7, %v5319_v5  ;;  %v5194_v5 = vmul.f32 4.0, %v9144_v30  ;;  %vm11336_vm7 = vcmask 257024  }
0x10d8   : > { %v5195_v29 = vsub.f32 1.0, %v5194_v5 }
0x10da   : > { %v5196_v35 = vmul.f32 %v9144_v30, %v5195_v29 }
0x10dc   : > { %v5197_v27 = vadd.f32 %v9144_v30, %v5196_v35 }
0x10e6   : > { %8718 = vmatmul.msk.bf16.gmra.mxu0 %vm11438_vm10, %v5320_v60  ;;  %vm5198_vm10 = vweird.f32 %v9144_v30 }
0x10f6   : > { %8719 = vmatmul.msk.bf16.gmra.mxu0 %vm11433_vm3, %v5321_v24  ;;  %vm11442_vm3 = vcmp.eq.s32.totalorder %v9718_v48, %v9712_v47  ;;  %v9173_v47 = vld [vmem:[%s9919_s1 + $0x58] sm:$0xff] }
0x10ff   : > { %v5016_v15 = vpop.f32.mrf.mxu1 }
0x1102   : > { %v4935_v19 = vpop.f32.mrf.mxu3 }
0x1103   : > { %v5099_v54 = vpop.f32.mrf.mxu0 }
0x1106   : > { %8720 = vmatmul.msk.bf16.gmra.mxu0 %vm11439_vm5, %v5322_v42  ;;  %vm11443_vm5 = vcmp.eq.s32.totalorder %v9718_v48, %v9732_v51  ;;  %v9175_v51 = vld [vmem:[%s9919_s1 + $0x48] sm:$0xff] }
0x1107   : > { %v5018_v41 = vpop.f32.mrf.mxu1 }
0x1109   : > { %v4874_v2 = vpop.f32.mrf.mxu2 }
0x110a   : > { %v4937_v14 = vpop.f32.mrf.mxu3  ;;  %v4936_v17 = vadd.f32 %v4935_v19, %v4874_v2 }
0x110b   : > { %v5101_v33 = vpop.f32.mrf.mxu0  ;;  %v10663_v14 = vsel %vm5198_vm10, %v9144_v30, %v5197_v27  ;;  %vm11444_vm10 = vcmp.eq.s32.totalorder %v9718_v48, %v9752_v55  ;;  %v9177_v55 = vld [vmem:[%s10099_s16 + $0x18] sm:$0xff] }
0x110c   : > { %v5020_v52 = vadd.f32 %v5016_v15, %v4936_v17 }
0x110e   : > { %v5103_v44 = vadd.f32 %v5099_v54, %v5020_v52 }
0x1111   : > { %v4876_v18 = vpop.f32.mrf.mxu2 }
0x1113   : > { %v10653_v45 = vpop.f32.mrf.mxu0 }
0x1119   : > { %v5180_v16 = vpop.f32.mrf.mxu2 }
0x111a   : > { %v10655_v60 = vadd.f32 %v5180_v16, %v5103_v44 }
0x111b   : > { %v10657_v21 = vpop.f32.mrf.mxu0 }
0x111c   : > { %v5186_v24 = vsel %vm11336_vm7, %v10655_v60, 0.0  ;;  %vm11450_vm7 = vcmp.eq.s32.totalorder %v9718_v48, %v9763_v56  ;;  %v11465_v56 = vld [vmem:[#allocation38_spill] sm:$0xff] }
0x111d   : > { %v5187_v37 = vrot.slane %v5186_v24, 4 }
0x111f   : > { %v5188_v19 = vadd.f32 %v5187_v37, %v5186_v24  ;;  %v5235_v24 = vld [vmem:[%s1641_s30] sm:$0x1] }
0x1120   : > { %v10680_v37 = vsel %vm2278_vm11, %v5235_v24, 0  ;;  %v9174_v24 = vld [vmem:[%s9919_s1 + $0x50] sm:$0xff] }
0x1121   : > { %v5189_v42 = vrot.slane %v5188_v19, 2  ;;  %v5182_v41 = vpop.f32.mrf.mxu2  ;;  %5250 = vmatpush.bf16.msra.mxu1 %v10680_v37 }
0x1123   : > { %v5190_v2 = vadd.f32 %v5189_v42, %v5188_v19  ;;  %v10661_v15 = vpop.f32.mrf.mxu0 }
0x1125   : > { %v5191_v54 = vrot.slane %v5190_v2, 1 }
0x1127   : > { %v5192_v33 = vadd.f32 %v5191_v54, %v5190_v2  ;;  %v11441_v2 = vmov 1.0  }
0x1129   : > { %v5200_v22 = vmul.f32 %v10663_v14, %v5192_v33 }
0x112b   : > { %v5205_v39 = vpack.c.bf16 %v5200_v22, %v5200_v22  ;;  %v10666_v17 = vpop.f32.mrf.mxu0 }
0x112d   : > { %8695 = vmatmul.msk.bf16.vlgmr.msra.gmra.mxu3 %vm3040_vm6, %v5205_v39 }
0x1133   : > { %v10669_v18 = vpop.f32.mrf.mxu0 }
0x113b   : > { %v10671_v52 = vpop.f32.mrf.mxu0 }
0x1143   : > { %v10673_v5 = vpop.f32.mrf.mxu0 }
0x114b   : > { %v10675_v44 = vpop.f32.mrf.mxu0 }
0x1153   : > { %v5376_v16 = vpop.f32.mrf.mxu0 }
0x115b   : > { %v5378_v29 = vpop.f32.mrf.mxu0 }
0x1163   : > { %v5381_v30 = vpop.f32.mrf.mxu0 }
0x116b   : > { %v5383_v35 = vpop.f32.mrf.mxu0 }
0x1173   : > { %v5386_v19 = vpop.f32.mrf.mxu0 }
0x117b   : > { %v5388_v42 = vpop.f32.mrf.mxu0 }
0x1183   : > { %v5391_v41 = vpop.f32.mrf.mxu0 }
0x118b   : > { %v5393_v27 = vpop.f32.mrf.mxu0 }
0x118c   : > { %5396 = vmatpush.msrb.mxu3 %v5393_v27  ;;  %5441 = vmatpush.msrb.mxu1 %v5393_v27 }
0x118e   : > { %5397 = vmatpush.msrb.mxu3 %v5391_v41  ;;  %5442 = vmatpush.msrb.mxu1 %v5391_v41 }
0x1190   : > { %5398 = vmatpush.msrb.mxu3 %v5388_v42  ;;  %5443 = vmatpush.msrb.mxu1 %v5388_v42 }
0x1192   : > { %5399 = vmatpush.msrb.mxu3 %v5386_v19  ;;  %5444 = vmatpush.msrb.mxu1 %v5386_v19 }
0x1194   : > { %5400 = vmatpush.msrb.mxu3 %v5383_v35  ;;  %5445 = vmatpush.msrb.mxu1 %v5383_v35 }
0x1196   : > { %5401 = vmatpush.msrb.mxu3 %v5381_v30  ;;  %5446 = vmatpush.msrb.mxu1 %v5381_v30 }
0x1198   : > { %5402 = vmatpush.msrb.mxu3 %v5378_v29  ;;  %5447 = vmatpush.msrb.mxu1 %v5378_v29 }
0x119a   : > { %5403 = vmatpush.msrb.mxu3 %v5376_v16  ;;  %5448 = vmatpush.msrb.mxu1 %v5376_v16 }
0x119c   : > { %5404 = vmatpush.msrb.mxu3 %v10675_v44  ;;  %5449 = vmatpush.msrb.mxu1 %v10675_v44 }
0x119e   : > { %5405 = vmatpush.msrb.mxu3 %v10673_v5  ;;  %5450 = vmatpush.msrb.mxu1 %v10673_v5 }
0x11a0   : > { %5406 = vmatpush.msrb.mxu3 %v10671_v52  ;;  %5451 = vmatpush.msrb.mxu1 %v10671_v52 }
0x11a2   : > { %5407 = vmatpush.msrb.mxu3 %v10669_v18  ;;  %5452 = vmatpush.msrb.mxu1 %v10669_v18 }
0x11a4   : > { %5408 = vmatpush.msrb.mxu3 %v10666_v17  ;;  %5453 = vmatpush.msrb.mxu1 %v10666_v17 }
0x11a6   : > { %5409 = vmatpush.msrb.mxu3 %v10661_v15  ;;  %5454 = vmatpush.msrb.mxu1 %v10661_v15 }
0x11a8   : > { %5410 = vmatpush.msrb.mxu3 %v10657_v21  ;;  %5455 = vmatpush.msrb.mxu1 %v10657_v21 }
0x11aa   : > { %5411 = vmatpush.msrb.mxu3 %v10653_v45  ;;  %5456 = vmatpush.msrb.mxu1 %v10653_v45 }
0x11ab   : > { %8721 = vmatmul.msk.f32.vlgmr.msrb.gmra.mxu3 %vm11442_vm3, %v11441_v2  ;;  %vm11445_vm3 = vcmp.eq.s32.totalorder %v9718_v48, %v9772_v58  ;;  %v9180_v58 = vld [vmem:[%s10099_s16] sm:$0xff] }
0x11ac   : > { %5568 = vmatpush.msra.mxu3 %v5393_v27  ;;  %v9182_v27 = vld [vmem:[%s10110_s0 + $0xf0] sm:$0xff] }
0x11ae   : > { %5569 = vmatpush.msra.mxu3 %v5391_v41 }
0x11b0   : > { %5570 = vmatpush.msra.mxu3 %v5388_v42  ;;  %v5230_v54 = vpop.f32.mrf.mxu3  ;;  %v9181_v42 = vld [vmem:[%s10110_s0 + $0xf8] sm:$0xff] }
0x11b1   : > { %v5234_v33 = vmax.f32 %v5230_v54, 0.0 }
0x11b2   : > { %5571 = vmatpush.msra.mxu3 %v5386_v19 }
0x11b3   : > { %v5236_v22 = vpack.c.bf16 %v5234_v33, %v5234_v33  ;;  %8722 = vmatmul.msk.f32.gmra.mxu3 %vm11443_vm5, %v11441_v2  ;;  %vm11446_vm5 = vcmp.eq.s32.totalorder %v9718_v48, %v9721_v49  ;;  %v9179_v49 = vld [vmem:[%s10099_s16 + $0x8] sm:$0xff]  ;;  %v9184_v33 = vld [vmem:[%s10110_s0 + $0xe0] sm:$0xff] }
0x11b4   : > { %5572 = vmatpush.msra.mxu3 %v5383_v35 }
0x11b5   : > { %8696 = vmatmul.msk.bf16.vlgmr.msra.gmra.mxu1 %vm11337_vm9, %v5236_v22  ;;  %vm11453_vm9 = vcmp.eq.s32.totalorder %v9718_v48, %v9853_v7 }
0x11b6   : > { %5573 = vmatpush.msra.mxu3 %v5381_v30  ;;  %5629 = vmatpush.bf16.msra.mxu1 %v9173_v47 }
0x11b8   : > { %5574 = vmatpush.msra.mxu3 %v5378_v29  ;;  %v5232_v39 = vpop.f32.mrf.mxu3 }
0x11b9   : > { %v9185_v39 = vld [vmem:[%s10110_s0 + $0xd8] sm:$0xff] }
0x11ba   : > { %5575 = vmatpush.msra.mxu3 %v5376_v16  ;;  %5630 = vmatpush.bf16.msra.mxu1 %v9174_v24  ;;  %v9176_v16 = vld [vmem:[%s9919_s1 + $0x40] sm:$0xff]  ;;  %s11507_s1 = sld [smem:[#allocation54_spill]] }
0x11bb   : > { %8723 = vmatmul.msk.f32.gmra.mxu3 %vm11444_vm10, %v11441_v2  ;;  %vm11447_vm10 = vcmp.eq.s32.totalorder %v9718_v48, %v9794_v61 }
0x11bc   : > { %5576 = vmatpush.msra.mxu3 %v10675_v44 }
0x11be   : > { %5577 = vmatpush.msra.mxu3 %v10673_v5  ;;  %5631 = vmatpush.bf16.msra.mxu1 %v9175_v51  ;;  %v9186_v51 = vld [vmem:[%s10110_s0 + $0xd0] sm:$0xff] }
0x11c0   : > { %5578 = vmatpush.msra.mxu3 %v10671_v52 }
0x11c2   : > { %5579 = vmatpush.msra.mxu3 %v10669_v18  ;;  %5632 = vmatpush.bf16.msra.mxu1 %v9176_v16  ;;  %v9178_v18 = vld [vmem:[%s10099_s16 + $0x10] sm:$0xff]  ;;  %v9187_v16 = vld [vmem:[%s10110_s0 + $0xc8] sm:$0xff] }
0x11c3   : > { %8724 = vmatmul.msk.f32.gmra.mxu3 %vm11445_vm3, %v11441_v2  ;;  %vm11448_vm3 = vcmp.eq.s32.totalorder %v9718_v48, %v9745_v53  ;;  %v11463_v53 = vld [vmem:[#allocation37_spill] sm:$0xff] }
0x11c4   : > { %5580 = vmatpush.msra.mxu3 %v10666_v17 }
0x11c5   : > { %8729 = vmatmul.msk.f32.vlgmr.msrb.gmra.mxu1 %vm11446_vm5, %v11441_v2  ;;  %vm11449_vm5 = vcmp.eq.s32.totalorder %v9718_v48, %v9816_v0 }
0x11c6   : > { %5581 = vmatpush.msra.mxu3 %v10661_v15  ;;  %5837 = vmatpush.bf16.msrb.mxu1 %v9177_v55 }
0x11c8   : > { %5582 = vmatpush.msra.mxu3 %v10657_v21 }
0x11ca   : > { %5583 = vmatpush.msra.mxu3 %v10653_v45  ;;  %5838 = vmatpush.bf16.msrb.mxu1 %v9178_v18  ;;  %v9188_v18 = vld [vmem:[%s10110_s0 + $0xc0] sm:$0xff] }
0x11cb   : > { %8725 = vmatmul.msk.f32.gmra.mxu3 %vm11447_vm10, %v11441_v2  ;;  %vm11451_vm10 = vcmp.eq.s32.totalorder %v9718_v48, %v9835_v3 }
0x11cd   : > { %8730 = vmatmul.msk.f32.gmra.mxu1 %vm11448_vm3, %v11441_v2  ;;  %vm11452_vm3 = vcmp.eq.s32.totalorder %v9718_v48, %v9785_v59  ;;  %v11467_v59 = vld [vmem:[#allocation39_spill] sm:$0xff] }
0x11ce   : > { %5839 = vmatpush.bf16.msrb.mxu1 %v9179_v49 }
0x11d2   : > { %5840 = vmatpush.bf16.msrb.mxu1 %v9180_v58 }
0x11d3   : > { %8726 = vmatmul.msk.f32.gmra.mxu3 %vm11449_vm5, %v11441_v2  ;;  %vm11454_vm5 = vcmp.eq.s32.totalorder %v9718_v48, %v9807_v62 }
0x11d5   : > { %8731 = vmatmul.msk.f32.gmra.mxu1 %vm11450_vm7, %v11441_v2  ;;  %vm11455_vm7 = vcmp.eq.s32.totalorder %v9718_v48, %v9879_v9 }
0x11db   : > { %8727 = vmatmul.msk.f32.gmra.mxu3 %vm11451_vm10, %v11441_v2  ;;  %vm11456_vm10 = vcmp.eq.s32.totalorder %v9718_v48, %v9828_v1 }
0x11dd   : > { %8732 = vmatmul.msk.f32.gmra.mxu1 %vm11452_vm3, %v11441_v2  ;;  %vm11457_vm3 = vcmp.eq.s32.totalorder %v9718_v48, %v9888_v10 }
0x11e3   : > { %8728 = vmatmul.msk.f32.gmra.mxu3 %vm11453_vm9, %v11441_v2  ;;  %vm11458_vm9 = vcmp.eq.s32.totalorder %v9718_v48, %v9846_v4 }
0x11e5   : > { %8733 = vmatmul.msk.f32.gmra.mxu1 %vm11454_vm5, %v11441_v2  ;;  %vm11459_vm5 = vcmp.eq.s32.totalorder %v9718_v48, %v9897_v11 }
0x11eb   : > { %8745 = vmatmul.msk.f32.vlgmr.msra.gmra.mxu3 %vm11455_vm7, %v11441_v2  ;;  %vm11460_vm7 = vcmp.eq.s32.totalorder %v9718_v48, %v9864_v8 }
0x11ed   : > { %8734 = vmatmul.msk.f32.gmra.mxu1 %vm11456_vm10, %v11441_v2  ;;  %vm11461_vm10 = vcmp.eq.s32.totalorder %v9718_v48, %v9906_v12 }
0x11f3   : > { %8746 = vmatmul.msk.f32.gmra.mxu3 %vm11457_vm3, %v11441_v2  ;;  %vm11462_vm3 = vcmp.eq.s32.totalorder %v9718_v48, %v9916_v13 }
0x11f5   : > { %8735 = vmatmul.msk.f32.gmra.mxu1 %vm11458_vm9, %v11441_v2  ;;  %vm11464_vm9 = vcmp.eq.s32.totalorder %v9718_v48, %v11463_v53 }
0x11fb   : > { %8747 = vmatmul.msk.f32.gmra.mxu3 %vm11459_vm5, %v11441_v2  ;;  %vm11466_vm5 = vcmp.eq.s32.totalorder %v9718_v48, %v11465_v56 }
0x11fd   : > { %8736 = vmatmul.msk.f32.gmra.mxu1 %vm11460_vm7, %v11441_v2  ;;  %vm11468_vm7 = vcmp.eq.s32.totalorder %v9718_v48, %v11467_v59 }
0x1203   : > { %8748 = vmatmul.msk.f32.gmra.mxu3 %vm11461_vm10, %v11441_v2  ;;  %vm11470_vm10 = vcmask 531456  }
0x120b   : > { %8749 = vmatmul.msk.f32.gmra.mxu3 %vm11462_vm3, %v11441_v2  ;;  %vm11472_vm3 = vmmov %vm11470_vm10 }
0x1213   : > { %8750 = vmatmul.msk.f32.gmra.mxu3 %vm11464_vm9, %v11441_v2  ;;  %vm11473_vm9 = vmmov %vm11472_vm3 }
0x121b   : > { %8751 = vmatmul.msk.f32.gmra.mxu3 %vm11466_vm5, %v11441_v2  ;;  %vm11476_vm5 = vmmov %vm11472_vm3 }
0x1223   : > { %8752 = vmatmul.msk.f32.gmra.mxu3 %vm11468_vm7, %v11441_v2  ;;  %v9183_v2 = vld [vmem:[%s10110_s0 + $0xe8] sm:$0xff]  ;;  %vm11477_vm7 = vmmov %vm11472_vm3 }
0x122e   : > { %v5413_v61 = vpop.f32.mrf.mxu3 }
0x1232   : > { %v10812_v62 = vpop.f32.mrf.mxu1 }
0x1236   : > { %v5416_v0 = vpop.f32.mrf.mxu3 }
0x1237   : > { %v5437_v47 = vpack.c.bf16 %v5416_v0, %v5413_v61 }
0x123a   : > { %v5254_v1 = vpop.f32.mrf.mxu1 }
0x123e   : > { %v5419_v3 = vpop.f32.mrf.mxu3 }
0x1242   : > { %v5458_v4 = vpop.f32.mrf.mxu1 }
0x1246   : > { %v5422_v7 = vpop.f32.mrf.mxu3 }
0x1247   : > { %v5438_v58 = vpack.c.bf16 %v5422_v7, %v5419_v3 }
0x124a   : > { %v5461_v8 = vpop.f32.mrf.mxu1 }
0x124b   : > { %v5482_v9 = vpack.c.bf16 %v5461_v8, %v5458_v4 }
0x124d   : > { %8737 = vmatmul.msk.bf16.vlgmr.msrb.gmra.mxu2 %vm1976_vm2, %v5482_v9 }
0x124e   : > { %v5425_v10 = vpop.f32.mrf.mxu3 }
0x1252   : > { %v5464_v11 = vpop.f32.mrf.mxu1 }
0x1256   : > { %v5428_v12 = vpop.f32.mrf.mxu3 }
0x1257   : > { %v5439_v61 = vpack.c.bf16 %v5428_v12, %v5425_v10 }
0x125a   : > { %v5467_v13 = vpop.f32.mrf.mxu1 }
0x125b   : > { %v5483_v45 = vpack.c.bf16 %v5467_v13, %v5464_v11 }
0x125d   : > { %8738 = vmatmul.msk.bf16.gmra.mxu2 %vm1976_vm2, %v5483_v45 }
0x125e   : > { %v5431_v48 = vpop.f32.mrf.mxu3 }
0x1262   : > { %v5470_v21 = vpop.f32.mrf.mxu1 }
0x1266   : > { %v5434_v15 = vpop.f32.mrf.mxu3 }
0x1267   : > { %v5440_v0 = vpack.c.bf16 %v5434_v15, %v5431_v48 }
0x126a   : > { %v5473_v17 = vpop.f32.mrf.mxu1 }
0x126b   : > { %v5484_v52 = vpack.c.bf16 %v5473_v17, %v5470_v21 }
0x126d   : > { %8739 = vmatmul.msk.bf16.gmra.mxu2 %vm1976_vm2, %v5484_v52 }
0x126e   : > { %v5585_v5 = vpop.f32.mrf.mxu3 }
0x1272   : > { %v5476_v44 = vpop.f32.mrf.mxu1 }
0x1276   : > { %v5588_v29 = vpop.f32.mrf.mxu3 }
0x1277   : > { %v5609_v30 = vpack.c.bf16 %v5588_v29, %v5585_v5 }
0x1279   : > { %8753 = vmatmul.msk.bf16.vlgmr.msra.gmra.mxu1 %vm1976_vm2, %v5609_v30 }
0x127a   : > { %v5479_v35 = vpop.f32.mrf.mxu1  ;;  %5993 = vmatpush.bf16.msra.mxu1 %v9181_v42 }
0x127b   : > { %v5485_v19 = vpack.c.bf16 %v5479_v35, %v5476_v44 }
0x127d   : > { %8740 = vmatmul.msk.bf16.gmra.mxu2 %vm1976_vm2, %v5485_v19 }
0x127e   : > { %v5591_v41 = vpop.f32.mrf.mxu3  ;;  %5994 = vmatpush.bf16.msra.mxu1 %v9182_v27 }
0x1282   : > { %5995 = vmatpush.bf16.msra.mxu1 %v9183_v2 }
0x1286   : > { %v5594_v54 = vpop.f32.mrf.mxu3  ;;  %5996 = vmatpush.bf16.msra.mxu1 %v9184_v33 }
0x1287   : > { %v5610_v22 = vpack.c.bf16 %v5594_v54, %v5591_v41 }
0x1289   : > { %8754 = vmatmul.msk.bf16.gmra.mxu1 %vm1976_vm2, %v5610_v22 }
0x128a   : > { %5997 = vmatpush.bf16.msra.mxu1 %v9185_v39 }
0x128d   : > { %8741 = vmatmul.msk.bf16.vlgmr.msra.gmra.mxu2 %vm1976_vm2, %v5437_v47 }
0x128e   : > { %v5597_v24 = vpop.f32.mrf.mxu3  ;;  %5998 = vmatpush.bf16.msra.mxu1 %v9186_v51  ;;  %v9189_v51 = vld [vmem:[%s9976_s7] ss:$0 sm:$0xff] }
0x1292   : > { %5999 = vmatpush.bf16.msra.mxu1 %v9187_v16 }
0x1296   : > { %v5600_v55 = vpop.f32.mrf.mxu3  ;;  %6000 = vmatpush.bf16.msra.mxu1 %v9188_v18 }
0x1297   : > { %v5611_v49 = vpack.c.bf16 %v5600_v55, %v5597_v24 }
0x1299   : > { %8755 = vmatmul.msk.bf16.gmra.mxu1 %vm1976_vm2, %v5611_v49 }
0x129d   : > { %8742 = vmatmul.msk.bf16.gmra.mxu2 %vm1976_vm2, %v5438_v58 }
0x129e   : > { %v5603_v53 = vpop.f32.mrf.mxu3 }
0x12a6   : > { %v5606_v56 = vpop.f32.mrf.mxu3 }
0x12a7   : > { %v5612_v59 = vpack.c.bf16 %v5606_v56, %v5603_v53 }
0x12a9   : > { %8756 = vmatmul.msk.bf16.gmra.mxu1 %vm1976_vm2, %v5612_v59 }
0x12ad   : > { %8743 = vmatmul.msk.bf16.gmra.mxu2 %vm1976_vm2, %v5439_v61 }
0x12bd   : > { %8744 = vmatmul.msk.bf16.gmra.mxu2 %vm1976_vm2, %v5440_v0  ;;  %v9190_v0 = vld [vmem:[%s9976_s7 + $0x1] ss:$0 sm:$0xff]  ;;  %s11508_s7 = sld [smem:[#allocation51_spill]] }
0x12d0   : > { %v5507_v1 = vpop.f32.mrf.mxu2 }
0x12d8   : > { %v5509_v4 = vpop.f32.mrf.mxu2 }
0x12e0   : > { %v5512_v8 = vpop.f32.mrf.mxu2 }
0x12e8   : > { %v5514_v9 = vpop.f32.mrf.mxu2 }
0x12f0   : > { %v5517_v11 = vpop.f32.mrf.mxu2 }
0x12f6   : > { %v5634_v7 = vpop.f32.mrf.mxu1 }
0x12f8   : > { %v5519_v13 = vpop.f32.mrf.mxu2 }
0x12fe   : > { %v5636_v21 = vpop.f32.mrf.mxu1 }
0x1300   : > { %v5522_v3 = vpop.f32.mrf.mxu2 }
0x1306   : > { %v5639_v44 = vpop.f32.mrf.mxu1 }
0x1308   : > { %v5524_v45 = vpop.f32.mrf.mxu2 }
0x130e   : > { %v5641_v29 = vpop.f32.mrf.mxu1 }
0x1310   : > { %v5548_v17 = vpop.f32.mrf.mxu2 }
0x1311   : > { %v5549_v52 = vadd.f32 %v5548_v17, %v5507_v1 }
0x1313   : > { %v5654_v5 = vadd.f32 %v5634_v7, %v5549_v52 }
0x1316   : > { %v5644_v15 = vpop.f32.mrf.mxu1 }
0x1318   : > { %v5550_v10 = vpop.f32.mrf.mxu2 }
0x1319   : > { %v5551_v18 = vadd.f32 %v5550_v10, %v5509_v4 }
0x131e   : > { %v5646_v35 = vpop.f32.mrf.mxu1 }
0x1320   : > { %v5553_v12 = vpop.f32.mrf.mxu2 }
0x1321   : > { %v5554_v39 = vadd.f32 %v5553_v12, %v5512_v8 }
0x1323   : > { %v5656_v59 = vadd.f32 %v5639_v44, %v5554_v39 }
0x1325   : > { %v5664_v17 = vmul.f32 %v9189_v51, %v5656_v59  ;;  %v9191_v59 = vld [vmem:[%s10110_s0 + $0x78] sm:$0xff] }
0x1326   : > { %v5649_v42 = vpop.f32.mrf.mxu1 }
0x1328   : > { %v5555_v48 = vpop.f32.mrf.mxu2 }
0x1329   : > { %v5556_v22 = vadd.f32 %v5555_v48, %v5514_v9 }
0x132b   : > { %v5657_v49 = vadd.f32 %v5641_v29, %v5556_v22  ;;  %v5662_v29 = vmul.f32 %v9189_v51, %v5654_v5 }
0x132e   : > { %v5651_v56 = vpop.f32.mrf.mxu1 }
0x1330   : > { %v5558_v30 = vpop.f32.mrf.mxu2 }
0x1331   : > { %v5559_v54 = vadd.f32 %v5558_v30, %v5517_v11  ;;  %v5655_v11 = vadd.f32 %v5636_v21, %v5551_v18 }
0x1333   : > { %v5658_v24 = vadd.f32 %v5644_v15, %v5559_v54  ;;  %v5663_v48 = vmul.f32 %v9189_v51, %v5655_v11  ;;  %v9196_v11 = vld [vmem:[%s10110_s0 + $0xb0] sm:$0xff] }
0x1335   : > { %v5666_v61 = vmul.f32 %v9189_v51, %v5658_v24 }
0x1337   : > { %v5674_v12 = vadd.f32 %v9190_v0, %v5666_v61  ;;  %v9192_v61 = vld [vmem:[%s10110_s0 + $0x38] sm:$0xff] }
0x1338   : > { %v5560_v19 = vpop.f32.mrf.mxu2 }
0x1339   : > { %v5561_v27 = vadd.f32 %v5560_v19, %v5519_v13  ;;  %v5682_v44 = vmax.f32 %v5674_v12, 0.0  ;;  %v5671_v19 = vadd.f32 %v9190_v0, %v5663_v48  ;;  %v9202_v12 = vld [vmem:[%s10110_s0 + $0xa0] sm:$0xff]  ;;  %v11478_v48 = vld [vmem:[#allocation43_spill] sm:$0xff] }
0x133b   : > { %v5659_v47 = vadd.f32 %v5646_v35, %v5561_v27  ;;  %v5672_v35 = vadd.f32 %v9190_v0, %v5664_v17  ;;  %v5670_v27 = vadd.f32 %v9190_v0, %v5662_v29  ;;  %v5701_v54 = vrot.slane %v5682_v44, 7  ;;  %v9199_v17 = vld [vmem:[%s10110_s0 + $0xa8] sm:$0xff]  ;;  %v9204_v29 = vld [vmem:[%s10110_s0 + $0x18] sm:$0xff]  ;;  %v9207_v44 = vld [vmem:[%s10110_s0 + $0x10] sm:$0xff] }
0x133d   : > { %v5667_v58 = vmul.f32 %v9189_v51, %v5659_v47  ;;  %v5679_v47 = vmax.f32 %v5671_v19, 0.0  ;;  %v5678_v39 = vmax.f32 %v5670_v27, 0.0  ;;  %v11483_v19 = vld [vmem:[#allocation46_spill] sm:$0xff] }
0x133e   : > { %v9210_v27 = vld [vmem:[%s10110_s0 + $0x8] sm:$0xff] }
0x133f   : > { %v5675_v9 = vadd.f32 %v9190_v0, %v5667_v58  ;;  %v5694_v18 = vrot.slane %v5678_v39, 7  ;;  %v9217_v39 = vld [vmem:[%s10110_s0 + $0x130] sm:$0xff] }
0x1340   : > { %v5563_v41 = vpop.f32.mrf.mxu2 }
0x1341   : > { %v5564_v2 = vadd.f32 %v5563_v41, %v5522_v3  ;;  %v5665_v3 = vmul.f32 %v9189_v51, %v5657_v49  ;;  %v5683_v10 = vmax.f32 %v5675_v9, 0.0  ;;  %v9198_v9 = vld [vmem:[%s10110_s0 + $0x28] sm:$0xff] }
0x1343   : > { %v5660_v33 = vadd.f32 %v5649_v42, %v5564_v2  ;;  %v5673_v15 = vadd.f32 %v9190_v0, %v5665_v3  ;;  %v5703_v21 = vrot.slane %v5683_v10, 7  ;;  %v11475_v3 = vld [vmem:[#allocation42_spill] sm:$0xff]  ;;  %v9203_v10 = vld [vmem:[%s10110_s0 + $0x58] sm:$0xff] }
0x1345   : > { %v5668_v16 = vmul.f32 %v9189_v51, %v5660_v33  ;;  %v5681_v41 = vmax.f32 %v5673_v15, 0.0  ;;  %v5680_v33 = vmax.f32 %v5672_v35, 0.0  ;;  %v5704_v5 = vsel %vm2278_vm11, %v5701_v54, %v5703_v21  ;;  %v11480_v15 = vld [vmem:[#allocation45_spill] sm:$0xff]  ;;  %v9208_v35 = vld [vmem:[%s10110_s0 + $0x90] sm:$0xff] }
0x1347   : > { %v5676_v1 = vadd.f32 %v9190_v0, %v5668_v16  ;;  %v5699_v22 = vrot.slane %v5681_v41, 7  ;;  %v9209_v41 = vld [vmem:[%s10110_s0 + $0x48] sm:$0xff] }
0x1348   : > { %v5565_v55 = vpop.f32.mrf.mxu2 }
0x1349   : > { %v5566_v53 = vadd.f32 %v5565_v55, %v5524_v45  ;;  %v5684_v8 = vmax.f32 %v5676_v1, 0.0  ;;  %v5702_v24 = vsel %vm2278_vm11, %v5699_v22, %v5701_v54  ;;  %v5695_v55 = vrot.slane %v5679_v47, 7  ;;  %v9194_v1 = vld [vmem:[%s10110_s0 + $0x70] sm:$0xff]  ;;  %v9212_v54 = vld [vmem:[%s10110_s0 + $0x40] sm:$0xff]  ;;  %v9216_v47 = vld [vmem:[%s10207_s28 + $0x8] sm:$0xff] }
0x134b   : > { %v5661_v13 = vadd.f32 %v5651_v56, %v5566_v53  ;;  %v5705_v45 = vrot.slane %v5684_v8, 7  ;;  %v5696_v58 = vsel %vm2278_vm11, %v5694_v18, %v5695_v55  ;;  %v11471_v56 = vld [vmem:[#allocation41_spill] sm:$0xff] }
0x134c   : > { %v9200_v8 = vld [vmem:[%s10110_s0 + $0x60] sm:$0xff] }
0x134d   : > { %v5669_v7 = vmul.f32 %v9189_v51, %v5661_v13  ;;  %v5706_v2 = vsel %vm2278_vm11, %v5703_v21, %v5705_v45  ;;  %v5697_v51 = vrot.slane %v5680_v33, 7  ;;  %v9195_v13 = vld [vmem:[%s10110_s0 + $0x30] sm:$0xff]  ;;  %v9213_v33 = vld [vmem:[%s10110_s0] sm:$0xff] }
0x134e   : > { %v11487_v21 = vld [vmem:[#allocation47_spill] sm:$0xff] }
0x134f   : > { %v5677_v52 = vadd.f32 %v9190_v0, %v5669_v7  ;;  %v5700_v16 = vsel %vm2278_vm11, %v5697_v51, %v5699_v22  ;;  %v5698_v49 = vsel %vm2278_vm11, %v5695_v55, %v5697_v51  ;;  %v9193_v0 = vld [vmem:[%s10110_s0 + $0xb8] sm:$0xff]  ;;  %v9197_v7 = vld [vmem:[%s10110_s0 + $0x68] sm:$0xff]  ;;  %v9215_v22 = vld [vmem:[%s10110_s0 + $0x80] sm:$0xff] }
0x1350   : > { %v9219_v51 = vld [vmem:[%s10110_s0 + $0x128] sm:$0xff]  ;;  %v9221_v55 = vld [vmem:[%s10110_s0 + $0x118] sm:$0xff] }
0x1351   : > { %v5685_v4 = vmax.f32 %v5677_v52, 0.0  ;;  %v9201_v52 = vld [vmem:[%s10110_s0 + $0x20] sm:$0xff] }
0x1353   : > { %v5707_v30 = vrot.slane %v5685_v4, 7  ;;  %v11481_v4 = vld [vmem:[#allocation44_spill] sm:$0xff] }
0x1355   : > { %v5708_v42 = vsel %vm2278_vm11, %v5705_v45, %v5707_v30  ;;  %v9205_v45 = vld [vmem:[%s10110_s0 + $0x98] sm:$0xff]  ;;  %v9206_v30 = vld [vmem:[%s10110_s0 + $0x50] sm:$0xff] }
0x1356   : > { %5726 = vmatpush.msra.mxu0 %v5708_v42  ;;  %5755 = vmatpush.msrb.mxu2 %v5708_v42 }
0x1357   : > { %5788 = vmatpush.msrb.mxu3 %v5708_v42  ;;  %v11485_v42 = vld [vmem:[#allocation48_spill] sm:$0xff] }
0x1358   : > { %5727 = vmatpush.msra.mxu0 %v5706_v2  ;;  %5756 = vmatpush.msrb.mxu2 %v5706_v2 }
0x1359   : > { %5789 = vmatpush.msrb.mxu3 %v5706_v2  ;;  %v9211_v2 = vld [vmem:[%s10110_s0 + $0x88] sm:$0xff] }
0x135a   : > { %5728 = vmatpush.msra.mxu0 %v5704_v5  ;;  %5757 = vmatpush.msrb.mxu2 %v5704_v5 }
0x135b   : > { %5790 = vmatpush.msrb.mxu3 %v5704_v5  ;;  %v9214_v5 = vld [vmem:[%s10110_s0 + $0x138] sm:$0xff] }
0x135c   : > { %5729 = vmatpush.msra.mxu0 %v5702_v24  ;;  %5758 = vmatpush.msrb.mxu2 %v5702_v24 }
0x135d   : > { %5791 = vmatpush.msrb.mxu3 %v5702_v24  ;;  %v9218_v24 = vld [vmem:[%s10207_s28] sm:$0xff] }
0x135e   : > { %5730 = vmatpush.msra.mxu0 %v5700_v16  ;;  %5759 = vmatpush.msrb.mxu2 %v5700_v16 }
0x135f   : > { %5792 = vmatpush.msrb.mxu3 %v5700_v16  ;;  %v9220_v16 = vld [vmem:[%s10110_s0 + $0x120] sm:$0xff] }
0x1360   : > { %5731 = vmatpush.msra.mxu0 %v5698_v49  ;;  %5760 = vmatpush.msrb.mxu2 %v5698_v49 }
0x1361   : > { %5793 = vmatpush.msrb.mxu3 %v5698_v49  ;;  %v9223_v49 = vld [vmem:[%s10110_s0 + $0x108] sm:$0xff] }
0x1362   : > { %5732 = vmatpush.msra.mxu0 %v5696_v58  ;;  %5761 = vmatpush.msrb.mxu2 %v5696_v58 }
0x1363   : > { %5794 = vmatpush.msrb.mxu3 %v5696_v58  ;;  %v9224_v58 = vld [vmem:[%s10110_s0 + $0x100] sm:$0xff] }
0x1364   : > { %8758 = vmatpush.msk.msra.mxu0 %vm9995_vm13, %v5694_v18  ;;  %8764 = vmatpush.msk.msrb.mxu2 %vm9995_vm13, %v5694_v18 }
0x1365   : > { %8770 = vmatpush.msk.msrb.mxu3 %vm9995_vm13, %v5694_v18  ;;  %8765 = vmatmul.msk.f32.vlgmr.msrb.gmra.mxu2 %vm11470_vm10, %v10002_v38  ;;  %vm11474_vm13 = vmmov %vm11472_vm3  ;;  %v9222_v18 = vld [vmem:[%s10110_s0 + $0x110] sm:$0xff] }
0x1366   : > { %8771 = vmatmul.msk.f32.vlgmr.msrb.gmra.mxu3 %vm11472_vm3, %v11471_v56  ;;  %8759 = vmatmul.msk.f32.vlgmr.msra.gmra.mxu0 %vm11473_vm9, %v10007_v34  ;;  %vm11479_vm10 = vmmov %vm11472_vm3 }
0x1367   : > { %5907 = vmatpush.bf16.msrb.mxu0 %v9191_v59  ;;  %5926 = vmatpush.bf16.msra.mxu2 %v9192_v61  ;;  %vm11482_vm9 = vmmov %vm11472_vm3 }
0x1368   : > { %5955 = vmatpush.bf16.msra.mxu3 %v9193_v0 }
0x136b   : > { %5908 = vmatpush.bf16.msrb.mxu0 %v9194_v1  ;;  %5927 = vmatpush.bf16.msra.mxu2 %v9195_v13  ;;  %v9225_v13 = vld [vmem:[%s10028_s10] ss:$0 sm:$0xff] }
0x136c   : > { %5956 = vmatpush.bf16.msra.mxu3 %v9196_v11 }
0x136d   : > { %8766 = vmatmul.msk.f32.gmra.mxu2 %vm11474_vm13, %v10033_v32  ;;  %vm11484_vm13 = vmmov %vm11472_vm3 }
0x136e   : > { %8772 = vmatmul.msk.f32.gmra.mxu3 %vm11476_vm5, %v11475_v3  ;;  %8760 = vmatmul.msk.f32.gmra.mxu0 %vm11477_vm7, %v10038_v50  ;;  %vm11486_vm5 = vmmov %vm11472_vm3 }
0x136f   : > { %5909 = vmatpush.bf16.msrb.mxu0 %v9197_v7  ;;  %5928 = vmatpush.bf16.msra.mxu2 %v9198_v9  ;;  %vm11488_vm7 = vmmov %vm11472_vm3 }
0x1370   : > { %5957 = vmatpush.bf16.msra.mxu3 %v9199_v17 }
0x1373   : > { %5910 = vmatpush.bf16.msrb.mxu0 %v9200_v8  ;;  %5929 = vmatpush.bf16.msra.mxu2 %v9201_v52  ;;  %v9226_v8 = vld [vmem:[%s10028_s10 + $0x1] ss:$0 sm:$0xff]  ;;  %s11513_s10 = smov 40  }
0x1374   : > { %5958 = vmatpush.bf16.msra.mxu3 %v9202_v12 }
0x1375   : > { %8767 = vmatmul.msk.f32.gmra.mxu2 %vm11479_vm10, %v11478_v48  ;;  %vm11489_vm10 = vsmask.f32 6400 }
0x1376   : > { %8773 = vmatmul.msk.f32.gmra.mxu3 %vm11472_vm3, %v11480_v15  ;;  %8761 = vmatmul.msk.f32.gmra.mxu0 %vm11482_vm9, %v11481_v4  ;;  %vm11490_vm3 = vmmov %vm11489_vm10  ;;  %vm11491_vm9 = vcmask 15360  }
0x1377   : > { %5911 = vmatpush.bf16.msrb.mxu0 %v9203_v10  ;;  %5930 = vmatpush.bf16.msra.mxu2 %v9204_v29 }
0x1378   : > { %5959 = vmatpush.bf16.msra.mxu3 %v9205_v45 }
0x137b   : > { %5912 = vmatpush.bf16.msrb.mxu0 %v9206_v30  ;;  %5931 = vmatpush.bf16.msra.mxu2 %v9207_v44 }
0x137c   : > { %5960 = vmatpush.bf16.msra.mxu3 %v9208_v35 }
0x137d   : > { %8768 = vmatmul.msk.f32.gmra.mxu2 %vm11484_vm13, %v11483_v19  ;;  %v9227_v19 = vld [vmem:[%s10244_s15 + $0x28] sm:$0xff] }
0x137e   : > { %8774 = vmatmul.msk.f32.gmra.mxu3 %vm11486_vm5, %v11485_v42  ;;  %8762 = vmatmul.msk.f32.gmra.mxu0 %vm11488_vm7, %v11487_v21 }
0x137f   : > { %5913 = vmatpush.bf16.msrb.mxu0 %v9209_v41  ;;  %5932 = vmatpush.bf16.msra.mxu2 %v9210_v27 }
0x1380   : > { %5961 = vmatpush.bf16.msra.mxu3 %v9211_v2  ;;  %v9228_v2 = vld [vmem:[%s10244_s15 + $0x20] sm:$0xff] }
0x1383   : > { %5914 = vmatpush.bf16.msrb.mxu0 %v9212_v54  ;;  %5933 = vmatpush.bf16.msra.mxu2 %v9213_v33 }
0x1384   : > { %5962 = vmatpush.bf16.msra.mxu3 %v9215_v22  ;;  %v9229_v22 = vld [vmem:[%s10244_s15 + $0x18] sm:$0xff] }
0x1387   : > { %6023 = vmatpush.bf16.msra.mxu0 %v9214_v5  ;;  %6070 = vmatpush.bf16.msrb.mxu2 %v9216_v47 }
0x1388   : > { %6089 = vmatpush.bf16.msrb.mxu3 %v10234_v36 }
0x138b   : > { %6024 = vmatpush.bf16.msra.mxu0 %v9217_v39  ;;  %6071 = vmatpush.bf16.msrb.mxu2 %v9218_v24 }
0x138f   : > { %6025 = vmatpush.bf16.msra.mxu0 %v9219_v51  ;;  %v9230_v51 = vld [vmem:[%s10244_s15 + $0x10] sm:$0xff] }
0x1393   : > { %6026 = vmatpush.bf16.msra.mxu0 %v9220_v16 }
0x1397   : > { %6027 = vmatpush.bf16.msra.mxu0 %v9221_v55  ;;  %v9231_v55 = vld [vmem:[%s10244_s15 + $0x8] sm:$0xff] }
0x139b   : > { %6028 = vmatpush.bf16.msra.mxu0 %v9222_v18  ;;  %v9232_v18 = vld [vmem:[%s10244_s15] sm:$0xff] }
0x139f   : > { %6029 = vmatpush.bf16.msra.mxu0 %v9223_v49 }
0x13a3   : > { %6030 = vmatpush.bf16.msra.mxu0 %v9224_v58  ;;  %v9233_v58 = vld [vmem:[%s10095_s11] ss:$0 sm:$0xff] }
0x13e3   : > { %v5735_v53 = vpop.f32.mrf.mxu0 }
0x13e8   : > { %v5764_v36 = vpop.f32.mrf.mxu2 }
0x13e9   : > { %v5776_v56 = vmax.f32 %v5735_v53, %v5764_v36  ;;  %v5797_v59 = vpop.f32.mrf.mxu3  ;;  %v9234_v36 = vld [vmem:[%s10095_s11 + $0x1] ss:$0 sm:$0xff] }
0x13eb   : > { %v5738_v61 = vpop.f32.mrf.mxu0  ;;  %v10908_v0 = vmax.f32 %v5776_v56, %v5797_v59 }
0x13ed   : > { %v5813_v11 = vmul.f32 %v9225_v13, %v10908_v0 }
0x13ef   : > { %v5817_v52 = vadd.f32 %v9226_v8, %v5813_v11 }
0x13f0   : > { %v5767_v1 = vpop.f32.mrf.mxu2 }
0x13f1   : > { %v5777_v3 = vmax.f32 %v5738_v61, %v5767_v1  ;;  %v5800_v7 = vpop.f32.mrf.mxu3  ;;  %v5821_v4 = vmax.f32 %v5817_v52, 0.0 }
0x13f3   : > { %v10912_v9 = vmax.f32 %v5777_v3, %v5800_v7  ;;  %v5741_v17 = vpop.f32.mrf.mxu0 }
0x13f5   : > { %v5814_v12 = vmul.f32 %v9225_v13, %v10912_v9 }
0x13f7   : > { %v5818_v48 = vadd.f32 %v9226_v8, %v5814_v12 }
0x13f8   : > { %v5770_v15 = vpop.f32.mrf.mxu2 }
0x13f9   : > { %v5822_v10 = vmax.f32 %v5818_v48, 0.0  ;;  %v5778_v29 = vmax.f32 %v5741_v17, %v5770_v15  ;;  %v5803_v45 = vpop.f32.mrf.mxu3 }
0x13fb   : > { %v5825_v30 = vpack.c.bf16 %v5822_v10, %v5821_v4  ;;  %v10916_v44 = vmax.f32 %v5778_v29, %v5803_v45  ;;  %v5744_v35 = vpop.f32.mrf.mxu0 }
0x13fd   : > { %8775 = vmatmul.msk.bf16.vlgmr.msrb.gmra.mxu1 %vm1976_vm2, %v5825_v30  ;;  %v5815_v21 = vmul.f32 %v9225_v13, %v10916_v44 }
0x13fe   : > { %6161 = vmatpush.bf16.msrb.mxu1 %v9227_v19 }
0x13ff   : > { %v5819_v33 = vadd.f32 %v9226_v8, %v5815_v21 }
0x1400   : > { %v5773_v42 = vpop.f32.mrf.mxu2 }
0x1401   : > { %v5779_v41 = vmax.f32 %v5744_v35, %v5773_v42  ;;  %v5806_v27 = vpop.f32.mrf.mxu3  ;;  %v5823_v39 = vmax.f32 %v5819_v33, 0.0 }
0x1402   : > { %6162 = vmatpush.bf16.msrb.mxu1 %v9228_v2 }
0x1403   : > { %v10922_v54 = vmax.f32 %v5779_v41, %v5806_v27 }
0x1405   : > { %v5816_v5 = vmul.f32 %v9225_v13, %v10922_v54 }
0x1406   : > { %6163 = vmatpush.bf16.msrb.mxu1 %v9229_v22 }
0x1407   : > { %v5820_v47 = vadd.f32 %v9226_v8, %v5816_v5 }
0x1409   : > { %v5824_v24 = vmax.f32 %v5820_v47, 0.0 }
0x140a   : > { %6164 = vmatpush.bf16.msrb.mxu1 %v9230_v51 }
0x140b   : > { %v5826_v16 = vpack.c.bf16 %v5824_v24, %v5823_v39 }
0x140d   : > { %8776 = vmatmul.msk.bf16.gmra.mxu1 %vm1976_vm2, %v5826_v16 }
0x140e   : > { %6165 = vmatpush.bf16.msrb.mxu1 %v9231_v55 }
0x1412   : > { %6166 = vmatpush.bf16.msrb.mxu1 %v9232_v18 }
0x147a   : > { %v5842_v49 = vpop.f32.mrf.mxu1 }
0x147b   : > { %v5852_v53 = vmul.f32 %v9233_v58, %v5842_v49 }
0x147d   : > { %v5856_v56 = vadd.f32 %v9234_v36, %v5852_v53 }
0x147f   : > { %v5860_v1 = vmax.f32 %v5856_v56, 0.0 }
0x1481   : > { %v5868_v3 = vrot.slane %v5860_v1, 6 }
0x1482   : > { %v5844_v59 = vpop.f32.mrf.mxu1 }
0x1483   : > { %v5853_v61 = vmul.f32 %v9233_v58, %v5844_v59  ;;  %v5880_v4 = vsel %vm2533_vm1, 0.0, %v5868_v3  ;;  %v9235_v59 = vld [vmem:[%s10290_s13 + $0x10] sm:$0xff] }
0x1485   : > { %v5857_v13 = vadd.f32 %v9234_v36, %v5853_v61 }
0x1487   : > { %v5861_v11 = vmax.f32 %v5857_v13, 0.0 }
0x1489   : > { %v5869_v7 = vrot.slane %v5861_v11, 6 }
0x148a   : > { %v5847_v17 = vpop.f32.mrf.mxu1 }
0x148b   : > { %v5870_v8 = vsel %vm2533_vm1, %v5868_v3, %v5869_v7  ;;  %v5854_v52 = vmul.f32 %v9233_v58, %v5847_v17 }
0x148c   : > { %v8779_v12 = vpack.c.bf16 %v5870_v8, %v5868_v3  ;;  %v10936_v45 = vpack.c.bf16 %v5870_v8, %v5880_v4  ;;  %v9236_v3 = vld [vmem:[%s10290_s13 + $0x8] sm:$0xff] }
0x148d   : > { %v5858_v48 = vadd.f32 %v9234_v36, %v5854_v52  ;;  %v9238_v52 = vld [vmem:[%s10290_s13] sm:$0xff]  ;;  %s11492_s13 = smov 64  }
0x148e   : > { %8780 = vmatmul.msk.bf16.vlgmr.msra.gmra.mxu2 %vm10173_vm14, %v8779_v12  ;;  %v5888_v42 = vshll.u32 %v10936_v45, 16  ;;  %v5886_v2 = vshrl.u32 %v10936_v45, 16  ;;  %v5948_v39 = vrot.slane %v10936_v45, 1  ;;  %v9239_v12 = vld [vmem:[%s10296_s14 + $0x70] sm:$0xff] }
0x148f   : > { %v5862_v10 = vmax.f32 %v5858_v48, 0.0 }
0x1490   : > { %v5890_v5 = vrot.slane %v5888_v42, 1  ;;  %v5978_v51 = vrot.slane %v5886_v2, 1  ;;  %v5979_v16 = vrot.slane %v5888_v42, 2 }
0x1491   : > { %v5871_v35 = vrot.slane %v5862_v10, 6 }
0x1492   : > { %v5849_v15 = vpop.f32.mrf.mxu1  ;;  %v5891_v55 = vor.u32 %v5890_v5, %v5886_v2  ;;  %v5980_v61 = vor.u32 %v5979_v16, %v5978_v51  ;;  %v9243_v2 = vld [vmem:[%s10296_s14 + $0x50] sm:$0xff] }
0x1493   : > { %v5855_v29 = vmul.f32 %v9233_v58, %v5849_v15  ;;  %v5872_v41 = vsel %vm2533_vm1, %v5869_v7, %v5871_v35  ;;  %v9237_v7 = vld [vmem:[%s10296_s14 + $0x78] sm:$0xff] }
0x1495   : > { %v5859_v30 = vadd.f32 %v9234_v36, %v5855_v29  ;;  %v9240_v29 = vld [vmem:[%s10296_s14 + $0x68] sm:$0xff] }
0x1497   : > { %v5863_v19 = vmax.f32 %v5859_v30, 0.0 }
0x1499   : > { %v5873_v21 = vrot.slane %v5863_v19, 6 }
0x149b   : > { %v5874_v27 = vsel %vm2533_vm1, %v5871_v35, %v5873_v21  ;;  %v5881_v36 = vsel %vm2533_vm1, %v5873_v21, 0.0  ;;  %v9241_v21 = vld [vmem:[%s10296_s14 + $0x60] sm:$0xff] }
0x149c   : > { %v10942_v33 = vpack.c.bf16 %v5874_v27, %v5872_v41  ;;  %v5884_v13 = vpack.c.bf16 %v5881_v36, %v5881_v36  ;;  %v9242_v27 = vld [vmem:[%s10296_s14 + $0x58] sm:$0xff] }
0x149e   : > { %v5893_v22 = vshll.u32 %v10942_v33, 16  ;;  %v5897_v47 = vshrl.u32 %v10942_v33, 16  ;;  %v5949_v24 = vrot.slane %v10942_v33, 1  ;;  %5939 = vmatmul.bf16.gmra.mxu2 %v10942_v33  ;;  %v5901_v17 = vshll.u32 %v5884_v13, 16 }
0x149f   : > { %v5985_v8 = vshrl.u32 %v5884_v13, 16  ;;  %v5951_v48 = vrot.slane %v5884_v13, 1  ;;  %v6017_v5 = vrot.slane %v10942_v33, 2  ;;  %v6019_v51 = vrot.slane %v5884_v13, 2 }
0x14a0   : > { %v5895_v18 = vrot.slane %v5893_v22, 1  ;;  %v5981_v49 = vrot.slane %v5897_v47, 1  ;;  %v5950_v58 = vsel %vm2761_vm12, %v5948_v39, %v5949_v24  ;;  %v5982_v53 = vrot.slane %v5893_v22, 2  ;;  %v9244_v22 = vld [vmem:[%s10296_s14 + $0x48] sm:$0xff] }
0x14a1   : > { %5963 = vmatmul.bf16.vlgmr.msra.gmra.mxu3 %v5950_v58  ;;  %v5987_v15 = vrot.slane %v5985_v8, 1  ;;  %v5988_v4 = vrot.slane %v5901_v17, 2  ;;  %v5903_v30 = vrot.slane %v5901_v17, 1  ;;  %v5952_v35 = vsel %vm2761_vm12, %v5949_v24, %v5951_v48  ;;  %v9245_v24 = vld [vmem:[%s10296_s14 + $0x40] sm:$0xff] }
0x14a2   : > { %v5896_v56 = vsel %vm2584_vm0, %v5891_v55, %v5895_v18  ;;  %6241 = vmatpush.bf16.msra.mxu3 %v9235_v59  ;;  %v5983_v1 = vor.u32 %v5982_v53, %v5981_v49  ;;  %v5899_v10 = vor.u32 %v5897_v47, %v5895_v18  ;;  %v6016_v47 = vrot.slane %v10936_v45, 2 }
0x14a3   : > { %5915 = vmatmul.bf16.vlgmr.msrb.gmra.mxu0 %v5896_v56  ;;  %v5989_v19 = vor.u32 %v5988_v4, %v5987_v15  ;;  %v6020_v16 = vsel %vm2961_vm8, %v6017_v5, %v6019_v51 }
0x14a4   : > { %v5984_v11 = vsel %vm11489_vm10, %v5980_v61, %v5983_v1  ;;  %v5904_v42 = vsel %vm2584_vm0, %v5899_v10, %v5903_v30  ;;  %v6018_v39 = vsel %vm2961_vm8, %v6016_v47, %v6017_v5 }
0x14a5   : > { %6001 = vmatmul.bf16.vlgmr.msra.gmra.mxu1 %v5984_v11  ;;  %v5990_v41 = vsel %vm11490_vm3, %v5983_v1, %v5989_v19  ;;  %vm11493_vm3 = vcmask 785408  }
0x14a6   : > { %6242 = vmatpush.bf16.msra.mxu3 %v9236_v3  ;;  %6281 = vmatpush.bf16.msra.mxu1 %v9237_v7 }
0x14aa   : > { %6243 = vmatpush.bf16.msra.mxu3 %v9238_v52  ;;  %6282 = vmatpush.bf16.msra.mxu1 %v9239_v12 }
0x14ae   : > { %6283 = vmatpush.bf16.msra.mxu1 %v9240_v29 }
0x14b1   : > { %5968 = vmatmul.bf16.gmra.mxu3 %v5952_v35 }
0x14b2   : > { %6284 = vmatpush.bf16.msra.mxu1 %v9241_v21 }
0x14b3   : > { %5920 = vmatmul.bf16.gmra.mxu0 %v5904_v42 }
0x14b5   : > { %6006 = vmatmul.bf16.gmra.mxu1 %v5990_v41 }
0x14b6   : > { %6285 = vmatpush.bf16.msra.mxu1 %v9242_v27 }
0x14ba   : > { %6286 = vmatpush.bf16.msra.mxu1 %v9243_v2 }
0x14be   : > { %6287 = vmatpush.bf16.msra.mxu1 %v9244_v22 }
0x14c2   : > { %6288 = vmatpush.bf16.msra.mxu1 %v9245_v24 }
0x14c3   : > { %6031 = vmatmul.bf16.vlgmr.msra.gmra.mxu0 %v6018_v39 }
0x14d3   : > { %6036 = vmatmul.bf16.gmra.mxu0 %v6020_v16 }
0x1511   : > { %v5935_v58 = vpop.f32.mrf.mxu2 }
0x1519   : > { %v5937_v56 = vpop.f32.mrf.mxu2 }
0x1520   : > { %v5916_v55 = vpop.f32.mrf.mxu0 }
0x1521   : > { %v5940_v1 = vpop.f32.mrf.mxu2  ;;  %v5936_v17 = vadd.f32 %v5935_v58, %v5916_v55 }
0x1522   : > { %v6002_v33 = vpop.f32.mrf.mxu1 }
0x1524   : > { %v5964_v53 = vpop.f32.mrf.mxu3 }
0x1525   : > { %v5974_v12 = vadd.f32 %v5964_v53, %v5936_v17 }
0x1527   : > { %v6012_v30 = vadd.f32 %v6002_v33, %v5974_v12  ;;  %v9251_v12 = vld [vmem:[%s10296_s14 + $0xd0] sm:$0xff] }
0x1528   : > { %v5918_v18 = vpop.f32.mrf.mxu0 }
0x1529   : > { %v5938_v7 = vadd.f32 %v5937_v56, %v5918_v18  ;;  %v5942_v4 = vpop.f32.mrf.mxu2 }
0x152a   : > { %v6004_v45 = vpop.f32.mrf.mxu1 }
0x152c   : > { %v5966_v59 = vpop.f32.mrf.mxu3 }
0x152d   : > { %v5975_v13 = vadd.f32 %v5966_v59, %v5938_v7  ;;  %v9246_v7 = vld [vmem:[%s10296_s14 + $0xf8] sm:$0xff] }
0x152f   : > { %v6013_v15 = vadd.f32 %v6004_v45, %v5975_v13  ;;  %v9247_v13 = vld [vmem:[%s10296_s14 + $0xf0] sm:$0xff] }
0x1530   : > { %v5921_v49 = vpop.f32.mrf.mxu0 }
0x1531   : > { %v5941_v8 = vadd.f32 %v5940_v1, %v5921_v49 }
0x1532   : > { %v6007_v52 = vpop.f32.mrf.mxu1 }
0x1534   : > { %v5969_v11 = vpop.f32.mrf.mxu3 }
0x1535   : > { %v5976_v48 = vadd.f32 %v5969_v11, %v5941_v8  ;;  %v9248_v8 = vld [vmem:[%s10296_s14 + $0xe8] sm:$0xff] }
0x1537   : > { %v6014_v19 = vadd.f32 %v6007_v52, %v5976_v48  ;;  %v9250_v52 = vld [vmem:[%s10296_s14 + $0xd8] sm:$0xff]  ;;  %v9252_v48 = vld [vmem:[%s10296_s14 + $0xc8] sm:$0xff] }
0x1538   : > { %v5923_v36 = vpop.f32.mrf.mxu0 }
0x1539   : > { %v5943_v42 = vadd.f32 %v5942_v4, %v5923_v36 }
0x153a   : > { %v6009_v5 = vpop.f32.mrf.mxu1 }
0x153c   : > { %v5971_v29 = vpop.f32.mrf.mxu3 }
0x153d   : > { %v5977_v27 = vadd.f32 %v5971_v29, %v5943_v42 }
0x153f   : > { %v6015_v39 = vadd.f32 %v6009_v5, %v5977_v27 }
0x1540   : > { %v6032_v61 = vpop.f32.mrf.mxu0 }
0x1541   : > { %v10973_v21 = vadd.f32 %v6032_v61, %v6012_v30 }
0x1543   : > { %v6046_v22 = vsel %vm3040_vm6, %v10973_v21, 0.0 }
0x1548   : > { %v6034_v3 = vpop.f32.mrf.mxu0 }
0x1549   : > { %v10971_v35 = vadd.f32 %v6034_v3, %v6013_v15  ;;  %v9253_v15 = vld [vmem:[%s10296_s14 + $0xc0] sm:$0xff] }
0x154b   : > { %v6047_v2 = vsel %vm3040_vm6, %v10971_v35, 0.0 }
0x154c   : > { %v6048_v24 = vadd.f32 %v6047_v2, %v6046_v22 }
0x1550   : > { %v6037_v10 = vpop.f32.mrf.mxu0 }
0x1551   : > { %v10975_v41 = vadd.f32 %v6037_v10, %v6014_v19 }
0x1553   : > { %v6049_v47 = vsel %vm3040_vm6, %v10975_v41, 0.0 }
0x1554   : > { %v6050_v55 = vadd.f32 %v6049_v47, %v6048_v24 }
0x1558   : > { %v6039_v51 = vpop.f32.mrf.mxu0 }
0x1559   : > { %v10983_v16 = vadd.f32 %v6039_v51, %v6015_v39 }
0x155b   : > { %v6051_v18 = vsel %vm3040_vm6, %v10983_v16, 0.0 }
0x155c   : > { %v6052_v49 = vadd.f32 %v6051_v18, %v6050_v55 }
0x155e   : > { %v6053_v58 = vrot.slane %v6052_v49, 4 }
0x1560   : > { %v6054_v53 = vadd.f32 %v6053_v58, %v6052_v49 }
0x1562   : > { %v6055_v36 = vrot.slane %v6054_v53, 2 }
0x1564   : > { %v6056_v33 = vadd.f32 %v6055_v36, %v6054_v53 }
0x1566   : > { %v6057_v56 = vrot.slane %v6056_v33, 1 }
0x1568   : > { %v6058_v59 = vadd.f32 %v6057_v56, %v6056_v33 }
0x156a   : > { %v6059_v61 = vmul.f32 %v6058_v59, %v10227_v63  ;;  %v9249_v63 = vld [vmem:[%s10296_s14 + $0xe0] sm:$0xff] }
0x156c   : > { %v6060_v45 = vpack.c.bf16 %v6059_v61, %v6059_v61  ;;  %v9254_v61 = vld [vmem:[%s10240_s4] ss:$0 sm:$0xff] }
0x156e   : > { %8781 = vmatmul.msk.bf16.vlgmr.msrb.gmra.mxu2 %vm3040_vm6, %v6060_v45  ;;  %v9255_v45 = vld [vmem:[%s10240_s4 + $0x1] ss:$0 sm:$0xff]  ;;  %s9449_s4 = smov 36  }
0x15f1   : > { %v6073_v1 = vpop.f32.mrf.mxu2 }
0x15f2   : > { %v6077_v11 = vmax.f32 %v6073_v1, 0.0 }
0x15f4   : > { %v6078_v3 = vpack.c.bf16 %v6077_v11, %v6077_v11 }
0x15f6   : > { %8782 = vmatmul.msk.bf16.vlgmr.msrb.gmra.mxu3 %vm11491_vm9, %v6078_v3  ;;  %vm11495_vm9 = vcmask 392192  }
0x15f7   : > { %6341 = vmatpush.bf16.msrb.mxu3 %v9246_v7 }
0x15f9   : > { %v6075_v17 = vpop.f32.mrf.mxu2 }
0x15fb   : > { %6342 = vmatpush.bf16.msrb.mxu3 %v9247_v13 }
0x15ff   : > { %6343 = vmatpush.bf16.msrb.mxu3 %v9248_v8 }
0x1603   : > { %6344 = vmatpush.bf16.msrb.mxu3 %v9249_v63  ;;  %v9256_v63 = vld [vmem:[%s10296_s14 + $0x138] sm:$0xff] }
0x1607   : > { %6345 = vmatpush.bf16.msrb.mxu3 %v9250_v52 }
0x160b   : > { %6346 = vmatpush.bf16.msrb.mxu3 %v9251_v12 }
0x160f   : > { %6347 = vmatpush.bf16.msrb.mxu3 %v9252_v48  ;;  %v9257_v48 = vld [vmem:[%s10296_s14 + $0x130] sm:$0xff] }
0x1613   : > { %6348 = vmatpush.bf16.msrb.mxu3 %v9253_v15 }
0x1679   : > { %v6091_v4 = vpop.f32.mrf.mxu3 }
0x167a   : > { %v6095_v10 = vsub.f32 0.0, %v6091_v4 }
0x167c   : > { %v6096_v29 = vmul.f32 1.442695, %v6095_v10  ;;  %v9258_v10 = vld [vmem:[%s10296_s14 + $0x128] sm:$0xff] }
0x167e   : > { %9145 = vpow2.f32 %v6096_v29 }
0x1681   : > { %v6093_v30 = vpop.f32.mrf.mxu3 }
0x1682   : > { %v9259_v30 = vld [vmem:[%s10296_s14 + $0x120] sm:$0xff] }
0x1684   : > { %v9146_v19 = vpop.eup %9145 }
0x1685   : > { %v6098_v42 = vadd.f32 1.0, %v9146_v19 }
0x1687   : > { %9147 = vrcp.f32 %v6098_v42  ;;  %v6110_v22 = vand.u32 2147483648, %v6098_v42  ;;  %v6108_v39 = vand.u32 2147483647, %v6098_v42  ;;  %vm6104_vm5 = vweird.f32 %v6098_v42 }
0x1689   : > { %v6111_v51 = vor.u32 1.1754944e-38, %v6110_v22  ;;  %vm6109_vm10 = vcmp.eq.f32.partialorder %v6108_v39, 8.507059e+37 }
0x168d   : > { %v9148_v27 = vpop.eup %9147 }
0x168e   : > { %v6100_v2 = vmul.f32 %v9148_v27, %v6098_v42  ;;  %vm6105_vm13 = vweird.f32 %v9148_v27  ;;  %v9261_v42 = vld [vmem:[%s10296_s14 + $0x110] sm:$0xff] }
0x168f   : > { %vm6106_vm7 = vmor %vm6104_vm5, %vm6105_vm13 }
0x1690   : > { %v6101_v5 = vsub.f32 1.0, %v6100_v2  ;;  %v9263_v2 = vld [vmem:[%s10296_s14 + $0x100] sm:$0xff] }
0x1692   : > { %v6102_v47 = vmul.f32 %v9148_v27, %v6101_v5 }
0x1694   : > { %v6103_v24 = vadd.f32 %v9148_v27, %v6102_v47 }
0x1696   : > { %v6107_v55 = vsel %vm6106_vm7, %v9148_v27, %v6103_v24  ;;  %v9262_v27 = vld [vmem:[%s10296_s14 + $0x108] sm:$0xff]  ;;  %v9264_v24 = vld [vmem:[%s10296_s14 + $0xb8] sm:$0xff] }
0x1697   : > { %v6112_v18 = vsel %vm6109_vm10, %v6111_v51, %v6107_v55  ;;  %v9265_v51 = vld [vmem:[%s10296_s14 + $0x38] sm:$0xff]  ;;  %v9266_v55 = vld [vmem:[%s10296_s14 + $0xb0] sm:$0xff] }
0x1698   : > { %v6114_v49 = vperm.slane %v6112_v18, 0  ;;  %v9267_v18 = vld [vmem:[%s10296_s14 + $0x30] sm:$0xff] }
0x169a   : > { %v6117_v58 = vmul.f32 %v6114_v49, %v10975_v41  ;;  %v6116_v53 = vmul.f32 %v6114_v49, %v10971_v35  ;;  %v6115_v36 = vmul.f32 %v6114_v49, %v10973_v21  ;;  %v6118_v33 = vmul.f32 %v6114_v49, %v10983_v16  ;;  %v9268_v49 = vld [vmem:[%s10296_s14 + $0xa8] sm:$0xff] }
0x169c   : > { %6127 = vrot.lane.b32.xlu0 %v6117_v58, %s11492_s13  ;;  %6125 = vrot.lane.b32.xlu2 %v6116_v53, %s11492_s13  ;;  %v9269_v58 = vld [vmem:[%s10296_s14 + $0x28] sm:$0xff]  ;;  %v9270_v53 = vld [vmem:[%s10296_s14 + $0xa0] sm:$0xff] }
0x169d   : > { %6123 = vrot.lane.b32.xlu1 %v6115_v36, %s11492_s13  ;;  %v9271_v36 = vld [vmem:[%s10296_s14 + $0x20] sm:$0xff] }
0x16a5   : > { %6129 = vrot.lane.b32.xlu1 %v6118_v33, %s11492_s13  ;;  %v9272_v33 = vld [vmem:[%s10296_s14 + $0x98] sm:$0xff] }
0x16f6   : > { %v6126_v56 = vpop.permute.xlu2 %6125 }
0x16f7   : > { %v6136_v59 = vsel %vm1976_vm2, %v10912_v9, %v6126_v56  ;;  %v9274_v56 = vld [vmem:[%s10296_s14 + $0x90] sm:$0xff] }
0x16f8   : > { %v6140_v41 = vmul.f32 %v9254_v61, %v6136_v59  ;;  %v9276_v59 = vld [vmem:[%s10296_s14 + $0x88] sm:$0xff] }
0x16fa   : > { %v6144_v1 = vadd.f32 %v9255_v45, %v6140_v41  ;;  %v9278_v41 = vld [vmem:[%s10296_s14 + $0x80] sm:$0xff] }
0x16fc   : > { %v6148_v7 = vmax.f32 %v6144_v1, 0.0 }
0x170e   : > { %v6128_v17 = vpop.permute.xlu0 %6127 }
0x170f   : > { %v6124_v35 = vpop.permute.xlu1 %6123 }
0x1710   : > { %v6135_v21 = vsel %vm1976_vm2, %v10908_v0, %v6124_v35  ;;  %v6137_v0 = vsel %vm1976_vm2, %v10916_v44, %v6128_v17  ;;  %v9260_v44 = vld [vmem:[%s10296_s14 + $0x118] sm:$0xff]  ;;  %v9279_v35 = vld [vmem:[%s10296_s14] sm:$0xff] }
0x1711   : > { %v6139_v11 = vmul.f32 %v9254_v61, %v6135_v21  ;;  %v6141_v12 = vmul.f32 %v9254_v61, %v6137_v0  ;;  %v9280_v21 = vld [vmem:[%s10361_s17 + $0x8] sm:$0xff] }
0x1713   : > { %v6143_v3 = vadd.f32 %v9255_v45, %v6139_v11  ;;  %v6145_v4 = vadd.f32 %v9255_v45, %v6141_v12 }
0x1715   : > { %v6147_v16 = vmax.f32 %v6143_v3, 0.0  ;;  %v6149_v29 = vmax.f32 %v6145_v4, 0.0 }
0x1717   : > { %v6151_v13 = vpack.c.bf16 %v6148_v7, %v6147_v16  ;;  %v6130_v8 = vpop.permute.xlu1 %6129 }
0x1718   : > { %v6138_v9 = vsel %vm1976_vm2, %v10922_v54, %v6130_v8  ;;  %vm11494_vm2 = vmmov %vm11493_vm3 }
0x1719   : > { %8783 = vmatmul.msk.bf16.vlgmr.msrb.gmra.mxu1 %vm11493_vm3, %v6151_v13  ;;  %v6142_v52 = vmul.f32 %v9254_v61, %v6138_v9  ;;  %v9277_v61 = vld [vmem:[%s10296_s14 + $0x8] sm:$0xff]  ;;  %v9282_v13 = vld [vmem:[%s10278_s9] ss:$0 sm:$0xff] }
0x171a   : > { %6361 = vmatpush.bf16.msrb.mxu1 %v9256_v63 }
0x171b   : > { %v6146_v15 = vadd.f32 %v9255_v45, %v6142_v52  ;;  %v9281_v45 = vld [vmem:[%s10361_s17] sm:$0xff]  ;;  %s11108_s17 = scalar_lea.vmem %s9628_s12, %s9972_s2 }
0x171d   : > { %v6150_v54 = vmax.f32 %v6146_v15, 0.0 }
0x171e   : > { %6362 = vmatpush.bf16.msrb.mxu1 %v9257_v48 }
0x171f   : > { %v6152_v19 = vpack.c.bf16 %v6150_v54, %v6149_v29  ;;  %v9285_v54 = vld [vmem:[%s10384_s20 + $0x18] sm:$0xff]  ;;  %v9286_v29 = vld [vmem:[%s10384_s20 + $0x10] sm:$0xff] }
0x1722   : > { %6363 = vmatpush.bf16.msrb.mxu1 %v9258_v10  ;;  %v9284_v10 = vld [vmem:[%s10384_s20 + $0x20] sm:$0xff] }
0x1726   : > { %6364 = vmatpush.bf16.msrb.mxu1 %v9259_v30  ;;  %v9287_v30 = vld [vmem:[%s10384_s20 + $0x8] sm:$0xff] }
0x1729   : > { %8784 = vmatmul.msk.bf16.gmra.mxu1 %vm11494_vm2, %v6152_v19  ;;  %v9288_v19 = vld [vmem:[%s10384_s20] sm:$0xff] }
0x172a   : > { %6365 = vmatpush.bf16.msrb.mxu1 %v9260_v44 }
0x172e   : > { %6366 = vmatpush.bf16.msrb.mxu1 %v9261_v42  ;;  %v9289_v42 = vld [vmem:[%s10286_s3] ss:$0 sm:$0xff] }
0x1732   : > { %6367 = vmatpush.bf16.msrb.mxu1 %v9262_v27 }
0x1736   : > { %6368 = vmatpush.bf16.msrb.mxu1 %v9263_v2  ;;  %v9290_v2 = vld [vmem:[%s10286_s3 + $0x1] ss:$0 sm:$0xff]  ;;  %s11498_s3 = sld [smem:[#allocation49_spill]] }
0x1796   : > { %v6168_v5 = vpop.f32.mrf.mxu1 }
0x179e   : > { %v6170_v22 = vpop.f32.mrf.mxu1 }
0x17a6   : > { %v6173_v47 = vpop.f32.mrf.mxu1 }
0x17ae   : > { %v6175_v39 = vpop.f32.mrf.mxu1 }
0x17af   : > { %6190 = vmatpush.msrb.mxu0 %v6175_v39  ;;  %6213 = vmatpush.msra.mxu2 %v6175_v39 }
0x17b1   : > { %6191 = vmatpush.msrb.mxu0 %v6173_v47  ;;  %6214 = vmatpush.msra.mxu2 %v6173_v47 }
0x17b3   : > { %6192 = vmatpush.msrb.mxu0 %v6170_v22  ;;  %6215 = vmatpush.msra.mxu2 %v6170_v22 }
0x17b5   : > { %6193 = vmatpush.msrb.mxu0 %v6168_v5  ;;  %6216 = vmatpush.msra.mxu2 %v6168_v5 }
0x17b6   : > { %8787 = vmatmul.msk.f32.vlgmr.msra.gmra.mxu2 %vm3040_vm6, %v10007_v34  ;;  %8785 = vmatmul.msk.f32.vlgmr.msrb.gmra.mxu0 %vm3040_vm6, %v10002_v38 }
0x17b7   : > { %6315 = vmatpush.bf16.msrb.mxu2 %v9264_v24  ;;  %6295 = vmatpush.bf16.msra.mxu0 %v9265_v51 }
0x17bb   : > { %6316 = vmatpush.bf16.msrb.mxu2 %v9266_v55  ;;  %6296 = vmatpush.bf16.msra.mxu0 %v9267_v18 }
0x17be   : > { %8788 = vmatmul.msk.f32.gmra.mxu2 %vm3040_vm6, %v10038_v50  ;;  %8786 = vmatmul.msk.f32.gmra.mxu0 %vm3040_vm6, %v10033_v32  ;;  %v9273_v50 = vld [vmem:[%s10296_s14 + $0x18] sm:$0xff]  ;;  %v9275_v32 = vld [vmem:[%s10296_s14 + $0x10] sm:$0xff]  ;;  %s11499_s14 = smov 48  }
0x17bf   : > { %6317 = vmatpush.bf16.msrb.mxu2 %v9268_v49  ;;  %6297 = vmatpush.bf16.msra.mxu0 %v9269_v58 }
0x17c3   : > { %6318 = vmatpush.bf16.msrb.mxu2 %v9270_v53  ;;  %6298 = vmatpush.bf16.msra.mxu0 %v9271_v36 }
0x17c7   : > { %6319 = vmatpush.bf16.msrb.mxu2 %v9272_v33  ;;  %6299 = vmatpush.bf16.msra.mxu0 %v9273_v50 }
0x17cb   : > { %6320 = vmatpush.bf16.msrb.mxu2 %v9274_v56  ;;  %6300 = vmatpush.bf16.msra.mxu0 %v9275_v32 }
0x17cf   : > { %6321 = vmatpush.bf16.msrb.mxu2 %v9276_v59  ;;  %6301 = vmatpush.bf16.msra.mxu0 %v9277_v61 }
0x17d3   : > { %6322 = vmatpush.bf16.msrb.mxu2 %v9278_v41  ;;  %6302 = vmatpush.bf16.msra.mxu0 %v9279_v35 }
0x17d7   : > { %6397 = vmatpush.bf16.msrb.mxu0 %v9280_v21  ;;  %6416 = vmatpush.bf16.msra.mxu2 %v10374_v31  ;;  %v9283_v31 = vld [vmem:[%s10278_s9 + $0x1] ss:$0 sm:$0xff] }
0x17db   : > { %6398 = vmatpush.bf16.msrb.mxu0 %v9281_v45 }
0x1833   : > { %v6195_v1 = vpop.f32.mrf.mxu0 }
0x1839   : > { %v6218_v11 = vpop.f32.mrf.mxu2 }
0x183a   : > { %v6219_v3 = vadd.f32 %v6218_v11, %v6195_v1 }
0x183b   : > { %v6198_v16 = vpop.f32.mrf.mxu0 }
0x183c   : > { %v11053_v7 = vmul.f32 0.5, %v6219_v3 }
0x183e   : > { %v6226_v8 = vmul.f32 %v9282_v13, %v11053_v7 }
0x1840   : > { %v6228_v63 = vadd.f32 %v9283_v31, %v6226_v8 }
0x1841   : > { %v6221_v17 = vpop.f32.mrf.mxu2 }
0x1842   : > { %v6222_v9 = vadd.f32 %v6221_v17, %v6198_v16  ;;  %v6230_v48 = vmax.f32 %v6228_v63, 0.0  ;;  %v9291_v63 = vld [vmem:[%s10426_s25 + $0x78] sm:$0xff] }
0x1844   : > { %v11057_v0 = vmul.f32 0.5, %v6222_v9 }
0x1846   : > { %v6227_v52 = vmul.f32 %v9282_v13, %v11057_v0 }
0x1848   : > { %v6229_v12 = vadd.f32 %v9283_v31, %v6227_v52  ;;  %v9292_v52 = vld [vmem:[%s10416_s22 + $0x8] sm:$0xff] }
0x184a   : > { %v6231_v15 = vmax.f32 %v6229_v12, 0.0  ;;  %v9293_v12 = vld [vmem:[%s10426_s25 + $0x70] sm:$0xff] }
0x184c   : > { %v6232_v4 = vpack.c.bf16 %v6231_v15, %v6230_v48  ;;  %v9294_v48 = vld [vmem:[%s10416_s22] sm:$0xff]  ;;  %v9295_v15 = vld [vmem:[%s10426_s25 + $0x68] sm:$0xff]  ;;  %s11505_s22 = sld [smem:[#allocation52_spill]] }
0x184e   : > { %8789 = vmatmul.msk.bf16.vlgmr.msra.gmra.mxu3 %vm11495_vm9, %v6232_v4 }
0x184f   : > { %6467 = vmatpush.bf16.msra.mxu3 %v9284_v10 }
0x1853   : > { %6468 = vmatpush.bf16.msra.mxu3 %v9285_v54  ;;  %v9296_v54 = vld [vmem:[%s10426_s25 + $0x60] sm:$0xff] }
0x1857   : > { %6469 = vmatpush.bf16.msra.mxu3 %v9286_v29  ;;  %v9297_v29 = vld [vmem:[%s10426_s25 + $0xf8] sm:$0xff] }
0x185b   : > { %6470 = vmatpush.bf16.msra.mxu3 %v9287_v30  ;;  %v9298_v30 = vld [vmem:[%s10426_s25 + $0x58] sm:$0xff] }
0x185f   : > { %6471 = vmatpush.bf16.msra.mxu3 %v9288_v19  ;;  %v9299_v19 = vld [vmem:[%s10426_s25 + $0xf0] sm:$0xff] }
0x18d1   : > { %v6245_v44 = vpop.f32.mrf.mxu3 }
0x18d2   : > { %v6250_v27 = vmul.f32 %v9289_v42, %v6245_v44  ;;  %v9300_v44 = vld [vmem:[%s10426_s25 + $0x50] sm:$0xff] }
0x18d4   : > { %v6252_v5 = vadd.f32 %v9290_v2, %v6250_v27  ;;  %v9302_v27 = vld [vmem:[%s10426_s25 + $0x48] sm:$0xff] }
0x18d6   : > { %v6254_v47 = vmax.f32 %v6252_v5, 0.0  ;;  %v9304_v5 = vld [vmem:[%s10426_s25 + $0x40] sm:$0xff] }
0x18d8   : > { %v6258_v51 = vrot.slane %v6254_v47, 6  ;;  %v9306_v47 = vld [vmem:[%s10426_s25 + $0xd0] sm:$0xff] }
0x18d9   : > { %v6247_v22 = vpop.f32.mrf.mxu3 }
0x18da   : > { %v6251_v39 = vmul.f32 %v9289_v42, %v6247_v22  ;;  %v6264_v49 = vsel %vm2533_vm1, 0.0, %v6258_v51  ;;  %v9301_v42 = vld [vmem:[%s10426_s25 + $0xe8] sm:$0xff]  ;;  %v9305_v22 = vld [vmem:[%s10426_s25 + $0xd8] sm:$0xff] }
0x18dc   : > { %v6253_v24 = vadd.f32 %v9290_v2, %v6251_v39  ;;  %v9303_v2 = vld [vmem:[%s10426_s25 + $0xe0] sm:$0xff]  ;;  %v9307_v39 = vld [vmem:[%s10426_s25 + $0xc8] sm:$0xff] }
0x18de   : > { %v6255_v55 = vmax.f32 %v6253_v24, 0.0  ;;  %v9308_v24 = vld [vmem:[%s10426_s25 + $0xc0] sm:$0xff] }
0x18e0   : > { %v6259_v18 = vrot.slane %v6255_v55, 6 }
0x18e2   : > { %v6260_v58 = vsel %vm2533_vm1, %v6258_v51, %v6259_v18  ;;  %v6265_v53 = vsel %vm2533_vm1, %v6259_v18, 0.0 }
0x18e3   : > { %v6266_v36 = vpack.c.bf16 %v6260_v58, %v6264_v49  ;;  %v6267_v33 = vpack.c.bf16 %v6265_v53, %v6265_v53  ;;  %v8792_v50 = vpack.c.bf16 %v6260_v58, %v6258_v51 }
0x18e5   : > { %v6269_v56 = vshrl.u32 %v6266_v36, 16  ;;  %v6271_v32 = vshll.u32 %v6266_v36, 16  ;;  %v6276_v59 = vshll.u32 %v6267_v33, 16  ;;  %v6311_v61 = vrot.slane %v6266_v36, 1  ;;  %8793 = vmatmul.msk.bf16.vlgmr.msra.gmra.mxu0 %vm10173_vm14, %v8792_v50 }
0x18e6   : > { %v6312_v41 = vrot.slane %v6267_v33, 1  ;;  %v6334_v35 = vshrl.u32 %v6267_v33, 16  ;;  %vm11496_vm14 = vsmask.f32 6400  ;;  %v6357_v4 = vrot.slane %v6266_v36, 2 }
0x18e7   : > { %v6273_v21 = vrot.slane %v6271_v32, 1  ;;  %v6331_v45 = vrot.slane %v6269_v56, 1  ;;  %v6332_v1 = vrot.slane %v6271_v32, 2  ;;  %v6337_v16 = vrot.slane %v6276_v59, 2 }
0x18e8   : > { %v6313_v11 = vsel %vm2761_vm12, %v6311_v61, %v6312_v41  ;;  %v6336_v3 = vrot.slane %v6334_v35, 1  ;;  %v6278_v13 = vrot.slane %v6276_v59, 1  ;;  %v6358_v10 = vrot.slane %v6267_v33, 2 }
0x18e9   : > { %v6274_v17 = vor.u32 %v6273_v21, %v6269_v56  ;;  %6323 = vmatmul.bf16.vlgmr.msrb.gmra.mxu2 %v6313_v11  ;;  %v6333_v8 = vor.u32 %v6332_v1, %v6331_v45 }
0x18ea   : > { %v6338_v25 = vor.u32 %v6337_v16, %v6336_v3 }
0x18eb   : > { %v6279_v9 = vsel %vm2584_vm0, %v6274_v17, %v6278_v13  ;;  %vm11497_vm0 = vcmask 15360  }
0x18ec   : > { %6289 = vmatmul.bf16.vlgmr.msra.gmra.mxu1 %v6279_v9  ;;  %v6339_v31 = vsel %vm11496_vm14, %v6333_v8, %v6338_v25  ;;  %vm11500_vm14 = vcmask 392192  }
0x18ed   : > { %6349 = vmatmul.bf16.vlgmr.msrb.gmra.mxu3 %v6339_v31  ;;  %6531 = vmatpush.bf16.msra.mxu1 %v10420_v46  ;;  %v6359_v46 = vsel %vm2961_vm8, %v6357_v4, %v6358_v10  ;;  %v5256_v10 = vsub.f32 0.0, %v10812_v62 }
0x18ee   : > { %6557 = vmatpush.bf16.msrb.mxu3 %v9291_v63 }
0x18f1   : > { %6532 = vmatpush.bf16.msra.mxu1 %v9292_v52 }
0x18f2   : > { %6558 = vmatpush.bf16.msrb.mxu3 %v9293_v12 }
0x18f5   : > { %6533 = vmatpush.bf16.msra.mxu1 %v9294_v48 }
0x18f6   : > { %6559 = vmatpush.bf16.msrb.mxu3 %v9295_v15 }
0x18fa   : > { %6560 = vmatpush.bf16.msrb.mxu3 %v9296_v54  ;;  %v5257_v54 = vmul.f32 1.442695, %v5256_v10  ;;  %v9316_v10 = vld [vmem:[%s10426_s25 + $0x110] sm:$0xff] }
0x18fc   : > { %6369 = vmatmul.bf16.vlgmr.msrb.gmra.mxu1 %v6359_v46  ;;  %9149 = vpow2.f32 %v5257_v54  ;;  %v9317_v54 = vld [vmem:[%s10426_s25 + $0x108] sm:$0xff] }
0x18fd   : > { %6604 = vmatpush.bf16.msrb.mxu1 %v9297_v29 }
0x18fe   : > { %6561 = vmatpush.bf16.msrb.mxu3 %v9298_v30 }
0x1901   : > { %6605 = vmatpush.bf16.msrb.mxu1 %v9299_v19 }
0x1902   : > { %6562 = vmatpush.bf16.msrb.mxu3 %v9300_v44  ;;  %v9150_v46 = vpop.eup %9149 }
0x1903   : > { %v5259_v19 = vadd.f32 1.0, %v9150_v46  ;;  %v9318_v46 = vld [vmem:[%s10426_s25 + $0x100] sm:$0xff] }
0x1905   : > { %6606 = vmatpush.bf16.msrb.mxu1 %v9301_v42  ;;  %vm5265_vm3 = vweird.f32 %v5259_v19 }
0x1906   : > { %6563 = vmatpush.bf16.msrb.mxu3 %v9302_v27 }
0x1909   : > { %6607 = vmatpush.bf16.msrb.mxu1 %v9303_v2 }
0x190a   : > { %6564 = vmatpush.bf16.msrb.mxu3 %v9304_v5 }
0x190d   : > { %6608 = vmatpush.bf16.msrb.mxu1 %v9305_v22 }
0x1911   : > { %6609 = vmatpush.bf16.msrb.mxu1 %v9306_v47 }
0x1915   : > { %6610 = vmatpush.bf16.msrb.mxu1 %v9307_v39 }
0x1919   : > { %6611 = vmatpush.bf16.msrb.mxu1 %v9308_v24 }
0x1962   : > { %v6304_v55 = vpop.f32.mrf.mxu0 }
0x1969   : > { %v6290_v51 = vpop.f32.mrf.mxu1 }
0x196a   : > { %v6305_v53 = vadd.f32 %v6304_v55, %v6290_v51  ;;  %v6306_v33 = vpop.f32.mrf.mxu0 }
0x196c   : > { %v6324_v49 = vpop.f32.mrf.mxu2 }
0x196d   : > { %v6329_v32 = vadd.f32 %v6324_v49, %v6305_v53 }
0x1970   : > { %v6350_v58 = vpop.f32.mrf.mxu3 }
0x1971   : > { %v6292_v18 = vpop.f32.mrf.mxu1  ;;  %v6355_v61 = vadd.f32 %v6350_v58, %v6329_v32 }
0x1972   : > { %v6307_v50 = vadd.f32 %v6306_v33, %v6292_v18 }
0x1974   : > { %v6326_v56 = vpop.f32.mrf.mxu2 }
0x1975   : > { %v6330_v41 = vadd.f32 %v6326_v56, %v6307_v50  ;;  %v5269_v50 = vand.u32 2147483647, %v5259_v19 }
0x1977   : > { %vm5270_vm9 = vcmp.eq.f32.partialorder %v5269_v50, 8.507059e+37 }
0x1978   : > { %v6352_v59 = vpop.f32.mrf.mxu3 }
0x1979   : > { %v6370_v36 = vpop.f32.mrf.mxu1  ;;  %v6356_v21 = vadd.f32 %v6352_v59, %v6330_v41 }
0x197a   : > { %v11097_v35 = vadd.f32 %v6370_v36, %v6355_v61  ;;  %v5271_v36 = vand.u32 2147483648, %v5259_v19 }
0x197c   : > { %v6377_v11 = vsel %vm3040_vm6, %v11097_v35, 0.0  ;;  %v5272_v61 = vor.u32 1.1754944e-38, %v5271_v36 }
0x1981   : > { %v6372_v45 = vpop.f32.mrf.mxu1 }
0x1982   : > { %v6376_v1 = vadd.f32 %v6372_v45, %v6356_v21 }
0x1984   : > { %v6378_v3 = vsel %vm3040_vm6, %v6376_v1, 0.0 }
0x1985   : > { %v6379_v16 = vadd.f32 %v6378_v3, %v6377_v11 }
0x1987   : > { %v6380_v17 = vrot.slane %v6379_v16, 4 }
0x1989   : > { %v6381_v13 = vadd.f32 %v6380_v17, %v6379_v16  ;;  %v9309_v17 = vld [vmem:[%s11498_s3] ss:$0 sm:$0xff] }
0x198b   : > { %v6382_v8 = vrot.slane %v6381_v13, 2 }
0x198d   : > { %v6383_v25 = vadd.f32 %v6382_v8, %v6381_v13 }
0x198f   : > { %v6384_v9 = vrot.slane %v6383_v25, 1 }
0x1991   : > { %v6385_v31 = vadd.f32 %v6384_v9, %v6383_v25  ;;  %v9310_v25 = vld [vmem:[%s11498_s3 + $0x1] ss:$0 sm:$0xff] }
0x1993   : > { %v6386_v63 = vmul.f32 %v6385_v31, %v10367_v26 }
0x1995   : > { %v6387_v52 = vpack.c.bf16 %v6386_v63, %v6386_v63 }
0x1997   : > { %8794 = vmatmul.msk.bf16.vlgmr.msrb.gmra.mxu0 %vm3040_vm6, %v6387_v52 }
0x1a14   : > { %v6400_v12 = vpop.f32.mrf.mxu0 }
0x1a15   : > { %v6404_v48 = vmax.f32 %v6400_v12, 0.0 }
0x1a17   : > { %v6405_v15 = vpack.c.bf16 %v6404_v48, %v6404_v48  ;;  %v9312_v48 = vld [vmem:[%s10426_s25 + $0x130] sm:$0xff] }
0x1a19   : > { %8795 = vmatmul.msk.bf16.vlgmr.msra.gmra.mxu2 %vm11497_vm0, %v6405_v15  ;;  %vm11501_vm0 = vmmov %vm11500_vm14  ;;  %v9313_v15 = vld [vmem:[%s10426_s25 + $0x128] sm:$0xff] }
0x1a1c   : > { %v6402_v4 = vpop.f32.mrf.mxu0 }
0x1a1d   : > { %v9315_v4 = vld [vmem:[%s10426_s25 + $0x118] sm:$0xff] }
0x1a9c   : > { %v6418_v29 = vpop.f32.mrf.mxu2 }
0x1a9d   : > { %v6422_v30 = vsub.f32 0.0, %v6418_v29 }
0x1a9f   : > { %v6423_v26 = vmul.f32 1.442695, %v6422_v30 }
0x1aa1   : > { %9151 = vpow2.f32 %v6423_v26  ;;  %v9320_v26 = vld [vmem:[%s10426_s25 + $0x38] sm:$0xff] }
0x1aa2   : > { %9153 = vrcp.f32 %v5259_v19 }
0x1aa4   : > { %v6420_v44 = vpop.f32.mrf.mxu2 }
0x1aa5   : > { %v9321_v44 = vld [vmem:[%s10426_s25 + $0xb0] sm:$0xff] }
0x1aa7   : > { %v9152_v42 = vpop.eup %9151 }
0x1aa8   : > { %v9154_v27 = vpop.eup %9153  ;;  %v6425_v2 = vadd.f32 1.0, %v9152_v42  ;;  %v9322_v42 = vld [vmem:[%s10426_s25 + $0x30] sm:$0xff] }
0x1aa9   : > { %v5261_v5 = vmul.f32 %v9154_v27, %v5259_v19  ;;  %vm5266_vm5 = vweird.f32 %v9154_v27  ;;  %v9319_v19 = vld [vmem:[%s10426_s25 + $0xb8] sm:$0xff] }
0x1aaa   : > { %9155 = vrcp.f32 %v6425_v2  ;;  %v6437_v51 = vand.u32 2147483648, %v6425_v2  ;;  %v6435_v18 = vand.u32 2147483647, %v6425_v2  ;;  %vm6431_vm13 = vweird.f32 %v6425_v2  ;;  %vm5267_vm2 = vmor %vm5265_vm3, %vm5266_vm5 }
0x1aab   : > { %v5262_v22 = vsub.f32 1.0, %v5261_v5  ;;  %v9325_v5 = vld [vmem:[%s10426_s25 + $0xa0] sm:$0xff] }
0x1aac   : > { %v6438_v53 = vor.u32 1.1754944e-38, %v6437_v51  ;;  %vm6436_vm10 = vcmp.eq.f32.partialorder %v6435_v18, 8.507059e+37  ;;  %v9331_v51 = vld [vmem:[%s10426_s25 + $0x88] sm:$0xff]  ;;  %v9333_v18 = vld [vmem:[%s10426_s25 + $0x80] sm:$0xff] }
0x1aad   : > { %v5263_v24 = vmul.f32 %v9154_v27, %v5262_v22  ;;  %v9326_v22 = vld [vmem:[%s10426_s25 + $0x20] sm:$0xff] }
0x1aaf   : > { %v5264_v58 = vadd.f32 %v9154_v27, %v5263_v24  ;;  %v9330_v24 = vld [vmem:[%s10426_s25 + $0x10] sm:$0xff] }
0x1ab0   : > { %v9156_v47 = vpop.eup %9155 }
0x1ab1   : > { %v6427_v62 = vmul.f32 %v9156_v47, %v6425_v2  ;;  %vm6432_vm12 = vweird.f32 %v9156_v47  ;;  %v5268_v59 = vsel %vm5267_vm2, %v9154_v27, %v5264_v58  ;;  %v9323_v27 = vld [vmem:[%s10426_s25 + $0xa8] sm:$0xff] }
0x1ab2   : > { %vm6433_vm7 = vmor %vm6431_vm13, %vm6432_vm12  ;;  %v5273_v45 = vsel %vm5270_vm9, %v5272_v61, %v5268_v59  ;;  %vm11502_vm12 = vcmask 654336   ;;  %vm11503_vm13 = vcmask 130048   ;;  %v9324_v2 = vld [vmem:[%s10426_s25 + $0x28] sm:$0xff]  ;;  %v9338_v61 = vld [vmem:[%s11506_s23 + $0x1] ss:$0 sm:$0xff] }
0x1ab3   : > { %v6428_v39 = vsub.f32 1.0, %v6427_v62  ;;  %v5275_v11 = vperm.slane %v5273_v45, 0  ;;  %vm11504_vm5 = vmmov %vm11503_vm13  ;;  %v9328_v62 = vld [vmem:[%s10426_s25 + $0x18] sm:$0xff]  ;;  %v9335_v58 = vld [vmem:[%s11505_s22 + $0x8] sm:$0xff] }
0x1ab5   : > { %v6429_v55 = vmul.f32 %v9156_v47, %v6428_v39  ;;  %v5276_v3 = vmul.f32 %v5275_v11, %v10655_v60  ;;  %v9329_v39 = vld [vmem:[%s10426_s25 + $0x90] sm:$0xff] }
0x1ab6   : > { %v9340_v11 = vld [vmem:[%s11507_s1 + $0x10] sm:$0xff] }
0x1ab7   : > { %v6430_v49 = vadd.f32 %v9156_v47, %v6429_v55  ;;  %v9332_v55 = vld [vmem:[%s10426_s25 + $0x8] sm:$0xff] }
0x1ab9   : > { %v6434_v33 = vsel %vm6433_vm7, %v9156_v47, %v6430_v49  ;;  %v9327_v47 = vld [vmem:[%s10426_s25 + $0x98] sm:$0xff]  ;;  %v9334_v49 = vld [vmem:[%s10426_s25] sm:$0xff]  ;;  %vm11509_vm7 = vcmask 326656  }
0x1aba   : > { %v6439_v56 = vsel %vm6436_vm10, %v6438_v53, %v6434_v33  ;;  %v9336_v53 = vld [vmem:[%s11505_s22] sm:$0xff]  ;;  %vm11510_vm10 = vmpackc.low %vm10165_vm15, %vm10165_vm15  ;;  %vm11511_vm15 = vcmask 15360  }
0x1abb   : > { %v6441_v32 = vperm.slane %v6439_v56, 0 }
0x1abd   : > { %v6443_v41 = vmul.f32 %v6441_v32, %v6376_v1  ;;  %v6442_v21 = vmul.f32 %v6441_v32, %v11097_v35  ;;  %v9337_v32 = vld [vmem:[%s11506_s23] ss:$0 sm:$0xff] }
0x1abf   : > { %6448 = vrot.lane.b32.xlu0 %v6443_v41, %s11499_s14  ;;  %6446 = vrot.lane.b32.xlu2 %v6442_v21, %s11499_s14 }
0x1ac7   : > { %5278 = vrot.lane.b32.xlu2 %v5276_v3, %s9449_s4  ;;  %v9341_v3 = vld [vmem:[%s11507_s1 + $0x8] sm:$0xff] }
0x1b19   : > { %v6447_v16 = vpop.permute.xlu2 %6446 }
0x1b1a   : > { %v6452_v1 = vsel %vm11500_vm14, %v11053_v7, %v6447_v16  ;;  %v9311_v7 = vld [vmem:[%s10426_s25 + $0x138] sm:$0xff]  ;;  %v9342_v16 = vld [vmem:[%s11507_s1] sm:$0xff] }
0x1b1b   : > { %v6454_v35 = vmul.f32 %v9309_v17, %v6452_v1 }
0x1b1d   : > { %v6456_v60 = vadd.f32 %v9310_v25, %v6454_v35 }
0x1b1f   : > { %v6458_v63 = vmax.f32 %v6456_v60, 0.0 }
0x1b31   : > { %v6449_v13 = vpop.permute.xlu0 %6448 }
0x1b32   : > { %v6453_v8 = vsel %vm11501_vm0, %v11057_v0, %v6449_v13  ;;  %v9314_v0 = vld [vmem:[%s10426_s25 + $0x120] sm:$0xff]  ;;  %vm11514_vm0 = vmmov %vm11509_vm7 }
0x1b33   : > { %v6455_v9 = vmul.f32 %v9309_v17, %v6453_v8  ;;  %v9343_v17 = vld [vmem:[%s11508_s7] ss:$0 sm:$0xff]  ;;  %v9344_v13 = vld [vmem:[%s11508_s7 + $0x1] ss:$0 sm:$0xff] }
0x1b35   : > { %v6457_v31 = vadd.f32 %v9310_v25, %v6455_v9 }
0x1b37   : > { %v6459_v52 = vmax.f32 %v6457_v31, 0.0 }
0x1b39   : > { %v6460_v12 = vpack.c.bf16 %v6459_v52, %v6458_v63 }
0x1b3b   : > { %8796 = vmatmul.msk.bf16.vlgmr.msra.gmra.mxu3 %vm11502_vm12, %v6460_v12  ;;  %vm11515_vm12 = vcmask 588800  }
0x1b3c   : > { %6620 = vmatpush.bf16.msra.mxu3 %v9311_v7 }
0x1b40   : > { %6621 = vmatpush.bf16.msra.mxu3 %v9312_v48 }
0x1b44   : > { %6622 = vmatpush.bf16.msra.mxu3 %v9313_v15 }
0x1b48   : > { %6623 = vmatpush.bf16.msra.mxu3 %v9314_v0 }
0x1b4c   : > { %6624 = vmatpush.bf16.msra.mxu3 %v9315_v4 }
0x1b50   : > { %6625 = vmatpush.bf16.msra.mxu3 %v9316_v10 }
0x1b54   : > { %6626 = vmatpush.bf16.msra.mxu3 %v9317_v54 }
0x1b58   : > { %6627 = vmatpush.bf16.msra.mxu3 %v9318_v46  ;;  %v9346_v46 = vld [vmem:[%s10543_s24 + $0x8] sm:$0xff] }
0x1bbe   : > { %v6473_v29 = vpop.f32.mrf.mxu3 }
0x1bc6   : > { %v6475_v30 = vpop.f32.mrf.mxu3 }
0x1bc7   : > { %6492 = vmatpush.msra.mxu0 %v6475_v30  ;;  %6512 = vmatpush.msrb.mxu2 %v6475_v30  ;;  %v9348_v30 = vld [vmem:[%s10543_s24] sm:$0xff]  ;;  %s11512_s24 = sld [smem:[#allocation53_spill]] }
0x1bc9   : > { %6493 = vmatpush.msra.mxu0 %v6473_v29  ;;  %6513 = vmatpush.msrb.mxu2 %v6473_v29  ;;  %v9347_v29 = vld [vmem:[%s10553_s6 + $0x70] sm:$0xff] }
0x1bca   : > { %8798 = vmatmul.msk.f32.vlgmr.msrb.gmra.mxu2 %vm11503_vm13, %v10007_v34  ;;  %8797 = vmatmul.msk.f32.vlgmr.msra.gmra.mxu0 %vm11504_vm5, %v10002_v38  ;;  %vm11516_vm13 = vcmask 64512  }
0x1bcb   : > { %6586 = vmatpush.bf16.msra.mxu2 %v9319_v19  ;;  %6570 = vmatpush.bf16.msrb.mxu0 %v9320_v26  ;;  %v9349_v19 = vld [vmem:[%s10553_s6 + $0x68] sm:$0xff]  ;;  %v9350_v26 = vld [vmem:[%s10553_s6 + $0x60] sm:$0xff]  ;;  %vm11517_vm5 = vmmov %vm11516_vm13 }
0x1bcf   : > { %6587 = vmatpush.bf16.msra.mxu2 %v9321_v44  ;;  %6571 = vmatpush.bf16.msrb.mxu0 %v9322_v42  ;;  %v9352_v42 = vld [vmem:[%s10553_s6 + $0xf8] sm:$0xff] }
0x1bd3   : > { %6588 = vmatpush.bf16.msra.mxu2 %v9323_v27  ;;  %6572 = vmatpush.bf16.msrb.mxu0 %v9324_v2  ;;  %v9353_v27 = vld [vmem:[%s10553_s6 + $0x50] sm:$0xff] }
0x1bd4   : > { %v9354_v2 = vld [vmem:[%s10553_s6 + $0xf0] sm:$0xff] }
0x1bd7   : > { %6589 = vmatpush.bf16.msra.mxu2 %v9325_v5  ;;  %6573 = vmatpush.bf16.msrb.mxu0 %v9326_v22  ;;  %v9355_v5 = vld [vmem:[%s10553_s6 + $0x48] sm:$0xff] }
0x1bd8   : > { %v9356_v22 = vld [vmem:[%s10553_s6 + $0xe8] sm:$0xff] }
0x1bdb   : > { %6590 = vmatpush.bf16.msra.mxu2 %v9327_v47  ;;  %6574 = vmatpush.bf16.msrb.mxu0 %v9328_v62  ;;  %v9357_v47 = vld [vmem:[%s10553_s6 + $0x40] sm:$0xff] }
0x1bdc   : > { %v9358_v62 = vld [vmem:[%s10553_s6 + $0xe0] sm:$0xff] }
0x1bdf   : > { %6591 = vmatpush.bf16.msra.mxu2 %v9329_v39  ;;  %6575 = vmatpush.bf16.msrb.mxu0 %v9330_v24  ;;  %v9359_v39 = vld [vmem:[%s10553_s6 + $0xd8] sm:$0xff]  ;;  %v9360_v24 = vld [vmem:[%s10553_s6 + $0xd0] sm:$0xff] }
0x1be3   : > { %6592 = vmatpush.bf16.msra.mxu2 %v9331_v51  ;;  %6576 = vmatpush.bf16.msrb.mxu0 %v9332_v55  ;;  %v9361_v51 = vld [vmem:[%s10553_s6 + $0xc8] sm:$0xff]  ;;  %v9362_v55 = vld [vmem:[%s10553_s6 + $0xc0] sm:$0xff] }
0x1be7   : > { %6593 = vmatpush.bf16.msra.mxu2 %v9333_v18  ;;  %6577 = vmatpush.bf16.msrb.mxu0 %v9334_v49 }
0x1beb   : > { %6652 = vmatpush.bf16.msra.mxu0 %v9335_v58  ;;  %6671 = vmatpush.bf16.msrb.mxu2 %v10501_v40  ;;  %v9339_v40 = vld [vmem:[%s11507_s1 + $0x18] sm:$0xff] }
0x1bef   : > { %6653 = vmatpush.bf16.msra.mxu0 %v9336_v53 }
0x1c47   : > { %v6495_v36 = vpop.f32.mrf.mxu0 }
0x1c4d   : > { %v6515_v33 = vpop.f32.mrf.mxu2 }
0x1c4e   : > { %v6516_v50 = vadd.f32 %v6515_v33, %v6495_v36 }
0x1c50   : > { %v11153_v56 = vmul.f32 0.5, %v6516_v50 }
0x1c52   : > { %v6519_v59 = vmul.f32 %v9337_v32, %v11153_v56 }
0x1c54   : > { %v6520_v41 = vadd.f32 %v9338_v61, %v6519_v59 }
0x1c56   : > { %v6521_v21 = vmax.f32 %v6520_v41, 0.0 }
0x1c58   : > { %v6522_v45 = vpack.c.bf16 %v6521_v21, %v6521_v21 }
0x1c5a   : > { %8799 = vmatmul.msk.bf16.vlgmr.msra.gmra.mxu1 %vm11509_vm7, %v6522_v45  ;;  %vm11518_vm7 = vcmask 293888  }
0x1c5b   : > { %6713 = vmatpush.bf16.msra.mxu1 %v10515_v43 }
0x1c5f   : > { %6714 = vmatpush.bf16.msra.mxu1 %v9339_v40 }
0x1c63   : > { %6715 = vmatpush.bf16.msra.mxu1 %v9340_v11 }
0x1c67   : > { %6716 = vmatpush.bf16.msra.mxu1 %v9341_v3 }
0x1c6b   : > { %6717 = vmatpush.bf16.msra.mxu1 %v9342_v16 }
0x1cd7   : > { %v6535_v1 = vpop.f32.mrf.mxu1 }
0x1cd8   : > { %v6539_v35 = vmul.f32 %v9343_v17, %v6535_v1 }
0x1cda   : > { %v6540_v8 = vadd.f32 %v9344_v13, %v6539_v35 }
0x1cdc   : > { %v6541_v25 = vmax.f32 %v6540_v8, 0.0 }
0x1cde   : > { %v6543_v60 = vrot.slane %v6541_v25, 6 }
0x1cdf   : > { %v6537_v9 = vpop.f32.mrf.mxu1 }
0x1ce0   : > { %v6545_v31 = vsel %vm2533_vm1, 0.0, %v6543_v60  ;;  %v6546_v43 = vsel %vm2533_vm1, %v6543_v60, 0.0  ;;  %v8803_v63 = vpack.c.bf16 %v6543_v60, %v6543_v60 }
0x1ce1   : > { %v6548_v52 = vpack.c.bf16 %v6546_v43, %v6545_v31 }
0x1ce2   : > { %8804 = vmatmul.msk.bf16.vlgmr.msrb.gmra.mxu0 %vm11510_vm10, %v8803_v63 }
0x1ce3   : > { %v6550_v12 = vshrl.u32 %v6548_v52, 16  ;;  %v6552_v7 = vshll.u32 %v6548_v52, 16  ;;  %v6584_v48 = vrot.slane %v6548_v52, 1  ;;  %v6618_v44 = vrot.slane %v6548_v52, 2 }
0x1ce5   : > { %v6554_v15 = vrot.slane %v6552_v7, 1  ;;  %6594 = vmatmul.bf16.vlgmr.msra.gmra.mxu2 %v6584_v48  ;;  %v6600_v0 = vrot.slane %v6550_v12, 1  ;;  %v6601_v4 = vrot.slane %v6552_v7, 2 }
0x1ce7   : > { %v6555_v10 = vor.u32 %v6554_v15, %v6550_v12  ;;  %v6602_v54 = vor.u32 %v6601_v4, %v6600_v0 }
0x1ce9   : > { %6565 = vmatmul.bf16.vlgmr.msrb.gmra.mxu3 %v6555_v10  ;;  %6612 = vmatmul.bf16.vlgmr.msrb.gmra.mxu1 %v6602_v54 }
0x1cea   : > { %6776 = vmatpush.bf16.msrb.mxu3 %v10547_v28  ;;  %6801 = vmatpush.bf16.msrb.mxu1 %v9345_v20  ;;  %v9351_v28 = vld [vmem:[%s10553_s6 + $0x58] sm:$0xff] }
0x1cee   : > { %6777 = vmatpush.bf16.msrb.mxu3 %v9346_v46  ;;  %6802 = vmatpush.bf16.msrb.mxu1 %v9347_v29 }
0x1cf2   : > { %6778 = vmatpush.bf16.msrb.mxu3 %v9348_v30  ;;  %6803 = vmatpush.bf16.msrb.mxu1 %v9349_v19 }
0x1cf6   : > { %6804 = vmatpush.bf16.msrb.mxu1 %v9350_v26 }
0x1cf9   : > { %6628 = vmatmul.bf16.vlgmr.msra.gmra.mxu3 %v6618_v44 }
0x1cfa   : > { %6805 = vmatpush.bf16.msrb.mxu1 %v9351_v28  ;;  %6848 = vmatpush.bf16.msra.mxu3 %v9352_v42 }
0x1cfe   : > { %6806 = vmatpush.bf16.msrb.mxu1 %v9353_v27  ;;  %6849 = vmatpush.bf16.msra.mxu3 %v9354_v2  ;;  %v9363_v27 = vld [vmem:[%s11512_s24] ss:$0 sm:$0xff] }
0x1d02   : > { %6807 = vmatpush.bf16.msrb.mxu1 %v9355_v5  ;;  %6850 = vmatpush.bf16.msra.mxu3 %v9356_v22  ;;  %v9364_v5 = vld [vmem:[%s11512_s24 + $0x1] ss:$0 sm:$0xff] }
0x1d06   : > { %6808 = vmatpush.bf16.msrb.mxu1 %v9357_v47  ;;  %6851 = vmatpush.bf16.msra.mxu3 %v9358_v62 }
0x1d0a   : > { %6852 = vmatpush.bf16.msra.mxu3 %v9359_v39  ;;  %v9365_v39 = vld [vmem:[%s10553_s6 + $0x138] sm:$0xff] }
0x1d0e   : > { %6853 = vmatpush.bf16.msra.mxu3 %v9360_v24  ;;  %v9366_v24 = vld [vmem:[%s10553_s6 + $0x130] sm:$0xff] }
0x1d12   : > { %6854 = vmatpush.bf16.msra.mxu3 %v9361_v51  ;;  %v9367_v51 = vld [vmem:[%s10553_s6 + $0x128] sm:$0xff] }
0x1d16   : > { %6855 = vmatpush.bf16.msra.mxu3 %v9362_v55  ;;  %v9369_v55 = vld [vmem:[%s10553_s6 + $0x118] sm:$0xff] }
0x1d5f   : > { %v6579_v18 = vpop.f32.mrf.mxu0 }
0x1d66   : > { %v6613_v49 = vpop.f32.mrf.mxu1 }
0x1d67   : > { %v6581_v58 = vpop.f32.mrf.mxu0 }
0x1d68   : > { %v6595_v53 = vpop.f32.mrf.mxu2  ;;  %v9372_v58 = vld [vmem:[%s10553_s6 + $0x100] sm:$0xff] }
0x1d6c   : > { %v6566_v36 = vpop.f32.mrf.mxu3 }
0x1d6d   : > { %v6580_v32 = vadd.f32 %v6579_v18, %v6566_v36  ;;  %v9370_v18 = vld [vmem:[%s10553_s6 + $0x110] sm:$0xff]  ;;  %v9373_v36 = vld [vmem:[%s10553_s6 + $0xb8] sm:$0xff] }
0x1d6e   : > { %v6615_v33 = vpop.f32.mrf.mxu1 }
0x1d6f   : > { %v6599_v61 = vadd.f32 %v6595_v53, %v6580_v32  ;;  %v9374_v33 = vld [vmem:[%s10553_s6 + $0x38] sm:$0xff]  ;;  %v9376_v32 = vld [vmem:[%s10553_s6 + $0x30] sm:$0xff] }
0x1d70   : > { %v6597_v50 = vpop.f32.mrf.mxu2 }
0x1d71   : > { %v6617_v41 = vadd.f32 %v6613_v49, %v6599_v61  ;;  %v9371_v49 = vld [vmem:[%s10553_s6 + $0x108] sm:$0xff]  ;;  %v9375_v50 = vld [vmem:[%s10553_s6 + $0xb0] sm:$0xff] }
0x1d72   : > { %v9377_v61 = vld [vmem:[%s10553_s6 + $0xa8] sm:$0xff] }
0x1d74   : > { %v6568_v59 = vpop.f32.mrf.mxu3 }
0x1d7c   : > { %v6629_v21 = vpop.f32.mrf.mxu3 }
0x1d7d   : > { %v6633_v45 = vadd.f32 %v6629_v21, %v6617_v41  ;;  %v9380_v41 = vld [vmem:[%s10553_s6 + $0x20] sm:$0xff]  ;;  %v9381_v21 = vld [vmem:[%s10553_s6 + $0x98] sm:$0xff] }
0x1d7f   : > { %v6634_v40 = vsel %vm3040_vm6, %v6633_v45, 0.0 }
0x1d80   : > { %v6635_v11 = vrot.slane %v6634_v40, 4 }
0x1d82   : > { %v6636_v3 = vadd.f32 %v6635_v11, %v6634_v40  ;;  %v9383_v40 = vld [vmem:[%s10553_s6 + $0x90] sm:$0xff] }
0x1d83   : > { %v9384_v11 = vld [vmem:[%s10553_s6 + $0x10] sm:$0xff] }
0x1d84   : > { %v6637_v16 = vrot.slane %v6636_v3, 2  ;;  %v6631_v1 = vpop.f32.mrf.mxu3 }
0x1d85   : > { %v9387_v1 = vld [vmem:[%s10553_s6 + $0x80] sm:$0xff] }
0x1d86   : > { %v6638_v17 = vadd.f32 %v6637_v16, %v6636_v3  ;;  %v9385_v3 = vld [vmem:[%s10553_s6 + $0x88] sm:$0xff] }
0x1d87   : > { %v9386_v16 = vld [vmem:[%s10553_s6 + $0x8] sm:$0xff] }
0x1d88   : > { %v6639_v35 = vrot.slane %v6638_v17, 1 }
0x1d8a   : > { %v6640_v13 = vadd.f32 %v6639_v35, %v6638_v17  ;;  %v9388_v17 = vld [vmem:[%s10553_s6] sm:$0xff]  ;;  %v9389_v35 = vld [vmem:[%s10648_s19 + $0x8] sm:$0xff] }
0x1d8c   : > { %v6641_v8 = vmul.f32 %v6640_v13, %v10494_v57  ;;  %v9390_v13 = vld [vmem:[%s10648_s19] sm:$0xff] }
0x1d8e   : > { %v6642_v25 = vpack.c.bf16 %v6641_v8, %v6641_v8 }
0x1d90   : > { %8805 = vmatmul.msk.bf16.vlgmr.msra.gmra.mxu0 %vm3040_vm6, %v6642_v25 }
0x1e0d   : > { %v6655_v60 = vpop.f32.mrf.mxu0 }
0x1e0e   : > { %v6659_v9 = vmax.f32 %v6655_v60, 0.0 }
0x1e10   : > { %v6660_v31 = vpack.c.bf16 %v6659_v9, %v6659_v9 }
0x1e12   : > { %8806 = vmatmul.msk.bf16.vlgmr.msrb.gmra.mxu2 %vm11511_vm15, %v6660_v31  ;;  %v9391_v31 = vld [vmem:[%s10530_s21] ss:$0 sm:$0xff] }
0x1e15   : > { %v6657_v43 = vpop.f32.mrf.mxu0 }
0x1e95   : > { %v6673_v63 = vpop.f32.mrf.mxu2 }
0x1e96   : > { %v6677_v52 = vsub.f32 0.0, %v6673_v63  ;;  %v9392_v63 = vld [vmem:[%s10530_s21 + $0x1] ss:$0 sm:$0xff] }
0x1e98   : > { %v6678_v12 = vmul.f32 1.442695, %v6677_v52 }
0x1e9a   : > { %9157 = vpow2.f32 %v6678_v12 }
0x1e9d   : > { %v6675_v7 = vpop.f32.mrf.mxu2 }
0x1ea0   : > { %v9158_v48 = vpop.eup %9157 }
0x1ea1   : > { %v6680_v15 = vadd.f32 1.0, %v9158_v48 }
0x1ea3   : > { %9159 = vrcp.f32 %v6680_v15  ;;  %v6692_v10 = vand.u32 2147483648, %v6680_v15  ;;  %v6690_v20 = vand.u32 2147483647, %v6680_v15  ;;  %vm6686_vm2 = vweird.f32 %v6680_v15 }
0x1ea5   : > { %v6693_v29 = vor.u32 1.1754944e-38, %v6692_v10  ;;  %vm6691_vm14 = vcmp.eq.f32.partialorder %v6690_v20, 8.507059e+37 }
0x1ea9   : > { %v9160_v0 = vpop.eup %9159 }
0x1eaa   : > { %v6682_v4 = vmul.f32 %v9160_v0, %v6680_v15  ;;  %vm6687_vm3 = vweird.f32 %v9160_v0  ;;  %v9393_v15 = vld [vmem:[%s10538_s29] ss:$0 sm:$0xff] }
0x1eab   : > { %vm6688_vm9 = vmor %vm6686_vm2, %vm6687_vm3  ;;  %vm5289_vm2 = vcmask 551936  }
0x1eac   : > { %v6683_v57 = vsub.f32 1.0, %v6682_v4  ;;  %vm11521_vm3 = vmmov %vm11518_vm7 }
0x1eae   : > { %v6684_v54 = vmul.f32 %v9160_v0, %v6683_v57 }
0x1eb0   : > { %v6685_v46 = vadd.f32 %v9160_v0, %v6684_v54 }
0x1eb2   : > { %v6689_v30 = vsel %vm6688_vm9, %v9160_v0, %v6685_v46  ;;  %v9394_v0 = vld [vmem:[%s10538_s29 + $0x1] ss:$0 sm:$0xff]  ;;  %vm11522_vm9 = vmmov %vm11521_vm3  ;;  %s11523_s29 = sld [smem:[#allocation35_spill]] }
0x1eb3   : > { %v6694_v19 = vsel %vm6691_vm14, %v6693_v29, %v6689_v30  ;;  %vm6959_vm14 = vcmask 549888  }
0x1eb4   : > { %v6696_v26 = vperm.slane %v6694_v19, 0 }
0x1eb6   : > { %v6697_v44 = vmul.f32 %v6696_v26, %v6633_v45  ;;  %v9382_v45 = vld [vmem:[%s10553_s6 + $0x18] sm:$0xff] }
0x1eb8   : > { %6699 = vrot.lane.b32.xlu1 %v6697_v44, %s11513_s10  ;;  %s1662_s11 = scalar_lea.vmem %s11523_s29, %s9972_s2 }
0x1f2a   : > { %v6700_v28 = vpop.permute.xlu1 %6699 }
0x1f2b   : > { %v6702_v42 = vsel %vm11514_vm0, %v11153_v56, %v6700_v28  ;;  %v9368_v56 = vld [vmem:[%s10553_s6 + $0x120] sm:$0xff] }
0x1f2c   : > { %v6703_v2 = vmul.f32 %v9363_v27, %v6702_v42 }
0x1f2e   : > { %v6704_v22 = vadd.f32 %v9364_v5, %v6703_v2 }
0x1f30   : > { %v6705_v47 = vmax.f32 %v6704_v22, 0.0 }
0x1f32   : > { %v6706_v62 = vpack.c.bf16 %v6705_v47, %v6705_v47 }
0x1f34   : > { %8807 = vmatmul.msk.bf16.vlgmr.msra.gmra.mxu1 %vm11515_vm12, %v6706_v62 }
0x1f35   : > { %6864 = vmatpush.bf16.msra.mxu1 %v9365_v39 }
0x1f39   : > { %6865 = vmatpush.bf16.msra.mxu1 %v9366_v24 }
0x1f3d   : > { %6866 = vmatpush.bf16.msra.mxu1 %v9367_v51 }
0x1f41   : > { %6867 = vmatpush.bf16.msra.mxu1 %v9368_v56 }
0x1f45   : > { %6868 = vmatpush.bf16.msra.mxu1 %v9369_v55 }
0x1f49   : > { %6869 = vmatpush.bf16.msra.mxu1 %v9370_v18 }
0x1f4d   : > { %6870 = vmatpush.bf16.msra.mxu1 %v9371_v49 }
0x1f51   : > { %6871 = vmatpush.bf16.msra.mxu1 %v9372_v58 }
0x1fb1   : > { %v6719_v53 = vpop.f32.mrf.mxu1 }
0x1fb2   : > { %6738 = vmatpush.msrb.mxu0 %v6719_v53  ;;  %6758 = vmatpush.msra.mxu2 %v6719_v53 }
0x1fb3   : > { %8809 = vmatmul.msk.f32.vlgmr.msra.gmra.mxu2 %vm11516_vm13, %v10007_v34  ;;  %8808 = vmatmul.msk.f32.vlgmr.msrb.gmra.mxu0 %vm11517_vm5, %v10002_v38  ;;  %v9378_v34 = vld [vmem:[%s10553_s6 + $0x28] sm:$0xff]  ;;  %v9379_v38 = vld [vmem:[%s10553_s6 + $0xa0] sm:$0xff] }
0x1fb4   : > { %6830 = vmatpush.bf16.msrb.mxu2 %v9373_v36  ;;  %6814 = vmatpush.bf16.msra.mxu0 %v9374_v33 }
0x1fb8   : > { %6831 = vmatpush.bf16.msrb.mxu2 %v9375_v50  ;;  %6815 = vmatpush.bf16.msra.mxu0 %v9376_v32 }
0x1fb9   : > { %v6721_v59 = vpop.f32.mrf.mxu1 }
0x1fbc   : > { %6832 = vmatpush.bf16.msrb.mxu2 %v9377_v61  ;;  %6816 = vmatpush.bf16.msra.mxu0 %v9378_v34 }
0x1fc0   : > { %6833 = vmatpush.bf16.msrb.mxu2 %v9379_v38  ;;  %6817 = vmatpush.bf16.msra.mxu0 %v9380_v41 }
0x1fc4   : > { %6834 = vmatpush.bf16.msrb.mxu2 %v9381_v21  ;;  %6818 = vmatpush.bf16.msra.mxu0 %v9382_v45 }
0x1fc8   : > { %6835 = vmatpush.bf16.msrb.mxu2 %v9383_v40  ;;  %6819 = vmatpush.bf16.msra.mxu0 %v9384_v11 }
0x1fcc   : > { %6836 = vmatpush.bf16.msrb.mxu2 %v9385_v3  ;;  %6820 = vmatpush.bf16.msra.mxu0 %v9386_v16 }
0x1fd0   : > { %6837 = vmatpush.bf16.msrb.mxu2 %v9387_v1  ;;  %6821 = vmatpush.bf16.msra.mxu0 %v9388_v17 }
0x1fd4   : > { %6896 = vmatpush.bf16.msrb.mxu0 %v9389_v35  ;;  %6915 = vmatpush.bf16.msra.mxu2 %v10680_v37 }
0x1fd8   : > { %6897 = vmatpush.bf16.msrb.mxu0 %v9390_v13 }
0x2030   : > { %v6740_v8 = vpop.f32.mrf.mxu0 }
0x2036   : > { %v6760_v25 = vpop.f32.mrf.mxu2 }
0x2037   : > { %v6761_v60 = vadd.f32 %v6760_v25, %v6740_v8 }
0x2039   : > { %v11233_v9 = vmul.f32 0.5, %v6761_v60 }
0x203b   : > { %v6764_v43 = vmul.f32 %v9391_v31, %v11233_v9 }
0x203d   : > { %v6765_v52 = vadd.f32 %v9392_v63, %v6764_v43 }
0x203f   : > { %v6766_v12 = vmax.f32 %v6765_v52, 0.0 }
0x2041   : > { %v6767_v7 = vpack.c.bf16 %v6766_v12, %v6766_v12 }
0x2043   : > { %8810 = vmatmul.msk.bf16.vlgmr.msrb.gmra.mxu3 %vm11518_vm7, %v6767_v7 }
0x20c6   : > { %v6780_v48 = vpop.f32.mrf.mxu3 }
0x20c7   : > { %v6784_v37 = vmul.f32 %v9393_v15, %v6780_v48 }
0x20c9   : > { %v6785_v4 = vadd.f32 %v9394_v0, %v6784_v37 }
0x20cb   : > { %v6786_v57 = vmax.f32 %v6785_v4, 0.0 }
0x20cd   : > { %v6788_v10 = vrot.slane %v6786_v57, 6  ;;  %v5279_v57 = vpop.permute.xlu2 %5278 }
0x20ce   : > { %v6782_v54 = vpop.f32.mrf.mxu3 }
0x20cf   : > { %v6790_v20 = vsel %vm2533_vm1, 0.0, %v6788_v10  ;;  %vm11519_vm1 = vcmask 257024   ;;  %v9123_v10 = vld [vmem:[%s11108_s17] ss:$0 sm:$0xff]  ;;  %v5281_v54 = vsel %vm11521_vm3, %v10575_v23, %v5279_v57 }
0x20d0   : > { %v6791_v46 = vsel %vm2961_vm8, %v6790_v20, 0.0  ;;  %v8812_v29 = vpack.c.bf16 %v6790_v20, %v6790_v20  ;;  %vm11520_vm8 = vmmov %vm11511_vm15  ;;  %v9124_v20 = vld [vmem:[%s11108_s17 + $0x1] ss:$0 sm:$0xff] }
0x20d1   : > { %v6792_v30 = vpack.c.bf16 %v6791_v46, %v6791_v46  ;;  %v5284_v46 = vmul.f32 %v9123_v10, %v5281_v54 }
0x20d2   : > { %8813 = vmatmul.msk.bf16.vlgmr.msra.gmra.mxu0 %vm10608_vm4, %v8812_v29 }
0x20d3   : > { %v6796_v19 = vshll.u32 %v6792_v30, 16  ;;  %v6794_v26 = vshrl.u32 %v6792_v30, 16  ;;  %v6828_v44 = vrot.slane %v6792_v30, 1  ;;  %v6862_v22 = vrot.slane %v6792_v30, 2 }
0x20d4   : > { %v5287_v29 = vadd.f32 %v9124_v20, %v5284_v46 }
0x20d5   : > { %v6798_v28 = vrot.slane %v6796_v19, 1  ;;  %6838 = vmatmul.bf16.vlgmr.msrb.gmra.mxu2 %v6828_v44  ;;  %v6844_v42 = vrot.slane %v6794_v26, 1  ;;  %v6845_v27 = vrot.slane %v6796_v19, 2 }
0x20d6   : > { %v5288_v30 = vmax.f32 %v5287_v29, 0.0 }
0x20d7   : > { %v6799_v2 = vor.u32 %v6798_v28, %v6794_v26  ;;  %v6846_v5 = vor.u32 %v6845_v27, %v6844_v42 }
0x20d8   : > { %v5290_v19 = vsel %vm5289_vm2, %v5288_v30, 0.0 }
0x20d9   : > { %6809 = vmatmul.bf16.vlgmr.msrb.gmra.mxu1 %v6799_v2  ;;  %6856 = vmatmul.bf16.vlgmr.msra.gmra.mxu3 %v6846_v5  ;;  %v5291_v26 = vrot.slane %v5290_v19, 4 }
0x20db   : > { %v5292_v28 = vadd.f32 %v5291_v26, %v5290_v19 }
0x20dd   : > { %v5293_v5 = vrot.slane %v5292_v28, 2 }
0x20df   : > { %v5294_v23 = vadd.f32 %v5293_v5, %v5292_v28 }
0x20e9   : > { %6872 = vmatmul.bf16.vlgmr.msra.gmra.mxu1 %v6862_v22 }
0x214f   : > { %v6823_v47 = vpop.f32.mrf.mxu0 }
0x2156   : > { %v6810_v62 = vpop.f32.mrf.mxu1 }
0x2157   : > { %v6825_v39 = vpop.f32.mrf.mxu0  ;;  %v6824_v56 = vadd.f32 %v6823_v47, %v6810_v62 }
0x2158   : > { %v6839_v24 = vpop.f32.mrf.mxu2 }
0x2159   : > { %v6843_v18 = vadd.f32 %v6839_v24, %v6824_v56  ;;  %v5295_v24 = vrot.slane %v5294_v23, 1 }
0x215b   : > { %v5296_v56 = vadd.f32 %v5295_v24, %v5294_v23 }
0x215c   : > { %v6857_v51 = vpop.f32.mrf.mxu3 }
0x215d   : > { %v6861_v58 = vadd.f32 %v6857_v51, %v6843_v18 }
0x215e   : > { %v6812_v6 = vpop.f32.mrf.mxu1 }
0x2160   : > { %v6841_v55 = vpop.f32.mrf.mxu2 }
0x2164   : > { %v6859_v49 = vpop.f32.mrf.mxu3 }
0x2165   : > { %v5297_v49 = vmul.f32 %v5296_v56, %v10663_v14 }
0x2166   : > { %v6873_v53 = vpop.f32.mrf.mxu1 }
0x2167   : > { %v6877_v36 = vadd.f32 %v6873_v53, %v6861_v58 }
0x2169   : > { %v6878_v33 = vsel %vm11519_vm1, %v6877_v36, 0.0 }
0x216a   : > { %v6879_v50 = vrot.slane %v6878_v33, 4 }
0x216c   : > { %v6880_v32 = vadd.f32 %v6879_v50, %v6878_v33 }
0x216e   : > { %v6881_v59 = vrot.slane %v6880_v32, 2  ;;  %v6875_v61 = vpop.f32.mrf.mxu1 }
0x2170   : > { %v6882_v34 = vadd.f32 %v6881_v59, %v6880_v32 }
0x2172   : > { %v6883_v38 = vrot.slane %v6882_v34, 1 }
0x2174   : > { %v6884_v41 = vadd.f32 %v6883_v38, %v6882_v34 }
0x2176   : > { %v6885_v21 = vmul.f32 %v6884_v41, %v10663_v14 }
0x2178   : > { %v6886_v45 = vpack.c.bf16 %v6885_v21, %v6885_v21 }
0x217a   : > { %8814 = vmatmul.msk.bf16.vlgmr.msrb.gmra.mxu0 %vm3040_vm6, %v6886_v45 }
0x21f7   : > { %v6899_v40 = vpop.f32.mrf.mxu0 }
0x21f8   : > { %v6903_v11 = vmax.f32 %v6899_v40, 0.0 }
0x21fa   : > { %v6904_v3 = vpack.c.bf16 %v6903_v11, %v6903_v11 }
0x21fc   : > { %8815 = vmatmul.msk.bf16.vlgmr.msra.gmra.mxu2 %vm11520_vm8, %v6904_v3 }
0x21ff   : > { %v6901_v16 = vpop.f32.mrf.mxu0 }
0x227f   : > { %v6917_v1 = vpop.f32.mrf.mxu2 }
0x2280   : > { %v6921_v17 = vsub.f32 0.0, %v6917_v1 }
0x2282   : > { %v6922_v35 = vmul.f32 1.442695, %v6921_v17 }
0x2284   : > { %9161 = vpow2.f32 %v6922_v35 }
0x2287   : > { %v6919_v13 = vpop.f32.mrf.mxu2 }
0x228a   : > { %v9162_v8 = vpop.eup %9161 }
0x228b   : > { %v6924_v25 = vadd.f32 1.0, %v9162_v8 }
0x228d   : > { %9163 = vrcp.f32 %v6924_v25  ;;  %v6936_v63 = vand.u32 2147483648, %v6924_v25  ;;  %v6934_v12 = vand.u32 2147483647, %v6924_v25  ;;  %vm6930_vm4 = vweird.f32 %v6924_v25 }
0x228f   : > { %v6937_v48 = vor.u32 1.1754944e-38, %v6936_v63  ;;  %vm6935_vm15 = vcmp.eq.f32.partialorder %v6934_v12, 8.507059e+37 }
0x2293   : > { %v9164_v60 = vpop.eup %9163 }
0x2294   : > { %v6926_v31 = vmul.f32 %v9164_v60, %v6924_v25  ;;  %vm6931_vm6 = vweird.f32 %v9164_v60 }
0x2295   : > { %vm6932_vm10 = vmor %vm6930_vm4, %vm6931_vm6 }
0x2296   : > { %v6927_v43 = vsub.f32 1.0, %v6926_v31 }
0x2298   : > { %v6928_v52 = vmul.f32 %v9164_v60, %v6927_v43 }
0x229a   : > { %v6929_v7 = vadd.f32 %v9164_v60, %v6928_v52 }
0x229c   : > { %v6933_v15 = vsel %vm6932_vm10, %v9164_v60, %v6929_v7 }
0x229d   : > { %v6938_v37 = vsel %vm6935_vm15, %v6937_v48, %v6933_v15 }
0x229e   : > { %v6940_v0 = vperm.slane %v6938_v37, 0 }
0x22a0   : > { %v6941_v4 = vmul.f32 %v6940_v0, %v6877_v36 }
0x22a2   : > { %6943 = vrot.lane.b32.xlu0 %v6941_v4, %s9449_s4 }
0x2314   : > { %v6944_v44 = vpop.permute.xlu0 %6943 }
0x2315   : > { %v6946_v42 = vsel %vm11522_vm9, %v11233_v9, %v6944_v44 }
0x2316   : > { %v6947_v27 = vmul.f32 %v9123_v10, %v6946_v42 }
0x2318   : > { %v6948_v2 = vadd.f32 %v9124_v20, %v6947_v27 }
0x231a   : > { %v6949_v22 = vmax.f32 %v6948_v2, 0.0 }
0x231c   : > { %v6950_v47 = vsel %vm5289_vm2, %v6949_v22, 0.0 }
0x231d   : > { %v6951_v62 = vrot.slane %v6950_v47, 4 }
0x231f   : > { %v6952_v39 = vadd.f32 %v6951_v62, %v6950_v47 }
0x2321   : > { %v6953_v51 = vrot.slane %v6952_v39, 2 }
0x2323   : > { %v6954_v6 = vadd.f32 %v6953_v51, %v6952_v39 }
0x2325   : > { %v6955_v55 = vrot.slane %v6954_v6, 1 }
0x2327   : > { %v6956_v18 = vadd.f32 %v6955_v55, %v6954_v6 }
0x2329   : > { %v6957_v9 = vmul.f32 %v6956_v18, %v10663_v14 }
0x232b   : > { %v6958_v58 = vsel %vm2278_vm11, %v5297_v49, %v6957_v9 }
0x232c   : > { %6960 = vst.msk [vmem:[%s1662_s11] sm:$0x3] %vm6959_vm14, %v6958_v58 }
0x232d PF: > { %s11524_s16 = sld [smem:[#allocation36_spill]] }
0x2333   : > { %s81_s22 = sadd.s32 1, %s11524_s16  }
0x2334   : > { %p78_p4 = scmp.ge.s32.totalorder %s81_s22, 4  }
0x2336   :  { %80 = sbr.rel (!%p78_p4) target bundleno = 79 (0x4f), region = 343 }

</bundles_post_ra>
